<compile_context>
chip_gen: v7x
topology: tpu7x:2x2x1
jax: 0.10.0
libtpu: 0.0.40
codegen_flags: <defaults>
</compile_context>

<pallas_src>
import functools

import jax
import jax.numpy as jnp
from jax.experimental import pallas as pl
from jax.experimental.pallas import tpu as pltpu

# ---- hyperparameters from the PyTorch module ----
N_EMBD = 384
N_HEAD = 6
HEAD_SIZE = N_EMBD // N_HEAD
N_LAYER = 6
BLOCK_SIZE = 258
VOCAB_SIZE = 65          # vocab_size = len(chars); chosen deterministically here
VOCAB_PAD = 128          # lane-dense lm_head / token-table width; sliced to 65 outside
LN_EPS = 1e-5


# ------------------------------ fused kernel ------------------------------- #
def _fused_bigram_kernel(
    idx_ref,                             # (B*T, 1) int32
    tok_emb_ref,                         # (VOCAB_PAD, C) f32   zero-padded rows >= 65
    pos_ref,                             # (T, C)         f32
    ln1g_ref, ln1b_ref,                  # (1, C)         f32   per-layer (squeezed)
    wqkv_q_ref, wqkv_s_ref,              # (C, 3C) int8 / (1, 3C) f32 per-layer
    wo_q_ref, wo_s_ref, bo_ref,          # (C, C)  int8 / (1, C)  f32 per-layer
    w1_q_ref, w1_s_ref, b1_ref,          # (C, 4C) int8 / (1, 4C) f32 per-layer
    w2_q_ref, w2_s_ref, b2_ref,          # (4C, C) int8 / (1, C)  f32 per-layer
    lnfg_ref, lnfb_ref,                  # (1, C)         f32   final LN
    lmw_ref, lmb_ref,                    # (C, VOCAB_PAD) bf16 / (1, VOCAB_PAD) f32
    logits_ref,                          # (B, T, VOCAB_PAD) bf16 output
    x_sc, mask_sc,                       # VMEM scratch: (BT, C) f32, (T, T) f32
    *, B, T):
    C = N_EMBD
    BT = B * T
    layer = pl.program_id(0)

    @pl.when(layer == 0)
    def _init():
        # Token embedding gather via one-hot matmul (tok table is VMEM-resident),
        # plus positional add, written straight into the resident activation.
        ids = idx_ref[...]                                          # (BT, 1) int32
        col = jax.lax.broadcasted_iota(jnp.int32, (BT, VOCAB_PAD), 1)
        onehot = (col == ids).astype(jnp.float32)                   # (BT, 128)
        tok = jnp.dot(onehot, tok_emb_ref[...],
                      preferred_element_type=jnp.float32)           # (BT, C)
        x_sc[...] = (tok.reshape(B, T, C) + pos_ref[...][None]).reshape(BT, C)
        # Additive causal mask, built once for all layers.
        row = jax.lax.broadcasted_iota(jnp.int32, (T, T), 0)
        colm = jax.lax.broadcasted_iota(jnp.int32, (T, T), 1)
        mask_sc[...] = jnp.where(row >= colm, 0.0, -1e30).astype(jnp.float32)

    def layer_norm(x, g_ref, b_ref):
        mu = jnp.mean(x, axis=-1, keepdims=True)
        xc = x - mu
        var = jnp.mean(xc * xc, axis=-1, keepdims=True)
        return xc * jax.lax.rsqrt(var + LN_EPS) * g_ref[...] + b_ref[...]

    x = x_sc[...]                                                   # (BT, C) f32

    # ---- causal multi-head self-attention (LN fused in, fused QKV weight) ----
    xn = layer_norm(x, ln1g_ref, ln1b_ref).astype(jnp.bfloat16)
    wqkv = wqkv_q_ref[...].astype(jnp.bfloat16)                     # int8 -> bf16 (VPU)
    qkv = jnp.dot(xn, wqkv, preferred_element_type=jnp.float32) * wqkv_s_ref[...]
    q = qkv[:, 0 * C:1 * C].reshape(B, T, C)
    k = qkv[:, 1 * C:2 * C].reshape(B, T, C)
    v = qkv[:, 2 * C:3 * C].reshape(B, T, C)

    scale = HEAD_SIZE ** -0.5
    mask = mask_sc[...][None]                                       # (1, T, T)
    wo_bf = wo_q_ref[...].astype(jnp.bfloat16)                      # (C, C) bf16
    attn_acc = jnp.zeros((BT, C), jnp.float32)
    for h in range(N_HEAD):                                         # static loop, 6 heads
        lo = h * HEAD_SIZE
        hi = lo + HEAD_SIZE
        qh = q[:, :, lo:hi]
        kh = k[:, :, lo:hi]
        vh = v[:, :, lo:hi]
        wei = jnp.einsum('btd,bsd->bts', qh, kh,
                         preferred_element_type=jnp.float32) * scale + mask
        m = jnp.max(wei, axis=-1, keepdims=True)
        e = jnp.exp(wei - m)
        p = e * pl.reciprocal(jnp.sum(e, axis=-1, keepdims=True), approx=True)
        oh = jnp.einsum('bts,bsd->btd', p, vh,
                        preferred_element_type=jnp.float32)
        # Project each head straight into the output accumulator (no slab).
        attn_acc = attn_acc + jnp.dot(
            oh.reshape(BT, HEAD_SIZE).astype(jnp.bfloat16), wo_bf[lo:hi, :],
            preferred_element_type=jnp.float32)
    x = x + attn_acc * wo_s_ref[...] + bo_ref[...]

    # ---- feed-forward (NOTE: PyTorch Block reuses ln1 for both residual paths) ----
    xn2 = layer_norm(x, ln1g_ref, ln1b_ref).astype(jnp.bfloat16)
    hid = (jnp.dot(xn2, w1_q_ref[...].astype(jnp.bfloat16),
                   preferred_element_type=jnp.float32) * w1_s_ref[...] + b1_ref[...])
    hid = jnp.maximum(hid, 0.0).astype(jnp.bfloat16)                # ReLU
    y = (jnp.dot(hid, w2_q_ref[...].astype(jnp.bfloat16),
                 preferred_element_type=jnp.float32) * w2_s_ref[...] + b2_ref[...])
    x = x + y
    x_sc[...] = x

    # ---- final LayerNorm + lm_head, only on the last layer iteration ----
    @pl.when(layer == N_LAYER - 1)
    def _final():
        xf = layer_norm(x, lnfg_ref, lnfb_ref).astype(jnp.bfloat16)
        logits = jnp.dot(xf, lmw_ref[...],
                         preferred_element_type=jnp.float32) + lmb_ref[...]
        logits_ref[...] = logits.reshape(B, T, VOCAB_PAD).astype(logits_ref.dtype)


# --------------------------- model wrapper --------------------------------- #
def bigram_forward(params, idx):
    """Forward pass of Bigram (targets=None -> only logits)."""
    B, T = idx.shape
    C = N_EMBD

    idx_col = idx.reshape(B * T, 1).astype(jnp.int32)   # tiny; gather happens in-kernel
    pos = params['pos_emb'][:T]                          # (T, C) — tiny slice, no x0 slab

    kernel = functools.partial(_fused_bigram_kernel, B=B, T=T)

    def layer_spec(shape):
        # (N_LAYER, *shape) array; stream one layer's block per grid step
        # (double-buffered by the Pallas pipeline -> weight DMA overlaps compute).
        return pl.BlockSpec((None,) + shape, lambda l: (l,) + (0,) * len(shape))

    def const_spec(shape):
        # Whole array, block index constant across the grid (fetched once).
        return pl.BlockSpec(shape, lambda l: (0,) * len(shape))

    grid_spec = pltpu.PrefetchScalarGridSpec(
        num_scalar_prefetch=0,
        grid=(N_LAYER,),
        in_specs=[
            const_spec((B * T, 1)),                                  # idx
            const_spec((VOCAB_PAD, C)),                              # tok_emb (padded)
            const_spec((T, C)),                                      # pos rows
            layer_spec((1, C)), layer_spec((1, C)),                  # ln1 g/b
            layer_spec((C, 3 * C)), layer_spec((1, 3 * C)),          # fused QKV (int8/scale)
            layer_spec((C, C)), layer_spec((1, C)), layer_spec((1, C)),        # wo/scale/bo
            layer_spec((C, 4 * C)), layer_spec((1, 4 * C)), layer_spec((1, 4 * C)),  # w1/s/b1
            layer_spec((4 * C, C)), layer_spec((1, C)), layer_spec((1, C)),    # w2/s/b2
            const_spec((1, C)), const_spec((1, C)),                  # lnf g/b
            const_spec((C, VOCAB_PAD)), const_spec((1, VOCAB_PAD)),  # lm w/b
        ],
        out_specs=pl.BlockSpec((B, T, VOCAB_PAD), lambda l: (0, 0, 0)),
        scratch_shapes=[
            pltpu.VMEM((B * T, C), jnp.float32),   # running activation (resident)
            pltpu.VMEM((T, T), jnp.float32),       # additive causal mask
        ],
    )

    logits_pad = pl.pallas_call(
        kernel,
        out_shape=jax.ShapeDtypeStruct((B, T, VOCAB_PAD), jnp.bfloat16),
        grid_spec=grid_spec,
        compiler_params=pltpu.CompilerParams(
            dimension_semantics=("arbitrary",),    # layers are serial
            # ~1.8 MB int8 weights/layer double-buffered + dequant temporaries +
            # resident activations: 32 MB is ample at these shapes and fits the
            # scoped limit on every generation (v5e default is only 16 MB).
            vmem_limit_bytes=32 * 1024 * 1024,
        ),
    )(idx_col, params['tok_emb'], pos,
      params['ln1_g'], params['ln1_b'],
      params['wqkv_q'], params['wqkv_s'],
      params['wo_q'], params['wo_s'], params['bo'],
      params['w1_q'], params['w1_s'], params['b1'],
      params['w2_q'], params['w2_s'], params['b2'],
      params['lnf_g'], params['lnf_b'],
      params['lm_w'], params['lm_b'])

    return logits_pad[:, :, :VOCAB_SIZE].astype(jnp.float32)


# ------------------------- deterministic init ------------------------------ #
def _quantize_per_col(w):
    """Symmetric int8 quantization with per-output-column scale (reduce over -2)."""
    s = jnp.max(jnp.abs(w), axis=-2, keepdims=True) / 127.0
    s = jnp.maximum(s, 1e-12)
    q = jnp.clip(jnp.round(w / s), -127.0, 127.0).astype(jnp.int8)
    return q, s.astype(jnp.float32)


def init_params(key):
    keys = iter(jax.random.split(key, 32))
    C, L = N_EMBD, N_LAYER

    def nrm(shape, scale=0.02):
        return (scale * jax.random.normal(next(keys), shape)).astype(jnp.float32)

    tok = nrm((VOCAB_SIZE, C), 1.0)
    tok_pad = jnp.zeros((VOCAB_PAD, C), jnp.float32).at[:VOCAB_SIZE].set(tok)

    lm_w = nrm((C, VOCAB_SIZE))
    lm_w_pad = jnp.zeros((C, VOCAB_PAD), jnp.float32).at[:, :VOCAB_SIZE].set(lm_w)
    lm_b = nrm((1, VOCAB_SIZE))
    lm_b_pad = jnp.zeros((1, VOCAB_PAD), jnp.float32).at[:, :VOCAB_SIZE].set(lm_b)

    wqkv_q, wqkv_s = _quantize_per_col(nrm((L, C, 3 * C)))
    wo_q, wo_s = _quantize_per_col(nrm((L, C, C)))
    w1_q, w1_s = _quantize_per_col(nrm((L, C, 4 * C)))
    w2_q, w2_s = _quantize_per_col(nrm((L, 4 * C, C)))

    return {
        'tok_emb': tok_pad,                       # (128, C) f32, rows >= 65 are zero
        'pos_emb': nrm((BLOCK_SIZE, C), 1.0),
        # per-layer params, stacked along a leading layer axis
        'ln1_g': 1.0 + nrm((L, 1, C), 0.1),
        'ln1_b': nrm((L, 1, C)),
        'wqkv_q': wqkv_q, 'wqkv_s': wqkv_s,
        'wo_q': wo_q, 'wo_s': wo_s, 'bo': nrm((L, 1, C)),
        'w1_q': w1_q, 'w1_s': w1_s, 'b1': nrm((L, 1, 4 * C)),
        'w2_q': w2_q, 'w2_s': w2_s, 'b2': nrm((L, 1, C)),
        # final LN + lm_head (padded to 128 lanes)
        'lnf_g': 1.0 + nrm((1, C), 0.1),
        'lnf_b': nrm((1, C)),
        'lm_w': lm_w_pad.astype(jnp.bfloat16),
        'lm_b': lm_b_pad,
    }


# --------------------------- pure-JAX reference ----------------------------- #
def reference_forward(params, idx):
    """Reference using the SAME (int8-dequantized / bf16-rounded) weights, f32 math."""
    B, T = idx.shape
    C = N_EMBD

    def ln(x, g, b):
        mu = x.mean(-1, keepdims=True)
        var = ((x - mu) ** 2).mean(-1, keepdims=True)
        return (x - mu) / jnp.sqrt(var + LN_EPS) * g + b

    def deq(q, s):
        return q.astype(jnp.float32) * s

    x = (jnp.take(params['tok_emb'], idx, axis=0)
         + params['pos_emb'][:T][None]).astype(jnp.float32)
    tril = jnp.tril(jnp.ones((T, T), bool))
    for l in range(N_LAYER):
        g1, b1n = params['ln1_g'][l], params['ln1_b'][l]
        wqkv = deq(params['wqkv_q'][l], params['wqkv_s'][l])
        wo = deq(params['wo_q'][l], params['wo_s'][l])
        w1 = deq(params['w1_q'][l], params['w1_s'][l])
        w2 = deq(params['w2_q'][l], params['w2_s'][l])
        bo, bb1, bb2 = params['bo'][l], params['b1'][l], params['b2'][l]

        h = ln(x, g1, b1n)
        qkv = h @ wqkv
        q = qkv[..., 0:C].reshape(B, T, N_HEAD, HEAD_SIZE)
        k = qkv[..., C:2 * C].reshape(B, T, N_HEAD, HEAD_SIZE)
        v = qkv[..., 2 * C:3 * C].reshape(B, T, N_HEAD, HEAD_SIZE)
        wei = jnp.einsum('bthd,bshd->bhts', q, k) * HEAD_SIZE ** -0.5
        wei = jnp.where(tril[None, None], wei, -jnp.inf)
        wei = jax.nn.softmax(wei, axis=-1)
        out = jnp.einsum('bhts,bshd->bthd', wei, v).reshape(B, T, C)
        x = x + out @ wo + bo
        h = ln(x, g1, b1n)          # PyTorch Block reuses ln1 for the FFN path
        x = x + jnp.maximum(h @ w1 + bb1, 0) @ w2 + bb2

    x = ln(x, params['lnf_g'], params['lnf_b'])
    lm_w = params['lm_w'].astype(jnp.float32)[:, :VOCAB_SIZE]
    lm_b = params['lm_b'][:, :VOCAB_SIZE]
    return x @ lm_w + lm_b


# --------------------------------- main ------------------------------------ #
if __name__ == "__main__":
    key = jax.random.PRNGKey(0)
    pkey, ikey = jax.random.split(key)
    params = init_params(pkey)

    B, T = 2, 8  # small example sequence (T <= block_size)
    idx = jax.random.randint(ikey, (B, T), 0, VOCAB_SIZE, dtype=jnp.int32)

    logits = jax.block_until_ready(bigram_forward(params, idx))

    assert logits.shape == (B, T, VOCAB_SIZE), logits.shape
    assert bool(jnp.all(jnp.isfinite(logits)))

    ref = reference_forward(params, idx)
    max_err = float(jnp.max(jnp.abs(logits - ref)))
    assert jnp.allclose(logits, ref, atol=5e-2, rtol=5e-2), max_err

    print("KERNEL_OK")
</pallas_src>

<mosaic_0001>
module attributes {stable_mosaic.version = 11 : i64} {
  func.func @_fused_bigram_kernel(%arg0: i32, %arg1: memref<16x1xi32, #tpu.memory_space<vmem>>, %arg2: memref<128x384xf32, #tpu.memory_space<vmem>>, %arg3: memref<8x384xf32, #tpu.memory_space<vmem>>, %arg4: memref<1x1x384xf32, #tpu.memory_space<vmem>>, %arg5: memref<1x1x384xf32, #tpu.memory_space<vmem>>, %arg6: memref<1x384x1152xi8, #tpu.memory_space<vmem>>, %arg7: memref<1x1x1152xf32, #tpu.memory_space<vmem>>, %arg8: memref<1x384x384xi8, #tpu.memory_space<vmem>>, %arg9: memref<1x1x384xf32, #tpu.memory_space<vmem>>, %arg10: memref<1x1x384xf32, #tpu.memory_space<vmem>>, %arg11: memref<1x384x1536xi8, #tpu.memory_space<vmem>>, %arg12: memref<1x1x1536xf32, #tpu.memory_space<vmem>>, %arg13: memref<1x1x1536xf32, #tpu.memory_space<vmem>>, %arg14: memref<1x1536x384xi8, #tpu.memory_space<vmem>>, %arg15: memref<1x1x384xf32, #tpu.memory_space<vmem>>, %arg16: memref<1x1x384xf32, #tpu.memory_space<vmem>>, %arg17: memref<1x384xf32, #tpu.memory_space<vmem>>, %arg18: memref<1x384xf32, #tpu.memory_space<vmem>>, %arg19: memref<384x128xbf16, #tpu.memory_space<vmem>>, %arg20: memref<1x128xf32, #tpu.memory_space<vmem>>, %arg21: memref<2x8x128xbf16, #tpu.memory_space<vmem>>, %arg22: memref<16x384xf32, #tpu.memory_space<vmem>>, %arg23: memref<8x8xf32, #tpu.memory_space<vmem>>) attributes {dimension_semantics = [#tpu.dimension_semantics<arbitrary>], iteration_bounds = array<i64: 6>, scalar_prefetch = 0 : i64, scratch_operands = 2 : i64, tpu.core_type = #tpu.core_type<tc>, window_params = [{pipeline_mode = #tpu.pipeline_mode<synchronous>, transform_indices = @transform_0, window_bounds = array<i64: 16, 1>}, {pipeline_mode = #tpu.pipeline_mode<synchronous>, transform_indices = @transform_1, window_bounds = array<i64: 128, 384>}, {pipeline_mode = #tpu.pipeline_mode<synchronous>, transform_indices = @transform_2, window_bounds = array<i64: 8, 384>}, {transform_indices = @transform_3, window_bounds = array<i64: 1, 1, 384>}, {transform_indices = @transform_4, window_bounds = array<i64: 1, 1, 384>}, {transform_indices = @transform_5, window_bounds = array<i64: 1, 384, 1152>}, {transform_indices = @transform_6, window_bounds = array<i64: 1, 1, 1152>}, {transform_indices = @transform_7, window_bounds = array<i64: 1, 384, 384>}, {transform_indices = @transform_8, window_bounds = array<i64: 1, 1, 384>}, {transform_indices = @transform_9, window_bounds = array<i64: 1, 1, 384>}, {transform_indices = @transform_10, window_bounds = array<i64: 1, 384, 1536>}, {transform_indices = @transform_11, window_bounds = array<i64: 1, 1, 1536>}, {transform_indices = @transform_12, window_bounds = array<i64: 1, 1, 1536>}, {transform_indices = @transform_13, window_bounds = array<i64: 1, 1536, 384>}, {transform_indices = @transform_14, window_bounds = array<i64: 1, 1, 384>}, {transform_indices = @transform_15, window_bounds = array<i64: 1, 1, 384>}, {pipeline_mode = #tpu.pipeline_mode<synchronous>, transform_indices = @transform_16, window_bounds = array<i64: 1, 384>}, {pipeline_mode = #tpu.pipeline_mode<synchronous>, transform_indices = @transform_17, window_bounds = array<i64: 1, 384>}, {pipeline_mode = #tpu.pipeline_mode<synchronous>, transform_indices = @transform_18, window_bounds = array<i64: 384, 128>}, {pipeline_mode = #tpu.pipeline_mode<synchronous>, transform_indices = @transform_19, window_bounds = array<i64: 1, 128>}, {pipeline_mode = #tpu.pipeline_mode<synchronous>, transform_indices = @transform_20, window_bounds = array<i64: 2, 8, 128>}]} {
    %c0_i32 = arith.constant 0 : i32
    %0 = arith.cmpi eq, %arg0, %c0_i32 : i32
    %1 = arith.extui %0 : i1 to i32
    %c0_i32_0 = arith.constant 0 : i32
    %2 = arith.cmpi ne, %1, %c0_i32_0 : i32
    scf.if %2 {
      %c0_102 = arith.constant 0 : index
      %c0_103 = arith.constant 0 : index
      %259 = vector.load %arg1[%c0_102, %c0_103] : memref<16x1xi32, #tpu.memory_space<vmem>>, vector<16x1xi32>
      %260 = tpu.iota {dimensions = array<i32: 1>} : vector<16x128xi32>
      %261 = vector.broadcast %259 : vector<16x1xi32> to vector<16x128xi32>
      %262 = arith.cmpi eq, %260, %261 : vector<16x128xi32>
      %263 = arith.extui %262 : vector<16x128xi1> to vector<16x128xi32>
      %264 = arith.sitofp %263 : vector<16x128xi32> to vector<16x128xf32>
      %c0_104 = arith.constant 0 : index
      %c0_105 = arith.constant 0 : index
      %265 = vector.load %arg2[%c0_104, %c0_105] : memref<128x384xf32, #tpu.memory_space<vmem>>, vector<128x384xf32>
      %cst_106 = arith.constant dense<0.000000e+00> : vector<16x384xf32>
      %266 = tpu.matmul %264, %265, %cst_106 {dimension_numbers = #tpu.dot_dimension_numbers<[1], [0], [0], [1], [0, 0, 1, 1], [], []>} : vector<16x128xf32>, vector<128x384xf32>, vector<16x384xf32> -> vector<16x384xf32>
      %267 = vector.shape_cast %266 : vector<16x384xf32> to vector<2x8x384xf32>
      %c0_107 = arith.constant 0 : index
      %c0_108 = arith.constant 0 : index
      %268 = vector.load %arg3[%c0_107, %c0_108] : memref<8x384xf32, #tpu.memory_space<vmem>>, vector<8x384xf32>
      %269 = vector.shape_cast %268 : vector<8x384xf32> to vector<1x8x384xf32>
      %270 = vector.broadcast %269 : vector<1x8x384xf32> to vector<2x8x384xf32>
      %271 = arith.addf %267, %270 : vector<2x8x384xf32>
      %272 = vector.shape_cast %271 : vector<2x8x384xf32> to vector<16x384xf32>
      %c0_109 = arith.constant 0 : index
      %c0_110 = arith.constant 0 : index
      %273 = vector.load %arg22[%c0_109, %c0_110] : memref<16x384xf32, #tpu.memory_space<vmem>>, vector<16x384xf32>
      tpu.vector_store %arg22[%c0_109, %c0_110], %272 {strides = array<i32>} : memref<16x384xf32, #tpu.memory_space<vmem>>, vector<16x384xf32>,
      %274 = tpu.iota {dimensions = array<i32: 0>} : vector<8x8xi32>
      %275 = tpu.iota {dimensions = array<i32: 1>} : vector<8x8xi32>
      %276 = arith.cmpi sge, %274, %275 : vector<8x8xi32>
      %cst_111 = arith.constant 0.000000e+00 : f32
      %cst_112 = arith.constant -1.000000e+30 : f32
      %277 = vector.broadcast %cst_111 : f32 to vector<8x8xf32>
      %278 = vector.broadcast %cst_112 : f32 to vector<8x8xf32>
      %279 = arith.select %276, %277, %278 : vector<8x8xi1>, vector<8x8xf32>
      %c0_113 = arith.constant 0 : index
      %c0_114 = arith.constant 0 : index
      %280 = vector.load %arg23[%c0_113, %c0_114] : memref<8x8xf32, #tpu.memory_space<vmem>>, vector<8x8xf32>
      tpu.vector_store %arg23[%c0_113, %c0_114], %279 {strides = array<i32>} : memref<8x8xf32, #tpu.memory_space<vmem>>, vector<8x8xf32>,
    } else {
    }
    %c0 = arith.constant 0 : index
    %c0_1 = arith.constant 0 : index
    %3 = vector.load %arg22[%c0, %c0_1] : memref<16x384xf32, #tpu.memory_space<vmem>>, vector<16x384xf32>
    %cst = arith.constant dense<0.000000e+00> : vector<16xf32>
    %4 = vector.multi_reduction <add>, %3, %cst [1] : vector<16x384xf32> to vector<16xf32>
    %5 = vector.shape_cast %4 : vector<16xf32> to vector<16x1xf32>
    %cst_2 = arith.constant 3.840000e+02 : f32
    %6 = vector.broadcast %cst_2 : f32 to vector<16x1xf32>
    %7 = arith.divf %5, %6 : vector<16x1xf32>
    %8 = vector.broadcast %7 : vector<16x1xf32> to vector<16x384xf32>
    %9 = arith.subf %3, %8 : vector<16x384xf32>
    %10 = arith.mulf %9, %9 : vector<16x384xf32>
    %cst_3 = arith.constant dense<0.000000e+00> : vector<16xf32>
    %11 = vector.multi_reduction <add>, %10, %cst_3 [1] : vector<16x384xf32> to vector<16xf32>
    %12 = vector.shape_cast %11 : vector<16xf32> to vector<16x1xf32>
    %cst_4 = arith.constant 3.840000e+02 : f32
    %13 = vector.broadcast %cst_4 : f32 to vector<16x1xf32>
    %14 = arith.divf %12, %13 : vector<16x1xf32>
    %cst_5 = arith.constant 9.99999974E-6 : f32
    %15 = vector.broadcast %cst_5 : f32 to vector<16x1xf32>
    %16 = arith.addf %14, %15 : vector<16x1xf32>
    %17 = math.rsqrt %16 : vector<16x1xf32>
    %18 = vector.broadcast %17 : vector<16x1xf32> to vector<16x384xf32>
    %19 = arith.mulf %9, %18 : vector<16x384xf32>
    %c0_6 = arith.constant 0 : index
    %c0_7 = arith.constant 0 : index
    %c0_8 = arith.constant 0 : index
    %20 = vector.load %arg4[%c0_6, %c0_7, %c0_8] : memref<1x1x384xf32, #tpu.memory_space<vmem>>, vector<1x1x384xf32>
    %21 = vector.shape_cast %20 : vector<1x1x384xf32> to vector<1x384xf32>
    %22 = vector.broadcast %21 : vector<1x384xf32> to vector<16x384xf32>
    %23 = arith.mulf %19, %22 : vector<16x384xf32>
    %c0_9 = arith.constant 0 : index
    %c0_10 = arith.constant 0 : index
    %c0_11 = arith.constant 0 : index
    %24 = vector.load %arg5[%c0_9, %c0_10, %c0_11] : memref<1x1x384xf32, #tpu.memory_space<vmem>>, vector<1x1x384xf32>
    %25 = vector.shape_cast %24 : vector<1x1x384xf32> to vector<1x384xf32>
    %26 = vector.broadcast %25 : vector<1x384xf32> to vector<16x384xf32>
    %27 = arith.addf %23, %26 : vector<16x384xf32>
    %28 = arith.truncf %27 : vector<16x384xf32> to vector<16x384xbf16>
    %c0_12 = arith.constant 0 : index
    %c0_13 = arith.constant 0 : index
    %c0_14 = arith.constant 0 : index
    %29 = vector.load %arg6[%c0_12, %c0_13, %c0_14] : memref<1x384x1152xi8, #tpu.memory_space<vmem>>, vector<1x384x1152xi8>
    %30 = vector.shape_cast %29 : vector<1x384x1152xi8> to vector<384x1152xi8>
    %31 = arith.sitofp %30 : vector<384x1152xi8> to vector<384x1152xbf16>
    %cst_15 = arith.constant dense<0.000000e+00> : vector<16x1152xf32>
    %32 = tpu.matmul %28, %31, %cst_15 {dimension_numbers = #tpu.dot_dimension_numbers<[1], [0], [0], [1], [0, 0, 1, 1], [], []>} : vector<16x384xbf16>, vector<384x1152xbf16>, vector<16x1152xf32> -> vector<16x1152xf32>
    %c0_16 = arith.constant 0 : index
    %c0_17 = arith.constant 0 : index
    %c0_18 = arith.constant 0 : index
    %33 = vector.load %arg7[%c0_16, %c0_17, %c0_18] : memref<1x1x1152xf32, #tpu.memory_space<vmem>>, vector<1x1x1152xf32>
    %34 = vector.shape_cast %33 : vector<1x1x1152xf32> to vector<1x1152xf32>
    %35 = vector.broadcast %34 : vector<1x1152xf32> to vector<16x1152xf32>
    %36 = arith.mulf %32, %35 : vector<16x1152xf32>
    %37 = vector.extract_strided_slice %36 {offsets = [0, 0], sizes = [16, 384], strides = [1, 1]} : vector<16x1152xf32> to vector<16x384xf32>
    %38 = vector.shape_cast %37 : vector<16x384xf32> to vector<2x8x384xf32>
    %39 = vector.extract_strided_slice %36 {offsets = [0, 384], sizes = [16, 384], strides = [1, 1]} : vector<16x1152xf32> to vector<16x384xf32>
    %40 = vector.shape_cast %39 : vector<16x384xf32> to vector<2x8x384xf32>
    %41 = vector.extract_strided_slice %36 {offsets = [0, 768], sizes = [16, 384], strides = [1, 1]} : vector<16x1152xf32> to vector<16x384xf32>
    %42 = vector.shape_cast %41 : vector<16x384xf32> to vector<2x8x384xf32>
    %c0_19 = arith.constant 0 : index
    %c0_20 = arith.constant 0 : index
    %43 = vector.load %arg23[%c0_19, %c0_20] : memref<8x8xf32, #tpu.memory_space<vmem>>, vector<8x8xf32>
    %44 = vector.shape_cast %43 : vector<8x8xf32> to vector<1x8x8xf32>
    %c0_21 = arith.constant 0 : index
    %c0_22 = arith.constant 0 : index
    %c0_23 = arith.constant 0 : index
    %45 = vector.load %arg8[%c0_21, %c0_22, %c0_23] : memref<1x384x384xi8, #tpu.memory_space<vmem>>, vector<1x384x384xi8>
    %46 = vector.shape_cast %45 : vector<1x384x384xi8> to vector<384x384xi8>
    %47 = arith.sitofp %46 : vector<384x384xi8> to vector<384x384xbf16>
    %cst_24 = arith.constant 0.000000e+00 : f32
    %48 = vector.broadcast %cst_24 : f32 to vector<16x384xf32>
    %49 = vector.extract_strided_slice %38 {offsets = [0, 0, 0], sizes = [2, 8, 64], strides = [1, 1, 1]} : vector<2x8x384xf32> to vector<2x8x64xf32>
    %50 = vector.extract_strided_slice %40 {offsets = [0, 0, 0], sizes = [2, 8, 64], strides = [1, 1, 1]} : vector<2x8x384xf32> to vector<2x8x64xf32>
    %51 = vector.extract_strided_slice %42 {offsets = [0, 0, 0], sizes = [2, 8, 64], strides = [1, 1, 1]} : vector<2x8x384xf32> to vector<2x8x64xf32>
    "tpu.trace_start"() <{level = 10 : i32, message = "btd,bsd->bts"}> : () -> ()
    %cst_25 = arith.constant dense<0.000000e+00> : vector<2x8x8xf32>
    %52 = tpu.matmul %49, %50, %cst_25 {dimension_numbers = #tpu.dot_dimension_numbers<[2], [2], [1], [1], [0, 0, 0, 1, 1, 1], [0], [0]>} : vector<2x8x64xf32>, vector<2x8x64xf32>, vector<2x8x8xf32> -> vector<2x8x8xf32>
    "tpu.trace_stop"() : () -> ()
    %cst_26 = arith.constant 1.250000e-01 : f32
    %53 = vector.broadcast %cst_26 : f32 to vector<2x8x8xf32>
    %54 = arith.mulf %52, %53 : vector<2x8x8xf32>
    %55 = vector.broadcast %44 : vector<1x8x8xf32> to vector<2x8x8xf32>
    %56 = arith.addf %54, %55 : vector<2x8x8xf32>
    %cst_27 = arith.constant dense<0xFF800000> : vector<2x8xf32>
    %57 = vector.multi_reduction <maximumf>, %56, %cst_27 [2] : vector<2x8x8xf32> to vector<2x8xf32>
    %58 = vector.shape_cast %57 : vector<2x8xf32> to vector<2x8x1xf32>
    %59 = vector.broadcast %58 : vector<2x8x1xf32> to vector<2x8x8xf32>
    %60 = arith.subf %56, %59 : vector<2x8x8xf32>
    %61 = math.exp %60 : vector<2x8x8xf32>
    %cst_28 = arith.constant dense<0.000000e+00> : vector<2x8xf32>
    %62 = vector.multi_reduction <add>, %61, %cst_28 [2] : vector<2x8x8xf32> to vector<2x8xf32>
    %63 = vector.shape_cast %62 : vector<2x8xf32> to vector<2x8x1xf32>
    %64 = tpu.reciprocal %63 {approx = true} : vector<2x8x1xf32> -> vector<2x8x1xf32>
    %65 = vector.broadcast %64 : vector<2x8x1xf32> to vector<2x8x8xf32>
    %66 = arith.mulf %61, %65 : vector<2x8x8xf32>
    "tpu.trace_start"() <{level = 10 : i32, message = "bts,bsd->btd"}> : () -> ()
    %cst_29 = arith.constant dense<0.000000e+00> : vector<2x8x64xf32>
    %67 = tpu.matmul %66, %51, %cst_29 {dimension_numbers = #tpu.dot_dimension_numbers<[2], [1], [1], [2], [0, 0, 0, 1, 1, 2], [0], [0]>} : vector<2x8x8xf32>, vector<2x8x64xf32>, vector<2x8x64xf32> -> vector<2x8x64xf32>
    "tpu.trace_stop"() : () -> ()
    %68 = vector.shape_cast %67 : vector<2x8x64xf32> to vector<16x64xf32>
    %69 = arith.truncf %68 : vector<16x64xf32> to vector<16x64xbf16>
    %70 = vector.extract_strided_slice %47 {offsets = [0, 0], sizes = [64, 384], strides = [1, 1]} : vector<384x384xbf16> to vector<64x384xbf16>
    %cst_30 = arith.constant dense<0.000000e+00> : vector<16x384xf32>
    %71 = tpu.matmul %69, %70, %cst_30 {dimension_numbers = #tpu.dot_dimension_numbers<[1], [0], [0], [1], [0, 0, 1, 1], [], []>} : vector<16x64xbf16>, vector<64x384xbf16>, vector<16x384xf32> -> vector<16x384xf32>
    %72 = arith.addf %48, %71 : vector<16x384xf32>
    %73 = vector.extract_strided_slice %38 {offsets = [0, 0, 64], sizes = [2, 8, 64], strides = [1, 1, 1]} : vector<2x8x384xf32> to vector<2x8x64xf32>
    %74 = vector.extract_strided_slice %40 {offsets = [0, 0, 64], sizes = [2, 8, 64], strides = [1, 1, 1]} : vector<2x8x384xf32> to vector<2x8x64xf32>
    %75 = vector.extract_strided_slice %42 {offsets = [0, 0, 64], sizes = [2, 8, 64], strides = [1, 1, 1]} : vector<2x8x384xf32> to vector<2x8x64xf32>
    "tpu.trace_start"() <{level = 10 : i32, message = "btd,bsd->bts"}> : () -> ()
    %cst_31 = arith.constant dense<0.000000e+00> : vector<2x8x8xf32>
    %76 = tpu.matmul %73, %74, %cst_31 {dimension_numbers = #tpu.dot_dimension_numbers<[2], [2], [1], [1], [0, 0, 0, 1, 1, 1], [0], [0]>} : vector<2x8x64xf32>, vector<2x8x64xf32>, vector<2x8x8xf32> -> vector<2x8x8xf32>
    "tpu.trace_stop"() : () -> ()
    %cst_32 = arith.constant 1.250000e-01 : f32
    %77 = vector.broadcast %cst_32 : f32 to vector<2x8x8xf32>
    %78 = arith.mulf %76, %77 : vector<2x8x8xf32>
    %79 = vector.broadcast %44 : vector<1x8x8xf32> to vector<2x8x8xf32>
    %80 = arith.addf %78, %79 : vector<2x8x8xf32>
    %cst_33 = arith.constant dense<0xFF800000> : vector<2x8xf32>
    %81 = vector.multi_reduction <maximumf>, %80, %cst_33 [2] : vector<2x8x8xf32> to vector<2x8xf32>
    %82 = vector.shape_cast %81 : vector<2x8xf32> to vector<2x8x1xf32>
    %83 = vector.broadcast %82 : vector<2x8x1xf32> to vector<2x8x8xf32>
    %84 = arith.subf %80, %83 : vector<2x8x8xf32>
    %85 = math.exp %84 : vector<2x8x8xf32>
    %cst_34 = arith.constant dense<0.000000e+00> : vector<2x8xf32>
    %86 = vector.multi_reduction <add>, %85, %cst_34 [2] : vector<2x8x8xf32> to vector<2x8xf32>
    %87 = vector.shape_cast %86 : vector<2x8xf32> to vector<2x8x1xf32>
    %88 = tpu.reciprocal %87 {approx = true} : vector<2x8x1xf32> -> vector<2x8x1xf32>
    %89 = vector.broadcast %88 : vector<2x8x1xf32> to vector<2x8x8xf32>
    %90 = arith.mulf %85, %89 : vector<2x8x8xf32>
    "tpu.trace_start"() <{level = 10 : i32, message = "bts,bsd->btd"}> : () -> ()
    %cst_35 = arith.constant dense<0.000000e+00> : vector<2x8x64xf32>
    %91 = tpu.matmul %90, %75, %cst_35 {dimension_numbers = #tpu.dot_dimension_numbers<[2], [1], [1], [2], [0, 0, 0, 1, 1, 2], [0], [0]>} : vector<2x8x8xf32>, vector<2x8x64xf32>, vector<2x8x64xf32> -> vector<2x8x64xf32>
    "tpu.trace_stop"() : () -> ()
    %92 = vector.shape_cast %91 : vector<2x8x64xf32> to vector<16x64xf32>
    %93 = arith.truncf %92 : vector<16x64xf32> to vector<16x64xbf16>
    %94 = vector.extract_strided_slice %47 {offsets = [64, 0], sizes = [64, 384], strides = [1, 1]} : vector<384x384xbf16> to vector<64x384xbf16>
    %cst_36 = arith.constant dense<0.000000e+00> : vector<16x384xf32>
    %95 = tpu.matmul %93, %94, %cst_36 {dimension_numbers = #tpu.dot_dimension_numbers<[1], [0], [0], [1], [0, 0, 1, 1], [], []>} : vector<16x64xbf16>, vector<64x384xbf16>, vector<16x384xf32> -> vector<16x384xf32>
    %96 = arith.addf %72, %95 : vector<16x384xf32>
    %97 = vector.extract_strided_slice %38 {offsets = [0, 0, 128], sizes = [2, 8, 64], strides = [1, 1, 1]} : vector<2x8x384xf32> to vector<2x8x64xf32>
    %98 = vector.extract_strided_slice %40 {offsets = [0, 0, 128], sizes = [2, 8, 64], strides = [1, 1, 1]} : vector<2x8x384xf32> to vector<2x8x64xf32>
    %99 = vector.extract_strided_slice %42 {offsets = [0, 0, 128], sizes = [2, 8, 64], strides = [1, 1, 1]} : vector<2x8x384xf32> to vector<2x8x64xf32>
    "tpu.trace_start"() <{level = 10 : i32, message = "btd,bsd->bts"}> : () -> ()
    %cst_37 = arith.constant dense<0.000000e+00> : vector<2x8x8xf32>
    %100 = tpu.matmul %97, %98, %cst_37 {dimension_numbers = #tpu.dot_dimension_numbers<[2], [2], [1], [1], [0, 0, 0, 1, 1, 1], [0], [0]>} : vector<2x8x64xf32>, vector<2x8x64xf32>, vector<2x8x8xf32> -> vector<2x8x8xf32>
    "tpu.trace_stop"() : () -> ()
    %cst_38 = arith.constant 1.250000e-01 : f32
    %101 = vector.broadcast %cst_38 : f32 to vector<2x8x8xf32>
    %102 = arith.mulf %100, %101 : vector<2x8x8xf32>
    %103 = vector.broadcast %44 : vector<1x8x8xf32> to vector<2x8x8xf32>
    %104 = arith.addf %102, %103 : vector<2x8x8xf32>
    %cst_39 = arith.constant dense<0xFF800000> : vector<2x8xf32>
    %105 = vector.multi_reduction <maximumf>, %104, %cst_39 [2] : vector<2x8x8xf32> to vector<2x8xf32>
    %106 = vector.shape_cast %105 : vector<2x8xf32> to vector<2x8x1xf32>
    %107 = vector.broadcast %106 : vector<2x8x1xf32> to vector<2x8x8xf32>
    %108 = arith.subf %104, %107 : vector<2x8x8xf32>
    %109 = math.exp %108 : vector<2x8x8xf32>
    %cst_40 = arith.constant dense<0.000000e+00> : vector<2x8xf32>
    %110 = vector.multi_reduction <add>, %109, %cst_40 [2] : vector<2x8x8xf32> to vector<2x8xf32>
    %111 = vector.shape_cast %110 : vector<2x8xf32> to vector<2x8x1xf32>
    %112 = tpu.reciprocal %111 {approx = true} : vector<2x8x1xf32> -> vector<2x8x1xf32>
    %113 = vector.broadcast %112 : vector<2x8x1xf32> to vector<2x8x8xf32>
    %114 = arith.mulf %109, %113 : vector<2x8x8xf32>
    "tpu.trace_start"() <{level = 10 : i32, message = "bts,bsd->btd"}> : () -> ()
    %cst_41 = arith.constant dense<0.000000e+00> : vector<2x8x64xf32>
    %115 = tpu.matmul %114, %99, %cst_41 {dimension_numbers = #tpu.dot_dimension_numbers<[2], [1], [1], [2], [0, 0, 0, 1, 1, 2], [0], [0]>} : vector<2x8x8xf32>, vector<2x8x64xf32>, vector<2x8x64xf32> -> vector<2x8x64xf32>
    "tpu.trace_stop"() : () -> ()
    %116 = vector.shape_cast %115 : vector<2x8x64xf32> to vector<16x64xf32>
    %117 = arith.truncf %116 : vector<16x64xf32> to vector<16x64xbf16>
    %118 = vector.extract_strided_slice %47 {offsets = [128, 0], sizes = [64, 384], strides = [1, 1]} : vector<384x384xbf16> to vector<64x384xbf16>
    %cst_42 = arith.constant dense<0.000000e+00> : vector<16x384xf32>
    %119 = tpu.matmul %117, %118, %cst_42 {dimension_numbers = #tpu.dot_dimension_numbers<[1], [0], [0], [1], [0, 0, 1, 1], [], []>} : vector<16x64xbf16>, vector<64x384xbf16>, vector<16x384xf32> -> vector<16x384xf32>
    %120 = arith.addf %96, %119 : vector<16x384xf32>
    %121 = vector.extract_strided_slice %38 {offsets = [0, 0, 192], sizes = [2, 8, 64], strides = [1, 1, 1]} : vector<2x8x384xf32> to vector<2x8x64xf32>
    %122 = vector.extract_strided_slice %40 {offsets = [0, 0, 192], sizes = [2, 8, 64], strides = [1, 1, 1]} : vector<2x8x384xf32> to vector<2x8x64xf32>
    %123 = vector.extract_strided_slice %42 {offsets = [0, 0, 192], sizes = [2, 8, 64], strides = [1, 1, 1]} : vector<2x8x384xf32> to vector<2x8x64xf32>
    "tpu.trace_start"() <{level = 10 : i32, message = "btd,bsd->bts"}> : () -> ()
    %cst_43 = arith.constant dense<0.000000e+00> : vector<2x8x8xf32>
    %124 = tpu.matmul %121, %122, %cst_43 {dimension_numbers = #tpu.dot_dimension_numbers<[2], [2], [1], [1], [0, 0, 0, 1, 1, 1], [0], [0]>} : vector<2x8x64xf32>, vector<2x8x64xf32>, vector<2x8x8xf32> -> vector<2x8x8xf32>
    "tpu.trace_stop"() : () -> ()
    %cst_44 = arith.constant 1.250000e-01 : f32
    %125 = vector.broadcast %cst_44 : f32 to vector<2x8x8xf32>
    %126 = arith.mulf %124, %125 : vector<2x8x8xf32>
    %127 = vector.broadcast %44 : vector<1x8x8xf32> to vector<2x8x8xf32>
    %128 = arith.addf %126, %127 : vector<2x8x8xf32>
    %cst_45 = arith.constant dense<0xFF800000> : vector<2x8xf32>
    %129 = vector.multi_reduction <maximumf>, %128, %cst_45 [2] : vector<2x8x8xf32> to vector<2x8xf32>
    %130 = vector.shape_cast %129 : vector<2x8xf32> to vector<2x8x1xf32>
    %131 = vector.broadcast %130 : vector<2x8x1xf32> to vector<2x8x8xf32>
    %132 = arith.subf %128, %131 : vector<2x8x8xf32>
    %133 = math.exp %132 : vector<2x8x8xf32>
    %cst_46 = arith.constant dense<0.000000e+00> : vector<2x8xf32>
    %134 = vector.multi_reduction <add>, %133, %cst_46 [2] : vector<2x8x8xf32> to vector<2x8xf32>
    %135 = vector.shape_cast %134 : vector<2x8xf32> to vector<2x8x1xf32>
    %136 = tpu.reciprocal %135 {approx = true} : vector<2x8x1xf32> -> vector<2x8x1xf32>
    %137 = vector.broadcast %136 : vector<2x8x1xf32> to vector<2x8x8xf32>
    %138 = arith.mulf %133, %137 : vector<2x8x8xf32>
    "tpu.trace_start"() <{level = 10 : i32, message = "bts,bsd->btd"}> : () -> ()
    %cst_47 = arith.constant dense<0.000000e+00> : vector<2x8x64xf32>
    %139 = tpu.matmul %138, %123, %cst_47 {dimension_numbers = #tpu.dot_dimension_numbers<[2], [1], [1], [2], [0, 0, 0, 1, 1, 2], [0], [0]>} : vector<2x8x8xf32>, vector<2x8x64xf32>, vector<2x8x64xf32> -> vector<2x8x64xf32>
    "tpu.trace_stop"() : () -> ()
    %140 = vector.shape_cast %139 : vector<2x8x64xf32> to vector<16x64xf32>
    %141 = arith.truncf %140 : vector<16x64xf32> to vector<16x64xbf16>
    %142 = vector.extract_strided_slice %47 {offsets = [192, 0], sizes = [64, 384], strides = [1, 1]} : vector<384x384xbf16> to vector<64x384xbf16>
    %cst_48 = arith.constant dense<0.000000e+00> : vector<16x384xf32>
    %143 = tpu.matmul %141, %142, %cst_48 {dimension_numbers = #tpu.dot_dimension_numbers<[1], [0], [0], [1], [0, 0, 1, 1], [], []>} : vector<16x64xbf16>, vector<64x384xbf16>, vector<16x384xf32> -> vector<16x384xf32>
    %144 = arith.addf %120, %143 : vector<16x384xf32>
    %145 = vector.extract_strided_slice %38 {offsets = [0, 0, 256], sizes = [2, 8, 64], strides = [1, 1, 1]} : vector<2x8x384xf32> to vector<2x8x64xf32>
    %146 = vector.extract_strided_slice %40 {offsets = [0, 0, 256], sizes = [2, 8, 64], strides = [1, 1, 1]} : vector<2x8x384xf32> to vector<2x8x64xf32>
    %147 = vector.extract_strided_slice %42 {offsets = [0, 0, 256], sizes = [2, 8, 64], strides = [1, 1, 1]} : vector<2x8x384xf32> to vector<2x8x64xf32>
    "tpu.trace_start"() <{level = 10 : i32, message = "btd,bsd->bts"}> : () -> ()
    %cst_49 = arith.constant dense<0.000000e+00> : vector<2x8x8xf32>
    %148 = tpu.matmul %145, %146, %cst_49 {dimension_numbers = #tpu.dot_dimension_numbers<[2], [2], [1], [1], [0, 0, 0, 1, 1, 1], [0], [0]>} : vector<2x8x64xf32>, vector<2x8x64xf32>, vector<2x8x8xf32> -> vector<2x8x8xf32>
    "tpu.trace_stop"() : () -> ()
    %cst_50 = arith.constant 1.250000e-01 : f32
    %149 = vector.broadcast %cst_50 : f32 to vector<2x8x8xf32>
    %150 = arith.mulf %148, %149 : vector<2x8x8xf32>
    %151 = vector.broadcast %44 : vector<1x8x8xf32> to vector<2x8x8xf32>
    %152 = arith.addf %150, %151 : vector<2x8x8xf32>
    %cst_51 = arith.constant dense<0xFF800000> : vector<2x8xf32>
    %153 = vector.multi_reduction <maximumf>, %152, %cst_51 [2] : vector<2x8x8xf32> to vector<2x8xf32>
    %154 = vector.shape_cast %153 : vector<2x8xf32> to vector<2x8x1xf32>
    %155 = vector.broadcast %154 : vector<2x8x1xf32> to vector<2x8x8xf32>
    %156 = arith.subf %152, %155 : vector<2x8x8xf32>
    %157 = math.exp %156 : vector<2x8x8xf32>
    %cst_52 = arith.constant dense<0.000000e+00> : vector<2x8xf32>
    %158 = vector.multi_reduction <add>, %157, %cst_52 [2] : vector<2x8x8xf32> to vector<2x8xf32>
    %159 = vector.shape_cast %158 : vector<2x8xf32> to vector<2x8x1xf32>
    %160 = tpu.reciprocal %159 {approx = true} : vector<2x8x1xf32> -> vector<2x8x1xf32>
    %161 = vector.broadcast %160 : vector<2x8x1xf32> to vector<2x8x8xf32>
    %162 = arith.mulf %157, %161 : vector<2x8x8xf32>
    "tpu.trace_start"() <{level = 10 : i32, message = "bts,bsd->btd"}> : () -> ()
    %cst_53 = arith.constant dense<0.000000e+00> : vector<2x8x64xf32>
    %163 = tpu.matmul %162, %147, %cst_53 {dimension_numbers = #tpu.dot_dimension_numbers<[2], [1], [1], [2], [0, 0, 0, 1, 1, 2], [0], [0]>} : vector<2x8x8xf32>, vector<2x8x64xf32>, vector<2x8x64xf32> -> vector<2x8x64xf32>
    "tpu.trace_stop"() : () -> ()
    %164 = vector.shape_cast %163 : vector<2x8x64xf32> to vector<16x64xf32>
    %165 = arith.truncf %164 : vector<16x64xf32> to vector<16x64xbf16>
    %166 = vector.extract_strided_slice %47 {offsets = [256, 0], sizes = [64, 384], strides = [1, 1]} : vector<384x384xbf16> to vector<64x384xbf16>
    %cst_54 = arith.constant dense<0.000000e+00> : vector<16x384xf32>
    %167 = tpu.matmul %165, %166, %cst_54 {dimension_numbers = #tpu.dot_dimension_numbers<[1], [0], [0], [1], [0, 0, 1, 1], [], []>} : vector<16x64xbf16>, vector<64x384xbf16>, vector<16x384xf32> -> vector<16x384xf32>
    %168 = arith.addf %144, %167 : vector<16x384xf32>
    %169 = vector.extract_strided_slice %38 {offsets = [0, 0, 320], sizes = [2, 8, 64], strides = [1, 1, 1]} : vector<2x8x384xf32> to vector<2x8x64xf32>
    %170 = vector.extract_strided_slice %40 {offsets = [0, 0, 320], sizes = [2, 8, 64], strides = [1, 1, 1]} : vector<2x8x384xf32> to vector<2x8x64xf32>
    %171 = vector.extract_strided_slice %42 {offsets = [0, 0, 320], sizes = [2, 8, 64], strides = [1, 1, 1]} : vector<2x8x384xf32> to vector<2x8x64xf32>
    "tpu.trace_start"() <{level = 10 : i32, message = "btd,bsd->bts"}> : () -> ()
    %cst_55 = arith.constant dense<0.000000e+00> : vector<2x8x8xf32>
    %172 = tpu.matmul %169, %170, %cst_55 {dimension_numbers = #tpu.dot_dimension_numbers<[2], [2], [1], [1], [0, 0, 0, 1, 1, 1], [0], [0]>} : vector<2x8x64xf32>, vector<2x8x64xf32>, vector<2x8x8xf32> -> vector<2x8x8xf32>
    "tpu.trace_stop"() : () -> ()
    %cst_56 = arith.constant 1.250000e-01 : f32
    %173 = vector.broadcast %cst_56 : f32 to vector<2x8x8xf32>
    %174 = arith.mulf %172, %173 : vector<2x8x8xf32>
    %175 = vector.broadcast %44 : vector<1x8x8xf32> to vector<2x8x8xf32>
    %176 = arith.addf %174, %175 : vector<2x8x8xf32>
    %cst_57 = arith.constant dense<0xFF800000> : vector<2x8xf32>
    %177 = vector.multi_reduction <maximumf>, %176, %cst_57 [2] : vector<2x8x8xf32> to vector<2x8xf32>
    %178 = vector.shape_cast %177 : vector<2x8xf32> to vector<2x8x1xf32>
    %179 = vector.broadcast %178 : vector<2x8x1xf32> to vector<2x8x8xf32>
    %180 = arith.subf %176, %179 : vector<2x8x8xf32>
    %181 = math.exp %180 : vector<2x8x8xf32>
    %cst_58 = arith.constant dense<0.000000e+00> : vector<2x8xf32>
    %182 = vector.multi_reduction <add>, %181, %cst_58 [2] : vector<2x8x8xf32> to vector<2x8xf32>
    %183 = vector.shape_cast %182 : vector<2x8xf32> to vector<2x8x1xf32>
    %184 = tpu.reciprocal %183 {approx = true} : vector<2x8x1xf32> -> vector<2x8x1xf32>
    %185 = vector.broadcast %184 : vector<2x8x1xf32> to vector<2x8x8xf32>
    %186 = arith.mulf %181, %185 : vector<2x8x8xf32>
    "tpu.trace_start"() <{level = 10 : i32, message = "bts,bsd->btd"}> : () -> ()
    %cst_59 = arith.constant dense<0.000000e+00> : vector<2x8x64xf32>
    %187 = tpu.matmul %186, %171, %cst_59 {dimension_numbers = #tpu.dot_dimension_numbers<[2], [1], [1], [2], [0, 0, 0, 1, 1, 2], [0], [0]>} : vector<2x8x8xf32>, vector<2x8x64xf32>, vector<2x8x64xf32> -> vector<2x8x64xf32>
    "tpu.trace_stop"() : () -> ()
    %188 = vector.shape_cast %187 : vector<2x8x64xf32> to vector<16x64xf32>
    %189 = arith.truncf %188 : vector<16x64xf32> to vector<16x64xbf16>
    %190 = vector.extract_strided_slice %47 {offsets = [320, 0], sizes = [64, 384], strides = [1, 1]} : vector<384x384xbf16> to vector<64x384xbf16>
    %cst_60 = arith.constant dense<0.000000e+00> : vector<16x384xf32>
    %191 = tpu.matmul %189, %190, %cst_60 {dimension_numbers = #tpu.dot_dimension_numbers<[1], [0], [0], [1], [0, 0, 1, 1], [], []>} : vector<16x64xbf16>, vector<64x384xbf16>, vector<16x384xf32> -> vector<16x384xf32>
    %192 = arith.addf %168, %191 : vector<16x384xf32>
    %c0_61 = arith.constant 0 : index
    %c0_62 = arith.constant 0 : index
    %c0_63 = arith.constant 0 : index
    %193 = vector.load %arg9[%c0_61, %c0_62, %c0_63] : memref<1x1x384xf32, #tpu.memory_space<vmem>>, vector<1x1x384xf32>
    %194 = vector.shape_cast %193 : vector<1x1x384xf32> to vector<1x384xf32>
    %195 = vector.broadcast %194 : vector<1x384xf32> to vector<16x384xf32>
    %196 = arith.mulf %192, %195 : vector<16x384xf32>
    %197 = arith.addf %3, %196 : vector<16x384xf32>
    %c0_64 = arith.constant 0 : index
    %c0_65 = arith.constant 0 : index
    %c0_66 = arith.constant 0 : index
    %198 = vector.load %arg10[%c0_64, %c0_65, %c0_66] : memref<1x1x384xf32, #tpu.memory_space<vmem>>, vector<1x1x384xf32>
    %199 = vector.shape_cast %198 : vector<1x1x384xf32> to vector<1x384xf32>
    %200 = vector.broadcast %199 : vector<1x384xf32> to vector<16x384xf32>
    %201 = arith.addf %197, %200 : vector<16x384xf32>
    %cst_67 = arith.constant dense<0.000000e+00> : vector<16xf32>
    %202 = vector.multi_reduction <add>, %201, %cst_67 [1] : vector<16x384xf32> to vector<16xf32>
    %203 = vector.shape_cast %202 : vector<16xf32> to vector<16x1xf32>
    %cst_68 = arith.constant 3.840000e+02 : f32
    %204 = vector.broadcast %cst_68 : f32 to vector<16x1xf32>
    %205 = arith.divf %203, %204 : vector<16x1xf32>
    %206 = vector.broadcast %205 : vector<16x1xf32> to vector<16x384xf32>
    %207 = arith.subf %201, %206 : vector<16x384xf32>
    %208 = arith.mulf %207, %207 : vector<16x384xf32>
    %cst_69 = arith.constant dense<0.000000e+00> : vector<16xf32>
    %209 = vector.multi_reduction <add>, %208, %cst_69 [1] : vector<16x384xf32> to vector<16xf32>
    %210 = vector.shape_cast %209 : vector<16xf32> to vector<16x1xf32>
    %cst_70 = arith.constant 3.840000e+02 : f32
    %211 = vector.broadcast %cst_70 : f32 to vector<16x1xf32>
    %212 = arith.divf %210, %211 : vector<16x1xf32>
    %cst_71 = arith.constant 9.99999974E-6 : f32
    %213 = vector.broadcast %cst_71 : f32 to vector<16x1xf32>
    %214 = arith.addf %212, %213 : vector<16x1xf32>
    %215 = math.rsqrt %214 : vector<16x1xf32>
    %216 = vector.broadcast %215 : vector<16x1xf32> to vector<16x384xf32>
    %217 = arith.mulf %207, %216 : vector<16x384xf32>
    %c0_72 = arith.constant 0 : index
    %c0_73 = arith.constant 0 : index
    %c0_74 = arith.constant 0 : index
    %218 = vector.load %arg4[%c0_72, %c0_73, %c0_74] : memref<1x1x384xf32, #tpu.memory_space<vmem>>, vector<1x1x384xf32>
    %219 = vector.shape_cast %218 : vector<1x1x384xf32> to vector<1x384xf32>
    %220 = vector.broadcast %219 : vector<1x384xf32> to vector<16x384xf32>
    %221 = arith.mulf %217, %220 : vector<16x384xf32>
    %c0_75 = arith.constant 0 : index
    %c0_76 = arith.constant 0 : index
    %c0_77 = arith.constant 0 : index
    %222 = vector.load %arg5[%c0_75, %c0_76, %c0_77] : memref<1x1x384xf32, #tpu.memory_space<vmem>>, vector<1x1x384xf32>
    %223 = vector.shape_cast %222 : vector<1x1x384xf32> to vector<1x384xf32>
    %224 = vector.broadcast %223 : vector<1x384xf32> to vector<16x384xf32>
    %225 = arith.addf %221, %224 : vector<16x384xf32>
    %226 = arith.truncf %225 : vector<16x384xf32> to vector<16x384xbf16>
    %c0_78 = arith.constant 0 : index
    %c0_79 = arith.constant 0 : index
    %c0_80 = arith.constant 0 : index
    %227 = vector.load %arg11[%c0_78, %c0_79, %c0_80] : memref<1x384x1536xi8, #tpu.memory_space<vmem>>, vector<1x384x1536xi8>
    %228 = vector.shape_cast %227 : vector<1x384x1536xi8> to vector<384x1536xi8>
    %229 = arith.sitofp %228 : vector<384x1536xi8> to vector<384x1536xbf16>
    %cst_81 = arith.constant dense<0.000000e+00> : vector<16x1536xf32>
    %230 = tpu.matmul %226, %229, %cst_81 {dimension_numbers = #tpu.dot_dimension_numbers<[1], [0], [0], [1], [0, 0, 1, 1], [], []>} : vector<16x384xbf16>, vector<384x1536xbf16>, vector<16x1536xf32> -> vector<16x1536xf32>
    %c0_82 = arith.constant 0 : index
    %c0_83 = arith.constant 0 : index
    %c0_84 = arith.constant 0 : index
    %231 = vector.load %arg12[%c0_82, %c0_83, %c0_84] : memref<1x1x1536xf32, #tpu.memory_space<vmem>>, vector<1x1x1536xf32>
    %232 = vector.shape_cast %231 : vector<1x1x1536xf32> to vector<1x1536xf32>
    %233 = vector.broadcast %232 : vector<1x1536xf32> to vector<16x1536xf32>
    %234 = arith.mulf %230, %233 : vector<16x1536xf32>
    %c0_85 = arith.constant 0 : index
    %c0_86 = arith.constant 0 : index
    %c0_87 = arith.constant 0 : index
    %235 = vector.load %arg13[%c0_85, %c0_86, %c0_87] : memref<1x1x1536xf32, #tpu.memory_space<vmem>>, vector<1x1x1536xf32>
    %236 = vector.shape_cast %235 : vector<1x1x1536xf32> to vector<1x1536xf32>
    %237 = vector.broadcast %236 : vector<1x1536xf32> to vector<16x1536xf32>
    %238 = arith.addf %234, %237 : vector<16x1536xf32>
    %cst_88 = arith.constant 0.000000e+00 : f32
    %239 = vector.broadcast %cst_88 : f32 to vector<16x1536xf32>
    %240 = arith.maximumf %238, %239 : vector<16x1536xf32>
    %241 = arith.truncf %240 : vector<16x1536xf32> to vector<16x1536xbf16>
    %c0_89 = arith.constant 0 : index
    %c0_90 = arith.constant 0 : index
    %c0_91 = arith.constant 0 : index
    %242 = vector.load %arg14[%c0_89, %c0_90, %c0_91] : memref<1x1536x384xi8, #tpu.memory_space<vmem>>, vector<1x1536x384xi8>
    %243 = vector.shape_cast %242 : vector<1x1536x384xi8> to vector<1536x384xi8>
    %244 = arith.sitofp %243 : vector<1536x384xi8> to vector<1536x384xbf16>
    %cst_92 = arith.constant dense<0.000000e+00> : vector<16x384xf32>
    %245 = tpu.matmul %241, %244, %cst_92 {dimension_numbers = #tpu.dot_dimension_numbers<[1], [0], [0], [1], [0, 0, 1, 1], [], []>} : vector<16x1536xbf16>, vector<1536x384xbf16>, vector<16x384xf32> -> vector<16x384xf32>
    %c0_93 = arith.constant 0 : index
    %c0_94 = arith.constant 0 : index
    %c0_95 = arith.constant 0 : index
    %246 = vector.load %arg15[%c0_93, %c0_94, %c0_95] : memref<1x1x384xf32, #tpu.memory_space<vmem>>, vector<1x1x384xf32>
    %247 = vector.shape_cast %246 : vector<1x1x384xf32> to vector<1x384xf32>
    %248 = vector.broadcast %247 : vector<1x384xf32> to vector<16x384xf32>
    %249 = arith.mulf %245, %248 : vector<16x384xf32>
    %c0_96 = arith.constant 0 : index
    %c0_97 = arith.constant 0 : index
    %c0_98 = arith.constant 0 : index
    %250 = vector.load %arg16[%c0_96, %c0_97, %c0_98] : memref<1x1x384xf32, #tpu.memory_space<vmem>>, vector<1x1x384xf32>
    %251 = vector.shape_cast %250 : vector<1x1x384xf32> to vector<1x384xf32>
    %252 = vector.broadcast %251 : vector<1x384xf32> to vector<16x384xf32>
    %253 = arith.addf %249, %252 : vector<16x384xf32>
    %254 = arith.addf %201, %253 : vector<16x384xf32>
    %c0_99 = arith.constant 0 : index
    %c0_100 = arith.constant 0 : index
    %255 = vector.load %arg22[%c0_99, %c0_100] : memref<16x384xf32, #tpu.memory_space<vmem>>, vector<16x384xf32>
    tpu.vector_store %arg22[%c0_99, %c0_100], %254 {strides = array<i32>} : memref<16x384xf32, #tpu.memory_space<vmem>>, vector<16x384xf32>,
    %c5_i32 = arith.constant 5 : i32
    %256 = arith.cmpi eq, %arg0, %c5_i32 : i32
    %257 = arith.extui %256 : i1 to i32
    %c0_i32_101 = arith.constant 0 : i32
    %258 = arith.cmpi ne, %257, %c0_i32_101 : i32
    scf.if %258 {
      %cst_102 = arith.constant dense<0.000000e+00> : vector<16xf32>
      %259 = vector.multi_reduction <add>, %254, %cst_102 [1] : vector<16x384xf32> to vector<16xf32>
      %260 = vector.shape_cast %259 : vector<16xf32> to vector<16x1xf32>
      %cst_103 = arith.constant 3.840000e+02 : f32
      %261 = vector.broadcast %cst_103 : f32 to vector<16x1xf32>
      %262 = arith.divf %260, %261 : vector<16x1xf32>
      %263 = vector.broadcast %262 : vector<16x1xf32> to vector<16x384xf32>
      %264 = arith.subf %254, %263 : vector<16x384xf32>
      %265 = arith.mulf %264, %264 : vector<16x384xf32>
      %cst_104 = arith.constant dense<0.000000e+00> : vector<16xf32>
      %266 = vector.multi_reduction <add>, %265, %cst_104 [1] : vector<16x384xf32> to vector<16xf32>
      %267 = vector.shape_cast %266 : vector<16xf32> to vector<16x1xf32>
      %cst_105 = arith.constant 3.840000e+02 : f32
      %268 = vector.broadcast %cst_105 : f32 to vector<16x1xf32>
      %269 = arith.divf %267, %268 : vector<16x1xf32>
      %cst_106 = arith.constant 9.99999974E-6 : f32
      %270 = vector.broadcast %cst_106 : f32 to vector<16x1xf32>
      %271 = arith.addf %269, %270 : vector<16x1xf32>
      %272 = math.rsqrt %271 : vector<16x1xf32>
      %273 = vector.broadcast %272 : vector<16x1xf32> to vector<16x384xf32>
      %274 = arith.mulf %264, %273 : vector<16x384xf32>
      %c0_107 = arith.constant 0 : index
      %c0_108 = arith.constant 0 : index
      %275 = vector.load %arg17[%c0_107, %c0_108] : memref<1x384xf32, #tpu.memory_space<vmem>>, vector<1x384xf32>
      %276 = vector.broadcast %275 : vector<1x384xf32> to vector<16x384xf32>
      %277 = arith.mulf %274, %276 : vector<16x384xf32>
      %c0_109 = arith.constant 0 : index
      %c0_110 = arith.constant 0 : index
      %278 = vector.load %arg18[%c0_109, %c0_110] : memref<1x384xf32, #tpu.memory_space<vmem>>, vector<1x384xf32>
      %279 = vector.broadcast %278 : vector<1x384xf32> to vector<16x384xf32>
      %280 = arith.addf %277, %279 : vector<16x384xf32>
      %281 = arith.truncf %280 : vector<16x384xf32> to vector<16x384xbf16>
      %c0_111 = arith.constant 0 : index
      %c0_112 = arith.constant 0 : index
      %282 = vector.load %arg19[%c0_111, %c0_112] : memref<384x128xbf16, #tpu.memory_space<vmem>>, vector<384x128xbf16>
      %cst_113 = arith.constant dense<0.000000e+00> : vector<16x128xf32>
      %283 = tpu.matmul %281, %282, %cst_113 {dimension_numbers = #tpu.dot_dimension_numbers<[1], [0], [0], [1], [0, 0, 1, 1], [], []>} : vector<16x384xbf16>, vector<384x128xbf16>, vector<16x128xf32> -> vector<16x128xf32>
      %c0_114 = arith.constant 0 : index
      %c0_115 = arith.constant 0 : index
      %284 = vector.load %arg20[%c0_114, %c0_115] : memref<1x128xf32, #tpu.memory_space<vmem>>, vector<1x128xf32>
      %285 = vector.broadcast %284 : vector<1x128xf32> to vector<16x128xf32>
      %286 = arith.addf %283, %285 : vector<16x128xf32>
      %287 = vector.shape_cast %286 : vector<16x128xf32> to vector<2x8x128xf32>
      %288 = arith.truncf %287 : vector<2x8x128xf32> to vector<2x8x128xbf16>
      %c0_116 = arith.constant 0 : index
      %c0_117 = arith.constant 0 : index
      %c0_118 = arith.constant 0 : index
      %289 = vector.load %arg21[%c0_116, %c0_117, %c0_118] : memref<2x8x128xbf16, #tpu.memory_space<vmem>>, vector<2x8x128xbf16>
      tpu.vector_store %arg21[%c0_116, %c0_117, %c0_118], %288 {strides = array<i32>} : memref<2x8x128xbf16, #tpu.memory_space<vmem>>, vector<2x8x128xbf16>,
    } else {
    }
    return
  }
  func.func @transform_0(%arg0: i32) -> (i32, i32) {
    %c0_i32 = arith.constant 0 : i32
    %c0_i32_0 = arith.constant 0 : i32
    %c0_i32_1 = arith.constant 0 : i32
    return %c0_i32, %c0_i32_0 : i32, i32
  }
  func.func @transform_1(%arg0: i32) -> (i32, i32) {
    %c0_i32 = arith.constant 0 : i32
    %c0_i32_0 = arith.constant 0 : i32
    %c0_i32_1 = arith.constant 0 : i32
    return %c0_i32, %c0_i32_0 : i32, i32
  }
  func.func @transform_2(%arg0: i32) -> (i32, i32) {
    %c0_i32 = arith.constant 0 : i32
    %c0_i32_0 = arith.constant 0 : i32
    %c0_i32_1 = arith.constant 0 : i32
    return %c0_i32, %c0_i32_0 : i32, i32
  }
  func.func @transform_3(%arg0: i32) -> (i32, i32, i32) {
    %c0_i32 = arith.constant 0 : i32
    %c0_i32_0 = arith.constant 0 : i32
    %c0_i32_1 = arith.constant 0 : i32
    return %arg0, %c0_i32, %c0_i32_0 : i32, i32, i32
  }
  func.func @transform_4(%arg0: i32) -> (i32, i32, i32) {
    %c0_i32 = arith.constant 0 : i32
    %c0_i32_0 = arith.constant 0 : i32
    %c0_i32_1 = arith.constant 0 : i32
    return %arg0, %c0_i32, %c0_i32_0 : i32, i32, i32
  }
  func.func @transform_5(%arg0: i32) -> (i32, i32, i32) {
    %c0_i32 = arith.constant 0 : i32
    %c0_i32_0 = arith.constant 0 : i32
    %c0_i32_1 = arith.constant 0 : i32
    return %arg0, %c0_i32, %c0_i32_0 : i32, i32, i32
  }
  func.func @transform_6(%arg0: i32) -> (i32, i32, i32) {
    %c0_i32 = arith.constant 0 : i32
    %c0_i32_0 = arith.constant 0 : i32
    %c0_i32_1 = arith.constant 0 : i32
    return %arg0, %c0_i32, %c0_i32_0 : i32, i32, i32
  }
  func.func @transform_7(%arg0: i32) -> (i32, i32, i32) {
    %c0_i32 = arith.constant 0 : i32
    %c0_i32_0 = arith.constant 0 : i32
    %c0_i32_1 = arith.constant 0 : i32
    return %arg0, %c0_i32, %c0_i32_0 : i32, i32, i32
  }
  func.func @transform_8(%arg0: i32) -> (i32, i32, i32) {
    %c0_i32 = arith.constant 0 : i32
    %c0_i32_0 = arith.constant 0 : i32
    %c0_i32_1 = arith.constant 0 : i32
    return %arg0, %c0_i32, %c0_i32_0 : i32, i32, i32
  }
  func.func @transform_9(%arg0: i32) -> (i32, i32, i32) {
    %c0_i32 = arith.constant 0 : i32
    %c0_i32_0 = arith.constant 0 : i32
    %c0_i32_1 = arith.constant 0 : i32
    return %arg0, %c0_i32, %c0_i32_0 : i32, i32, i32
  }
  func.func @transform_10(%arg0: i32) -> (i32, i32, i32) {
    %c0_i32 = arith.constant 0 : i32
    %c0_i32_0 = arith.constant 0 : i32
    %c0_i32_1 = arith.constant 0 : i32
    return %arg0, %c0_i32, %c0_i32_0 : i32, i32, i32
  }
  func.func @transform_11(%arg0: i32) -> (i32, i32, i32) {
    %c0_i32 = arith.constant 0 : i32
    %c0_i32_0 = arith.constant 0 : i32
    %c0_i32_1 = arith.constant 0 : i32
    return %arg0, %c0_i32, %c0_i32_0 : i32, i32, i32
  }
  func.func @transform_12(%arg0: i32) -> (i32, i32, i32) {
    %c0_i32 = arith.constant 0 : i32
    %c0_i32_0 = arith.constant 0 : i32
    %c0_i32_1 = arith.constant 0 : i32
    return %arg0, %c0_i32, %c0_i32_0 : i32, i32, i32
  }
  func.func @transform_13(%arg0: i32) -> (i32, i32, i32) {
    %c0_i32 = arith.constant 0 : i32
    %c0_i32_0 = arith.constant 0 : i32
    %c0_i32_1 = arith.constant 0 : i32
    return %arg0, %c0_i32, %c0_i32_0 : i32, i32, i32
  }
  func.func @transform_14(%arg0: i32) -> (i32, i32, i32) {
    %c0_i32 = arith.constant 0 : i32
    %c0_i32_0 = arith.constant 0 : i32
    %c0_i32_1 = arith.constant 0 : i32
    return %arg0, %c0_i32, %c0_i32_0 : i32, i32, i32
  }
  func.func @transform_15(%arg0: i32) -> (i32, i32, i32) {
    %c0_i32 = arith.constant 0 : i32
    %c0_i32_0 = arith.constant 0 : i32
    %c0_i32_1 = arith.constant 0 : i32
    return %arg0, %c0_i32, %c0_i32_0 : i32, i32, i32
  }
  func.func @transform_16(%arg0: i32) -> (i32, i32) {
    %c0_i32 = arith.constant 0 : i32
    %c0_i32_0 = arith.constant 0 : i32
    %c0_i32_1 = arith.constant 0 : i32
    return %c0_i32, %c0_i32_0 : i32, i32
  }
  func.func @transform_17(%arg0: i32) -> (i32, i32) {
    %c0_i32 = arith.constant 0 : i32
    %c0_i32_0 = arith.constant 0 : i32
    %c0_i32_1 = arith.constant 0 : i32
    return %c0_i32, %c0_i32_0 : i32, i32
  }
  func.func @transform_18(%arg0: i32) -> (i32, i32) {
    %c0_i32 = arith.constant 0 : i32
    %c0_i32_0 = arith.constant 0 : i32
    %c0_i32_1 = arith.constant 0 : i32
    return %c0_i32, %c0_i32_0 : i32, i32
  }
  func.func @transform_19(%arg0: i32) -> (i32, i32) {
    %c0_i32 = arith.constant 0 : i32
    %c0_i32_0 = arith.constant 0 : i32
    %c0_i32_1 = arith.constant 0 : i32
    return %c0_i32, %c0_i32_0 : i32, i32
  }
  func.func @transform_20(%arg0: i32) -> (i32, i32, i32) {
    %c0_i32 = arith.constant 0 : i32
    %c0_i32_0 = arith.constant 0 : i32
    %c0_i32_1 = arith.constant 0 : i32
    %c0_i32_2 = arith.constant 0 : i32
    return %c0_i32, %c0_i32_0, %c0_i32_1 : i32, i32, i32
  }
}

</mosaic_0001>

<bundles_post_ra>
// kernel: tpu_custom_call.1
= control target key start
LH: loop header
LB: loop body
LE: loop exit
PB: predicated region body
PF: predicated region fallthrough
CT: control target
= control target key end

     0   :  { %s11700_s0 = inlined_call_operand.vmem [shape: s32[16,1], index: 0, kind: input, shape index: {}]   ;;  %s11701_s1 = inlined_call_operand.hbm [shape: f32[128,384], index: 1, kind: input, shape index: {}]   ;;  %s11702_s2 = inlined_call_operand.hbm [shape: f32[8,384], index: 2, kind: input, shape index: {}]   ;;  %s11703_s3 = inlined_call_operand.hbm [shape: f32[6,1,384], index: 3, kind: input, shape index: {}]   ;;  %s11704_s4 = inlined_call_operand.hbm [shape: f32[6,1,384], index: 4, kind: input, shape index: {}]   ;;  %s11705_s5 = inlined_call_operand.hbm [shape: s8[6,384,1152], index: 5, kind: input, shape index: {}]   ;;  %s11706_s6 = inlined_call_operand.hbm [shape: f32[6,1,1152], index: 6, kind: input, shape index: {}]   ;;  %s11707_s7 = inlined_call_operand.hbm [shape: s8[6,384,384], index: 7, kind: input, shape index: {}]   ;;  %s11708_s8 = inlined_call_operand.hbm [shape: f32[6,1,384], index: 8, kind: input, shape index: {}]   ;;  %s11709_s9 = inlined_call_operand.hbm [shape: f32[6,1,384], index: 9, kind: input, shape index: {}]   ;;  %s11710_s10 = inlined_call_operand.hbm [shape: s8[6,384,1536], index: 10, kind: input, shape index: {}]   ;;  %s11711_s11 = inlined_call_operand.hbm [shape: f32[6,1,1536], index: 11, kind: input, shape index: {}]   ;;  %s11712_s12 = inlined_call_operand.hbm [shape: f32[6,1,1536], index: 12, kind: input, shape index: {}]   ;;  %s11713_s13 = inlined_call_operand.hbm [shape: s8[6,1536,384], index: 13, kind: input, shape index: {}]   ;;  %s11714_s14 = inlined_call_operand.hbm [shape: f32[6,1,384], index: 14, kind: input, shape index: {}]   ;;  %s11715_s15 = inlined_call_operand.hbm [shape: f32[6,1,384], index: 15, kind: input, shape index: {}]   ;;  %s11716_s16 = inlined_call_operand.hbm [shape: f32[1,384], index: 16, kind: input, shape index: {}]   ;;  %s11717_s17 = inlined_call_operand.hbm [shape: f32[1,384], index: 17, kind: input, shape index: {}]   ;;  %s11718_s18 = inlined_call_operand.hbm [shape: bf16[384,128], index: 18, kind: input, shape index: {}]   ;;  %s11719_s19 = inlined_call_operand.hbm [shape: f32[1,128], index: 19, kind: input, shape index: {}]   ;;  %s11720_s20 = inlined_call_operand.hbm [shape: bf16[2,8,128], index: 20, kind: output, shape index: {}]  }
   0x1   :  { %11753 = sst [smem:[#allocation42_spill]] %s11700_s0 }
   0x2   :  { %11754 = sst [smem:[#allocation43_spill]] %s11701_s1 }
   0x3   :  { %11755 = sst [smem:[#allocation44_spill]] %s11702_s2 }
   0x4   :  { %11756 = sst [smem:[#allocation45_spill]] %s11703_s3 }
   0x5   :  { %11757 = sst [smem:[#allocation46_spill]] %s11704_s4 }
   0x6   :  { %11758 = sst [smem:[#allocation47_spill]] %s11705_s5 }
   0x7   :  { %11759 = sst [smem:[#allocation48_spill]] %s11706_s6 }
   0x8   :  { %11760 = sst [smem:[#allocation49_spill]] %s11707_s7 }
   0x9   :  { %11761 = sst [smem:[#allocation50_spill]] %s11711_s11 }
   0xa   :  { %11762 = sst [smem:[#allocation51_spill]] %s11712_s12 }
   0xb   :  { %11763 = sst [smem:[#allocation52_spill]] %s11713_s13 }
   0xc   :  { %11764 = sst [smem:[#allocation53_spill]] %s11714_s14 }
   0xd   :  { %11765 = sst [smem:[#allocation54_spill]] %s11715_s15 }
   0xe   :  { %11766 = sst [smem:[#allocation55_spill]] %s11716_s16 }
   0xf   :  { %11767 = sst [smem:[#allocation56_spill]] %s11717_s17 }
  0x10   :  { %11768 = sst [smem:[#allocation57_spill]] %s11720_s20 }
  0x11   :  { %25 = vsyncpa [#allocation5], 0 }
  0x12   :  { %26 = vsyncpa [#allocation8], 0 }
  0x13   :  { %27 = vsyncpa [#allocation24], 0 }
  0x14   :  { %28 = vsyncpa [#allocation27], 0 }
  0x15   :  { %29 = vsyncpa [#allocation6], 0  ;;  %s9848_s1 = smov 0   ;;  %s9850_s22 = smov 0  }
  0x16   :  { %s9852_s23 = smov 0   ;;  %s9854_s24 = smov 0  }
  0x17 LB: > { %11769 = sst [smem:[#allocation36_spill]] %s9692_s22  ;;  %s9867_s2 = sadd.s32 4294967295, %s9700_s24   ;;  %s9700_s24 = sphi %s9854_s24, %s11824_s24   ;;  %s9696_s23 = sphi %s9852_s23, %s11828_s23   ;;  %s9692_s22 = sphi %s9850_s22, %s11827_s22   ;;  %s9688_s1 = sphi %s9848_s1, %s11825_s1  }
  0x18   : > { %11770 = sst [smem:[#allocation37_spill]] %s9867_s2  ;;  %s9870_s25 = sadd.s32 1, %s9700_s24  }
  0x19   : > { %11771 = sst [smem:[#allocation38_spill]] %s9870_s25  ;;  %s102_s3 = ssub.s32 %s9700_s24, %s9870_s25 }
  0x1a   : > { %s105_s26 = sadd.s32 1, %s9696_s23  ;;  %p103_p0 = scmp.eq.s32.totalorder %s102_s3, 0 }
  0x1b   : > { %p112_p1 = scmp.ne.s32.totalorder %s9696_s23, %s9692_s22  ;;  %p113_p2 = scmp.eq.s32.totalorder %s9700_s24, 0 }
  0x1c   : > { %p118_p3 = scmp.ne.s32.totalorder %s9692_s22, %s9688_s1  ;;  %p11736_p5 = scmp.eq.s32.totalorder %s9867_s2, 0 }
  0x1d   : > { %s9880_s27 = scalar_select %p103_p0, %s9696_s23, %s105_s26  }
  0x1e   : > { %p9882_p4 = por %p113_p2, %p112_p1  ;;  %p7973_p6 = scmp.ge.s32.totalorder %s9700_s24, 1 }
  0x1f   : > { %11772 = sst [smem:[#allocation39_spill]] %s9880_s27  ;;  %p546_p7 = scmp.lt.s32.totalorder %s9700_s24, 7 }
  0x20   : > { %s11773_s28 = scalar_select %p9882_p4, 1, 0 }
  0x21   : > { %p9891_p8 = por %p11736_p5, %p118_p3  ;;  %p9896_p10 = pnand %p7973_p6, %p546_p7 }
  0x22   : > { %s9702_s30 = smov [#allocation7]   ;;  %s9703_s21 = smov [#allocation23]  }
  0x23   : > { %s11774_s4 = scalar_select %p9891_p8, 1, 0 }
  0x24   : > { %s11776_s29 = scalar_select %p9896_p10, 1, 0 }
  0x25   : > { %11775 = sst [smem:[#allocation40_spill]] %s11774_s4  ;;  %s575_s0 = sshll.u32 %s9702_s30, 4  ;;  %s576_s0 = int_to_ptr.vmem [resolvable:$true] %s575_s0 }
  0x26   : > { %11777 = sst [smem:[#allocation41_spill]] %s11776_s29  ;;  %p8899_p11 = pneg %p9896_p10 }
  0x27   : > { %s597_s1 = sshll.u32 %s9703_s21, 4  ;;  %s9704_s26 = smov [#allocation4]   ;;  %s9908_s1 = int_to_ptr.vmem [resolvable:$true] %s597_s1 }
  0x28   : > { %p9904_p12 = pnand %p8899_p11, %p11736_p5  ;;  %s561_s27 = sshll.u32 %s9704_s26, 4  ;;  %s9910_s27 = int_to_ptr.vmem [resolvable:$true] %s561_s27 }
  0x29   : > { %s11779_s30 = sld [smem:[#allocation44_spill]] }
  0x2a   : > { %p9920_p0 = pneg %p9904_p12 }
  0x2f   : > { %s9084_s4 = scalar_lea.hbm %s11779_s30, 384 }
  0x30   : > { %p9085_p13 = scmp.ne.s32.totalorder %s11779_s30, %s9084_s4  ;;  %p9091_p3 = scmp.lt.u32.totalorder %s9084_s4, %s11779_s30 }
  0x32   : > { %p9087_p1 = pnand %p9920_p0, %p9085_p13 }
  0x34   : > { %p9088_p2 = pneg %p9087_p1 }
  0x36   : > { %p9093_p6 = pnand %p9091_p3, %p9088_p2 }
  0x38   : > { %9096 = shalt.err (!%p9093_p6)
}
  0x39   : > { %s9097_s20 = scalar_lea.vmem %s576_s0, 384  ;;  %p9105_p5 = scmp.lt.s32.totalorder %s576_s0, %s576_s0 }
  0x3a   : > { %p9098_p7 = scmp.ne.s32.totalorder %s576_s0, %s9097_s20  ;;  %p9106_p8 = scmp.lt.s32.totalorder %s9097_s20, %s9097_s20 }
  0x3c   : > { %p9100_p11 = pnand %p9098_p7, %p9920_p0  ;;  %p9107_p10 = por %p9106_p8, %p9105_p5 }
  0x3e   : > { %p9101_p9 = pneg %p9100_p11 }
  0x40   : > { %p9108_p4 = pnand %p9107_p10, %p9101_p9 }
  0x42   : > { %9111 = shalt.err (!%p9108_p4)
}
  0x43   : > { %8905 = dma.hbm_to_vmem [thread:$0]  (!%p9904_p12), %s11779_s30, 384, %s576_s0, [#allocation8]  }
  0x44   : > { %s11781_s17 = sld [smem:[#allocation56_spill]] }
  0x4a   : > { %s9112_s29 = scalar_lea.hbm %s11781_s17, 48 }
  0x4b   : > { %p9113_p13 = scmp.ne.s32.totalorder %s11781_s17, %s9112_s29  ;;  %p9119_p4 = scmp.lt.u32.totalorder %s9112_s29, %s11781_s17 }
  0x4d   : > { %p9115_p1 = pnand %p9113_p13, %p9920_p0 }
  0x4f   : > { %p9116_p5 = pneg %p9115_p1 }
  0x51   : > { %p9121_p8 = pnand %p9119_p4, %p9116_p5 }
  0x53   : > { %9124 = shalt.err (!%p9121_p8)
}
  0x54   : > { %s9125_s0 = scalar_lea.vmem %s9908_s1, 48  ;;  %s9132_s15 = scalar_lea.vmem %s9908_s1, 64 }
  0x55   : > { %p9126_p9 = scmp.ne.s32.totalorder %s9908_s1, %s9125_s0  ;;  %p9133_p3 = scmp.lt.s32.totalorder %s9908_s1, %s9908_s1 }
  0x56   : > { %p9134_p6 = scmp.lt.s32.totalorder %s9132_s15, %s9125_s0 }
  0x57   : > { %p9128_p10 = pnand %p9126_p9, %p9920_p0 }
  0x58   : > { %p9135_p7 = por %p9134_p6, %p9133_p3 }
  0x59   : > { %p9129_p2 = pneg %p9128_p10 }
  0x5b   : > { %p9136_p11 = pnand %p9135_p7, %p9129_p2 }
  0x5d   : > { %9139 = shalt.err (!%p9136_p11)
}
  0x5e   : > { %8911 = dma.hbm_to_vmem [thread:$0]  (!%p9904_p12), %s11781_s17, 48, %s9908_s1, [#allocation24]  }
  0x5f   : > { %s11782_s4 = sld [smem:[#allocation43_spill]] }
  0x65   : > { %s9140_s29 = scalar_lea.hbm %s11782_s4, 6144 }
  0x66   : > { %p9141_p13 = scmp.ne.s32.totalorder %s11782_s4, %s9140_s29  ;;  %p9147_p4 = scmp.lt.u32.totalorder %s9140_s29, %s11782_s4 }
  0x68   : > { %p9143_p1 = pnand %p9141_p13, %p9920_p0 }
  0x6a   : > { %p9144_p5 = pneg %p9143_p1 }
  0x6c   : > { %p9149_p8 = pnand %p9147_p4, %p9144_p5 }
  0x6e   : > { %9152 = shalt.err (!%p9149_p8)
}
  0x6f   : > { %s9153_s1 = scalar_lea.vmem %s9910_s27, 6144  ;;  %p9161_p3 = scmp.lt.s32.totalorder %s9910_s27, %s9910_s27 }
  0x70   : > { %p9154_p9 = scmp.ne.s32.totalorder %s9910_s27, %s9153_s1  ;;  %p9162_p6 = scmp.lt.s32.totalorder %s9153_s1, %s9153_s1 }
  0x72   : > { %p9156_p10 = pnand %p9154_p9, %p9920_p0  ;;  %p9163_p7 = por %p9162_p6, %p9161_p3 }
  0x74   : > { %p9157_p2 = pneg %p9156_p10 }
  0x76   : > { %p9164_p11 = pnand %p9163_p7, %p9157_p2 }
  0x78   : > { %9167 = shalt.err (!%p9164_p11)
}
  0x79   : > { %s9705_s14 = smov 384   ;;  %s9706_s22 = smov 24  }
  0x7a   : > { %8902 = dma.hbm_to_vmem [thread:$0]  (!%p9904_p12), %s11782_s4, 6144, %s9910_s27, [#allocation5], %s9705_s14, %s9705_s14, %s9706_s22  }
  0x7b   : > { %s9707_s29 = smov [#allocation22]   ;;  %s9708_s20 = smov [#allocation25]  }
  0x7c   : > { %s586_s26 = sshll.u32 %s9707_s29, 4  ;;  %s607_s0 = sshll.u32 %s9708_s20, 4  ;;  %s587_s26 = int_to_ptr.vmem [resolvable:$true] %s586_s26  ;;  %s608_s0 = int_to_ptr.vmem [resolvable:$true] %s607_s0 }
  0x7d   : > { %s11783_s16 = sld [smem:[#allocation55_spill]] }
  0x83   : > { %s9168_s17 = scalar_lea.hbm %s11783_s16, 48 }
  0x84   : > { %p9169_p13 = scmp.ne.s32.totalorder %s11783_s16, %s9168_s17  ;;  %p9175_p4 = scmp.lt.u32.totalorder %s9168_s17, %s11783_s16 }
  0x86   : > { %p9171_p1 = pnand %p9169_p13, %p9920_p0 }
  0x88   : > { %p9172_p5 = pneg %p9171_p1 }
  0x8a   : > { %p9177_p8 = pnand %p9175_p4, %p9172_p5 }
  0x8c   : > { %9180 = shalt.err (!%p9177_p8)
}
  0x8d   : > { %s9181_s27 = scalar_lea.vmem %s587_s26, 48  ;;  %s9188_s14 = scalar_lea.vmem %s587_s26, 64 }
  0x8e   : > { %p9182_p9 = scmp.ne.s32.totalorder %s587_s26, %s9181_s27  ;;  %p9189_p3 = scmp.lt.s32.totalorder %s587_s26, %s587_s26 }
  0x8f   : > { %p9190_p6 = scmp.lt.s32.totalorder %s9188_s14, %s9181_s27 }
  0x90   : > { %p9184_p10 = pnand %p9182_p9, %p9920_p0 }
  0x91   : > { %p9191_p7 = por %p9190_p6, %p9189_p3 }
  0x92   : > { %p9185_p2 = pneg %p9184_p10 }
  0x94   : > { %p9192_p11 = pnand %p9191_p7, %p9185_p2 }
  0x96   : > { %9195 = shalt.err (!%p9192_p11)
}
  0x97   : > { %8908 = dma.hbm_to_vmem [thread:$0]  (!%p9904_p12), %s11783_s16, 48, %s587_s26, [#allocation8]  }
  0x98   : > { %s9196_s17 = scalar_lea.hbm %s11718_s18, 3072 }
  0x99   : > { %p9197_p13 = scmp.ne.s32.totalorder %s11718_s18, %s9196_s17  ;;  %p9203_p4 = scmp.lt.u32.totalorder %s9196_s17, %s11718_s18 }
  0x9b   : > { %p9199_p1 = pnand %p9197_p13, %p9920_p0 }
  0x9d   : > { %p9200_p5 = pneg %p9199_p1 }
  0x9f   : > { %p9205_p8 = pnand %p9203_p4, %p9200_p5 }
  0xa1   : > { %9208 = shalt.err (!%p9205_p8)
}
  0xa2   : > { %s9209_s20 = scalar_lea.vmem %s608_s0, 3072  ;;  %p9217_p3 = scmp.lt.s32.totalorder %s608_s0, %s608_s0 }
  0xa3   : > { %p9210_p9 = scmp.ne.s32.totalorder %s608_s0, %s9209_s20  ;;  %p9218_p6 = scmp.lt.s32.totalorder %s9209_s20, %s9209_s20 }
  0xa5   : > { %p9212_p10 = pnand %p9210_p9, %p9920_p0  ;;  %p9219_p7 = por %p9218_p6, %p9217_p3 }
  0xa7   : > { %p9213_p2 = pneg %p9212_p10 }
  0xa9   : > { %p9220_p11 = pnand %p9219_p7, %p9213_p2 }
  0xab   : > { %9223 = shalt.err (!%p9220_p11)
}
  0xac   : > { %s9709_s26 = smov 64   ;;  %s9710_s15 = smov 4  }
  0xad   : > { %8914 = dma.hbm_to_vmem [thread:$0]  (!%p9904_p12), %s11718_s18, 3072, %s608_s0, [#allocation24], %s9709_s26, %s9709_s26, %s9710_s15  }
  0xae   : > { %s9711_s14 = smov [#allocation26]   ;;  %s9224_s12 = scalar_lea.hbm %s11719_s19, 16 }
  0xaf   : > { %s621_s13 = sshll.u32 %s9711_s14, 4  ;;  %p9225_p13 = scmp.ne.s32.totalorder %s11719_s19, %s9224_s12  ;;  %s622_s13 = int_to_ptr.vmem [resolvable:$true] %s621_s13 }
  0xb0   : > { %p9231_p4 = scmp.lt.u32.totalorder %s9224_s12, %s11719_s19 }
  0xb1   : > { %p9227_p1 = pnand %p9225_p13, %p9920_p0 }
  0xb3   : > { %p9228_p5 = pneg %p9227_p1 }
  0xb5   : > { %p9233_p8 = pnand %p9231_p4, %p9228_p5 }
  0xb7   : > { %9236 = shalt.err (!%p9233_p8)
}
  0xb8   : > { %s9237_s0 = scalar_lea.vmem %s622_s13, 16  ;;  %s9244_s29 = scalar_lea.vmem %s622_s13, 32 }
  0xb9   : > { %p9238_p9 = scmp.ne.s32.totalorder %s622_s13, %s9237_s0  ;;  %p9245_p3 = scmp.lt.s32.totalorder %s622_s13, %s622_s13 }
  0xba   : > { %p9246_p6 = scmp.lt.s32.totalorder %s9244_s29, %s9237_s0 }
  0xbb   : > { %p9240_p10 = pnand %p9238_p9, %p9920_p0 }
  0xbc   : > { %p9247_p7 = por %p9246_p6, %p9245_p3 }
  0xbd   : > { %p9241_p2 = pneg %p9240_p10 }
  0xbf   : > { %p9248_p11 = pnand %p9247_p7, %p9241_p2 }
  0xc1   : > { %9251 = shalt.err (!%p9248_p11)
}
  0xc2   : > { %8917 = dma.hbm_to_vmem [thread:$0]  (!%p9904_p12), %s11719_s19, 16, %s622_s13, [#allocation27]  }
  0xc3   : > { %p7980_p13 = scmp.ge.s32.totalorder %s9700_s24, 6 }
  0xc4   : > { %s632_s21 = sand.u32 (!%p7980_p13), 1, %s9700_s24   ;;  %s10040_s15 = sand.u32 (!%p7980_p13), 1, %s9696_s23  }
  0xc5   : > { %628 = sbr.rel (%p7980_p13) target bundleno = 554 (0x22a), region = 44  ;;  %s11784_s13 = sld [smem:[#allocation45_spill]] (!%p7980_p13) }
  0xc6   : > { %s10043_s1 = smul.u32 (!%p7980_p13), 3, %s10040_s15  ;;  %s11785_s25 = sld [smem:[#allocation46_spill]] (!%p7980_p13) }
  0xc7   : > { %s10046_s27 = smul.u32 (!%p7980_p13), 48, %s9700_s24  ;;  %s10063_s0 = scalar_lea.sflag (!%p7980_p13), [#allocation5], %s632_s21 }
  0xc8   : > { %s636_s11 = scalar_lea.vmem (!%p7980_p13), [#allocation9], %s10043_s1  ;;  %p11786_p0 = scmp.ne.s32.totalorder (!%p7980_p13), %s11773_s28, 0 }
  0xc9   : > { %s644_s12 = sshll.u32 (!%p7980_p13), %s636_s11, 4  ;;  %s10055_s12 = int_to_ptr.vmem [resolvable:$true] %s644_s12 }
  0xcb   : > { %s10052_s30 = scalar_lea.hbm (!%p7980_p13), %s11784_s13, %s10046_s27  ;;  %s9256_s3 = scalar_lea.hbm (!%p7980_p13), %s11784_s13, 288 }
  0xcc   : > { %s10061_s2 = scalar_lea.hbm %s11785_s25, %s10046_s27  ;;  %s9252_s29 = scalar_lea.hbm %s10052_s30, 48 }
  0xcd   : > { %p9253_p12 = scmp.ne.s32.totalorder %s10052_s30, %s9252_s29  ;;  %p9257_p4 = scmp.lt.u32.totalorder %s10052_s30, %s11784_s13 }
  0xce   : > { %p9258_p8 = scmp.lt.u32.totalorder %s9256_s3, %s9252_s29  ;;  %p9260_p10 = scmp.lt.u32.totalorder %s9252_s29, %s10052_s30 }
  0xcf   : > { %p9254_p1 = pnand %p9253_p12, %p11786_p0 }
  0xd0   : > { %p9259_p9 = por %p9258_p8, %p9257_p4 }
  0xd1   : > { %p9255_p5 = pneg %p9254_p1 }
  0xd2   : > { %p9261_p2 = por %p9260_p10, %p9259_p9 }
  0xd4   : > { %p9262_p3 = pnand %p9261_p2, %p9255_p5 }
  0xd6   : > { %9265 = shalt.err (!%p9262_p3)
}
  0xd7   : > { %s9266_s21 = scalar_lea.vmem %s10055_s12, 48  ;;  %s9712_s17 = smov [#allocation9]  }
  0xd8   : > { %p9267_p6 = scmp.ne.s32.totalorder %s10055_s12, %s9266_s21  ;;  %s9270_s22 = sshll.u32 %s9712_s17, 4  ;;  %s9271_s22 = int_to_ptr.vmem [resolvable:$false] %s9270_s22 }
  0xd9   : > { %s9272_s20 = scalar_lea.vmem %s9271_s22, 96  ;;  %p9273_p13 = scmp.lt.s32.totalorder %s10055_s12, %s9271_s22 }
  0xda   : > { %p9268_p7 = pnand %p9267_p6, %p11786_p0  ;;  %p9274_p12 = scmp.lt.s32.totalorder %s9272_s20, %s9266_s21 }
  0xdc   : > { %p9269_p11 = pneg %p9268_p7  ;;  %p9275_p1 = por %p9274_p12, %p9273_p13 }
  0xde   : > { %p9276_p4 = pnand %p9275_p1, %p9269_p11 }
  0xe0   : > { %9279 = shalt.err (!%p9276_p4)
}
  0xe1   : > { %8857 = dma.hbm_to_vmem [thread:$0]  (%p11786_p0), %s10052_s30, 48, %s10055_s12, %s10063_s0  }
  0xe2   : > { %s655_s29 = scalar_lea.vmem [#allocation10], %s10043_s1  ;;  %s8817_s3 = smul.u32 864, %s10040_s15 }
  0xe3   : > { %s663_s26 = sshll.u32 %s655_s29, 4  ;;  %s8818_s14 = smul.u32 13824, %s9700_s24  ;;  %s664_s26 = int_to_ptr.vmem [resolvable:$true] %s663_s26 }
  0xe4   : > { %s9280_s11 = scalar_lea.hbm %s10061_s2, 48  ;;  %s9284_s22 = scalar_lea.hbm %s11785_s25, 288 }
  0xe5   : > { %p9281_p5 = scmp.ne.s32.totalorder %s10061_s2, %s9280_s11  ;;  %p9285_p10 = scmp.lt.u32.totalorder %s10061_s2, %s11785_s25 }
  0xe6   : > { %p9286_p2 = scmp.lt.u32.totalorder %s9284_s22, %s9280_s11  ;;  %p9288_p6 = scmp.lt.u32.totalorder %s9280_s11, %s10061_s2 }
  0xe7   : > { %p9282_p8 = pnand %p9281_p5, %p11786_p0 }
  0xe8   : > { %p9287_p3 = por %p9286_p2, %p9285_p10 }
  0xe9   : > { %p9283_p9 = pneg %p9282_p8 }
  0xea   : > { %p9289_p7 = por %p9288_p6, %p9287_p3 }
  0xec   : > { %p9290_p11 = pnand %p9289_p7, %p9283_p9 }
  0xee   : > { %9293 = shalt.err (!%p9290_p11)
}
  0xef   : > { %s9294_s30 = scalar_lea.vmem %s664_s26, 48  ;;  %s9713_s12 = smov [#allocation10]  }
  0xf0   : > { %p9295_p13 = scmp.ne.s32.totalorder %s664_s26, %s9294_s30  ;;  %s9298_s29 = sshll.u32 %s9713_s12, 4  ;;  %s9299_s29 = int_to_ptr.vmem [resolvable:$false] %s9298_s29 }
  0xf1   : > { %s9300_s21 = scalar_lea.vmem %s9299_s29, 96  ;;  %p9301_p4 = scmp.lt.s32.totalorder %s664_s26, %s9299_s29 }
  0xf2   : > { %p9296_p12 = pnand %p9295_p13, %p11786_p0  ;;  %p9302_p5 = scmp.lt.s32.totalorder %s9300_s21, %s9294_s30 }
  0xf4   : > { %p9297_p1 = pneg %p9296_p12  ;;  %p9303_p8 = por %p9302_p5, %p9301_p4 }
  0xf6   : > { %p9304_p2 = pnand %p9303_p8, %p9297_p1 }
  0xf8   : > { %9307 = shalt.err (!%p9304_p2)
}
  0xf9   : > { %8858 = dma.hbm_to_vmem [thread:$0]  (%p11786_p0), %s10061_s2, 48, %s664_s26, %s10063_s0  }
  0xfa   : > { %s11787_s5 = sld [smem:[#allocation47_spill]]  ;;  %s674_s22 = scalar_lea.vmem [#allocation11], %s8817_s3 }
  0xfb   : > { %s681_s20 = sshll.u32 %s674_s22, 4  ;;  %s8819_s30 = smul.u32 9, %s10040_s15  ;;  %s10115_s20 = int_to_ptr.vmem [resolvable:$true] %s681_s20 }
 0x100   : > { %s10111_s17 = scalar_lea.hbm %s11787_s5, %s8818_s14  ;;  %s9312_s14 = scalar_lea.hbm %s11787_s5, 82944 }
 0x101   : > { %s9308_s12 = scalar_lea.hbm %s10111_s17, 13824  ;;  %p9313_p6 = scmp.lt.u32.totalorder %s10111_s17, %s11787_s5 }
 0x102   : > { %p9309_p9 = scmp.ne.s32.totalorder %s10111_s17, %s9308_s12  ;;  %p9314_p7 = scmp.lt.u32.totalorder %s9312_s14, %s9308_s12 }
 0x103   : > { %p9316_p13 = scmp.lt.u32.totalorder %s9308_s12, %s10111_s17 }
 0x104   : > { %p9310_p10 = pnand %p9309_p9, %p11786_p0  ;;  %p9315_p11 = por %p9314_p7, %p9313_p6 }
 0x106   : > { %p9311_p3 = pneg %p9310_p10  ;;  %p9317_p12 = por %p9316_p13, %p9315_p11 }
 0x108   : > { %p9318_p1 = pnand %p9317_p12, %p9311_p3 }
 0x10a   : > { %9321 = shalt.err (!%p9318_p1)
}
 0x10b   : > { %s9322_s3 = scalar_lea.vmem %s10115_s20, 13824  ;;  %s9714_s4 = smov [#allocation11]  }
 0x10c   : > { %p9323_p4 = scmp.ne.s32.totalorder %s10115_s20, %s9322_s3  ;;  %s9326_s11 = sshll.u32 %s9714_s4, 4  ;;  %s9327_s11 = int_to_ptr.vmem [resolvable:$false] %s9326_s11 }
 0x10d   : > { %s9328_s22 = scalar_lea.vmem %s9327_s11, 27648  ;;  %p9329_p2 = scmp.lt.s32.totalorder %s10115_s20, %s9327_s11 }
 0x10e   : > { %p9324_p5 = pnand %p9323_p4, %p11786_p0  ;;  %p9330_p9 = scmp.lt.s32.totalorder %s9328_s22, %s9322_s3 }
 0x110   : > { %p9325_p8 = pneg %p9324_p5  ;;  %p9331_p10 = por %p9330_p9, %p9329_p2 }
 0x112   : > { %p9332_p6 = pnand %p9331_p10, %p9325_p8 }
 0x114   : > { %9335 = shalt.err (!%p9332_p6)
}
 0x115   : > { %s9715_s12 = smov 1152   ;;  %s9716_s2 = smov 72  }
 0x116   : > { %8859 = dma.hbm_to_vmem [thread:$0]  (%p11786_p0), %s10111_s17, 13824, %s10115_s20, %s10063_s0, %s9715_s12, %s9715_s12, %s9716_s2  }
 0x117   : > { %s8820_s26 = smul.u32 144, %s9700_s24  ;;  %s695_s14 = scalar_lea.vmem [#allocation12], %s8819_s30 }
 0x118   : > { %s703_s29 = sshll.u32 %s695_s14, 4  ;;  %s8821_s21 = smul.u32 288, %s10040_s15  ;;  %s704_s29 = int_to_ptr.vmem [resolvable:$true] %s703_s29 }
 0x119   : > { %s11788_s6 = sld [smem:[#allocation48_spill]] }
 0x11f   : > { %s701_s11 = scalar_lea.hbm %s11788_s6, %s8820_s26  ;;  %s9340_s16 = scalar_lea.hbm %s11788_s6, 864 }
 0x120   : > { %s9336_s22 = scalar_lea.hbm %s701_s11, 144  ;;  %p9341_p13 = scmp.lt.u32.totalorder %s701_s11, %s11788_s6 }
 0x121   : > { %p9337_p3 = scmp.ne.s32.totalorder %s701_s11, %s9336_s22  ;;  %p9342_p12 = scmp.lt.u32.totalorder %s9340_s16, %s9336_s22 }
 0x122   : > { %p9344_p4 = scmp.lt.u32.totalorder %s9336_s22, %s701_s11 }
 0x123   : > { %p9338_p7 = pnand %p9337_p3, %p11786_p0  ;;  %p9343_p1 = por %p9342_p12, %p9341_p13 }
 0x125   : > { %p9339_p11 = pneg %p9338_p7  ;;  %p9345_p5 = por %p9344_p4, %p9343_p1 }
 0x127   : > { %p9346_p8 = pnand %p9345_p5, %p9339_p11 }
 0x129   : > { %9349 = shalt.err (!%p9346_p8)
}
 0x12a   : > { %s9350_s30 = scalar_lea.vmem %s704_s29, 144  ;;  %s9717_s12 = smov [#allocation12]  }
 0x12b   : > { %p9351_p2 = scmp.ne.s32.totalorder %s704_s29, %s9350_s30  ;;  %s9354_s2 = sshll.u32 %s9717_s12, 4  ;;  %s9355_s2 = int_to_ptr.vmem [resolvable:$false] %s9354_s2 }
 0x12c   : > { %s9356_s5 = scalar_lea.vmem %s9355_s2, 288  ;;  %p9357_p6 = scmp.lt.s32.totalorder %s704_s29, %s9355_s2 }
 0x12d   : > { %p9352_p9 = pnand %p9351_p2, %p11786_p0  ;;  %p9358_p3 = scmp.lt.s32.totalorder %s9356_s5, %s9350_s30 }
 0x12f   : > { %p9353_p10 = pneg %p9352_p9  ;;  %p9359_p7 = por %p9358_p3, %p9357_p6 }
 0x131   : > { %p9360_p12 = pnand %p9359_p7, %p9353_p10 }
 0x133   : > { %9363 = shalt.err (!%p9360_p12)
}
 0x134   : > { %8860 = dma.hbm_to_vmem [thread:$0]  (%p11786_p0), %s701_s11, 144, %s704_s29, %s10063_s0  }
 0x135   : > { %s8822_s16 = smul.u32 4608, %s9700_s24  ;;  %s714_s13 = scalar_lea.vmem [#allocation13], %s8821_s21 }
 0x136   : > { %s721_s26 = sshll.u32 %s714_s13, 4  ;;  %s11789_s7 = sld [smem:[#allocation49_spill]]  ;;  %s10168_s26 = int_to_ptr.vmem [resolvable:$true] %s721_s26 }
 0x13c   : > { %s10166_s4 = scalar_lea.hbm %s11789_s7, %s8822_s16  ;;  %s9368_s21 = scalar_lea.hbm %s11789_s7, 27648 }
 0x13d   : > { %s9364_s22 = scalar_lea.hbm %s10166_s4, 4608  ;;  %p9369_p4 = scmp.lt.u32.totalorder %s10166_s4, %s11789_s7 }
 0x13e   : > { %p9365_p11 = scmp.ne.s32.totalorder %s10166_s4, %s9364_s22  ;;  %p9370_p5 = scmp.lt.u32.totalorder %s9368_s21, %s9364_s22 }
 0x13f   : > { %p9372_p2 = scmp.lt.u32.totalorder %s9364_s22, %s10166_s4 }
 0x140   : > { %p9366_p13 = pnand %p9365_p11, %p11786_p0  ;;  %p9371_p8 = por %p9370_p5, %p9369_p4 }
 0x142   : > { %p9367_p1 = pneg %p9366_p13  ;;  %p9373_p9 = por %p9372_p2, %p9371_p8 }
 0x144   : > { %p9374_p10 = pnand %p9373_p9, %p9367_p1 }
 0x146   : > { %9377 = shalt.err (!%p9374_p10)
}
 0x147   : > { %s9378_s30 = scalar_lea.vmem %s10168_s26, 4608  ;;  %s9718_s12 = smov [#allocation13]  }
 0x148   : > { %p9379_p6 = scmp.ne.s32.totalorder %s10168_s26, %s9378_s30  ;;  %s9382_s2 = sshll.u32 %s9718_s12, 4  ;;  %s9383_s2 = int_to_ptr.vmem [resolvable:$false] %s9382_s2 }
 0x149   : > { %s9384_s5 = scalar_lea.vmem %s9383_s2, 9216  ;;  %p9385_p12 = scmp.lt.s32.totalorder %s10168_s26, %s9383_s2 }
 0x14a   : > { %p9380_p3 = pnand %p9379_p6, %p11786_p0  ;;  %p9386_p11 = scmp.lt.s32.totalorder %s9384_s5, %s9378_s30 }
 0x14c   : > { %p9381_p7 = pneg %p9380_p3  ;;  %p9387_p13 = por %p9386_p11, %p9385_p12 }
 0x14e   : > { %p9388_p4 = pnand %p9387_p13, %p9381_p7 }
 0x150   : > { %9391 = shalt.err (!%p9388_p4)
}
 0x151   : > { %s11748_s16 = smov 384   ;;  %s11749_s13 = smov 24  }
 0x152   : > { %8861 = dma.hbm_to_vmem [thread:$0]  (%p11786_p0), %s10166_s4, 4608, %s10168_s26, %s10063_s0, %s11748_s16, %s11748_s16, %s11749_s13  }
 0x153   : > { %s10199_s22 = scalar_lea.hbm %s11708_s8, %s10046_s27  ;;  %s735_s29 = scalar_lea.vmem [#allocation14], %s10043_s1 }
 0x154   : > { %s743_s11 = sshll.u32 %s735_s29, 4  ;;  %s9392_s21 = scalar_lea.hbm %s10199_s22, 48  ;;  %s744_s11 = int_to_ptr.vmem [resolvable:$true] %s743_s11 }
 0x155   : > { %p9393_p1 = scmp.ne.s32.totalorder %s10199_s22, %s9392_s21  ;;  %s9396_s26 = scalar_lea.hbm %s11708_s8, 288 }
 0x156   : > { %p9397_p2 = scmp.lt.u32.totalorder %s10199_s22, %s11708_s8  ;;  %p9398_p9 = scmp.lt.u32.totalorder %s9396_s26, %s9392_s21 }
 0x157   : > { %p9394_p5 = pnand %p9393_p1, %p11786_p0  ;;  %p9400_p6 = scmp.lt.u32.totalorder %s9392_s21, %s10199_s22 }
 0x158   : > { %p9399_p10 = por %p9398_p9, %p9397_p2 }
 0x159   : > { %p9395_p8 = pneg %p9394_p5 }
 0x15a   : > { %p9401_p3 = por %p9400_p6, %p9399_p10 }
 0x15c   : > { %p9402_p7 = pnand %p9401_p3, %p9395_p8 }
 0x15e   : > { %9405 = shalt.err (!%p9402_p7)
}
 0x15f   : > { %s9406_s12 = scalar_lea.vmem %s744_s11, 48  ;;  %s9721_s2 = smov [#allocation14]  }
 0x160   : > { %p9407_p12 = scmp.ne.s32.totalorder %s744_s11, %s9406_s12  ;;  %s9410_s5 = sshll.u32 %s9721_s2, 4  ;;  %s9411_s5 = int_to_ptr.vmem [resolvable:$false] %s9410_s5 }
 0x161   : > { %s9412_s14 = scalar_lea.vmem %s9411_s5, 96  ;;  %p9413_p4 = scmp.lt.s32.totalorder %s744_s11, %s9411_s5 }
 0x162   : > { %p9408_p11 = pnand %p9407_p12, %p11786_p0  ;;  %p9414_p1 = scmp.lt.s32.totalorder %s9412_s14, %s9406_s12 }
 0x164   : > { %p9409_p13 = pneg %p9408_p11  ;;  %p9415_p5 = por %p9414_p1, %p9413_p4 }
 0x166   : > { %p9416_p2 = pnand %p9415_p5, %p9409_p13 }
 0x168   : > { %9419 = shalt.err (!%p9416_p2)
}
 0x169   : > { %8862 = dma.hbm_to_vmem [thread:$0]  (%p11786_p0), %s10199_s22, 48, %s744_s11, %s10063_s0  }
 0x16a   : > { %s10224_s21 = scalar_lea.hbm %s11709_s9, %s10046_s27  ;;  %s754_s17 = scalar_lea.vmem [#allocation15], %s10043_s1 }
 0x16b   : > { %s762_s20 = sshll.u32 %s754_s17, 4  ;;  %s11750_s26 = smul.u32 1152, %s10040_s15  ;;  %s763_s20 = int_to_ptr.vmem [resolvable:$true] %s762_s20 }
 0x16c   : > { %s9420_s4 = scalar_lea.hbm %s10224_s21, 48  ;;  %s9424_s11 = scalar_lea.hbm %s11709_s9, 288 }
 0x16d   : > { %p9421_p8 = scmp.ne.s32.totalorder %s10224_s21, %s9420_s4  ;;  %p9425_p6 = scmp.lt.u32.totalorder %s10224_s21, %s11709_s9 }
 0x16e   : > { %p9426_p3 = scmp.lt.u32.totalorder %s9424_s11, %s9420_s4  ;;  %p9428_p12 = scmp.lt.u32.totalorder %s9420_s4, %s10224_s21 }
 0x16f   : > { %p9422_p9 = pnand %p9421_p8, %p11786_p0 }
 0x170   : > { %p9427_p7 = por %p9426_p3, %p9425_p6 }
 0x171   : > { %p9423_p10 = pneg %p9422_p9 }
 0x172   : > { %p9429_p11 = por %p9428_p12, %p9427_p7 }
 0x174   : > { %p9430_p13 = pnand %p9429_p11, %p9423_p10 }
 0x176   : > { %9433 = shalt.err (!%p9430_p13)
}
 0x177   : > { %s9434_s5 = scalar_lea.vmem %s763_s20, 48  ;;  %s9722_s14 = smov [#allocation15]  }
 0x178   : > { %p9435_p4 = scmp.ne.s32.totalorder %s763_s20, %s9434_s5  ;;  %s9438_s3 = sshll.u32 %s9722_s14, 4  ;;  %s9439_s3 = int_to_ptr.vmem [resolvable:$false] %s9438_s3 }
 0x179   : > { %s9440_s29 = scalar_lea.vmem %s9439_s3, 96  ;;  %p9441_p2 = scmp.lt.s32.totalorder %s763_s20, %s9439_s3 }
 0x17a   : > { %p9436_p1 = pnand %p9435_p4, %p11786_p0  ;;  %p9442_p8 = scmp.lt.s32.totalorder %s9440_s29, %s9434_s5 }
 0x17c   : > { %p9437_p5 = pneg %p9436_p1  ;;  %p9443_p9 = por %p9442_p8, %p9441_p2 }
 0x17e   : > { %p9444_p3 = pnand %p9443_p9, %p9437_p5 }
 0x180   : > { %9447 = shalt.err (!%p9444_p3)
}
 0x181   : > { %8863 = dma.hbm_to_vmem [thread:$0]  (%p11786_p0), %s10224_s21, 48, %s763_s20, %s10063_s0  }
 0x182   : > { %s11751_s17 = smul.u32 18432, %s9700_s24  ;;  %s773_s4 = scalar_lea.vmem [#allocation16], %s11750_s26 }
 0x183   : > { %s780_s30 = sshll.u32 %s773_s4, 4  ;;  %s8829_s2 = smul.u32 12, %s10040_s15  ;;  %s10256_s30 = int_to_ptr.vmem [resolvable:$true] %s780_s30 }
 0x184   : > { %s10254_s12 = scalar_lea.hbm %s11710_s10, %s11751_s17  ;;  %s9452_s14 = scalar_lea.hbm %s11710_s10, 110592 }
 0x185   : > { %s9448_s5 = scalar_lea.hbm %s10254_s12, 18432  ;;  %p9453_p12 = scmp.lt.u32.totalorder %s10254_s12, %s11710_s10 }
 0x186   : > { %p9449_p10 = scmp.ne.s32.totalorder %s10254_s12, %s9448_s5  ;;  %p9454_p11 = scmp.lt.u32.totalorder %s9452_s14, %s9448_s5 }
 0x187   : > { %p9456_p4 = scmp.lt.u32.totalorder %s9448_s5, %s10254_s12 }
 0x188   : > { %p9450_p6 = pnand %p9449_p10, %p11786_p0  ;;  %p9455_p13 = por %p9454_p11, %p9453_p12 }
 0x18a   : > { %p9451_p7 = pneg %p9450_p6  ;;  %p9457_p1 = por %p9456_p4, %p9455_p13 }
 0x18c   : > { %p9458_p5 = pnand %p9457_p1, %p9451_p7 }
 0x18e   : > { %9461 = shalt.err (!%p9458_p5)
}
 0x18f   : > { %s9462_s4 = scalar_lea.vmem %s10256_s30, 18432  ;;  %s9723_s22 = smov [#allocation16]  }
 0x190   : > { %p9463_p2 = scmp.ne.s32.totalorder %s10256_s30, %s9462_s4  ;;  %s9466_s11 = sshll.u32 %s9723_s22, 4  ;;  %s9467_s11 = int_to_ptr.vmem [resolvable:$false] %s9466_s11 }
 0x191   : > { %s9468_s21 = scalar_lea.vmem %s9467_s11, 36864  ;;  %p9469_p3 = scmp.lt.s32.totalorder %s10256_s30, %s9467_s11 }
 0x192   : > { %p9464_p8 = pnand %p9463_p2, %p11786_p0  ;;  %p9470_p10 = scmp.lt.s32.totalorder %s9468_s21, %s9462_s4 }
 0x194   : > { %p9465_p9 = pneg %p9464_p8  ;;  %p9471_p6 = por %p9470_p10, %p9469_p3 }
 0x196   : > { %p9472_p12 = pnand %p9471_p6, %p9465_p9 }
 0x198   : > { %9475 = shalt.err (!%p9472_p12)
}
 0x199   : > { %s9724_s5 = smov 1536   ;;  %s9725_s20 = smov 96  }
 0x19a   : > { %8864 = dma.hbm_to_vmem [thread:$0]  (%p11786_p0), %s10254_s12, 18432, %s10256_s30, %s10063_s0, %s9724_s5, %s9724_s5, %s9725_s20  }
 0x19b   : > { %s8830_s14 = smul.u32 192, %s9700_s24  ;;  %s794_s3 = scalar_lea.vmem [#allocation17], %s8829_s2 }
 0x19c   : > { %s802_s29 = sshll.u32 %s794_s3, 4  ;;  %s11790_s11 = sld [smem:[#allocation50_spill]]  ;;  %s803_s29 = int_to_ptr.vmem [resolvable:$true] %s802_s29 }
 0x1a2   : > { %s800_s21 = scalar_lea.hbm %s11790_s11, %s8830_s14  ;;  %s9480_s17 = scalar_lea.hbm %s11790_s11, 1152 }
 0x1a3   : > { %s9476_s16 = scalar_lea.hbm %s800_s21, 192  ;;  %p9481_p4 = scmp.lt.u32.totalorder %s800_s21, %s11790_s11 }
 0x1a4   : > { %p9477_p7 = scmp.ne.s32.totalorder %s800_s21, %s9476_s16  ;;  %p9482_p1 = scmp.lt.u32.totalorder %s9480_s17, %s9476_s16 }
 0x1a5   : > { %p9484_p2 = scmp.lt.u32.totalorder %s9476_s16, %s800_s21 }
 0x1a6   : > { %p9478_p11 = pnand %p9477_p7, %p11786_p0  ;;  %p9483_p5 = por %p9482_p1, %p9481_p4 }
 0x1a8   : > { %p9479_p13 = pneg %p9478_p11  ;;  %p9485_p8 = por %p9484_p2, %p9483_p5 }
 0x1aa   : > { %p9486_p9 = pnand %p9485_p8, %p9479_p13 }
 0x1ac   : > { %9489 = shalt.err (!%p9486_p9)
}
 0x1ad   : > { %s9490_s5 = scalar_lea.vmem %s803_s29, 192  ;;  %s9726_s20 = smov [#allocation17]  }
 0x1ae   : > { %p9491_p3 = scmp.ne.s32.totalorder %s803_s29, %s9490_s5  ;;  %s9494_s3 = sshll.u32 %s9726_s20, 4  ;;  %s9495_s3 = int_to_ptr.vmem [resolvable:$false] %s9494_s3 }
 0x1af   : > { %s9496_s13 = scalar_lea.vmem %s9495_s3, 384  ;;  %p9497_p12 = scmp.lt.s32.totalorder %s803_s29, %s9495_s3 }
 0x1b0   : > { %p9492_p10 = pnand %p9491_p3, %p11786_p0  ;;  %p9498_p7 = scmp.lt.s32.totalorder %s9496_s13, %s9490_s5 }
 0x1b2   : > { %p9493_p6 = pneg %p9492_p10  ;;  %p9499_p11 = por %p9498_p7, %p9497_p12 }
 0x1b4   : > { %p9500_p1 = pnand %p9499_p11, %p9493_p6 }
 0x1b6   : > { %9503 = shalt.err (!%p9500_p1)
}
 0x1b7   : > { %8865 = dma.hbm_to_vmem [thread:$0]  (%p11786_p0), %s800_s21, 192, %s803_s29, %s10063_s0  }
 0x1b8   : > { %s11791_s17 = sld [smem:[#allocation51_spill]]  ;;  %s813_s22 = scalar_lea.vmem [#allocation18], %s8829_s2 }
 0x1b9   : > { %s821_s30 = sshll.u32 %s813_s22, 4  ;;  %s822_s30 = int_to_ptr.vmem [resolvable:$true] %s821_s30 }
 0x1be   : > { %s10307_s4 = scalar_lea.hbm %s11791_s17, %s8830_s14  ;;  %s9508_s5 = scalar_lea.hbm %s11791_s17, 1152 }
 0x1bf   : > { %s9504_s12 = scalar_lea.hbm %s10307_s4, 192  ;;  %p9509_p2 = scmp.lt.u32.totalorder %s10307_s4, %s11791_s17 }
 0x1c0   : > { %p9505_p13 = scmp.ne.s32.totalorder %s10307_s4, %s9504_s12  ;;  %p9510_p8 = scmp.lt.u32.totalorder %s9508_s5, %s9504_s12 }
 0x1c1   : > { %p9512_p3 = scmp.lt.u32.totalorder %s9504_s12, %s10307_s4 }
 0x1c2   : > { %p9506_p4 = pnand %p9505_p13, %p11786_p0  ;;  %p9511_p9 = por %p9510_p8, %p9509_p2 }
 0x1c4   : > { %p9507_p5 = pneg %p9506_p4  ;;  %p9513_p10 = por %p9512_p3, %p9511_p9 }
 0x1c6   : > { %p9514_p6 = pnand %p9513_p10, %p9507_p5 }
 0x1c8   : > { %9517 = shalt.err (!%p9514_p6)
}
 0x1c9   : > { %s9518_s2 = scalar_lea.vmem %s822_s30, 192  ;;  %s9727_s3 = smov [#allocation18]  }
 0x1ca   : > { %p9519_p12 = scmp.ne.s32.totalorder %s822_s30, %s9518_s2  ;;  %s9522_s13 = sshll.u32 %s9727_s3, 4  ;;  %s9523_s13 = int_to_ptr.vmem [resolvable:$false] %s9522_s13 }
 0x1cb   : > { %s9524_s16 = scalar_lea.vmem %s9523_s13, 384  ;;  %p9525_p1 = scmp.lt.s32.totalorder %s822_s30, %s9523_s13 }
 0x1cc   : > { %p9520_p7 = pnand %p9519_p12, %p11786_p0  ;;  %p9526_p13 = scmp.lt.s32.totalorder %s9524_s16, %s9518_s2 }
 0x1ce   : > { %p9521_p11 = pneg %p9520_p7  ;;  %p9527_p4 = por %p9526_p13, %p9525_p1 }
 0x1d0   : > { %p9528_p2 = pnand %p9527_p4, %p9521_p11 }
 0x1d2   : > { %9531 = shalt.err (!%p9528_p2)
}
 0x1d3   : > { %8866 = dma.hbm_to_vmem [thread:$0]  (%p11786_p0), %s10307_s4, 192, %s822_s30, %s10063_s0  }
 0x1d4   : > { %s11792_s26 = smul.u32 18432, %s9700_s24  ;;  %s11793_s29 = sld [smem:[#allocation52_spill]] }
 0x1d5   : > { %s11794_s5 = smul.u32 1152, %s10040_s15 }
 0x1d7   : > { %s832_s20 = scalar_lea.vmem [#allocation19], %s11794_s5 }
 0x1d8   : > { %s839_s14 = sshll.u32 %s832_s20, 4  ;;  %s10338_s14 = int_to_ptr.vmem [resolvable:$true] %s839_s14 }
 0x1da   : > { %s10334_s21 = scalar_lea.hbm %s11793_s29, %s11792_s26  ;;  %s9536_s30 = scalar_lea.hbm %s11793_s29, 110592 }
 0x1db   : > { %s9532_s2 = scalar_lea.hbm %s10334_s21, 18432  ;;  %p9537_p3 = scmp.lt.u32.totalorder %s10334_s21, %s11793_s29 }
 0x1dc   : > { %p9533_p5 = scmp.ne.s32.totalorder %s10334_s21, %s9532_s2  ;;  %p9538_p10 = scmp.lt.u32.totalorder %s9536_s30, %s9532_s2 }
 0x1dd   : > { %p9540_p12 = scmp.lt.u32.totalorder %s9532_s2, %s10334_s21 }
 0x1de   : > { %p9534_p8 = pnand %p9533_p5, %p11786_p0  ;;  %p9539_p6 = por %p9538_p10, %p9537_p3 }
 0x1e0   : > { %p9535_p9 = pneg %p9534_p8  ;;  %p9541_p7 = por %p9540_p12, %p9539_p6 }
 0x1e2   : > { %p9542_p11 = pnand %p9541_p7, %p9535_p9 }
 0x1e4   : > { %9545 = shalt.err (!%p9542_p11)
}
 0x1e5   : > { %s9546_s15 = scalar_lea.vmem %s10338_s14, 18432  ;;  %s9728_s16 = smov [#allocation19]  }
 0x1e6   : > { %p9547_p1 = scmp.ne.s32.totalorder %s10338_s14, %s9546_s15  ;;  %s9550_s26 = sshll.u32 %s9728_s16, 4  ;;  %s9551_s26 = int_to_ptr.vmem [resolvable:$false] %s9550_s26 }
 0x1e7   : > { %s9552_s22 = scalar_lea.vmem %s9551_s26, 36864  ;;  %p9553_p2 = scmp.lt.s32.totalorder %s10338_s14, %s9551_s26 }
 0x1e8   : > { %p9548_p13 = pnand %p9547_p1, %p11786_p0  ;;  %p9554_p5 = scmp.lt.s32.totalorder %s9552_s22, %s9546_s15 }
 0x1ea   : > { %p9549_p4 = pneg %p9548_p13  ;;  %p9555_p8 = por %p9554_p5, %p9553_p2 }
 0x1ec   : > { %p9556_p3 = pnand %p9555_p8, %p9549_p4 }
 0x1ee   : > { %9559 = shalt.err (!%p9556_p3)
}
 0x1ef   : > { %s11795_s12 = smov 24   ;;  %s11796_s5 = smov 384  }
 0x1f0   : > { %8867 = dma.hbm_to_vmem [thread:$0]  (%p11786_p0), %s10334_s21, 18432, %s10338_s14, %s10063_s0, %s11796_s5, %s11796_s5, %s11795_s12  }
 0x1f1   : > { %s11797_s24 = sld [smem:[#allocation53_spill]]  ;;  %s853_s3 = scalar_lea.vmem [#allocation20], %s10043_s1 }
 0x1f2   : > { %s861_s13 = sshll.u32 %s853_s3, 4  ;;  %s862_s13 = int_to_ptr.vmem [resolvable:$true] %s861_s13 }
 0x1f7   : > { %s11798_s4 = smov %s11797_s24  ;;  %s10369_s30 = scalar_lea.hbm %s11797_s24, %s10046_s27 }
 0x1f8   : > { %s9560_s15 = scalar_lea.hbm %s10369_s30, 48  ;;  %s9564_s21 = scalar_lea.hbm %s11798_s4, 288 }
 0x1f9   : > { %p9561_p9 = scmp.ne.s32.totalorder %s10369_s30, %s9560_s15  ;;  %p9565_p12 = scmp.lt.u32.totalorder %s10369_s30, %s11798_s4 }
 0x1fa   : > { %p9566_p7 = scmp.lt.u32.totalorder %s9564_s21, %s9560_s15  ;;  %p9568_p1 = scmp.lt.u32.totalorder %s9560_s15, %s10369_s30 }
 0x1fb   : > { %p9562_p10 = pnand %p9561_p9, %p11786_p0 }
 0x1fc   : > { %p9567_p11 = por %p9566_p7, %p9565_p12 }
 0x1fd   : > { %p9563_p6 = pneg %p9562_p10 }
 0x1fe   : > { %p9569_p13 = por %p9568_p1, %p9567_p11 }
 0x200   : > { %p9570_p4 = pnand %p9569_p13, %p9563_p6 }
 0x202   : > { %9573 = shalt.err (!%p9570_p4)
}
 0x203   : > { %s9574_s12 = scalar_lea.vmem %s862_s13, 48  ;;  %s9729_s5 = smov [#allocation20]  }
 0x204   : > { %p9575_p2 = scmp.ne.s32.totalorder %s862_s13, %s9574_s12  ;;  %s9578_s20 = sshll.u32 %s9729_s5, 4  ;;  %s9579_s20 = int_to_ptr.vmem [resolvable:$false] %s9578_s20 }
 0x205   : > { %s9580_s2 = scalar_lea.vmem %s9579_s20, 96  ;;  %p9581_p3 = scmp.lt.s32.totalorder %s862_s13, %s9579_s20 }
 0x206   : > { %p9576_p5 = pnand %p9575_p2, %p11786_p0  ;;  %p9582_p9 = scmp.lt.s32.totalorder %s9580_s2, %s9574_s12 }
 0x208   : > { %p9577_p8 = pneg %p9576_p5  ;;  %p9583_p10 = por %p9582_p9, %p9581_p3 }
 0x20a   : > { %p9584_p7 = pnand %p9583_p10, %p9577_p8 }
 0x20c   : > { %9587 = shalt.err (!%p9584_p7)
}
 0x20d   : > { %8868 = dma.hbm_to_vmem [thread:$0]  (%p11786_p0), %s10369_s30, 48, %s862_s13, %s10063_s0  }
 0x20e   : > { %s11799_s15 = sld [smem:[#allocation54_spill]]  ;;  %s872_s26 = scalar_lea.vmem [#allocation21], %s10043_s1 }
 0x20f   : > { %s880_s21 = sshll.u32 %s872_s26, 4  ;;  %s881_s21 = int_to_ptr.vmem [resolvable:$true] %s880_s21 }
 0x214   : > { %s10394_s16 = scalar_lea.hbm %s11799_s15, %s10046_s27  ;;  %s9592_s30 = scalar_lea.hbm %s11799_s15, 288 }
 0x215   : > { %s9588_s14 = scalar_lea.hbm %s10394_s16, 48  ;;  %p9593_p1 = scmp.lt.u32.totalorder %s10394_s16, %s11799_s15 }
 0x216   : > { %p9589_p6 = scmp.ne.s32.totalorder %s10394_s16, %s9588_s14  ;;  %p9594_p13 = scmp.lt.u32.totalorder %s9592_s30, %s9588_s14 }
 0x217   : > { %p9596_p2 = scmp.lt.u32.totalorder %s9588_s14, %s10394_s16 }
 0x218   : > { %p9590_p12 = pnand %p9589_p6, %p11786_p0  ;;  %p9595_p4 = por %p9594_p13, %p9593_p1 }
 0x21a   : > { %p9591_p11 = pneg %p9590_p12  ;;  %p9597_p5 = por %p9596_p2, %p9595_p4 }
 0x21c   : > { %p9598_p8 = pnand %p9597_p5, %p9591_p11 }
 0x21e   : > { %9601 = shalt.err (!%p9598_p8)
}
 0x21f   : > { %s9602_s1 = scalar_lea.vmem %s881_s21, 48  ;;  %s9730_s27 = smov [#allocation21]  }
 0x220   : > { %p9603_p3 = scmp.ne.s32.totalorder %s881_s21, %s9602_s1  ;;  %s9606_s20 = sshll.u32 %s9730_s27, 4  ;;  %s9607_s20 = int_to_ptr.vmem [resolvable:$false] %s9606_s20 }
 0x221   : > { %s9608_s2 = scalar_lea.vmem %s9607_s20, 96  ;;  %p9609_p7 = scmp.lt.s32.totalorder %s881_s21, %s9607_s20 }
 0x222   : > { %p9604_p9 = pnand %p9603_p3, %p11786_p0  ;;  %p9610_p6 = scmp.lt.s32.totalorder %s9608_s2, %s9602_s1 }
 0x224   : > { %p9605_p10 = pneg %p9604_p9  ;;  %p9611_p12 = por %p9610_p6, %p9609_p7 }
 0x226   : > { %p9612_p1 = pnand %p9611_p12, %p9605_p10 }
 0x228   : > { %9615 = shalt.err (!%p9612_p1)
}
 0x229   : > { %8869 = dma.hbm_to_vmem [thread:$0]  (%p11786_p0), %s10394_s16, 48, %s881_s21, %s10063_s0  }
 0x22a PF: > { %s11800_s24 = sld [smem:[#allocation41_spill]] }
 0x230   : > { %p11801_p11 = scmp.ne.s32.totalorder %s11800_s24, 0 }
 0x231   : > { %s11802_s3 = sld [smem:[#allocation37_spill]] (!%p11801_p11) }
 0x232   : > { %889 = sbr.rel (%p11801_p11) target bundleno = 7906 (0x1ee2), region = 100 }
 0x237   : > { %p11803_p13 = scmp.eq.s32.totalorder (!%p11801_p11), %s11802_s3, 0 }
 0x239   : > { %9659 = dma.done.wait (%p11803_p13), [#allocation5], 6144   ;;  %p11804_p4 = pmov %p11803_p13 }
 0x23b   : > { %9661 = vsyncadd (%p11804_p4), [#allocation5], 4294961152  ;;  %p11805_p2 = pmov %p11804_p4 }
 0x23d   : > { %9663 = dma.done.wait (%p11805_p2), [#allocation8], 384   ;;  %p11806_p5 = pmov %p11805_p2 }
 0x23e   : > { %s11807_s28 = sld [smem:[#allocation36_spill]]  ;;  %s11808_s26 = sld [smem:[#allocation40_spill]] }
 0x23f   : > { %9665 = vsyncadd (%p11806_p5), [#allocation8], 4294966912  ;;  %s899_s0 = sand.u32 1, %s11802_s3  }
 0x240   : > { %s900_s14 = scalar_lea.sflag [#allocation5], %s899_s0 }
 0x244   : > { %s901_s16 = sand.u32 1, %s11807_s28   ;;  %p11809_p0 = scmp.ne.s32.totalorder %s11808_s26, 0 }
 0x245   : > { %s10427_s21 = smul.u32 3, %s901_s16 }
 0x246   : > { %9667 = dma.done.wait (%p11809_p0), %s900_s14, 56112  }
 0x247   : > { %9669 = vsyncadd (%p11809_p0), %s900_s14, 4294911184  ;;  %s8840_s12 = smul.u32 864, %s901_s16  ;;  %s912_s27 = scalar_lea.vmem [#allocation10], %s10427_s21 }
 0x248   : > { %s8841_s30 = smul.u32 9, %s901_s16  ;;  %s948_s28 = scalar_lea.vmem [#allocation14], %s10427_s21 }
 0x249   : > { %s8842_s13 = smul.u32 288, %s901_s16  ;;  %s10435_s20 = scalar_lea.vmem [#allocation11], %s8840_s12 }
 0x24a   : > { %s8843_s5 = smul.u32 1152, %s901_s16  ;;  %s10437_s2 = scalar_lea.vmem [#allocation12], %s8841_s30 }
 0x24b   : > { %s8844_s1 = smul.u32 12, %s901_s16  ;;  %s10439_s24 = scalar_lea.vmem [#allocation13], %s8842_s13 }
 0x24c   : > { %s957_s26 = scalar_lea.vmem [#allocation15], %s10427_s21  ;;  %s10443_s0 = scalar_lea.vmem [#allocation16], %s8843_s5 }
 0x24d   : > { %s10445_s14 = scalar_lea.vmem [#allocation17], %s8844_s1  ;;  %s10447_s22 = scalar_lea.vmem [#allocation18], %s8844_s1 }
 0x24e   : > { %s10449_s4 = scalar_lea.vmem [#allocation19], %s8843_s5  ;;  %s1002_s6 = scalar_lea.vmem [#allocation20], %s10427_s21 }
 0x24f   : > { %s1011_s7 = scalar_lea.vmem [#allocation21], %s10427_s21  ;;  %p11810_p8 = pmov %p11805_p2 }
 0x250   : > { %p11811_p3 = pmov %p11805_p2 }
 0x251   : > { %9671 = dma.done.wait (%p11810_p8), [#allocation8], 48  }
 0x252   : > { %9673 = vsyncadd (%p11811_p3), [#allocation8], 4294967248  ;;  %p11812_p9 = pmov %p11805_p2 }
 0x253   : > { %p11813_p10 = pmov %p11805_p2 }
 0x254   : > { %9675 = dma.done.wait (%p11812_p9), [#allocation24], 3120  }
 0x255   : > { %9677 = vsyncadd (%p11813_p10), [#allocation24], 4294964176  ;;  %p11814_p7 = pmov %p11805_p2 }
 0x256   : > { %p11815_p6 = pmov %p11805_p2 }
 0x257   : > { %9679 = dma.done.wait (%p11814_p7), [#allocation27], 16  }
 0x258   : > { %9681 = vsyncadd (%p11815_p6), [#allocation27], 4294967280  ;;  %p11816_p12 = scmp.ne.s32.totalorder %s11802_s3, 0 }
 0x259   : > { %s11817_s30 = sld [smem:[#allocation42_spill]] (!%p11816_p12)  ;;  %v1161_v1 = vld [vmem:[#allocation4 + $0x8] sm:$0xff] (!%p11816_p12)  ;;  %v1146_v2 = vlaneseq (!%p11816_p12)  ;;  %v9731_v3 = vmov (!%p11816_p12), 0   ;;  %v1164_v5 = vld [vmem:[#allocation4 + $0x20] sm:$0xff] (!%p11816_p12)  ;;  %v1163_v7 = vld [vmem:[#allocation4 + $0x18] sm:$0xff] (!%p11816_p12)  ;;  %v9732_v15 = vmov (!%p11816_p12), 0.0  }
 0x25a   : > { %1143 = sbr.rel (%p11816_p12) target bundleno = 957 (0x3bd), region = 180  ;;  %8992 = vset.pattern.permute.xlu0 (!%p11816_p12), %v9731_v3  ;;  %v1160_v6 = vld [vmem:[#allocation4] sm:$0xff] (!%p11816_p12)  ;;  %v8649_v8 = vpack.c.bf16 (!%p11816_p12), %v1164_v5, %v1161_v1  ;;  %v1167_v10 = vld [vmem:[#allocation4 + $0x38] sm:$0xff] (!%p11816_p12)  ;;  %v1170_v11 = vld [vmem:[#allocation4 + $0x50] sm:$0xff] (!%p11816_p12)  ;;  %1272 = vmatprep.mubr.f32.mxu0 (!%p11816_p12), %v9732_v15  ;;  %vm1379_vm0 = vcmask (!%p11816_p12), 64512  }
 0x25b   : > { %v8651_v9 = vpack.c.bf16 (!%p11816_p12), %v1163_v7, %v1160_v6  ;;  %v1162_v12 = vld [vmem:[#allocation4 + $0x10] sm:$0xff] (!%p11816_p12)  ;;  %v10473_v13 = vand.u32 (!%p11816_p12), 127, %v1146_v2  ;;  %v1376_v14 = vshrl.u32 (!%p11816_p12), %v1146_v2, 7  ;;  %v8653_v16 = vpack.c.bf16 (!%p11816_p12), %v1170_v11, %v1167_v10  ;;  %v1165_v17 = vld [vmem:[#allocation4 + $0x28] sm:$0xff] (!%p11816_p12)  ;;  %v1176_v22 = vld [vmem:[#allocation4 + $0x80] sm:$0xff] (!%p11816_p12) }
 0x25c   : > { %v1166_v18 = vld [vmem:[#allocation4 + $0x30] sm:$0xff] (!%p11816_p12)  ;;  %v1169_v19 = vld [vmem:[#allocation4 + $0x48] sm:$0xff] (!%p11816_p12)  ;;  %8650 = vmatprep.subr.bf16.mxu0 (!%p11816_p12), %v8649_v8  ;;  %v8681_v20 = vpack.c.bf16 (!%p11816_p12), %v1165_v17, %v1162_v12  ;;  %v1168_v23 = vld [vmem:[#allocation4 + $0x40] sm:$0xff] (!%p11816_p12)  ;;  %v9733_v26 = vmov (!%p11816_p12), -1e+30  }
 0x25d   : > { %v1173_v21 = vld [vmem:[#allocation4 + $0x68] sm:$0xff] (!%p11816_p12)  ;;  %vm1377_vm1 = vcmp.ge.s32.totalorder (!%p11816_p12), %v1376_v14, %v10473_v13  ;;  %8652 = vmatpush1.bf16.msra.mxu0 (!%p11816_p12), %v8651_v9  ;;  %v8655_v24 = vpack.c.bf16 (!%p11816_p12), %v1169_v19, %v1166_v18  ;;  %v1171_v25 = vld [vmem:[#allocation4 + $0x58] sm:$0xff] (!%p11816_p12)  ;;  %v1172_v30 = vld [vmem:[#allocation4 + $0x60] sm:$0xff] (!%p11816_p12) }
 0x25e   : > { %v1378_v27 = vsel (!%p11816_p12), %vm1377_vm1, 0.0, %v9733_v26  ;;  %8654 = vmatprep.subr.bf16.mxu0 (!%p11816_p12), %v8653_v16  ;;  %v8657_v28 = vpack.c.bf16 (!%p11816_p12), %v1176_v22, %v1173_v21  ;;  %v8685_v29 = vpack.c.bf16 (!%p11816_p12), %v1171_v25, %v1168_v23  ;;  %v1175_v31 = vld [vmem:[#allocation4 + $0x78] sm:$0xff] (!%p11816_p12)  ;;  %v1174_v32 = vld [vmem:[#allocation4 + $0x70] sm:$0xff] (!%p11816_p12)  ;;  %8682 = vmatprep.subr.bf16.mxu1 (!%p11816_p12), %v8681_v20  ;;  %v1177_v35 = vld [vmem:[#allocation4 + $0x88] sm:$0xff] (!%p11816_p12) }
 0x25f   : > { %v1144_v0 = vld [vmem:[%s11817_s30] sm:$0xff] (!%p11816_p12)  ;;  %v1145_v4 = vld [vmem:[%s11817_s30 + $0x8] sm:$0xff] (!%p11816_p12)  ;;  %1380 = vst.msk [vmem:[#allocation3] sm:$0xff] (!%p11816_p12), %vm1379_vm0, %v1378_v27  ;;  %v1179_v33 = vld [vmem:[#allocation4 + $0x98] sm:$0xff] (!%p11816_p12)  ;;  %8684 = vmatpush3.bf16.msra.mxu1 (!%p11816_p12), %v8681_v20  ;;  %v8659_v36 = vpack.c.bf16 (!%p11816_p12), %v1175_v31, %v1172_v30  ;;  %v8689_v37 = vpack.c.bf16 (!%p11816_p12), %v1177_v35, %v1174_v32  ;;  %v9734_v20 = vmov (!%p11816_p12), 1.0  }
 0x260   : > { %1149 = vperm.xlu0 (!%p11816_p12), %8992, %v1144_v0   ;;  %v1182_v34 = vld [vmem:[#allocation4 + $0xb0] sm:$0xff] (!%p11816_p12)  ;;  %8686 = vmatprep.subr.bf16.mxu1 (!%p11816_p12), %v8685_v29  ;;  %v1181_v40 = vld [vmem:[#allocation4 + $0xa8] sm:$0xff] (!%p11816_p12)  ;;  %v1180_v41 = vld [vmem:[#allocation4 + $0xa0] sm:$0xff] (!%p11816_p12) }
 0x261   : > { %8656 = vmatpush1.bf16.msra.mxu0 %v8655_v24  ;;  %v1178_v38 = vld [vmem:[#allocation4 + $0x90] sm:$0xff]  ;;  %v8661_v39 = vpack.c.bf16 %v1182_v34, %v1179_v33  ;;  %v1183_v42 = vld [vmem:[#allocation4 + $0xb8] sm:$0xff]  ;;  %v1185_v43 = vld [vmem:[#allocation4 + $0xc8] sm:$0xff] }
 0x262   : > { %8658 = vmatprep.subr.bf16.mxu0 %v8657_v28  ;;  %v1188_v44 = vld [vmem:[#allocation4 + $0xe0] sm:$0xff]  ;;  %v8663_v45 = vpack.c.bf16 %v1181_v40, %v1178_v38  ;;  %v8693_v46 = vpack.c.bf16 %v1183_v42, %v1180_v41  ;;  %v1187_v49 = vld [vmem:[#allocation4 + $0xd8] sm:$0xff]  ;;  %v1186_v50 = vld [vmem:[#allocation4 + $0xd0] sm:$0xff] }
 0x263   : > { %8688 = vmatpush3.bf16.msra.mxu1 %v8685_v29  ;;  %v1184_v47 = vld [vmem:[#allocation4 + $0xc0] sm:$0xff]  ;;  %v8665_v48 = vpack.c.bf16 %v1188_v44, %v1185_v43  ;;  %v1189_v51 = vld [vmem:[#allocation4 + $0xe8] sm:$0xff]  ;;  %v1191_v52 = vld [vmem:[#allocation4 + $0xf8] sm:$0xff] }
 0x264   : > { %1152 = vperm.xlu0 %8992, %v1145_v4   ;;  %8690 = vmatprep.subr.bf16.mxu1 %v8689_v37  ;;  %v1194_v53 = vld [vmem:[#allocation4 + $0x110] sm:$0xff]  ;;  %v8667_v54 = vpack.c.bf16 %v1187_v49, %v1184_v47  ;;  %v8697_v55 = vpack.c.bf16 %v1189_v51, %v1186_v50  ;;  %v1193_v58 = vld [vmem:[#allocation4 + $0x108] sm:$0xff]  ;;  %v1192_v59 = vld [vmem:[#allocation4 + $0x100] sm:$0xff] }
 0x265   : > { %8660 = vmatpush1.bf16.msra.mxu0 %v8659_v36  ;;  %v1190_v56 = vld [vmem:[#allocation4 + $0xf0] sm:$0xff]  ;;  %v8669_v57 = vpack.c.bf16 %v1194_v53, %v1191_v52  ;;  %v1195_v60 = vld [vmem:[#allocation4 + $0x118] sm:$0xff]  ;;  %v1197_v61 = vld [vmem:[#allocation4 + $0x128] sm:$0xff] }
 0x266   : > { %8662 = vmatprep.subr.bf16.mxu0 %v8661_v39  ;;  %v1200_v62 = vld [vmem:[#allocation4 + $0x140] sm:$0xff]  ;;  %v8671_v63 = vpack.c.bf16 %v1193_v58, %v1190_v56  ;;  %v8701_v0 = vpack.c.bf16 %v1195_v60, %v1192_v59  ;;  %v1199_v3 = vld [vmem:[#allocation4 + $0x138] sm:$0xff]  ;;  %v1198_v4 = vld [vmem:[#allocation4 + $0x130] sm:$0xff] }
 0x267   : > { %8692 = vmatpush3.bf16.msra.mxu1 %v8689_v37  ;;  %v1196_v1 = vld [vmem:[#allocation4 + $0x120] sm:$0xff]  ;;  %v8673_v2 = vpack.c.bf16 %v1200_v62, %v1197_v61  ;;  %v1201_v5 = vld [vmem:[#allocation4 + $0x148] sm:$0xff]  ;;  %v1203_v6 = vld [vmem:[#allocation4 + $0x158] sm:$0xff] }
 0x268   : > { %8694 = vmatprep.subr.bf16.mxu1 %v8693_v46  ;;  %v1206_v7 = vld [vmem:[#allocation4 + $0x170] sm:$0xff]  ;;  %v8675_v8 = vpack.c.bf16 %v1199_v3, %v1196_v1  ;;  %v8705_v9 = vpack.c.bf16 %v1201_v5, %v1198_v4  ;;  %v1205_v12 = vld [vmem:[#allocation4 + $0x168] sm:$0xff]  ;;  %v1204_v14 = vld [vmem:[#allocation4 + $0x160] sm:$0xff] }
 0x269   : > { %8664 = vmatpush1.bf16.msra.mxu0 %v8663_v45  ;;  %v1202_v10 = vld [vmem:[#allocation4 + $0x150] sm:$0xff]  ;;  %v8677_v11 = vpack.c.bf16 %v1206_v7, %v1203_v6  ;;  %v1207_v16 = vld [vmem:[#allocation4 + $0x178] sm:$0xff]  ;;  %v1360_v22 = vld [vmem:[#allocation7] sm:$0xff] }
 0x26a   : > { %8666 = vmatprep.subr.bf16.mxu0 %v8665_v48  ;;  %v8679_v17 = vpack.c.bf16 %v1205_v12, %v1202_v10  ;;  %v8709_v18 = vpack.c.bf16 %v1207_v16, %v1204_v14  ;;  %v1361_v23 = vld [vmem:[#allocation7 + $0x8] sm:$0xff]  ;;  %v1362_v28 = vld [vmem:[#allocation7 + $0x10] sm:$0xff] }
 0x26b   : > { %8696 = vmatpush3.bf16.msra.mxu1 %v8693_v46 }
 0x26c   : > { %8698 = vmatprep.subr.bf16.mxu1 %v8697_v55 }
 0x26d   : > { %8668 = vmatpush1.bf16.msra.mxu0 %v8667_v54 }
 0x26e   : > { %8670 = vmatprep.subr.bf16.mxu0 %v8669_v57 }
 0x26f   : > { %8700 = vmatpush3.bf16.msra.mxu1 %v8697_v55 }
 0x270   : > { %8702 = vmatprep.subr.bf16.mxu1 %v8701_v0 }
 0x271   : > { %8672 = vmatpush1.bf16.msra.mxu0 %v8671_v63 }
 0x272   : > { %8674 = vmatprep.subr.bf16.mxu0 %v8673_v2 }
 0x273   : > { %8704 = vmatpush3.bf16.msra.mxu1 %v8701_v0 }
 0x274   : > { %8706 = vmatprep.subr.bf16.mxu1 %v8705_v9 }
 0x275   : > { %8676 = vmatpush1.bf16.msra.mxu0 %v8675_v8 }
 0x276   : > { %8678 = vmatprep.subr.bf16.mxu0 %v8677_v11 }
 0x277   : > { %8708 = vmatpush3.bf16.msra.mxu1 %v8705_v9 }
 0x278   : > { %8710 = vmatprep.subr.bf16.mxu1 %v8709_v18 }
 0x279   : > { %8680 = vmatpush1.bf16.msra.mxu0 %v8679_v17 }
 0x27b   : > { %8712 = vmatpush3.bf16.msra.mxu1 %v8709_v18 }
 0x2df   : > { %v1150_v19 = vpop.permute.xlu0 %1149 }
 0x2e0   : > { %vm1154_vm2 = vcmp.eq.s32.totalorder %v10473_v13, %v1150_v19 }
 0x2e1   : > { %8004 = vmatmul.mubr.msk.f32.vlgmr.msra.gmra.mrb[0].mxu0 %vm1154_vm2, %v9734_v20  ;;  %8414 = vmatprep.mubr.msk.f32.mxu1 %vm1154_vm2, %v9734_v20 }
 0x2e2   : > { %1278 = vmatprep.mubr.f32.mxu0 %v9732_v15 }
 0x2e3   : > { %v1153_v21 = vpop.permute.xlu0 %1152 }
 0x2e4   : > { %vm1155_vm3 = vcmp.eq.s32.totalorder %v10473_v13, %v1153_v21 }
 0x2e5   : > { %8005 = vmatmul.mubr.msk.f32.gmra.mrb[2].mxu0 %vm1155_vm3, %v9734_v20  ;;  %8415 = vmatmul.mubr.msk.f32.vlgmr.msra.gmra.mrb[0].mxu1 %vm1155_vm3, %v9734_v20 }
 0x3b4   : > { %v1274_v24 = vpop.f32.mrb[0].mxu0 }
 0x3b5   : > { %v1363_v25 = vadd.f32 %v1360_v22, %v1274_v24  ;;  %v1276_v26 = vpop.f32.mrb[1].mxu0 }
 0x3b6   : > { %v1364_v27 = vadd.f32 %v1361_v23, %v1276_v26 }
 0x3b7   : > { %1369 = vst [vmem:[#allocation2] sm:$0xff] %v1363_v25 }
 0x3b8   : > { %1370 = vst [vmem:[#allocation2 + $0x8] sm:$0xff] %v1364_v27  ;;  %v1280_v29 = vpop.f32.mrb[2].mxu0  ;;  %v8416_v30 = vpop.f32.mrb[0].mxu1 }
 0x3b9   : > { %v1366_v31 = vadd.f32 %v1360_v22, %v1280_v29  ;;  %v1368_v32 = vadd.f32 %v8416_v30, %v1362_v28  ;;  %v1282_v33 = vpop.f32.mrb[3].mxu0  ;;  %v1351_v15 = vpop.f32.mrb[1].mxu1 }
 0x3ba   : > { %v1367_v34 = vadd.f32 %v1361_v23, %v1282_v33  ;;  %v1365_v35 = vadd.f32 %v1362_v28, %v1351_v15 }
 0x3bb   : > { %1372 = vst [vmem:[#allocation2 + $0x18] sm:$0xff] %v1366_v31  ;;  %1374 = vst [vmem:[#allocation2 + $0x28] sm:$0xff] %v1368_v32 }
 0x3bc   : > { %1373 = vst [vmem:[#allocation2 + $0x20] sm:$0xff] %v1367_v34  ;;  %1371 = vst [vmem:[#allocation2 + $0x10] sm:$0xff] %v1365_v35 }
 0x3bd PF: > { %v1480_v45 = vld [vmem:[%s10435_s20 + $0x8] sm:$0xff]  ;;  %v1479_v47 = vld [vmem:[%s10435_s20] sm:$0xff]  ;;  %v1489_v55 = vld [vmem:[%s10435_s20 + $0x50] sm:$0xff]  ;;  %s11818_s3 = scalar_lea.vmem [#allocation9], %s10427_s21  ;;  %vm9737_vm4 = vmmov 0   ;;  %vm2405_vm5 = vcmask 523264  }
 0x3be   : > { %v10481_v13 = vld [vmem:[#allocation2] sm:$0xff]  ;;  %v1588_v48 = vunpack.c.l.s8.bf16 %v1480_v45  ;;  %v1597_v49 = vunpack.c.h.s8.bf16 %v1480_v45  ;;  %v1587_v53 = vunpack.c.l.s8.bf16 %v1479_v47  ;;  %v1493_v56 = vld [vmem:[%s10435_s20 + $0x70] sm:$0xff]  ;;  %v1596_v57 = vunpack.c.h.s8.bf16 %v1479_v47  ;;  %v1498_v3 = vld [vmem:[%s10435_s20 + $0x98] sm:$0xff]  ;;  %s9738_s1 = smov 64  }
 0x3bf   : > { %v10483_v36 = vld [vmem:[#allocation2 + $0x8] sm:$0xff]  ;;  %v1483_v52 = vld [vmem:[%s10435_s20 + $0x20] sm:$0xff]  ;;  %v1606_v59 = vunpack.c.l.s8.bf16 %v1489_v55  ;;  %v1610_v60 = vunpack.c.l.s8.bf16 %v1493_v56  ;;  %v1615_v1 = vunpack.c.h.s8.bf16 %v1489_v55  ;;  %v1619_v2 = vunpack.c.h.s8.bf16 %v1493_v56  ;;  %v1502_v4 = vld [vmem:[%s10435_s20 + $0xb8] sm:$0xff] }
 0x3c0   : > { %v1387_v38 = vadd.f32 %v10483_v36, %v10481_v13  ;;  %v1484_v46 = vld [vmem:[%s10435_s20 + $0x28] sm:$0xff]  ;;  %v1591_v54 = vunpack.c.l.s8.bf16 %v1483_v52  ;;  %1803 = vmatprep.subr.bf16.mxu1 %v1588_v48  ;;  %v1600_v58 = vunpack.c.h.s8.bf16 %v1483_v52  ;;  %v1624_v7 = vunpack.c.l.s8.bf16 %v1498_v3  ;;  %v1497_v9 = vld [vmem:[%s10435_s20 + $0x90] sm:$0xff]  ;;  %v1507_v17 = vld [vmem:[%s10435_s20 + $0xe0] sm:$0xff] }
 0x3c1   : > { %v1592_v50 = vunpack.c.l.s8.bf16 %v1484_v46  ;;  %v1601_v51 = vunpack.c.h.s8.bf16 %v1484_v46  ;;  %1804 = vmatpush1.bf16.msra.mxu1 %v1587_v53  ;;  %v1488_v61 = vld [vmem:[%s10435_s20 + $0x48] sm:$0xff]  ;;  %v1628_v8 = vunpack.c.l.s8.bf16 %v1502_v4  ;;  %v1501_v10 = vld [vmem:[%s10435_s20 + $0xb0] sm:$0xff]  ;;  %v1623_v11 = vunpack.c.l.s8.bf16 %v1497_v9  ;;  %v1511_v18 = vld [vmem:[%s10435_s20 + $0x100] sm:$0xff] }
 0x3c2   : > { %v10489_v39 = vld [vmem:[#allocation2 + $0x18] sm:$0xff]  ;;  %v10493_v41 = vld [vmem:[#allocation2 + $0x28] sm:$0xff]  ;;  %1805 = vmatprep.subr.bf16.mxu1 %v1597_v49  ;;  %v1605_v63 = vunpack.c.l.s8.bf16 %v1488_v61  ;;  %v1614_v5 = vunpack.c.h.s8.bf16 %v1488_v61  ;;  %v1627_v12 = vunpack.c.l.s8.bf16 %v1501_v10  ;;  %v1633_v14 = vunpack.c.h.s8.bf16 %v1498_v3 }
 0x3c3   : > { %v10485_v37 = vld [vmem:[#allocation2 + $0x10] sm:$0xff]  ;;  %v10491_v40 = vld [vmem:[#allocation2 + $0x20] sm:$0xff]  ;;  %1975 = vmatprep.subr.bf16.mxu0 %v1592_v50  ;;  %v1637_v16 = vunpack.c.h.s8.bf16 %v1502_v4  ;;  %v1632_v19 = vunpack.c.h.s8.bf16 %v1497_v9  ;;  %v1636_v20 = vunpack.c.h.s8.bf16 %v1501_v10  ;;  %v1642_v21 = vunpack.c.l.s8.bf16 %v1507_v17 }
 0x3c4   : > { %v1391_v42 = vadd.f32 %v10491_v40, %v10489_v39  ;;  %v1388_v43 = vadd.f32 %v1387_v38, %v10485_v37  ;;  %1976 = vmatpush1.bf16.msra.mxu0 %v1591_v54  ;;  %v1492_v62 = vld [vmem:[%s10435_s20 + $0x68] sm:$0xff]  ;;  %v1646_v22 = vunpack.c.l.s8.bf16 %v1511_v18  ;;  %v1506_v23 = vld [vmem:[%s10435_s20 + $0xd8] sm:$0xff]  ;;  %v1651_v27 = vunpack.c.h.s8.bf16 %v1507_v17  ;;  %v1515_v34 = vld [vmem:[%s10435_s20 + $0x120] sm:$0xff] }
 0x3c5   : > { %1977 = vmatprep.subr.bf16.mxu0 %v1601_v51  ;;  %1806 = vmatpush1.bf16.msra.mxu1 %v1596_v57  ;;  %v1609_v0 = vunpack.c.l.s8.bf16 %v1492_v62  ;;  %v1618_v6 = vunpack.c.h.s8.bf16 %v1492_v62  ;;  %v1510_v24 = vld [vmem:[%s10435_s20 + $0xf8] sm:$0xff]  ;;  %v1641_v25 = vunpack.c.l.s8.bf16 %v1506_v23  ;;  %v1655_v28 = vunpack.c.h.s8.bf16 %v1511_v18  ;;  %v1516_v29 = vld [vmem:[%s10435_s20 + $0x128] sm:$0xff]  ;;  %v1519_v35 = vld [vmem:[%s10435_s20 + $0x140] sm:$0xff] }
 0x3c6   : > { %1389 = vadd.xlane.f32.xlu0 %v1388_v43  ;;  %v1392_v44 = vadd.f32 %v1391_v42, %v10493_v41  ;;  %1807 = vmatprep.subr.bf16.mxu1 %v1606_v59  ;;  %v1645_v26 = vunpack.c.l.s8.bf16 %v1510_v24  ;;  %v1520_v30 = vld [vmem:[%s10435_s20 + $0x148] sm:$0xff]  ;;  %v1650_v31 = vunpack.c.h.s8.bf16 %v1506_v23  ;;  %v1654_v32 = vunpack.c.h.s8.bf16 %v1510_v24  ;;  %v1525_v61 = vld [vmem:[%s10435_s20 + $0x170] sm:$0xff]  ;;  %v1534_v9 = vld [vmem:[%s10435_s20 + $0x1b8] sm:$0xff] }
 0x3c7   : > { %v1660_v33 = vunpack.c.l.s8.bf16 %v1516_v29  ;;  %v1664_v15 = vunpack.c.l.s8.bf16 %v1520_v30  ;;  %v1659_v38 = vunpack.c.l.s8.bf16 %v1515_v34  ;;  %v1663_v42 = vunpack.c.l.s8.bf16 %v1519_v35  ;;  %v1529_v62 = vld [vmem:[%s10435_s20 + $0x190] sm:$0xff]  ;;  %v1538_v10 = vld [vmem:[%s10435_s20 + $0x1d8] sm:$0xff] }
 0x3c8   : > { %1978 = vmatpush1.bf16.msra.mxu0 %v1600_v58  ;;  %v1669_v43 = vunpack.c.h.s8.bf16 %v1516_v29  ;;  %v1537_v17 = vld [vmem:[%s10435_s20 + $0x1d0] sm:$0xff]  ;;  %v1705_v18 = vunpack.c.h.s8.bf16 %v1534_v9  ;;  %vm2562_vm6 = vcmask 64512  }
 0x3c9   : > { %1979 = vmatprep.subr.bf16.mxu0 %v1610_v60  ;;  %1808 = vmatpush1.bf16.msra.mxu1 %v1605_v63  ;;  %v1668_v60 = vunpack.c.h.s8.bf16 %v1515_v34  ;;  %v1678_v63 = vunpack.c.l.s8.bf16 %v1525_v61  ;;  %v1708_v24 = vunpack.c.h.s8.bf16 %v1537_v17  ;;  %v1552_v34 = vld [vmem:[%s10435_s20 + $0x248] sm:$0xff] }
 0x3ca   : > { %1393 = vadd.xlane.f32.xlu0 %v1392_v44  ;;  %1809 = vmatprep.subr.bf16.mxu1 %v1615_v1  ;;  %v1673_v44 = vunpack.c.h.s8.bf16 %v1520_v30  ;;  %v1524_v1 = vld [vmem:[%s10435_s20 + $0x168] sm:$0xff] }
 0x3cb   : > { %v1677_v3 = vunpack.c.l.s8.bf16 %v1524_v1 }
 0x3cc   : > { %1980 = vmatpush1.bf16.msra.mxu0 %v1609_v0  ;;  %v1682_v0 = vunpack.c.l.s8.bf16 %v1529_v62 }
 0x3cd   : > { %1981 = vmatprep.subr.bf16.mxu0 %v1619_v2  ;;  %1810 = vmatpush1.bf16.msra.mxu1 %v1614_v5  ;;  %v1528_v2 = vld [vmem:[%s10435_s20 + $0x188] sm:$0xff]  ;;  %v1687_v5 = vunpack.c.h.s8.bf16 %v1525_v61 }
 0x3ce   : > { %1811 = vmatprep.subr.bf16.mxu1 %v1624_v7  ;;  %v1681_v4 = vunpack.c.l.s8.bf16 %v1528_v2  ;;  %v1686_v7 = vunpack.c.h.s8.bf16 %v1524_v1 }
 0x3d0   : > { %1982 = vmatpush1.bf16.msra.mxu0 %v1618_v6  ;;  %v1691_v6 = vunpack.c.h.s8.bf16 %v1529_v62 }
 0x3d1   : > { %1983 = vmatprep.subr.bf16.mxu0 %v1628_v8  ;;  %1812 = vmatpush1.bf16.msra.mxu1 %v1623_v11  ;;  %v1690_v8 = vunpack.c.h.s8.bf16 %v1528_v2  ;;  %v1533_v11 = vld [vmem:[%s10435_s20 + $0x1b0] sm:$0xff] }
 0x3d2   : > { %1813 = vmatprep.subr.bf16.mxu1 %v1633_v14  ;;  %v1700_v14 = vunpack.c.l.s8.bf16 %v1538_v10  ;;  %v1704_v23 = vunpack.c.h.s8.bf16 %v1533_v11 }
 0x3d4   : > { %1984 = vmatpush1.bf16.msra.mxu0 %v1627_v12  ;;  %v1696_v12 = vunpack.c.l.s8.bf16 %v1534_v9 }
 0x3d5   : > { %1985 = vmatprep.subr.bf16.mxu0 %v1637_v16  ;;  %1814 = vmatpush1.bf16.msra.mxu1 %v1632_v19  ;;  %v1695_v16 = vunpack.c.l.s8.bf16 %v1533_v11  ;;  %v1699_v19 = vunpack.c.l.s8.bf16 %v1537_v17 }
 0x3d6   : > { %1815 = vmatprep.subr.bf16.mxu1 %v1642_v21  ;;  %v1543_v21 = vld [vmem:[%s10435_s20 + $0x200] sm:$0xff] }
 0x3d8   : > { %1986 = vmatpush1.bf16.msra.mxu0 %v1636_v20  ;;  %v1709_v20 = vunpack.c.h.s8.bf16 %v1538_v10 }
 0x3d9   : > { %1987 = vmatprep.subr.bf16.mxu0 %v1646_v22  ;;  %1816 = vmatpush1.bf16.msra.mxu1 %v1641_v25  ;;  %v1547_v22 = vld [vmem:[%s10435_s20 + $0x220] sm:$0xff]  ;;  %v1714_v25 = vunpack.c.l.s8.bf16 %v1543_v21 }
 0x3da   : > { %1817 = vmatprep.subr.bf16.mxu1 %v1651_v27  ;;  %v1542_v27 = vld [vmem:[%s10435_s20 + $0x1f8] sm:$0xff] }
 0x3db   : > { %v1713_v29 = vunpack.c.l.s8.bf16 %v1542_v27 }
 0x3dc   : > { %1988 = vmatpush1.bf16.msra.mxu0 %v1645_v26  ;;  %v1718_v26 = vunpack.c.l.s8.bf16 %v1547_v22 }
 0x3dd   : > { %1989 = vmatprep.subr.bf16.mxu0 %v1655_v28  ;;  %1818 = vmatpush1.bf16.msra.mxu1 %v1650_v31  ;;  %v1546_v28 = vld [vmem:[%s10435_s20 + $0x218] sm:$0xff]  ;;  %v1723_v31 = vunpack.c.h.s8.bf16 %v1543_v21  ;;  %v1560_v21 = vld [vmem:[%s10435_s20 + $0x288] sm:$0xff] }
 0x3de   : > { %1819 = vmatprep.subr.bf16.mxu1 %v1660_v33  ;;  %v1717_v30 = vunpack.c.l.s8.bf16 %v1546_v28  ;;  %v1722_v33 = vunpack.c.h.s8.bf16 %v1542_v27 }
 0x3e0   : > { %1990 = vmatpush1.bf16.msra.mxu0 %v1654_v32  ;;  %v1727_v32 = vunpack.c.h.s8.bf16 %v1547_v22  ;;  %v1564_v22 = vld [vmem:[%s10435_s20 + $0x2a8] sm:$0xff] }
 0x3e1   : > { %1991 = vmatprep.subr.bf16.mxu0 %v1664_v15  ;;  %1820 = vmatpush1.bf16.msra.mxu1 %v1659_v38  ;;  %v1726_v15 = vunpack.c.h.s8.bf16 %v1546_v28  ;;  %v1732_v38 = vunpack.c.l.s8.bf16 %v1552_v34  ;;  %v1570_v28 = vld [vmem:[%s10435_s20 + $0x2d8] sm:$0xff] }
 0x3e2   : > { %1821 = vmatprep.subr.bf16.mxu1 %v1669_v43 }
 0x3e4   : > { %1992 = vmatpush1.bf16.msra.mxu0 %v1663_v42 }
 0x3e5   : > { %1993 = vmatprep.subr.bf16.mxu0 %v1673_v44  ;;  %1822 = vmatpush1.bf16.msra.mxu1 %v1668_v60 }
 0x3e6   : > { %1823 = vmatprep.subr.bf16.mxu1 %v1678_v63 }
 0x3e9   : > { %1824 = vmatpush1.bf16.msra.mxu1 %v1677_v3  ;;  %v1551_v3 = vld [vmem:[%s10435_s20 + $0x240] sm:$0xff] }
 0x3ea   : > { %1825 = vmatprep.subr.bf16.mxu1 %v1687_v5  ;;  %v1740_v17 = vunpack.c.h.s8.bf16 %v1551_v3 }
 0x3ed   : > { %1826 = vmatpush1.bf16.msra.mxu1 %v1686_v7 }
 0x3ee   : > { %1827 = vmatprep.subr.bf16.mxu1 %v1696_v12  ;;  %v1741_v12 = vunpack.c.h.s8.bf16 %v1552_v34  ;;  %v1573_v34 = vld [vmem:[%s10435_s20 + $0x2f0] sm:$0xff] }
 0x3f1   : > { %1828 = vmatpush1.bf16.msra.mxu1 %v1695_v16  ;;  %v1565_v16 = vld [vmem:[%s10435_s20 + $0x2b0] sm:$0xff] }
 0x3f2   : > { %1829 = vmatprep.subr.bf16.mxu1 %v1705_v18  ;;  %v1763_v27 = vunpack.c.h.s8.bf16 %v1565_v16 }
 0x3f5   : > { %1830 = vmatpush1.bf16.msra.mxu1 %v1704_v23  ;;  %v9735_v23 = vmov 0  }
 0x3f6   : > { %1831 = vmatprep.subr.bf16.mxu1 %v1714_v25  ;;  %v1753_v25 = vunpack.c.l.s8.bf16 %v1564_v22 }
 0x3f9   : > { %1832 = vmatpush1.bf16.msra.mxu1 %v1713_v29  ;;  %v1574_v29 = vld [vmem:[%s10435_s20 + $0x2f8] sm:$0xff] }
 0x3fa   : > { %1833 = vmatprep.subr.bf16.mxu1 %v1723_v31  ;;  %v1762_v31 = vunpack.c.h.s8.bf16 %v1564_v22  ;;  %v1496_v22 = vld [vmem:[%s10435_s20 + $0x88] sm:$0xff] }
 0x3fd   : > { %1834 = vmatpush1.bf16.msra.mxu1 %v1722_v33  ;;  %v1772_v33 = vunpack.c.l.s8.bf16 %v1574_v29 }
 0x3fe   : > { %1846 = vmatprep.subr.bf16.mxu1 %v1732_v38  ;;  %v1771_v38 = vunpack.c.l.s8.bf16 %v1573_v34 }
 0x453   : > { %v1390_v45 = vpop.xlane.xlu0 %1389 }
 0x454   : > { %v1396_v46 = vmul.f32 0.0026041667, %v1390_v45 }
 0x456   : > { %v10520_v47 = vsub.f32 %v10481_v13, %v1396_v46  ;;  %v10523_v48 = vsub.f32 %v10483_v36, %v1396_v46  ;;  %v10526_v49 = vsub.f32 %v10485_v37, %v1396_v46 }
 0x457   : > { %v1394_v50 = vpop.xlane.xlu0 %1393 }
 0x458   : > { %v1397_v51 = vmul.f32 0.0026041667, %v1394_v50  ;;  %v1404_v52 = vmul.f32 %v10520_v47, %v10520_v47  ;;  %v1405_v53 = vmul.f32 %v10523_v48, %v10523_v48  ;;  %v1406_v54 = vmul.f32 %v10526_v49, %v10526_v49 }
 0x459   : > { %v1432_v50 = vlaneseq }
 0x45a   : > { %v10535_v13 = vsub.f32 %v10489_v39, %v1397_v51  ;;  %v10538_v36 = vsub.f32 %v10491_v40, %v1397_v51  ;;  %v10541_v37 = vsub.f32 %v10493_v41, %v1397_v51  ;;  %v1410_v55 = vadd.f32 %v1405_v53, %v1404_v52 }
 0x45b   : > { %v1672_v41 = vunpack.c.h.s8.bf16 %v1519_v35  ;;  %v1556_v35 = vld [vmem:[%s10435_s20 + $0x268] sm:$0xff]  ;;  %v10563_v53 = vshrl.u32 %v1432_v50, 7 }
 0x45c   : > { %v1411_v56 = vadd.f32 %v1410_v55, %v1406_v54  ;;  %v1407_v57 = vmul.f32 %v10535_v13, %v10535_v13  ;;  %v1408_v58 = vmul.f32 %v10538_v36, %v10538_v36  ;;  %v1409_v39 = vmul.f32 %v10541_v37, %v10541_v37 }
 0x45d   : > { %1994 = vmatpush1.bf16.msra.mxu0 %v1672_v41  ;;  %v1736_v42 = vunpack.c.l.s8.bf16 %v1556_v35  ;;  %v10566_v54 = vsub.s32 1, %v10563_v53  ;;  %v10569_v55 = vsub.s32 0, %v10563_v53 }
 0x45e   : > { %1412 = vadd.xlane.f32.xlu1 %v1411_v56  ;;  %v1414_v40 = vadd.f32 %v1408_v58, %v1407_v57  ;;  %1995 = vmatprep.subr.bf16.mxu0 %v1682_v0  ;;  %v10573_v56 = vld [vmem:[%s11818_s3] sm:$0x7] }
 0x45f   : > { %v1435_v60 = vrot.slane %v10573_v56, %v10569_v55 }
 0x460   : > { %v1415_v59 = vadd.f32 %v1414_v40, %v1409_v39  ;;  %v1439_v39 = vrot.slane %v10573_v56, %v10566_v54  ;;  %v10583_v40 = vld [vmem:[%s912_s27] sm:$0x7] }
 0x461   : > { %1996 = vmatpush1.bf16.msra.mxu0 %v1681_v4  ;;  %v1462_v61 = vrot.slane %v10583_v40, %v10566_v54  ;;  %v1555_v4 = vld [vmem:[%s10435_s20 + $0x260] sm:$0xff] }
 0x462   : > { %1416 = vadd.xlane.f32.xlu1 %v1415_v59  ;;  %1997 = vmatprep.subr.bf16.mxu0 %v1691_v6  ;;  %v1735_v11 = vunpack.c.l.s8.bf16 %v1555_v4  ;;  %v1744_v18 = vunpack.c.h.s8.bf16 %v1555_v4 }
 0x465   : > { %1998 = vmatpush1.bf16.msra.mxu0 %v1690_v8 }
 0x466   : > { %1999 = vmatprep.subr.bf16.mxu0 %v1700_v14  ;;  %v1561_v14 = vld [vmem:[%s10435_s20 + $0x290] sm:$0xff] }
 0x469   : > { %2000 = vmatpush1.bf16.msra.mxu0 %v1699_v19  ;;  %v1750_v19 = vunpack.c.l.s8.bf16 %v1561_v14 }
 0x46a   : > { %2001 = vmatprep.subr.bf16.mxu0 %v1709_v20  ;;  %v1754_v20 = vunpack.c.l.s8.bf16 %v1565_v16  ;;  %v1532_v16 = vld [vmem:[%s10435_s20 + $0x1a8] sm:$0xff] }
 0x46d   : > { %2002 = vmatpush1.bf16.msra.mxu0 %v1708_v24  ;;  %v1749_v24 = vunpack.c.l.s8.bf16 %v1560_v21 }
 0x46e   : > { %2003 = vmatprep.subr.bf16.mxu0 %v1718_v26  ;;  %v1759_v26 = vunpack.c.h.s8.bf16 %v1561_v14  ;;  %v1491_v14 = vld [vmem:[%s10435_s20 + $0x60] sm:$0xff] }
 0x471   : > { %2004 = vmatpush1.bf16.msra.mxu0 %v1717_v30  ;;  %v1758_v30 = vunpack.c.h.s8.bf16 %v1560_v21  ;;  %v1685_v21 = vunpack.c.l.s8.bf16 %v1532_v16 }
 0x472   : > { %2005 = vmatprep.subr.bf16.mxu0 %v1727_v32  ;;  %v1768_v32 = vunpack.c.l.s8.bf16 %v1570_v28 }
 0x475   : > { %2006 = vmatpush1.bf16.msra.mxu0 %v1726_v15  ;;  %v1569_v15 = vld [vmem:[%s10435_s20 + $0x2d0] sm:$0xff] }
 0x476   : > { %2018 = vmatprep.subr.bf16.mxu0 %v1736_v42  ;;  %v1777_v42 = vunpack.c.h.s8.bf16 %v1570_v28  ;;  %v1776_v50 = vunpack.c.h.s8.bf16 %v1569_v15  ;;  %v1500_v28 = vld [vmem:[%s10435_s20 + $0xa8] sm:$0xff] }
 0x4eb   : > { %v1413_v43 = vpop.xlane.xlu1 %1412 }
 0x4ec   : > { %v1418_v44 = vmul.f32 0.0026041667, %v1413_v43  ;;  %v1781_v43 = vunpack.c.h.s8.bf16 %v1574_v29  ;;  %v1541_v29 = vld [vmem:[%s10435_s20 + $0x1f0] sm:$0xff] }
 0x4ee   : > { %v1420_v45 = vadd.f32 1e-05, %v1418_v44  ;;  %v1579_v44 = vld [vmem:[%s10435_s20 + $0x320] sm:$0xff] }
 0x4ef   : > { %v1417_v46 = vpop.xlane.xlu1 %1416 }
 0x4f0   : > { %8993 = vrsqrt.f32 %v1420_v45  ;;  %v1419_v51 = vmul.f32 0.0026041667, %v1417_v46  ;;  %v1583_v45 = vld [vmem:[%s10435_s20 + $0x340] sm:$0xff]  ;;  %v10622_v46 = vsub.s32 2, %v10563_v53 }
 0x4f2   : > { %v1421_v52 = vadd.f32 1e-05, %v1419_v51  ;;  %v1780_v51 = vunpack.c.h.s8.bf16 %v1573_v34  ;;  %v1505_v34 = vld [vmem:[%s10435_s20 + $0xd0] sm:$0xff] }
 0x4f4   : > { %8995 = vrsqrt.f32 %v1421_v52  ;;  %v1786_v52 = vunpack.c.l.s8.bf16 %v1579_v44 }
 0x4fa   : > { %v10575_v57 = vpop.eup %8993 }
 0x4fb   : > { %v1425_v58 = vmul.f32 %v10575_v57, %v10523_v48  ;;  %v1424_v59 = vmul.f32 %v10575_v57, %v10520_v47  ;;  %v1458_v48 = vrot.slane %v10583_v40, %v10569_v55 }
 0x4fd   : > { %v1448_v63 = vmul.f32 %v1439_v39, %v1425_v58  ;;  %v1447_v1 = vmul.f32 %v1435_v60, %v1424_v59  ;;  %v1790_v58 = vunpack.c.l.s8.bf16 %v1583_v45  ;;  %v1582_v59 = vld [vmem:[%s10435_s20 + $0x338] sm:$0xff] }
 0x4fe   : > { %v10589_v41 = vpop.eup %8995 }
 0x4ff   : > { %v1428_v62 = vmul.f32 %v10589_v41, %v10538_v36  ;;  %v1427_v0 = vmul.f32 %v10589_v41, %v10535_v13  ;;  %v1471_v5 = vadd.f32 %v1462_v61, %v1448_v63  ;;  %v1470_v7 = vadd.f32 %v1458_v48, %v1447_v1 }
 0x500   : > { %v1731_v36 = vunpack.c.l.s8.bf16 %v1551_v3  ;;  %v1745_v13 = vunpack.c.h.s8.bf16 %v1556_v35  ;;  %v1767_v35 = vunpack.c.l.s8.bf16 %v1569_v15  ;;  %v1789_v63 = vunpack.c.l.s8.bf16 %v1582_v59  ;;  %v1523_v3 = vld [vmem:[%s10435_s20 + $0x160] sm:$0xff] }
 0x501   : > { %v1451_v47 = vmul.f32 %v1439_v39, %v1428_v62  ;;  %v1450_v2 = vmul.f32 %v1435_v60, %v1427_v0  ;;  %v1578_v39 = vld [vmem:[%s10435_s20 + $0x318] sm:$0xff]  ;;  %v1429_v60 = vmul.f32 %v10589_v41, %v10541_v37  ;;  %v1795_v0 = vunpack.c.h.s8.bf16 %v1579_v44  ;;  %v1509_v44 = vld [vmem:[%s10435_s20 + $0xf0] sm:$0xff] }
 0x502   : > { %v1785_v62 = vunpack.c.l.s8.bf16 %v1578_v39  ;;  %v1799_v1 = vunpack.c.h.s8.bf16 %v1583_v45  ;;  %v1703_v15 = vunpack.c.l.s8.bf16 %v1541_v29  ;;  %v1550_v45 = vld [vmem:[%s10435_s20 + $0x238] sm:$0xff] }
 0x503   : > { %v1474_v6 = vadd.f32 %v1462_v61, %v1451_v47  ;;  %v1473_v8 = vadd.f32 %v1458_v48, %v1450_v2  ;;  %v1426_v61 = vmul.f32 %v10575_v57, %v10526_v49  ;;  %v1443_v48 = vrot.slane %v10573_v56, %v10622_v46  ;;  %v1482_v2 = vld [vmem:[%s10435_s20 + $0x18] sm:$0xff] }
 0x504   : > { %v1466_v49 = vrot.slane %v10583_v40, %v10622_v46  ;;  %v1794_v56 = vunpack.c.h.s8.bf16 %v1578_v39  ;;  %v1798_v57 = vunpack.c.h.s8.bf16 %v1582_v59  ;;  %v1590_v4 = vunpack.c.l.s8.bf16 %v1482_v2  ;;  %v1514_v59 = vld [vmem:[%s10435_s20 + $0x118] sm:$0xff] }
 0x505   : > { %v10601_v9 = vpack.c.bf16 %v1474_v6, %v1471_v5  ;;  %v10603_v10 = vpack.c.bf16 %v1473_v8, %v1470_v7  ;;  %v1452_v47 = vmul.f32 %v1443_v48, %v1429_v60  ;;  %v1449_v37 = vmul.f32 %v1443_v48, %v1426_v61  ;;  %v1481_v6 = vld [vmem:[%s10435_s20 + $0x10] sm:$0xff]  ;;  %v1487_v7 = vld [vmem:[%s10435_s20 + $0x40] sm:$0xff] }
 0x506   : > { %v1667_v5 = vunpack.c.l.s8.bf16 %v1523_v3  ;;  %v1595_v40 = vunpack.c.l.s8.bf16 %v1487_v7  ;;  %v1721_v39 = vunpack.c.l.s8.bf16 %v1550_v45  ;;  %v1649_v61 = vunpack.c.l.s8.bf16 %v1514_v59 }
 0x507   : > { %1835 = vmatprep.mubr.bf16.mxu1 %v10601_v9  ;;  %2007 = vmatprep.mubr.bf16.mxu0 %v10601_v9  ;;  %v1475_v41 = vadd.f32 %v1466_v49, %v1452_v47  ;;  %v1472_v8 = vadd.f32 %v1466_v49, %v1449_v37  ;;  %v1653_v48 = vunpack.c.h.s8.bf16 %v1509_v44  ;;  %v1527_v49 = vld [vmem:[%s10435_s20 + $0x180] sm:$0xff] }
 0x508   : > { %1836 = vmatmul.mubr.bf16.vlgmr.msra.gmra.mrb[0].mxu1 %v10603_v10  ;;  %2008 = vmatmul.mubr.bf16.vlgmr.msra.gmra.mrb[0].mxu0 %v10603_v10 }
 0x509   : > { %1847 = vmatpush1.bf16.msra.mxu1 %v1731_v36  ;;  %2019 = vmatpush1.bf16.msra.mxu0 %v1735_v11  ;;  %v1589_v36 = vunpack.c.l.s8.bf16 %v1481_v6  ;;  %v10638_v11 = vpack.c.bf16 %v1475_v41, %v1472_v8  ;;  %v1526_v41 = vld [vmem:[%s10435_s20 + $0x178] sm:$0xff] }
 0x50a   : > { %1848 = vmatprep.subr.bf16.mxu1 %v1741_v12  ;;  %2020 = vmatprep.subr.bf16.mxu0 %v1745_v13  ;;  %v1599_v12 = vunpack.c.h.s8.bf16 %v1482_v2  ;;  %v1676_v13 = vunpack.c.h.s8.bf16 %v1523_v3  ;;  %v1517_v2 = vld [vmem:[%s10435_s20 + $0x130] sm:$0xff] }
 0x50b   : > { %1878 = vmatprep.mubr.bf16.mxu1 %v9735_v23  ;;  %2050 = vmatprep.mubr.bf16.mxu0 %v9735_v23  ;;  %v1661_v3 = vunpack.c.l.s8.bf16 %v1517_v2 }
 0x50d   : > { %1849 = vmatpush1.bf16.msra.mxu1 %v1740_v17  ;;  %2021 = vmatpush1.bf16.msra.mxu0 %v1744_v18  ;;  %v1598_v17 = vunpack.c.h.s8.bf16 %v1481_v6  ;;  %v1604_v18 = vunpack.c.h.s8.bf16 %v1487_v7  ;;  %v1536_v6 = vld [vmem:[%s10435_s20 + $0x1c8] sm:$0xff]  ;;  %v1688_v7 = vunpack.c.h.s8.bf16 %v1526_v41 }
 0x50e   : > { %1850 = vmatprep.subr.bf16.mxu1 %v1750_v19  ;;  %2022 = vmatprep.subr.bf16.mxu0 %v1754_v20  ;;  %v1608_v19 = vunpack.c.l.s8.bf16 %v1491_v14  ;;  %v1490_v20 = vld [vmem:[%s10435_s20 + $0x58] sm:$0xff]  ;;  %v1698_v8 = vunpack.c.l.s8.bf16 %v1536_v6 }
 0x511   : > { %1851 = vmatpush1.bf16.msra.mxu1 %v1749_v24  ;;  %2023 = vmatpush1.bf16.msra.mxu0 %v1753_v25  ;;  %v1607_v24 = vunpack.c.l.s8.bf16 %v1490_v20  ;;  %v1613_v25 = vunpack.c.l.s8.bf16 %v1496_v22 }
 0x512   : > { %1852 = vmatprep.subr.bf16.mxu1 %v1759_v26  ;;  %2024 = vmatprep.subr.bf16.mxu0 %v1763_v27  ;;  %v1617_v26 = vunpack.c.h.s8.bf16 %v1491_v14  ;;  %v1694_v27 = vunpack.c.h.s8.bf16 %v1532_v16 }
 0x515   : > { %1853 = vmatpush1.bf16.msra.mxu1 %v1758_v30  ;;  %2025 = vmatpush1.bf16.msra.mxu0 %v1762_v31  ;;  %v1616_v30 = vunpack.c.h.s8.bf16 %v1490_v20  ;;  %v1622_v31 = vunpack.c.h.s8.bf16 %v1496_v22  ;;  %v1554_v20 = vld [vmem:[%s10435_s20 + $0x258] sm:$0xff] }
 0x516   : > { %1854 = vmatprep.subr.bf16.mxu1 %v1768_v32  ;;  %2026 = vmatprep.subr.bf16.mxu0 %v1772_v33  ;;  %v1626_v32 = vunpack.c.l.s8.bf16 %v1500_v28  ;;  %v1499_v33 = vld [vmem:[%s10435_s20 + $0xa0] sm:$0xff]  ;;  %v1734_v22 = vunpack.c.l.s8.bf16 %v1554_v20 }
 0x519   : > { %1855 = vmatpush1.bf16.msra.mxu1 %v1767_v35  ;;  %2027 = vmatpush1.bf16.msra.mxu0 %v1771_v38  ;;  %v1625_v35 = vunpack.c.l.s8.bf16 %v1499_v33  ;;  %v1631_v38 = vunpack.c.l.s8.bf16 %v1505_v34 }
 0x51a   : > { %1856 = vmatprep.subr.bf16.mxu1 %v1777_v42  ;;  %2028 = vmatprep.subr.bf16.mxu0 %v1781_v43  ;;  %v1635_v42 = vunpack.c.h.s8.bf16 %v1500_v28  ;;  %v1712_v43 = vunpack.c.h.s8.bf16 %v1541_v29 }
 0x51d   : > { %1857 = vmatpush1.bf16.msra.mxu1 %v1776_v50  ;;  %2029 = vmatpush1.bf16.msra.mxu0 %v1780_v51  ;;  %v1634_v50 = vunpack.c.h.s8.bf16 %v1499_v33  ;;  %v1640_v51 = vunpack.c.h.s8.bf16 %v1505_v34 }
 0x51e   : > { %1858 = vmatprep.subr.bf16.mxu1 %v1786_v52  ;;  %2030 = vmatprep.subr.bf16.mxu0 %v1790_v58  ;;  %v1644_v52 = vunpack.c.l.s8.bf16 %v1509_v44  ;;  %v1508_v58 = vld [vmem:[%s10435_s20 + $0xe8] sm:$0xff]  ;;  %v1581_v44 = vld [vmem:[%s10435_s20 + $0x330] sm:$0xff] }
 0x51f   : > { %v1643_v60 = vunpack.c.l.s8.bf16 %v1508_v58 }
 0x521   : > { %1859 = vmatpush1.bf16.msra.mxu1 %v1785_v62  ;;  %2031 = vmatpush1.bf16.msra.mxu0 %v1789_v63  ;;  %v1730_v62 = vunpack.c.h.s8.bf16 %v1550_v45  ;;  %v1518_v63 = vld [vmem:[%s10435_s20 + $0x138] sm:$0xff] }
 0x522   : > { %1860 = vmatprep.subr.bf16.mxu1 %v1795_v0  ;;  %2032 = vmatprep.subr.bf16.mxu0 %v1799_v1  ;;  %v1652_v0 = vunpack.c.h.s8.bf16 %v1508_v58  ;;  %v1658_v1 = vunpack.c.h.s8.bf16 %v1514_v59  ;;  %v1662_v47 = vunpack.c.l.s8.bf16 %v1518_v63  ;;  %v1671_v37 = vunpack.c.h.s8.bf16 %v1518_v63  ;;  %v1495_v63 = vld [vmem:[%s10435_s20 + $0x80] sm:$0xff] }
 0x523   : > { %v1797_v58 = vunpack.c.h.s8.bf16 %v1581_v44 }
 0x525   : > { %1861 = vmatpush1.bf16.msra.mxu1 %v1794_v56  ;;  %2033 = vmatpush1.bf16.msra.mxu0 %v1798_v57  ;;  %v1670_v56 = vunpack.c.h.s8.bf16 %v1517_v2  ;;  %v1680_v57 = vunpack.c.l.s8.bf16 %v1527_v49 }
 0x526   : > { %1889 = vmatprep.subr.bf16.mxu1 %v1590_v4  ;;  %8110 = vmatprep.subr.bf16.mxu0 %v1667_v5  ;;  %v1679_v4 = vunpack.c.l.s8.bf16 %v1526_v41  ;;  %v1689_v5 = vunpack.c.h.s8.bf16 %v1527_v49 }
 0x528   : > { %1879 = vmatmul.mubr.bf16.vlgmr.msra.gmra.mrb[0].mxu1 %v10638_v11  ;;  %2051 = vmatmul.mubr.bf16.vlgmr.msra.gmra.mrb[0].mxu0 %v10638_v11 }
 0x529   : > { %1890 = vmatpush1.bf16.msra.mxu1 %v1589_v36  ;;  %1921 = vmatprep.mubr.bf16.mxu1 %v10601_v9  ;;  %v1535_v36 = vld [vmem:[%s10435_s20 + $0x1c0] sm:$0xff] }
 0x52a   : > { %8111 = vmatpush3.bf16.msra.mxu0 %v1595_v40  ;;  %2179 = vmatprep.mubr.bf16.mxu0 %v10601_v9  ;;  %v1697_v40 = vunpack.c.l.s8.bf16 %v1535_v36  ;;  %v1706_v14 = vunpack.c.h.s8.bf16 %v1535_v36 }
 0x52b   : > { %1891 = vmatprep.subr.bf16.mxu1 %v1599_v12  ;;  %8112 = vmatprep.subr.bf16.mxu0 %v1676_v13  ;;  %v1707_v12 = vunpack.c.h.s8.bf16 %v1536_v6  ;;  %v1545_v13 = vld [vmem:[%s10435_s20 + $0x210] sm:$0xff] }
 0x52c   : > { %v1716_v16 = vunpack.c.l.s8.bf16 %v1545_v13 }
 0x52d   : > { %1892 = vmatpush1.bf16.msra.mxu1 %v1598_v17  ;;  %v1544_v17 = vld [vmem:[%s10435_s20 + $0x208] sm:$0xff] }
 0x52e   : > { %8113 = vmatpush3.bf16.msra.mxu0 %v1604_v18  ;;  %1893 = vmatprep.subr.bf16.mxu1 %v1608_v19  ;;  %v1715_v18 = vunpack.c.l.s8.bf16 %v1544_v17  ;;  %v1725_v19 = vunpack.c.h.s8.bf16 %v1545_v13 }
 0x52f   : > { %8114 = vmatprep.subr.bf16.mxu0 %v1685_v21  ;;  %v1724_v21 = vunpack.c.h.s8.bf16 %v1544_v17 }
 0x531   : > { %1894 = vmatpush1.bf16.msra.mxu1 %v1607_v24  ;;  %v1553_v24 = vld [vmem:[%s10435_s20 + $0x250] sm:$0xff] }
 0x532   : > { %8115 = vmatpush3.bf16.msra.mxu0 %v1613_v25  ;;  %1895 = vmatprep.subr.bf16.mxu1 %v1617_v26  ;;  %v1733_v25 = vunpack.c.l.s8.bf16 %v1553_v24  ;;  %v1743_v26 = vunpack.c.h.s8.bf16 %v1554_v20  ;;  %v1742_v28 = vunpack.c.h.s8.bf16 %v1553_v24 }
 0x533   : > { %8116 = vmatprep.subr.bf16.mxu0 %v1694_v27  ;;  %v1563_v27 = vld [vmem:[%s10435_s20 + $0x2a0] sm:$0xff] }
 0x534   : > { %v1752_v29 = vunpack.c.l.s8.bf16 %v1563_v27  ;;  %v1761_v33 = vunpack.c.h.s8.bf16 %v1563_v27 }
 0x535   : > { %1896 = vmatpush1.bf16.msra.mxu1 %v1616_v30  ;;  %v1562_v30 = vld [vmem:[%s10435_s20 + $0x298] sm:$0xff] }
 0x536   : > { %8117 = vmatpush3.bf16.msra.mxu0 %v1622_v31  ;;  %1897 = vmatprep.subr.bf16.mxu1 %v1626_v32  ;;  %v9736_v31 = vmov 0.0   ;;  %v1751_v32 = vunpack.c.l.s8.bf16 %v1562_v30  ;;  %v1760_v34 = vunpack.c.h.s8.bf16 %v1562_v30 }
 0x537   : > { %8118 = vmatprep.subr.bf16.mxu0 %v1703_v15  ;;  %v1572_v15 = vld [vmem:[%s10435_s20 + $0x2e8] sm:$0xff] }
 0x539   : > { %1898 = vmatpush1.bf16.msra.mxu1 %v1625_v35  ;;  %v1770_v35 = vunpack.c.l.s8.bf16 %v1572_v15 }
 0x53a   : > { %8119 = vmatpush3.bf16.msra.mxu0 %v1631_v38  ;;  %1899 = vmatprep.subr.bf16.mxu1 %v1635_v42  ;;  %v1571_v38 = vld [vmem:[%s10435_s20 + $0x2e0] sm:$0xff] }
 0x53b   : > { %8120 = vmatprep.subr.bf16.mxu0 %v1712_v43  ;;  %v1769_v42 = vunpack.c.l.s8.bf16 %v1571_v38  ;;  %v1779_v43 = vunpack.c.h.s8.bf16 %v1572_v15  ;;  %v1778_v45 = vunpack.c.h.s8.bf16 %v1571_v38 }
 0x53d   : > { %1900 = vmatpush1.bf16.msra.mxu1 %v1634_v50  ;;  %v1788_v50 = vunpack.c.l.s8.bf16 %v1581_v44 }
 0x53e   : > { %8121 = vmatpush3.bf16.msra.mxu0 %v1640_v51  ;;  %1901 = vmatprep.subr.bf16.mxu1 %v1644_v52  ;;  %v1580_v51 = vld [vmem:[%s10435_s20 + $0x328] sm:$0xff] }
 0x53f   : > { %8122 = vmatprep.subr.bf16.mxu0 %v1721_v39  ;;  %v1787_v52 = vunpack.c.l.s8.bf16 %v1580_v51  ;;  %v1486_v39 = vld [vmem:[%s10435_s20 + $0x38] sm:$0xff]  ;;  %v1796_v59 = vunpack.c.h.s8.bf16 %v1580_v51 }
 0x541   : > { %1902 = vmatpush1.bf16.msra.mxu1 %v1643_v60  ;;  %v1594_v60 = vunpack.c.l.s8.bf16 %v1486_v39 }
 0x542   : > { %8123 = vmatpush3.bf16.msra.mxu0 %v1649_v61  ;;  %1903 = vmatprep.subr.bf16.mxu1 %v1653_v48  ;;  %v1485_v61 = vld [vmem:[%s10435_s20 + $0x30] sm:$0xff] }
 0x543   : > { %8124 = vmatprep.subr.bf16.mxu0 %v1730_v62  ;;  %v1593_v48 = vunpack.c.l.s8.bf16 %v1485_v61  ;;  %v1603_v62 = vunpack.c.h.s8.bf16 %v1486_v39 }
 0x545   : > { %1904 = vmatpush1.bf16.msra.mxu1 %v1652_v0  ;;  %v1602_v0 = vunpack.c.h.s8.bf16 %v1485_v61 }
 0x546   : > { %8125 = vmatpush3.bf16.msra.mxu0 %v1658_v1  ;;  %1905 = vmatprep.subr.bf16.mxu1 %v1662_v47  ;;  %v1612_v1 = vunpack.c.l.s8.bf16 %v1495_v63  ;;  %v1494_v47 = vld [vmem:[%s10435_s20 + $0x78] sm:$0xff] }
 0x547   : > { %8437 = vmatprep.subr.mxu0 %v9736_v31  ;;  %v1611_v2 = vunpack.c.l.s8.bf16 %v1494_v47  ;;  %v1620_v49 = vunpack.c.h.s8.bf16 %v1494_v47  ;;  %v1585_v47 = vld [vmem:[%s10435_s20 + $0x350] sm:$0xff] }
 0x549   : > { %2180 = vmatmul.mubr.bf16.vlgmr.msra.gmra.mrb[4].mxu0 %v10603_v10  ;;  %1906 = vmatpush1.bf16.msra.mxu1 %v1661_v3  ;;  %v1621_v3 = vunpack.c.h.s8.bf16 %v1495_v63 }
 0x54a   : > { %1907 = vmatprep.subr.bf16.mxu1 %v1671_v37  ;;  %8439 = vmatprep.mubr.msk.f32.mxu0 %vm9737_vm4, %v9736_v31  ;;  %v1504_v37 = vld [vmem:[%s10435_s20 + $0xc8] sm:$0xff] }
 0x54d   : > { %1908 = vmatpush1.bf16.msra.mxu1 %v1670_v56  ;;  %v1630_v56 = vunpack.c.l.s8.bf16 %v1504_v37 }
 0x54e   : > { %1909 = vmatprep.subr.bf16.mxu1 %v1680_v57  ;;  %v1503_v57 = vld [vmem:[%s10435_s20 + $0xc0] sm:$0xff] }
 0x54f   : > { %v1629_v41 = vunpack.c.l.s8.bf16 %v1503_v57 }
 0x551   : > { %1910 = vmatpush1.bf16.msra.mxu1 %v1679_v4  ;;  %v1513_v4 = vld [vmem:[%s10435_s20 + $0x110] sm:$0xff] }
 0x552   : > { %1911 = vmatprep.subr.bf16.mxu1 %v1689_v5  ;;  %v1638_v5 = vunpack.c.h.s8.bf16 %v1503_v57  ;;  %v1648_v6 = vunpack.c.l.s8.bf16 %v1513_v4  ;;  %v1657_v36 = vunpack.c.h.s8.bf16 %v1513_v4 }
 0x555   : > { %1912 = vmatpush1.bf16.msra.mxu1 %v1688_v7  ;;  %v1512_v7 = vld [vmem:[%s10435_s20 + $0x108] sm:$0xff] }
 0x556   : > { %1913 = vmatprep.subr.bf16.mxu1 %v1698_v8  ;;  %v1647_v8 = vunpack.c.l.s8.bf16 %v1512_v7 }
 0x559   : > { %1914 = vmatpush1.bf16.msra.mxu1 %v1697_v40  ;;  %v1522_v40 = vld [vmem:[%s10435_s20 + $0x158] sm:$0xff] }
 0x55a   : > { %1915 = vmatprep.subr.bf16.mxu1 %v1707_v12  ;;  %v1656_v12 = vunpack.c.h.s8.bf16 %v1512_v7  ;;  %v1666_v13 = vunpack.c.l.s8.bf16 %v1522_v40  ;;  %v1675_v17 = vunpack.c.h.s8.bf16 %v1522_v40 }
 0x55d   : > { %1916 = vmatpush1.bf16.msra.mxu1 %v1706_v14  ;;  %v1521_v14 = vld [vmem:[%s10435_s20 + $0x150] sm:$0xff] }
 0x55e   : > { %1917 = vmatprep.subr.bf16.mxu1 %v1716_v16  ;;  %v1665_v16 = vunpack.c.l.s8.bf16 %v1521_v14 }
 0x561   : > { %1918 = vmatpush1.bf16.msra.mxu1 %v1715_v18  ;;  %v1531_v18 = vld [vmem:[%s10435_s20 + $0x1a0] sm:$0xff] }
 0x562   : > { %1919 = vmatprep.subr.bf16.mxu1 %v1725_v19  ;;  %v1674_v19 = vunpack.c.h.s8.bf16 %v1521_v14  ;;  %v1684_v20 = vunpack.c.l.s8.bf16 %v1531_v18  ;;  %v1693_v24 = vunpack.c.h.s8.bf16 %v1531_v18 }
 0x565   : > { %1920 = vmatpush1.bf16.msra.mxu1 %v1724_v21  ;;  %v1530_v21 = vld [vmem:[%s10435_s20 + $0x198] sm:$0xff] }
 0x566   : > { %1932 = vmatprep.subr.bf16.mxu1 %v1734_v22  ;;  %v1683_v22 = vunpack.c.l.s8.bf16 %v1530_v21 }
 0x568   : > { %1922 = vmatmul.mubr.bf16.vlgmr.msra.gmra.mrb[4].mxu1 %v10603_v10 }
 0x569   : > { %1933 = vmatpush1.bf16.msra.mxu1 %v1733_v25  ;;  %1964 = vmatprep.mubr.bf16.mxu1 %v9735_v23  ;;  %v1540_v25 = vld [vmem:[%s10435_s20 + $0x1e8] sm:$0xff] }
 0x56a   : > { %1934 = vmatprep.subr.bf16.mxu1 %v1743_v26  ;;  %v1692_v26 = vunpack.c.h.s8.bf16 %v1530_v21  ;;  %v1702_v27 = vunpack.c.l.s8.bf16 %v1540_v25  ;;  %v1711_v30 = vunpack.c.h.s8.bf16 %v1540_v25 }
 0x56d   : > { %1935 = vmatpush1.bf16.msra.mxu1 %v1742_v28  ;;  %v1539_v28 = vld [vmem:[%s10435_s20 + $0x1e0] sm:$0xff] }
 0x56e   : > { %1936 = vmatprep.subr.bf16.mxu1 %v1752_v29  ;;  %v1701_v29 = vunpack.c.l.s8.bf16 %v1539_v28 }
 0x571   : > { %1937 = vmatpush1.bf16.msra.mxu1 %v1751_v32  ;;  %v1549_v32 = vld [vmem:[%s10435_s20 + $0x230] sm:$0xff] }
 0x572   : > { %1938 = vmatprep.subr.bf16.mxu1 %v1761_v33  ;;  %v1710_v33 = vunpack.c.h.s8.bf16 %v1539_v28  ;;  %v1720_v15 = vunpack.c.l.s8.bf16 %v1549_v32  ;;  %v1729_v38 = vunpack.c.h.s8.bf16 %v1549_v32  ;;  %v10738_v32 = vsub.s32 3, %v10563_v53 }
 0x575   : > { %1939 = vmatpush1.bf16.msra.mxu1 %v1760_v34  ;;  %v1548_v34 = vld [vmem:[%s10435_s20 + $0x228] sm:$0xff] }
 0x576   : > { %1940 = vmatprep.subr.bf16.mxu1 %v1770_v35  ;;  %v1719_v35 = vunpack.c.l.s8.bf16 %v1548_v34 }
 0x579   : > { %1941 = vmatpush1.bf16.msra.mxu1 %v1769_v42  ;;  %v1558_v42 = vld [vmem:[%s10435_s20 + $0x278] sm:$0xff] }
 0x57a   : > { %1942 = vmatprep.subr.bf16.mxu1 %v1779_v43  ;;  %v1728_v43 = vunpack.c.h.s8.bf16 %v1548_v34  ;;  %v1738_v44 = vunpack.c.l.s8.bf16 %v1558_v42  ;;  %v1747_v51 = vunpack.c.h.s8.bf16 %v1558_v42 }
 0x57d   : > { %1943 = vmatpush1.bf16.msra.mxu1 %v1778_v45  ;;  %v1557_v45 = vld [vmem:[%s10435_s20 + $0x270] sm:$0xff] }
 0x57e   : > { %1944 = vmatprep.subr.bf16.mxu1 %v1788_v50  ;;  %v1737_v50 = vunpack.c.l.s8.bf16 %v1557_v45 }
 0x581   : > { %1945 = vmatpush1.bf16.msra.mxu1 %v1787_v52  ;;  %v1567_v52 = vld [vmem:[%s10435_s20 + $0x2c0] sm:$0xff] }
 0x582   : > { %1946 = vmatprep.subr.bf16.mxu1 %v1797_v58  ;;  %v1746_v58 = vunpack.c.h.s8.bf16 %v1557_v45  ;;  %v1756_v39 = vunpack.c.l.s8.bf16 %v1567_v52  ;;  %v1765_v61 = vunpack.c.h.s8.bf16 %v1567_v52 }
 0x585   : > { %1947 = vmatpush1.bf16.msra.mxu1 %v1796_v59  ;;  %v1566_v59 = vld [vmem:[%s10435_s20 + $0x2b8] sm:$0xff] }
 0x586   : > { %2061 = vmatprep.subr.bf16.mxu1 %v1594_v60  ;;  %v1755_v60 = vunpack.c.l.s8.bf16 %v1566_v59 }
 0x588   : > { %1965 = vmatmul.mubr.bf16.vlgmr.msra.gmra.mrb[4].mxu1 %v10638_v11 }
 0x589   : > { %2062 = vmatpush1.bf16.msra.mxu1 %v1593_v48  ;;  %2093 = vmatprep.mubr.bf16.mxu1 %v10601_v9  ;;  %v1639_v9 = vunpack.c.h.s8.bf16 %v1504_v37  ;;  %v1576_v48 = vld [vmem:[%s10435_s20 + $0x308] sm:$0xff] }
 0x58a   : > { %2063 = vmatprep.subr.bf16.mxu1 %v1603_v62  ;;  %v1764_v62 = vunpack.c.h.s8.bf16 %v1566_v59  ;;  %v1774_v63 = vunpack.c.l.s8.bf16 %v1576_v48  ;;  %v1584_v37 = vld [vmem:[%s10435_s20 + $0x348] sm:$0xff] }
 0x58b   : > { %v1800_v57 = vunpack.c.h.s8.bf16 %v1584_v37 }
 0x58d   : > { %2064 = vmatpush1.bf16.msra.mxu1 %v1602_v0 }
 0x58e   : > { %2065 = vmatprep.subr.bf16.mxu1 %v1612_v1  ;;  %v1783_v1 = vunpack.c.h.s8.bf16 %v1576_v48 }
 0x591   : > { %2066 = vmatpush1.bf16.msra.mxu1 %v1611_v2 }
 0x592   : > { %2067 = vmatprep.subr.bf16.mxu1 %v1621_v3  ;;  %v1792_v3 = vunpack.c.l.s8.bf16 %v1585_v47 }
 0x595   : > { %2068 = vmatpush1.bf16.msra.mxu1 %v1620_v49  ;;  %v1791_v49 = vunpack.c.l.s8.bf16 %v1584_v37 }
 0x596   : > { %2069 = vmatprep.subr.bf16.mxu1 %v1630_v56  ;;  %v1801_v56 = vunpack.c.h.s8.bf16 %v1585_v47 }
 0x599   : > { %2070 = vmatpush1.bf16.msra.mxu1 %v1629_v41  ;;  %v1559_v41 = vld [vmem:[%s10435_s20 + $0x280] sm:$0xff] }
 0x59a   : > { %2071 = vmatprep.subr.bf16.mxu1 %v1639_v9  ;;  %v1739_v9 = vunpack.c.l.s8.bf16 %v1559_v41  ;;  %v1748_v4 = vunpack.c.h.s8.bf16 %v1559_v41 }
 0x59d   : > { %2072 = vmatpush1.bf16.msra.mxu1 %v1638_v5  ;;  %v1568_v5 = vld [vmem:[%s10435_s20 + $0x2c8] sm:$0xff] }
 0x59e   : > { %2073 = vmatprep.subr.bf16.mxu1 %v1648_v6  ;;  %v1757_v6 = vunpack.c.l.s8.bf16 %v1568_v5  ;;  %v1766_v7 = vunpack.c.h.s8.bf16 %v1568_v5 }
 0x5a1   : > { %2074 = vmatpush1.bf16.msra.mxu1 %v1647_v8  ;;  %v1577_v8 = vld [vmem:[%s10435_s20 + $0x310] sm:$0xff] }
 0x5a2   : > { %2075 = vmatprep.subr.bf16.mxu1 %v1657_v36  ;;  %v1775_v36 = vunpack.c.l.s8.bf16 %v1577_v8  ;;  %v1784_v40 = vunpack.c.h.s8.bf16 %v1577_v8 }
 0x5a5   : > { %2076 = vmatpush1.bf16.msra.mxu1 %v1656_v12  ;;  %v1586_v12 = vld [vmem:[%s10435_s20 + $0x358] sm:$0xff] }
 0x5a6   : > { %2077 = vmatprep.subr.bf16.mxu1 %v1666_v13 }
 0x5a9   : > { %2078 = vmatpush1.bf16.msra.mxu1 %v1665_v16 }
 0x5aa   : > { %2079 = vmatprep.subr.bf16.mxu1 %v1675_v17 }
 0x5ad   : > { %2080 = vmatpush1.bf16.msra.mxu1 %v1674_v19 }
 0x5ae   : > { %2081 = vmatprep.subr.bf16.mxu1 %v1684_v20  ;;  %v1793_v20 = vunpack.c.l.s8.bf16 %v1586_v12 }
 0x5b1   : > { %2082 = vmatpush1.bf16.msra.mxu1 %v1683_v22 }
 0x5b2   : > { %2083 = vmatprep.subr.bf16.mxu1 %v1693_v24  ;;  %v1802_v24 = vunpack.c.h.s8.bf16 %v1586_v12 }
 0x5b5   : > { %2084 = vmatpush1.bf16.msra.mxu1 %v1692_v26 }
 0x5b6   : > { %2085 = vmatprep.subr.bf16.mxu1 %v1702_v27 }
 0x5b9   : > { %2086 = vmatpush1.bf16.msra.mxu1 %v1701_v29 }
 0x5ba   : > { %2087 = vmatprep.subr.bf16.mxu1 %v1711_v30 }
 0x5bd   : > { %2088 = vmatpush1.bf16.msra.mxu1 %v1710_v33  ;;  %v10741_v33 = vld [vmem:[%s10437_s2] sm:$0xff] }
 0x5be   : > { %2089 = vmatprep.subr.bf16.mxu1 %v1720_v15  ;;  %v2248_v15 = vrot.slane %v10741_v33, %v10738_v32 }
 0x5c1   : > { %2090 = vmatpush1.bf16.msra.mxu1 %v1719_v35 }
 0x5c2   : > { %2091 = vmatprep.subr.bf16.mxu1 %v1729_v38 }
 0x5c5   : > { %2092 = vmatpush1.bf16.msra.mxu1 %v1728_v43 }
 0x5c6   : > { %2104 = vmatprep.subr.bf16.mxu1 %v1738_v44 }
 0x5c8   : > { %2094 = vmatmul.mubr.bf16.vlgmr.msra.gmra.mrb[8].mxu1 %v10603_v10  ;;  %v1575_v10 = vld [vmem:[%s10435_s20 + $0x300] sm:$0xff]  ;;  %s11819_s20 = smov %s11818_s3 }
 0x5c9   : > { %2105 = vmatpush1.bf16.msra.mxu1 %v1737_v50  ;;  %2136 = vmatprep.mubr.bf16.mxu1 %v9735_v23  ;;  %v1773_v0 = vunpack.c.l.s8.bf16 %v1575_v10  ;;  %v1782_v2 = vunpack.c.h.s8.bf16 %v1575_v10 }
 0x5ca   : > { %2106 = vmatprep.subr.bf16.mxu1 %v1747_v51  ;;  %v10765_v51 = vsub.s32 6, %v10563_v53 }
 0x5cc   : > { %v2260_v52 = vrot.slane %v10741_v33, %v10765_v51 }
 0x5cd   : > { %2107 = vmatpush1.bf16.msra.mxu1 %v1746_v58 }
 0x5ce   : > { %2108 = vmatprep.subr.bf16.mxu1 %v1756_v39 }
 0x5d1   : > { %2109 = vmatpush1.bf16.msra.mxu1 %v1755_v60 }
 0x5d2   : > { %2110 = vmatprep.subr.bf16.mxu1 %v1765_v61 }
 0x5d5   : > { %2111 = vmatpush1.bf16.msra.mxu1 %v1764_v62 }
 0x5d6   : > { %2112 = vmatprep.subr.bf16.mxu1 %v1774_v63 }
 0x5d9   : > { %2113 = vmatpush1.bf16.msra.mxu1 %v1773_v0 }
 0x5da   : > { %2114 = vmatprep.subr.bf16.mxu1 %v1783_v1 }
 0x5dd   : > { %2115 = vmatpush1.bf16.msra.mxu1 %v1782_v2 }
 0x5de   : > { %2116 = vmatprep.subr.bf16.mxu1 %v1792_v3  ;;  %v10785_v3 = vld [vmem:[#allocation3] sm:$0xff] }
 0x5e1   : > { %2117 = vmatpush1.bf16.msra.mxu1 %v1791_v49 }
 0x5e2   : > { %2118 = vmatprep.subr.bf16.mxu1 %v1801_v56 }
 0x5e5   : > { %2119 = vmatpush1.bf16.msra.mxu1 %v1800_v57 }
 0x5e6   : > { %8417 = vmatprep.subr.bf16.mxu1 %v9736_v31 }
 0x5e8   : > { %2137 = vmatmul.mubr.bf16.vlgmr.msra.gmra.mrb[8].mxu1 %v10638_v11 }
 0x5e9   : > { %8418 = vmatpush3.bf16.msra.mxu1 %v1739_v9  ;;  %8433 = vmatprep.mubr.msk.bf16.mxu1 %vm9737_vm4, %v9736_v31 }
 0x5ea   : > { %8419 = vmatprep.subr.bf16.mxu1 %v9736_v31 }
 0x5ed   : > { %8420 = vmatpush3.bf16.msra.mxu1 %v1748_v4 }
 0x5ee   : > { %8421 = vmatprep.subr.bf16.mxu1 %v9736_v31 }
 0x5f1   : > { %8422 = vmatpush3.bf16.msra.mxu1 %v1757_v6 }
 0x5f2   : > { %8423 = vmatprep.subr.bf16.mxu1 %v9736_v31 }
 0x5f5   : > { %8424 = vmatpush3.bf16.msra.mxu1 %v1766_v7 }
 0x5f6   : > { %8425 = vmatprep.subr.bf16.mxu1 %v9736_v31 }
 0x5f9   : > { %8426 = vmatpush3.bf16.msra.mxu1 %v1775_v36 }
 0x5fa   : > { %8427 = vmatprep.subr.bf16.mxu1 %v9736_v31 }
 0x5fb   : > { %v1880_v13 = vpop.f32.mrb[0].mxu1  ;;  %v10719_v14 = vpop.f32.mrb[0].mxu0 }
 0x5fc   : > { %v10721_v16 = vpop.f32.mrb[1].mxu1  ;;  %v10723_v17 = vpop.f32.mrb[1].mxu0 }
 0x5fd   : > { %v1884_v18 = vpop.f32.mrb[2].mxu1  ;;  %v10725_v19 = vpop.f32.mrb[2].mxu0  ;;  %8428 = vmatpush3.bf16.msra.mxu1 %v1784_v40 }
 0x5fe   : > { %v10727_v21 = vpop.f32.mrb[3].mxu1  ;;  %v10729_v22 = vpop.f32.mrb[3].mxu0  ;;  %8429 = vmatprep.subr.bf16.mxu1 %v9736_v31 }
 0x601   : > { %8430 = vmatpush3.bf16.msra.mxu1 %v1793_v20 }
 0x602   : > { %8431 = vmatprep.subr.bf16.mxu1 %v9736_v31 }
 0x605   : > { %8432 = vmatpush3.bf16.msra.mxu1 %v1802_v24 }
 0x606   : > { %8442 = vmatprep.subr.mxu1 %v9736_v31 }
 0x608   : > { %8434 = vmatmul.mubr.bf16.vlgmr.msra.gmra.mrb[12].mxu1 %v10638_v11  ;;  %v2236_v11 = vrot.slane %v10741_v33, %v10569_v55 }
 0x609   : > { %8444 = vmatprep.mubr.msk.f32.mxu1 %vm9737_vm4, %v9736_v31 }
 0x60a   : > { %v2278_v45 = vmul.f32 %v2236_v11, %v1880_v13  ;;  %v2287_v50 = vmul.f32 %v2236_v11, %v1884_v18 }
 0x61c   : > { %v8126_v25 = vpop.f32.mrb[4].mxu0 }
 0x61d   : > { %v8127_v26 = vpop.f32.mrb[5].mxu0 }
 0x61e   : > { %v8128_v27 = vadd.f32 %v8127_v26, %v8126_v25  ;;  %v8129_v28 = vpop.f32.mrb[6].mxu0 }
 0x61f   : > { %v8130_v29 = vpop.f32.mrb[7].mxu0 }
 0x620   : > { %v8131_v30 = vadd.f32 %v8130_v29, %v8129_v28 }
 0x65b   : > { %v10745_v34 = vpop.f32.mrb[4].mxu1 }
 0x65c   : > { %v1968_v35 = vpop.f32.mrb[5].mxu1 }
 0x65d   : > { %v10749_v38 = vmul.f32 %v2248_v15, %v1968_v35  ;;  %v10751_v42 = vpop.f32.mrb[6].mxu1 }
 0x65e   : > { %v1972_v43 = vpop.f32.mrb[7].mxu1 }
 0x65f   : > { %v2290_v44 = vmul.f32 %v2248_v15, %v1972_v43  ;;  %8438 = vmatpush3.xpose.msk.msra.mxu0 %vm2405_vm5, %v10749_v38 }
 0x660   : > { %8447 = vmatprep.subr.mxu0 %v9736_v31 }
 0x661   : > { %8443 = vmatpush3.xpose.msk.msra.mxu1 %vm2405_vm5, %v2290_v44 }
 0x662   : > { %8440 = vmatmul.mubr.msk.f32.vlgmr.msra.gmra.mrb[8].mxu0 %vm2405_vm5, %v2278_v45  ;;  %8452 = vmatprep.subr.mxu1 %v9736_v31 }
 0x663   : > { %8449 = vmatprep.mubr.msk.f32.mxu0 %vm9737_vm4, %v9736_v31 }
 0x664   : > { %8445 = vmatmul.mubr.msk.f32.vlgmr.msra.gmra.mrb[16].mxu1 %vm2405_vm5, %v2287_v50 }
 0x665   : > { %8454 = vmatprep.mubr.msk.f32.mxu1 %vm9737_vm4, %v9736_v31 }
 0x6bb   : > { %v2138_v58 = vpop.f32.mrb[8].mxu1 }
 0x6bc   : > { %v10769_v39 = vmul.f32 %v2260_v52, %v2138_v58  ;;  %v10771_v59 = vpop.f32.mrb[9].mxu1 }
 0x6bd   : > { %v2142_v60 = vpop.f32.mrb[10].mxu1 }
 0x6be   : > { %v10773_v61 = vmul.f32 %v2260_v52, %v2142_v60  ;;  %v10775_v48 = vpop.f32.mrb[11].mxu1  ;;  %8448 = vmatpush3.msra.mxu0 %v10769_v39 }
 0x6bf   : > { %8457 = vmatprep.subr.mxu0 %v9736_v31 }
 0x6c0   : > { %8453 = vmatpush3.msra.mxu1 %v10773_v61 }
 0x6c1   : > { %8462 = vmatprep.subr.mxu1 %v9736_v31 }
 0x6db   : > { %v2222_v62 = vpop.f32.mrb[12].mxu1 }
 0x6dc   : > { %v10781_v63 = vadd.f32 %v8128_v27, %v2222_v62  ;;  %v8435_v10 = vpop.f32.mrb[13].mxu1 }
 0x6dd   : > { %v2225_v0 = vpop.f32.mrb[14].mxu1 }
 0x6de   : > { %v10783_v1 = vadd.f32 %v8131_v30, %v2225_v0  ;;  %v8436_v47 = vpop.f32.mrb[15].mxu1 }
 0x735   : > { %v2478_v2 = vpop.f32.mrb[8].mxu0 }
 0x736   : > { %v2558_v37 = vmul.f32 0.125, %v2478_v2  ;;  %v8441_v49 = vpop.f32.mrb[9].mxu0 }
 0x737   : > { %v2554_v56 = vpop.f32.mrb[16].mxu1 }
 0x738   : > { %v2559_v57 = vmul.f32 0.125, %v2554_v56  ;;  %v8446_v41 = vpop.f32.mrb[17].mxu1  ;;  %v2560_v9 = vadd.f32 %v2558_v37, %v10785_v3 }
 0x73a   : > { %v2563_v4 = vsel %vm2562_vm6, %v2560_v9, -inf  ;;  %v2561_v5 = vadd.f32 %v2559_v57, %v10785_v3 }
 0x73b   : > { %2564 = vmax.xlane.f32.xlu0 %v2563_v4 }
 0x73c   : > { %v2566_v6 = vsel %vm2562_vm6, %v2561_v5, -inf }
 0x73d   : > { %2567 = vmax.xlane.f32.xlu1 %v2566_v6 }
 0x74e   : > { %2812 = vrot.lane.b32.xlu1 %v2290_v44, %s9738_s1 }
 0x752   : > { %2732 = vrot.lane.b32.xlu1 %v2278_v45, %s9738_s1 }
 0x7c8   : > { %v2565_v7 = vpop.xlane.xlu0 %2564 }
 0x7c9   : > { %v2569_v8 = vsub.f32 %v2560_v9, %v2565_v7 }
 0x7ca   : > { %v2568_v36 = vpop.xlane.xlu1 %2567 }
 0x7cb   : > { %v2571_v40 = vmul.f32 1.442695, %v2569_v8  ;;  %v2570_v12 = vsub.f32 %v2561_v5, %v2568_v36 }
 0x7cd   : > { %8997 = vpow2.f32 %v2571_v40  ;;  %v2573_v13 = vmul.f32 1.442695, %v2570_v12 }
 0x7ce   : > { %v2813_v26 = vpop.permute.xlu1 %2812 }
 0x7cf   : > { %8999 = vpow2.f32 %v2573_v13 }
 0x7d2   : > { %v2733_v27 = vpop.permute.xlu1 %2732 }
 0x7d7   : > { %v8998_v18 = vpop.eup %8997 }
 0x7d8   : > { %v2575_v20 = vsel %vm2562_vm6, %v8998_v18, 0.0 }
 0x7d9   : > { %v9000_v24 = vpop.eup %8999  ;;  %2576 = vadd.xlane.f32.xlu0 %v2575_v20 }
 0x7da   : > { %v2578_v25 = vsel %vm2562_vm6, %v9000_v24, 0.0 }
 0x7db   : > { %2579 = vadd.xlane.f32.xlu1 %v2578_v25 }
 0x7ec   : > { %2810 = vrot.lane.b32.xlu1 %v2287_v50, %s9738_s1 }
 0x7ef   : > { %2734 = vrot.lane.b32.xlu0 %v10749_v38, %s9738_s1 }
 0x866   : > { %v2577_v28 = vpop.xlane.xlu0 %2576 }
 0x867   : > { %9001 = vrcp.f32 %v2577_v28 }
 0x868   : > { %v2580_v29 = vpop.xlane.xlu1 %2579 }
 0x869   : > { %9003 = vrcp.f32 %v2580_v29 }
 0x86a   : > { %v2735_v43 = vpop.permute.xlu0 %2734 }
 0x86c   : > { %v2811_v38 = vpop.permute.xlu1 %2810 }
 0x871   : > { %v9002_v30 = vpop.eup %9001 }
 0x872   : > { %v2583_v15 = vmul.f32 %v9002_v30, %v8998_v18  ;;  %v2304_v18 = vld [vmem:[%s10439_s24 + $0x38] sm:$0xff]  ;;  %v2305_v30 = vld [vmem:[%s10439_s24 + $0x40] sm:$0xff] }
 0x873   : > { %v9004_v11 = vpop.eup %9003 }
 0x874   : > { %v2584_v35 = vmul.f32 %v9004_v11, %v9000_v24  ;;  %8450 = vmatmul.mubr.msk.f32.vlgmr.msra.gmra.mrb[10].mxu0 %vm2562_vm6, %v2583_v15  ;;  %v2346_v24 = vunpack.c.l.s8.bf16 %v2304_v18  ;;  %v2349_v15 = vunpack.c.h.s8.bf16 %v2304_v18  ;;  %v2307_v11 = vld [vmem:[%s10439_s24 + $0x50] sm:$0xff]  ;;  %v2302_v18 = vld [vmem:[%s10439_s24 + $0x28] sm:$0xff] }
 0x875   : > { %8458 = vmatpush3.xpose.msk.msra.mxu0 %vm2405_vm5, %v2735_v43  ;;  %8459 = vmatprep.mubr.msk.f32.mxu0 %vm9737_vm4, %v9736_v31 }
 0x876   : > { %8455 = vmatmul.mubr.msk.f32.vlgmr.msra.gmra.mrb[18].mxu1 %vm2562_vm6, %v2584_v35  ;;  %8467 = vmatprep.subr.mxu0 %v9736_v31  ;;  %v2347_v35 = vunpack.c.l.s8.bf16 %v2305_v30 }
 0x877   : > { %8463 = vmatpush3.xpose.msk.msra.mxu1 %vm2405_vm5, %v2813_v26  ;;  %8464 = vmatprep.mubr.msk.f32.mxu1 %vm9737_vm4, %v9736_v31  ;;  %v2303_v26 = vld [vmem:[%s10439_s24 + $0x30] sm:$0xff] }
 0x878   : > { %8460 = vmatmul.mubr.msk.f32.vlgmr.msra.gmra.mrb[12].mxu0 %vm2405_vm5, %v2733_v27  ;;  %8472 = vmatprep.subr.mxu1 %v9736_v31  ;;  %v2345_v28 = vunpack.c.l.s8.bf16 %v2303_v26  ;;  %v2348_v43 = vunpack.c.h.s8.bf16 %v2303_v26 }
 0x879   : > { %8469 = vmatprep.mubr.msk.f32.mxu0 %vm9737_vm4, %v9736_v31 }
 0x87a   : > { %8465 = vmatmul.mubr.msk.f32.vlgmr.msra.gmra.mrb[20].mxu1 %vm2405_vm5, %v2811_v38 }
 0x87b   : > { %8474 = vmatprep.mubr.msk.f32.mxu1 %vm9737_vm4, %v9736_v31 }
 0x947   : > { %v2654_v44 = vpop.f32.mrb[10].mxu0 }
 0x948   : > { %v8451_v45 = vpop.f32.mrb[11].mxu0 }
 0x949   : > { %v2727_v50 = vpop.f32.mrb[18].mxu1  ;;  %v2306_v45 = vld [vmem:[%s10439_s24 + $0x48] sm:$0xff] }
 0x94a   : > { %v10814_v52 = vpack.c.bf16 %v2727_v50, %v2654_v44  ;;  %v8456_v58 = vpop.f32.mrb[19].mxu1  ;;  %v2352_v44 = vunpack.c.l.s8.bf16 %v2307_v11  ;;  %v2350_v50 = vunpack.c.h.s8.bf16 %v2305_v30  ;;  %v10864_v30 = vsub.s32 7, %v10563_v53 }
 0x94b   : > { %v2806_v60 = vpop.f32.mrb[12].mxu0  ;;  %v2351_v58 = vunpack.c.l.s8.bf16 %v2306_v45 }
 0x94c   : > { %v2888_v62 = vmul.f32 0.125, %v2806_v60  ;;  %v8461_v10 = vpop.f32.mrb[13].mxu0  ;;  %v2308_v60 = vld [vmem:[%s10439_s24 + $0x58] sm:$0xff] }
 0x94d   : > { %v2884_v0 = vpop.f32.mrb[20].mxu1  ;;  %v2355_v10 = vunpack.c.h.s8.bf16 %v2307_v11 }
 0x94e   : > { %v2889_v47 = vmul.f32 0.125, %v2884_v0  ;;  %v8466_v2 = vpop.f32.mrb[21].mxu1  ;;  %v2890_v37 = vadd.f32 %v2888_v62, %v10785_v3  ;;  %v2353_v62 = vunpack.c.l.s8.bf16 %v2308_v60  ;;  %v2354_v0 = vunpack.c.h.s8.bf16 %v2306_v45 }
 0x94f   : > { %v2298_v2 = vld [vmem:[%s10439_s24 + $0x8] sm:$0xff] }
 0x950   : > { %v2892_v49 = vsel %vm2562_vm6, %v2890_v37, -inf  ;;  %v2891_v56 = vadd.f32 %v2889_v47, %v10785_v3  ;;  %v2356_v47 = vunpack.c.h.s8.bf16 %v2308_v60 }
 0x951   : > { %2893 = vmax.xlane.f32.xlu0 %v2892_v49 }
 0x952   : > { %v2895_v57 = vsel %vm2562_vm6, %v2891_v56, -inf }
 0x953   : > { %2896 = vmax.xlane.f32.xlu1 %v2895_v57  ;;  %v2297_v57 = vld [vmem:[%s10439_s24] sm:$0xff] }
 0x964   : > { %2992 = vrot.lane.b32.xlu1 %v10773_v61, %s9738_s1 }
 0x9de   : > { %v2894_v41 = vpop.xlane.xlu0 %2893 }
 0x9df   : > { %v2898_v9 = vsub.f32 %v2890_v37, %v2894_v41  ;;  %v2334_v37 = vunpack.c.l.s8.bf16 %v2298_v2  ;;  %v2299_v41 = vld [vmem:[%s10439_s24 + $0x10] sm:$0xff] }
 0x9e0   : > { %v2897_v4 = vpop.xlane.xlu1 %2896 }
 0x9e1   : > { %v2900_v5 = vmul.f32 1.442695, %v2898_v9  ;;  %v2899_v6 = vsub.f32 %v2891_v56, %v2897_v4  ;;  %v2333_v4 = vunpack.c.l.s8.bf16 %v2297_v57 }
 0x9e3   : > { %9005 = vpow2.f32 %v2900_v5  ;;  %v2902_v7 = vmul.f32 1.442695, %v2899_v6  ;;  %v2335_v5 = vunpack.c.l.s8.bf16 %v2299_v41 }
 0x9e4   : > { %v2993_v8 = vpop.permute.xlu1 %2992 }
 0x9e5   : > { %9007 = vpow2.f32 %v2902_v7  ;;  %8473 = vmatpush3.msra.mxu1 %v2993_v8  ;;  %v2337_v8 = vunpack.c.h.s8.bf16 %v2298_v2 }
 0x9e6   : > { %8477 = vmatprep.subr.bf16.mxu1 %v9736_v31 }
 0x9ed   : > { %v9006_v36 = vpop.eup %9005 }
 0x9ee   : > { %v2904_v40 = vsel %vm2562_vm6, %v9006_v36, 0.0 }
 0x9ef   : > { %v9008_v12 = vpop.eup %9007  ;;  %2905 = vadd.xlane.f32.xlu0 %v2904_v40  ;;  %v2336_v40 = vunpack.c.h.s8.bf16 %v2297_v57 }
 0x9f0   : > { %v2907_v61 = vsel %vm2562_vm6, %v9008_v12, 0.0 }
 0x9f3   : > { %2908 = vadd.xlane.f32.xlu0 %v2907_v61 }
 0xa09   : > { %2915 = vrot.lane.b32.xlu0 %v10769_v39, %s9738_s1 }
 0xa7c   : > { %v2906_v13 = vpop.xlane.xlu0 %2905 }
 0xa7d   : > { %9009 = vrcp.f32 %v2906_v13  ;;  %v2300_v13 = vld [vmem:[%s10439_s24 + $0x18] sm:$0xff] }
 0xa7e   : > { %v2342_v26 = vunpack.c.h.s8.bf16 %v2300_v13 }
 0xa80   : > { %v2909_v20 = vpop.xlane.xlu0 %2908 }
 0xa81   : > { %9011 = vrcp.f32 %v2909_v20  ;;  %v2339_v20 = vunpack.c.l.s8.bf16 %v2300_v13 }
 0xa84   : > { %v2916_v25 = vpop.permute.xlu0 %2915 }
 0xa85   : > { %8468 = vmatpush3.msra.mxu0 %v2916_v25 }
 0xa86   : > { %3072 = vmatprep.subr.bf16.mxu0 %v2346_v24  ;;  %v2341_v24 = vunpack.c.l.s8.bf16 %v2302_v18 }
 0xa87   : > { %v9010_v27 = vpop.eup %9009 }
 0xa88   : > { %v2912_v29 = vmul.f32 %v9010_v27, %v9006_v36  ;;  %v2301_v36 = vld [vmem:[%s10439_s24 + $0x20] sm:$0xff]  ;;  %v2344_v27 = vunpack.c.h.s8.bf16 %v2302_v18 }
 0xa89   : > { %v2340_v61 = vunpack.c.l.s8.bf16 %v2301_v36  ;;  %v2343_v25 = vunpack.c.h.s8.bf16 %v2301_v36 }
 0xa8a   : > { %8470 = vmatmul.mubr.msk.f32.vlgmr.msra.gmra.mrb[14].mxu0 %vm2562_vm6, %v2912_v29 }
 0xa8b   : > { %v9012_v39 = vpop.eup %9011  ;;  %3073 = vmatpush1.bf16.msra.mxu0 %v2345_v28  ;;  %3104 = vmatprep.mubr.bf16.mxu0 %v9735_v23  ;;  %v10857_v28 = vsub.s32 4, %v10563_v53 }
 0xa8c   : > { %v2913_v38 = vmul.f32 %v9012_v39, %v9008_v12  ;;  %3074 = vmatprep.subr.bf16.mxu0 %v2349_v15  ;;  %v2338_v12 = vunpack.c.h.s8.bf16 %v2299_v41  ;;  %v2240_v15 = vrot.slane %v10741_v33, %v10566_v54 }
 0xa8d   : > { %v2252_v29 = vrot.slane %v10741_v33, %v10857_v28 }
 0xa8e   : > { %8475 = vmatmul.mubr.msk.f32.vlgmr.msra.gmra.mrb[22].mxu1 %vm2562_vm6, %v2913_v38 }
 0xa8f   : > { %8478 = vmatpush3.bf16.msra.mxu1 %v2347_v35  ;;  %3075 = vmatpush1.bf16.msra.mxu0 %v2348_v43  ;;  %v2282_v11 = vmul.f32 %v2252_v29, %v10719_v14  ;;  %v2291_v39 = vmul.f32 %v2252_v29, %v10725_v19  ;;  %v2264_v35 = vrot.slane %v10741_v33, %v10864_v30  ;;  %v2312_v29 = vld [vmem:[%s10439_s24 + $0x78] sm:$0xff] }
 0xa90   : > { %8479 = vmatprep.subr.bf16.mxu1 %v9736_v31  ;;  %3076 = vmatprep.subr.bf16.mxu0 %v2352_v44  ;;  %v2288_v43 = vmul.f32 %v2240_v15, %v10727_v21 }
 0xa91   : > { %8485 = vmatprep.mubr.msk.bf16.mxu1 %vm9737_vm4, %v9736_v31  ;;  %v10887_v38 = vmul.f32 %v2264_v35, %v10771_v59  ;;  %v10890_v14 = vmul.f32 %v2264_v35, %v10775_v48 }
 0xa93   : > { %8480 = vmatpush3.bf16.msra.mxu1 %v2350_v50  ;;  %3077 = vmatpush1.bf16.msra.mxu0 %v2351_v58 }
 0xa94   : > { %8481 = vmatprep.subr.bf16.mxu1 %v9736_v31  ;;  %3078 = vmatprep.subr.bf16.mxu0 %v2355_v10 }
 0xa97   : > { %8482 = vmatpush3.bf16.msra.mxu1 %v2353_v62  ;;  %3079 = vmatpush1.bf16.msra.mxu0 %v2354_v0 }
 0xa98   : > { %8483 = vmatprep.subr.bf16.mxu1 %v9736_v31  ;;  %3159 = vmatprep.subr.bf16.mxu0 %v2334_v37 }
 0xa9b   : > { %8484 = vmatpush3.bf16.msra.mxu1 %v2356_v47 }
 0xa9c   : > { %8489 = vmatprep.subr.bf16.mxu1 %v9736_v31 }
 0xb5d   : > { %v2987_v49 = vpop.f32.mrb[14].mxu0 }
 0xb5e   : > { %v8471_v56 = vpop.f32.mrb[15].mxu0 }
 0xb61   : > { %v3064_v9 = vpop.f32.mrb[22].mxu1 }
 0xb62   : > { %v3068_v6 = vpack.c.bf16 %v3064_v9, %v2987_v49  ;;  %v8476_v7 = vpop.f32.mrb[23].mxu1  ;;  %v2310_v9 = vld [vmem:[%s10439_s24 + $0x68] sm:$0xff] }
 0xb63   : > { %v2309_v7 = vld [vmem:[%s10439_s24 + $0x60] sm:$0xff]  ;;  %v2361_v18 = vunpack.c.h.s8.bf16 %v2310_v9 }
 0xb64   : > { %8021 = vmatmul.mubr.msk.bf16.vlgmr.msra.gmra.mrb[16].mxu0 %vm2405_vm5, %v3068_v6  ;;  %8486 = vmatmul.mubr.msk.bf16.vlgmr.msra.gmra.mrb[24].mxu1 %vm2405_vm5, %v3068_v6 }
 0xb65   : > { %3160 = vmatpush1.bf16.msra.mxu0 %v2333_v4  ;;  %8490 = vmatpush3.bf16.msra.mxu1 %v2335_v5  ;;  %v2358_v4 = vunpack.c.l.s8.bf16 %v2310_v9 }
 0xb66   : > { %3161 = vmatprep.subr.bf16.mxu0 %v2337_v8  ;;  %8491 = vmatprep.subr.bf16.mxu1 %v9736_v31  ;;  %v2311_v8 = vld [vmem:[%s10439_s24 + $0x70] sm:$0xff] }
 0xb67   : > { %3191 = vmatprep.mubr.bf16.mxu0 %v9735_v23  ;;  %8497 = vmatprep.mubr.msk.bf16.mxu1 %vm9737_vm4, %v9736_v31  ;;  %v2359_v13 = vunpack.c.l.s8.bf16 %v2311_v8 }
 0xb69   : > { %3162 = vmatpush1.bf16.msra.mxu0 %v2336_v40  ;;  %8492 = vmatpush3.bf16.msra.mxu1 %v2338_v12  ;;  %v2357_v40 = vunpack.c.l.s8.bf16 %v2309_v7 }
 0xb6a   : > { %3163 = vmatprep.subr.bf16.mxu0 %v2340_v61  ;;  %8493 = vmatprep.subr.bf16.mxu1 %v9736_v31 }
 0xb6d   : > { %3164 = vmatpush1.bf16.msra.mxu0 %v2339_v20  ;;  %8494 = vmatpush3.bf16.msra.mxu1 %v2341_v24  ;;  %v2313_v24 = vld [vmem:[%s10439_s24 + $0x80] sm:$0xff] }
 0xb6e   : > { %3165 = vmatprep.subr.bf16.mxu0 %v2343_v25  ;;  %8495 = vmatprep.subr.bf16.mxu1 %v9736_v31  ;;  %v2360_v25 = vunpack.c.h.s8.bf16 %v2309_v7  ;;  %v2367_v35 = vunpack.c.h.s8.bf16 %v2313_v24 }
 0xb71   : > { %3166 = vmatpush1.bf16.msra.mxu0 %v2342_v26  ;;  %8496 = vmatpush3.bf16.msra.mxu1 %v2344_v27  ;;  %v2362_v26 = vunpack.c.h.s8.bf16 %v2311_v8  ;;  %v2364_v27 = vunpack.c.l.s8.bf16 %v2313_v24 }
 0xb72   : > { %8501 = vmatprep.subr.mxu0 %v9736_v31  ;;  %8506 = vmatprep.subr.mxu1 %v9736_v31 }
 0xb74   : > { %8023 = vmatmul.mubr.msk.bf16.vlgmr.msra.gmra.mrb[16].mxu0 %vm2405_vm5, %v10814_v52  ;;  %8498 = vmatmul.mubr.msk.bf16.vlgmr.msra.gmra.mrb[24].mxu1 %vm2405_vm5, %v10814_v52  ;;  %v2279_v52 = vmul.f32 %v2240_v15, %v10721_v16  ;;  %v2314_v15 = vld [vmem:[%s10439_s24 + $0x88] sm:$0xff] }
 0xb75   : > { %8503 = vmatprep.mubr.msk.f32.mxu0 %vm9737_vm4, %v9736_v31  ;;  %8508 = vmatprep.mubr.msk.f32.mxu1 %vm9737_vm4, %v9736_v31 }
 0xb7a   : > { %8502 = vmatpush3.xpose.msk.msra.mxu0 %vm2405_vm5, %v2282_v11  ;;  %8507 = vmatpush3.xpose.msk.msra.mxu1 %vm2405_vm5, %v2291_v39 }
 0xb7b   : > { %8511 = vmatprep.subr.mxu0 %v9736_v31  ;;  %8516 = vmatprep.subr.mxu1 %v9736_v31 }
 0xb7d   : > { %8504 = vmatmul.mubr.msk.f32.vlgmr.msra.gmra.mrb[20].mxu0 %vm2405_vm5, %v2279_v52  ;;  %8509 = vmatmul.mubr.msk.f32.vlgmr.msra.gmra.mrb[28].mxu1 %vm2405_vm5, %v2288_v43 }
 0xb7e   : > { %8512 = vmatpush3.msra.mxu0 %v10887_v38  ;;  %8517 = vmatpush3.msra.mxu1 %v10890_v14 }
 0xb7f   : > { %8513 = vmatprep.mubr.msk.f32.mxu0 %vm9737_vm4, %v9736_v31  ;;  %8518 = vmatprep.mubr.msk.f32.mxu1 %vm9737_vm4, %v9736_v31 }
 0xb80   : > { %8521 = vmatprep.subr.bf16.mxu1 %v9736_v31  ;;  %3571 = vmatprep.subr.bf16.mxu0 %v2358_v4 }
 0xc50   : > { %v3315_v16 = vpop.f32.mrb[20].mxu0  ;;  %v3391_v19 = vpop.f32.mrb[28].mxu1 }
 0xc51   : > { %v3395_v21 = vmul.f32 0.125, %v3315_v16  ;;  %v3396_v59 = vmul.f32 0.125, %v3391_v19  ;;  %v8505_v48 = vpop.f32.mrb[21].mxu0  ;;  %v8510_v44 = vpop.f32.mrb[29].mxu1 }
 0xc53   : > { %v3397_v45 = vadd.f32 %v3395_v21, %v10785_v3  ;;  %v3398_v50 = vadd.f32 %v3396_v59, %v10785_v3 }
 0xc55   : > { %v3399_v58 = vsel %vm2562_vm6, %v3397_v45, -inf  ;;  %v3402_v60 = vsel %vm2562_vm6, %v3398_v50, -inf }
 0xc56   : > { %3400 = vmax.xlane.f32.xlu1 %v3399_v58  ;;  %3403 = vmax.xlane.f32.xlu0 %v3402_v60 }
 0xce3   : > { %v3401_v62 = vpop.xlane.xlu1 %3400  ;;  %v3404_v10 = vpop.xlane.xlu0 %3403 }
 0xce4   : > { %v3405_v0 = vsub.f32 %v3397_v45, %v3401_v62  ;;  %v3406_v47 = vsub.f32 %v3398_v50, %v3404_v10 }
 0xce6   : > { %v3407_v2 = vmul.f32 1.442695, %v3405_v0  ;;  %v3409_v37 = vmul.f32 1.442695, %v3406_v47 }
 0xce8   : > { %9013 = vpow2.f32 %v3407_v2 }
 0xce9   : > { %9015 = vpow2.f32 %v3409_v37 }
 0xcf2   : > { %v9014_v49 = vpop.eup %9013 }
 0xcf3   : > { %v9016_v56 = vpop.eup %9015  ;;  %v3411_v57 = vsel %vm2562_vm6, %v9014_v49, 0.0 }
 0xcf4   : > { %3412 = vadd.xlane.f32.xlu0 %v3411_v57  ;;  %v3414_v41 = vsel %vm2562_vm6, %v9016_v56, 0.0 }
 0xcf5   : > { %3415 = vadd.xlane.f32.xlu1 %v3414_v41 }
 0xd06   : > { %3741 = vrot.lane.b32.xlu1 %v2291_v39, %s9738_s1  ;;  %v2365_v39 = vunpack.c.l.s8.bf16 %v2314_v15 }
 0xd0a   : > { %3661 = vrot.lane.b32.xlu1 %v2279_v52, %s9738_s1  ;;  %3663 = vrot.lane.b32.xlu0 %v2282_v11, %s9738_s1  ;;  %v2363_v11 = vunpack.c.l.s8.bf16 %v2312_v29  ;;  %v2366_v52 = vunpack.c.h.s8.bf16 %v2312_v29 }
 0xd0e   : > { %3739 = vrot.lane.b32.xlu1 %v2288_v43, %s9738_s1  ;;  %v2368_v43 = vunpack.c.h.s8.bf16 %v2314_v15  ;;  %v2317_v15 = vld [vmem:[%s10439_s24 + $0xa0] sm:$0xff] }
 0xd81   : > { %v3413_v5 = vpop.xlane.xlu0 %3412 }
 0xd82   : > { %v3416_v6 = vpop.xlane.xlu1 %3415  ;;  %9017 = vrcp.f32 %v3413_v5 }
 0xd83   : > { %9019 = vrcp.f32 %v3416_v6 }
 0xd85   : > { %v3664_v45 = vpop.permute.xlu0 %3663 }
 0xd86   : > { %v3742_v16 = vpop.permute.xlu1 %3741 }
 0xd8a   : > { %v3662_v50 = vpop.permute.xlu1 %3661 }
 0xd8c   : > { %v9018_v36 = vpop.eup %9017 }
 0xd8d   : > { %v9020_v12 = vpop.eup %9019  ;;  %v3419_v61 = vmul.f32 %v9018_v36, %v9014_v49 }
 0xd8e   : > { %v3420_v20 = vmul.f32 %v9020_v12, %v9016_v56  ;;  %v3740_v58 = vpop.permute.xlu1 %3739 }
 0xd8f   : > { %8514 = vmatmul.mubr.msk.f32.vlgmr.msra.gmra.mrb[22].mxu0 %vm2562_vm6, %v3419_v61 }
 0xd90   : > { %8519 = vmatmul.mubr.msk.f32.vlgmr.msra.gmra.mrb[30].mxu1 %vm2562_vm6, %v3420_v20  ;;  %3572 = vmatpush1.bf16.msra.mxu0 %v2357_v40 }
 0xd91   : > { %8522 = vmatpush3.bf16.msra.mxu1 %v2359_v13  ;;  %3573 = vmatprep.subr.bf16.mxu0 %v2361_v18  ;;  %v2316_v13 = vld [vmem:[%s10439_s24 + $0x98] sm:$0xff] }
 0xd92   : > { %8523 = vmatprep.subr.bf16.mxu1 %v9736_v31  ;;  %3603 = vmatprep.mubr.bf16.mxu0 %v9735_v23  ;;  %v2370_v20 = vunpack.c.l.s8.bf16 %v2316_v13 }
 0xd93   : > { %8529 = vmatprep.mubr.msk.bf16.mxu1 %vm9737_vm4, %v9736_v31 }
 0xd94   : > { %3574 = vmatpush1.bf16.msra.mxu0 %v2360_v25  ;;  %v2315_v25 = vld [vmem:[%s10439_s24 + $0x90] sm:$0xff] }
 0xd95   : > { %8524 = vmatpush3.bf16.msra.mxu1 %v2362_v26  ;;  %3575 = vmatprep.subr.bf16.mxu0 %v2364_v27  ;;  %v2369_v27 = vunpack.c.l.s8.bf16 %v2315_v25 }
 0xd96   : > { %8525 = vmatprep.subr.bf16.mxu1 %v9736_v31 }
 0xd98   : > { %3576 = vmatpush1.bf16.msra.mxu0 %v2363_v11  ;;  %v2373_v11 = vunpack.c.h.s8.bf16 %v2316_v13 }
 0xd99   : > { %8526 = vmatpush3.bf16.msra.mxu1 %v2365_v39  ;;  %3577 = vmatprep.subr.bf16.mxu0 %v2367_v35  ;;  %v2319_v39 = vld [vmem:[%s10439_s24 + $0xb0] sm:$0xff]  ;;  %v2371_v35 = vunpack.c.l.s8.bf16 %v2317_v15 }
 0xd9a   : > { %8527 = vmatprep.subr.bf16.mxu1 %v9736_v31 }
 0xd9c   : > { %3578 = vmatpush1.bf16.msra.mxu0 %v2366_v52  ;;  %v2372_v52 = vunpack.c.h.s8.bf16 %v2315_v25  ;;  %v2322_v25 = vld [vmem:[%s10439_s24 + $0xc8] sm:$0xff] }
 0xd9d   : > { %8528 = vmatpush3.bf16.msra.mxu1 %v2368_v43  ;;  %8533 = vmatprep.subr.mxu0 %v9736_v31 }
 0xd9e   : > { %8538 = vmatprep.subr.mxu1 %v9736_v31 }
 0xe62   : > { %v3490_v19 = vpop.f32.mrb[22].mxu0 }
 0xe63   : > { %v3563_v21 = vpop.f32.mrb[30].mxu1  ;;  %v8515_v59 = vpop.f32.mrb[23].mxu0 }
 0xe64   : > { %v3567_v48 = vpack.c.bf16 %v3563_v21, %v3490_v19  ;;  %v8520_v44 = vpop.f32.mrb[31].mxu1  ;;  %v2318_v19 = vld [vmem:[%s10439_s24 + $0xa8] sm:$0xff]  ;;  %v2374_v21 = vunpack.c.h.s8.bf16 %v2317_v15  ;;  %v2321_v15 = vld [vmem:[%s10439_s24 + $0xc0] sm:$0xff] }
 0xe65   : > { %v2375_v59 = vunpack.c.l.s8.bf16 %v2318_v19  ;;  %v2379_v44 = vunpack.c.h.s8.bf16 %v2319_v39 }
 0xe66   : > { %8031 = vmatmul.mubr.msk.bf16.vlgmr.msra.gmra.mrb[16].mxu0 %vm2405_vm5, %v3567_v48  ;;  %8530 = vmatmul.mubr.msk.bf16.vlgmr.msra.gmra.mrb[24].mxu1 %vm2405_vm5, %v3567_v48  ;;  %v2320_v48 = vld [vmem:[%s10439_s24 + $0xb8] sm:$0xff] }
 0xe67   : > { %8534 = vmatpush3.xpose.msk.msra.mxu0 %vm2405_vm5, %v3664_v45  ;;  %8539 = vmatpush3.xpose.msk.msra.mxu1 %vm2405_vm5, %v3742_v16  ;;  %v2376_v16 = vunpack.c.l.s8.bf16 %v2319_v39  ;;  %v2377_v45 = vunpack.c.l.s8.bf16 %v2320_v48 }
 0xe68   : > { %8535 = vmatprep.mubr.msk.f32.mxu0 %vm9737_vm4, %v9736_v31  ;;  %8540 = vmatprep.mubr.msk.f32.mxu1 %vm9737_vm4, %v9736_v31 }
 0xe69   : > { %8548 = vmatprep.subr.mxu1 %v9736_v31  ;;  %8543 = vmatprep.subr.mxu0 %v9736_v31 }
 0xe6e   : > { %8536 = vmatmul.mubr.msk.f32.vlgmr.msra.gmra.mrb[24].mxu0 %vm2405_vm5, %v3662_v50  ;;  %8541 = vmatmul.mubr.msk.f32.vlgmr.msra.gmra.mrb[32].mxu1 %vm2405_vm5, %v3740_v58  ;;  %v2378_v50 = vunpack.c.h.s8.bf16 %v2318_v19  ;;  %v2380_v58 = vunpack.c.h.s8.bf16 %v2320_v48 }
 0xe6f   : > { %8545 = vmatprep.mubr.msk.f32.mxu0 %vm9737_vm4, %v9736_v31  ;;  %8550 = vmatprep.mubr.msk.f32.mxu1 %vm9737_vm4, %v9736_v31 }
 0xf41   : > { %v3735_v60 = vpop.f32.mrb[24].mxu0  ;;  %v3813_v62 = vpop.f32.mrb[32].mxu1 }
 0xf42   : > { %v3817_v10 = vmul.f32 0.125, %v3735_v60  ;;  %v3818_v0 = vmul.f32 0.125, %v3813_v62  ;;  %v8537_v47 = vpop.f32.mrb[25].mxu0  ;;  %v8542_v2 = vpop.f32.mrb[33].mxu1  ;;  %v10971_v60 = vsub.s32 5, %v10563_v53  ;;  %v2244_v53 = vrot.slane %v10741_v33, %v10622_v46 }
 0xf44   : > { %v3819_v37 = vadd.f32 %v3817_v10, %v10785_v3  ;;  %v3820_v49 = vadd.f32 %v3818_v0, %v10785_v3  ;;  %v2256_v0 = vrot.slane %v10741_v33, %v10971_v60 }
 0xf46   : > { %v3821_v56 = vsel %vm2562_vm6, %v3819_v37, -inf  ;;  %v3824_v57 = vsel %vm2562_vm6, %v3820_v49, -inf }
 0xf47   : > { %3822 = vmax.xlane.f32.xlu0 %v3821_v56  ;;  %3825 = vmax.xlane.f32.xlu1 %v3824_v57  ;;  %v2292_v56 = vmul.f32 %v2256_v0, %v10729_v22  ;;  %v2280_v22 = vmul.f32 %v2244_v53, %v10745_v34  ;;  %v2289_v57 = vmul.f32 %v2244_v53, %v10751_v42 }
 0xf58   : > { %3921 = vrot.lane.b32.xlu1 %v10890_v14, %s9738_s1 }
 0xfd4   : > { %v3823_v41 = vpop.xlane.xlu0 %3822  ;;  %v3826_v9 = vpop.xlane.xlu1 %3825 }
 0xfd5   : > { %v3827_v4 = vsub.f32 %v3819_v37, %v3823_v41  ;;  %v3828_v5 = vsub.f32 %v3820_v49, %v3826_v9  ;;  %v2283_v49 = vmul.f32 %v2256_v0, %v10723_v17  ;;  %v8008_v17 = vld [vmem:[%s10437_s2 + $0x8] ss:$0 sm:$0xff] }
 0xfd6   : > { %v10993_v41 = vmul.f32 %v8008_v17, %v10781_v63  ;;  %v10996_v33 = vmul.f32 %v8008_v17, %v10783_v1 }
 0xfd7   : > { %v3829_v6 = vmul.f32 1.442695, %v3827_v4  ;;  %v3831_v7 = vmul.f32 1.442695, %v3828_v5 }
 0xfd8   : > { %v3922_v8 = vpop.permute.xlu1 %3921 }
 0xfd9   : > { %9021 = vpow2.f32 %v3829_v6  ;;  %8549 = vmatpush3.msra.mxu1 %v3922_v8 }
 0xfda   : > { %8553 = vmatprep.subr.bf16.mxu1 %v9736_v31  ;;  %9023 = vpow2.f32 %v3831_v7 }
 0xfe3   : > { %v9022_v36 = vpop.eup %9021 }
 0xfe4   : > { %v3833_v40 = vsel %vm2562_vm6, %v9022_v36, 0.0  ;;  %v9024_v12 = vpop.eup %9023 }
 0xfe5   : > { %3834 = vadd.xlane.f32.xlu0 %v3833_v40  ;;  %v3836_v14 = vsel %vm2562_vm6, %v9024_v12, 0.0 }
 0xfe9   : > { %3837 = vadd.xlane.f32.xlu0 %v3836_v14 }
 0xfff   : > { %3844 = vrot.lane.b32.xlu0 %v10887_v38, %s9738_s1 }
0x1072   : > { %v3835_v61 = vpop.xlane.xlu0 %3834 }
0x1073   : > { %9025 = vrcp.f32 %v3835_v61 }
0x1076   : > { %v3838_v18 = vpop.xlane.xlu0 %3837 }
0x1077   : > { %9027 = vrcp.f32 %v3838_v18 }
0x107a   : > { %v3845_v24 = vpop.permute.xlu0 %3844 }
0x107b   : > { %8544 = vmatpush3.msra.mxu0 %v3845_v24 }
0x107c   : > { %4001 = vmatprep.subr.bf16.mxu0 %v2370_v20 }
0x107d   : > { %v9026_v26 = vpop.eup %9025 }
0x107e   : > { %v3841_v29 = vmul.f32 %v9026_v26, %v9022_v36  ;;  %v2382_v26 = vunpack.c.l.s8.bf16 %v2322_v25 }
0x1080   : > { %8546 = vmatmul.mubr.msk.f32.vlgmr.msra.gmra.mrb[26].mxu0 %vm2562_vm6, %v3841_v29 }
0x1081   : > { %v9028_v38 = vpop.eup %9027  ;;  %4002 = vmatpush1.bf16.msra.mxu0 %v2369_v27  ;;  %4033 = vmatprep.mubr.bf16.mxu0 %v9735_v23 }
0x1082   : > { %v3842_v43 = vmul.f32 %v9028_v38, %v9024_v12  ;;  %4003 = vmatprep.subr.bf16.mxu0 %v2373_v11  ;;  %v2323_v11 = vld [vmem:[%s10439_s24 + $0xd0] sm:$0xff]  ;;  %v2381_v38 = vunpack.c.l.s8.bf16 %v2321_v15 }
0x1083   : > { %v2386_v48 = vunpack.c.h.s8.bf16 %v2323_v11 }
0x1084   : > { %8551 = vmatmul.mubr.msk.f32.vlgmr.msra.gmra.mrb[34].mxu1 %vm2562_vm6, %v3842_v43  ;;  %v2383_v43 = vunpack.c.l.s8.bf16 %v2323_v11 }
0x1085   : > { %8554 = vmatpush3.bf16.msra.mxu1 %v2371_v35  ;;  %4004 = vmatpush1.bf16.msra.mxu0 %v2372_v52 }
0x1086   : > { %8555 = vmatprep.subr.bf16.mxu1 %v9736_v31  ;;  %4005 = vmatprep.subr.bf16.mxu0 %v2376_v16  ;;  %v2385_v16 = vunpack.c.h.s8.bf16 %v2322_v25 }
0x1087   : > { %8561 = vmatprep.mubr.msk.bf16.mxu1 %vm9737_vm4, %v9736_v31 }
0x1089   : > { %8556 = vmatpush3.bf16.msra.mxu1 %v2374_v21  ;;  %4006 = vmatpush1.bf16.msra.mxu0 %v2375_v59  ;;  %v2325_v21 = vld [vmem:[%s10439_s24 + $0xe0] sm:$0xff]  ;;  %v2384_v59 = vunpack.c.h.s8.bf16 %v2321_v15 }
0x108a   : > { %8557 = vmatprep.subr.bf16.mxu1 %v9736_v31  ;;  %4007 = vmatprep.subr.bf16.mxu0 %v2379_v44  ;;  %v2388_v44 = vunpack.c.l.s8.bf16 %v2325_v21 }
0x108d   : > { %8558 = vmatpush3.bf16.msra.mxu1 %v2377_v45  ;;  %4008 = vmatpush1.bf16.msra.mxu0 %v2378_v50  ;;  %v2324_v45 = vld [vmem:[%s10439_s24 + $0xd8] sm:$0xff]  ;;  %v2326_v50 = vld [vmem:[%s10439_s24 + $0xe8] sm:$0xff] }
0x108e   : > { %8559 = vmatprep.subr.bf16.mxu1 %v9736_v31  ;;  %8565 = vmatprep.subr.mxu0 %v9736_v31  ;;  %v2390_v0 = vunpack.c.h.s8.bf16 %v2324_v45 }
0x1091   : > { %8560 = vmatpush3.bf16.msra.mxu1 %v2380_v58  ;;  %v2387_v58 = vunpack.c.l.s8.bf16 %v2324_v45 }
0x1092   : > { %8570 = vmatprep.subr.mxu1 %v9736_v31 }
0x1153   : > { %v3916_v62 = vpop.f32.mrb[26].mxu0 }
0x1154   : > { %v8547_v10 = vpop.f32.mrb[27].mxu0 }
0x1155   : > { %v2391_v10 = vunpack.c.h.s8.bf16 %v2325_v21  ;;  %v2331_v21 = vld [vmem:[%s10439_s24 + $0x110] sm:$0xff] }
0x1156   : > { %v2400_v45 = vunpack.c.l.s8.bf16 %v2331_v21 }
0x1157   : > { %v3993_v47 = vpop.f32.mrb[34].mxu1 }
0x1158   : > { %v3997_v2 = vpack.c.bf16 %v3993_v47, %v3916_v62  ;;  %v8552_v37 = vpop.f32.mrb[35].mxu1  ;;  %v2389_v62 = vunpack.c.l.s8.bf16 %v2326_v50  ;;  %v2392_v47 = vunpack.c.h.s8.bf16 %v2326_v50 }
0x115a   : > { %8039 = vmatmul.mubr.msk.bf16.vlgmr.msra.gmra.mrb[16].mxu0 %vm2405_vm5, %v3997_v2  ;;  %8562 = vmatmul.mubr.msk.bf16.vlgmr.msra.gmra.mrb[24].mxu1 %vm2405_vm5, %v3997_v2 }
0x115b   : > { %8566 = vmatpush3.xpose.msk.msra.mxu0 %vm2405_vm5, %v2283_v49  ;;  %8571 = vmatpush3.xpose.msk.msra.mxu1 %vm2405_vm5, %v2292_v56 }
0x115c   : > { %8567 = vmatprep.mubr.msk.f32.mxu0 %vm9737_vm4, %v9736_v31  ;;  %8572 = vmatprep.mubr.msk.f32.mxu1 %vm9737_vm4, %v9736_v31 }
0x115d   : > { %8575 = vmatprep.subr.mxu0 %v9736_v31  ;;  %8580 = vmatprep.subr.mxu1 %v9736_v31 }
0x1162   : > { %8568 = vmatmul.mubr.msk.f32.vlgmr.msra.gmra.mrb[28].mxu0 %vm2405_vm5, %v2280_v22  ;;  %8573 = vmatmul.mubr.msk.f32.vlgmr.msra.gmra.mrb[36].mxu1 %vm2405_vm5, %v2289_v57 }
0x1163   : > { %8576 = vmatpush3.msra.mxu0 %v10993_v41  ;;  %8581 = vmatpush3.msra.mxu1 %v10996_v33 }
0x1164   : > { %8577 = vmatprep.mubr.msk.f32.mxu0 %vm9737_vm4, %v9736_v31  ;;  %8582 = vmatprep.mubr.msk.f32.mxu1 %vm9737_vm4, %v9736_v31 }
0x1165   : > { %8585 = vmatprep.subr.bf16.mxu1 %v9736_v31  ;;  %4419 = vmatprep.subr.bf16.mxu0 %v2382_v26 }
0x1235   : > { %v4163_v34 = vpop.f32.mrb[28].mxu0  ;;  %v4239_v42 = vpop.f32.mrb[36].mxu1 }
0x1236   : > { %v4243_v63 = vmul.f32 0.125, %v4163_v34  ;;  %v4244_v1 = vmul.f32 0.125, %v4239_v42  ;;  %v8569_v9 = vpop.f32.mrb[29].mxu0  ;;  %v8574_v4 = vpop.f32.mrb[37].mxu1 }
0x1238   : > { %v4245_v5 = vadd.f32 %v4243_v63, %v10785_v3  ;;  %v4246_v6 = vadd.f32 %v4244_v1, %v10785_v3 }
0x123a   : > { %v4247_v7 = vsel %vm2562_vm6, %v4245_v5, -inf  ;;  %v4250_v8 = vsel %vm2562_vm6, %v4246_v6, -inf }
0x123b   : > { %4248 = vmax.xlane.f32.xlu1 %v4247_v7  ;;  %4251 = vmax.xlane.f32.xlu0 %v4250_v8 }
0x12c8   : > { %v4249_v36 = vpop.xlane.xlu1 %4248  ;;  %v4252_v40 = vpop.xlane.xlu0 %4251 }
0x12c9   : > { %v4253_v12 = vsub.f32 %v4245_v5, %v4249_v36  ;;  %v4254_v14 = vsub.f32 %v4246_v6, %v4252_v40  ;;  %v9049_v6 = vld [vmem:[#allocation3] sm:$0xff] }
0x12cb   : > { %v4255_v61 = vmul.f32 1.442695, %v4253_v12  ;;  %v4257_v13 = vmul.f32 1.442695, %v4254_v14 }
0x12cd   : > { %9029 = vpow2.f32 %v4255_v61 }
0x12ce   : > { %9031 = vpow2.f32 %v4257_v13 }
0x12d7   : > { %v9030_v18 = vpop.eup %9029 }
0x12d8   : > { %v9032_v20 = vpop.eup %9031  ;;  %v4259_v3 = vsel %vm2562_vm6, %v9030_v18, 0.0 }
0x12d9   : > { %4260 = vadd.xlane.f32.xlu0 %v4259_v3  ;;  %v4262_v24 = vsel %vm2562_vm6, %v9032_v20, 0.0 }
0x12da   : > { %4263 = vadd.xlane.f32.xlu1 %v4262_v24 }
0x12eb   : > { %4589 = vrot.lane.b32.xlu1 %v2292_v56, %s9738_s1 }
0x12ef   : > { %4509 = vrot.lane.b32.xlu1 %v2280_v22, %s9738_s1  ;;  %4511 = vrot.lane.b32.xlu0 %v2283_v49, %s9738_s1 }
0x12f3   : > { %4587 = vrot.lane.b32.xlu1 %v2289_v57, %s9738_s1 }
0x1366   : > { %v4261_v27 = vpop.xlane.xlu0 %4260 }
0x1367   : > { %v4264_v29 = vpop.xlane.xlu1 %4263  ;;  %9033 = vrcp.f32 %v4261_v27 }
0x1368   : > { %9035 = vrcp.f32 %v4264_v29  ;;  %v2328_v29 = vld [vmem:[%s10439_s24 + $0xf8] sm:$0xff] }
0x1369   : > { %v2394_v11 = vunpack.c.l.s8.bf16 %v2328_v29 }
0x136a   : > { %v4512_v22 = vpop.permute.xlu0 %4511 }
0x136b   : > { %v4590_v2 = vpop.permute.xlu1 %4589 }
0x136f   : > { %v4510_v57 = vpop.permute.xlu1 %4509 }
0x1371   : > { %v9034_v39 = vpop.eup %9033 }
0x1372   : > { %v9036_v35 = vpop.eup %9035  ;;  %v4267_v52 = vmul.f32 %v9034_v39, %v9030_v18 }
0x1373   : > { %v4268_v19 = vmul.f32 %v9036_v35, %v9032_v20  ;;  %v4588_v34 = vpop.permute.xlu1 %4587 }
0x1374   : > { %8578 = vmatmul.mubr.msk.f32.vlgmr.msra.gmra.mrb[30].mxu0 %vm2562_vm6, %v4267_v52 }
0x1375   : > { %8583 = vmatmul.mubr.msk.f32.vlgmr.msra.gmra.mrb[38].mxu1 %vm2562_vm6, %v4268_v19  ;;  %4420 = vmatpush1.bf16.msra.mxu0 %v2381_v38  ;;  %v2327_v38 = vld [vmem:[%s10439_s24 + $0xf0] sm:$0xff]  ;;  %v2397_v19 = vunpack.c.h.s8.bf16 %v2328_v29 }
0x1376   : > { %8586 = vmatpush3.bf16.msra.mxu1 %v2383_v43  ;;  %4421 = vmatprep.subr.bf16.mxu0 %v2385_v16  ;;  %v2393_v52 = vunpack.c.l.s8.bf16 %v2327_v38  ;;  %v2329_v16 = vld [vmem:[%s10439_s24 + $0x100] sm:$0xff] }
0x1377   : > { %8587 = vmatprep.subr.bf16.mxu1 %v9736_v31  ;;  %4451 = vmatprep.mubr.bf16.mxu0 %v9735_v23  ;;  %v2398_v50 = vunpack.c.h.s8.bf16 %v2329_v16 }
0x1378   : > { %8593 = vmatprep.mubr.msk.bf16.mxu1 %vm9737_vm4, %v9736_v31 }
0x1379   : > { %4422 = vmatpush1.bf16.msra.mxu0 %v2384_v59  ;;  %v2395_v59 = vunpack.c.l.s8.bf16 %v2329_v16  ;;  %v9055_v16 = vld [vmem:[#allocation2 + $0x20] sm:$0xff] }
0x137a   : > { %8588 = vmatpush3.bf16.msra.mxu1 %v2386_v48  ;;  %4423 = vmatprep.subr.bf16.mxu0 %v2388_v44  ;;  %v2396_v48 = vunpack.c.h.s8.bf16 %v2327_v38 }
0x137b   : > { %8589 = vmatprep.subr.bf16.mxu1 %v9736_v31 }
0x137d   : > { %4424 = vmatpush1.bf16.msra.mxu0 %v2387_v58  ;;  %v2330_v58 = vld [vmem:[%s10439_s24 + $0x108] sm:$0xff] }
0x137e   : > { %8590 = vmatpush3.bf16.msra.mxu1 %v2389_v62  ;;  %4425 = vmatprep.subr.bf16.mxu0 %v2391_v10  ;;  %v2332_v62 = vld [vmem:[%s10439_s24 + $0x118] sm:$0xff]  ;;  %v2399_v10 = vunpack.c.l.s8.bf16 %v2330_v58 }
0x137f   : > { %8591 = vmatprep.subr.bf16.mxu1 %v9736_v31 }
0x1381   : > { %4426 = vmatpush1.bf16.msra.mxu0 %v2390_v0  ;;  %v2401_v0 = vunpack.c.l.s8.bf16 %v2332_v62 }
0x1382   : > { %8592 = vmatpush3.bf16.msra.mxu1 %v2392_v47  ;;  %8597 = vmatprep.subr.mxu0 %v9736_v31  ;;  %v2403_v47 = vunpack.c.h.s8.bf16 %v2331_v21 }
0x1383   : > { %8602 = vmatprep.subr.mxu1 %v9736_v31 }
0x1447   : > { %v4338_v37 = vpop.f32.mrb[30].mxu0 }
0x1448   : > { %v4411_v49 = vpop.f32.mrb[38].mxu1  ;;  %v8579_v56 = vpop.f32.mrb[31].mxu0 }
0x1449   : > { %v4415_v53 = vpack.c.bf16 %v4411_v49, %v4338_v37  ;;  %v8584_v17 = vpop.f32.mrb[39].mxu1  ;;  %v2404_v37 = vunpack.c.h.s8.bf16 %v2332_v62  ;;  %v5083_v62 = vld [vmem:[%s10443_s0 + $0x8] sm:$0xff] }
0x144b   : > { %8047 = vmatmul.mubr.msk.bf16.vlgmr.msra.gmra.mrb[16].mxu0 %vm2405_vm5, %v4415_v53  ;;  %8594 = vmatmul.mubr.msk.bf16.vlgmr.msra.gmra.mrb[24].mxu1 %vm2405_vm5, %v4415_v53 }
0x144c   : > { %8598 = vmatpush3.xpose.msk.msra.mxu0 %vm2405_vm5, %v4512_v22  ;;  %8603 = vmatpush3.xpose.msk.msra.mxu1 %vm2405_vm5, %v4590_v2  ;;  %v2402_v2 = vunpack.c.h.s8.bf16 %v2330_v58 }
0x144d   : > { %8599 = vmatprep.mubr.msk.f32.mxu0 %vm9737_vm4, %v9736_v31  ;;  %8604 = vmatprep.mubr.msk.f32.mxu1 %vm9737_vm4, %v9736_v31 }
0x144e   : > { %8612 = vmatprep.subr.mxu1 %v9736_v31  ;;  %8607 = vmatprep.subr.mxu0 %v9736_v31 }
0x1453   : > { %8600 = vmatmul.mubr.msk.f32.vlgmr.msra.gmra.mrb[32].mxu0 %vm2405_vm5, %v4510_v57  ;;  %8605 = vmatmul.mubr.msk.f32.vlgmr.msra.gmra.mrb[40].mxu1 %vm2405_vm5, %v4588_v34  ;;  %v4939_v57 = vld [vmem:[%s948_s28] sm:$0x7] }
0x1454   : > { %8609 = vmatprep.mubr.msk.f32.mxu0 %vm9737_vm4, %v9736_v31  ;;  %8614 = vmatprep.mubr.msk.f32.mxu1 %vm9737_vm4, %v9736_v31  ;;  %v4944_v34 = vrot.slane %v4939_v57, %v10569_v55 }
0x1526   : > { %v4583_v42 = vpop.f32.mrb[32].mxu0  ;;  %v4661_v63 = vpop.f32.mrb[40].mxu1 }
0x1527   : > { %v4665_v1 = vmul.f32 0.125, %v4583_v42  ;;  %v4666_v9 = vmul.f32 0.125, %v4661_v63  ;;  %v8601_v4 = vpop.f32.mrb[33].mxu0  ;;  %v8606_v5 = vpop.f32.mrb[41].mxu1  ;;  %v4968_v42 = vld [vmem:[%s957_s26] sm:$0x7]  ;;  %v4948_v63 = vrot.slane %v4939_v57, %v10566_v54 }
0x1528   : > { %v4973_v5 = vrot.slane %v4968_v42, %v10569_v55 }
0x1529   : > { %v4667_v7 = vadd.f32 %v9049_v6, %v4665_v1  ;;  %v4668_v8 = vadd.f32 %v9049_v6, %v4666_v9 }
0x152b   : > { %v4669_v36 = vsel %vm2562_vm6, %v4667_v7, -inf  ;;  %v4672_v40 = vsel %vm2562_vm6, %v4668_v8, -inf }
0x152c   : > { %4670 = vmax.xlane.f32.xlu0 %v4669_v36  ;;  %4673 = vmax.xlane.f32.xlu1 %v4672_v40  ;;  %v4977_v40 = vrot.slane %v4968_v42, %v10566_v54 }
0x153d   : > { %4769 = vrot.lane.b32.xlu1 %v10996_v33, %s9738_s1 }
0x15b9   : > { %v4671_v12 = vpop.xlane.xlu0 %4670  ;;  %v4674_v14 = vpop.xlane.xlu1 %4673 }
0x15ba   : > { %v4675_v61 = vsub.f32 %v4667_v7, %v4671_v12  ;;  %v4676_v13 = vsub.f32 %v4668_v8, %v4674_v14 }
0x15bc   : > { %v4677_v18 = vmul.f32 1.442695, %v4675_v61  ;;  %v4679_v20 = vmul.f32 1.442695, %v4676_v13  ;;  %v9050_v61 = vld [vmem:[#allocation2] sm:$0xff] }
0x15bd   : > { %v4770_v3 = vpop.permute.xlu1 %4769 }
0x15be   : > { %9037 = vpow2.f32 %v4677_v18  ;;  %8613 = vmatpush3.msra.mxu1 %v4770_v3 }
0x15bf   : > { %8617 = vmatprep.subr.bf16.mxu1 %v9736_v31  ;;  %9039 = vpow2.f32 %v4679_v20 }
0x15c8   : > { %v9038_v24 = vpop.eup %9037 }
0x15c9   : > { %v4681_v25 = vsel %vm2562_vm6, %v9038_v24, 0.0  ;;  %v9040_v26 = vpop.eup %9039 }
0x15ca   : > { %4682 = vadd.xlane.f32.xlu0 %v4681_v25  ;;  %v4684_v33 = vsel %vm2562_vm6, %v9040_v26, 0.0  ;;  %v9051_v25 = vld [vmem:[#allocation2 + $0x10] sm:$0xff] }
0x15ce   : > { %4685 = vadd.xlane.f32.xlu0 %v4684_v33  ;;  %v4981_v33 = vrot.slane %v4968_v42, %v10622_v46 }
0x15e4   : > { %4692 = vrot.lane.b32.xlu0 %v10993_v41, %s9738_s1 }
0x1657   : > { %v4683_v27 = vpop.xlane.xlu0 %4682 }
0x1658   : > { %9041 = vrcp.f32 %v4683_v27  ;;  %v9052_v27 = vld [vmem:[#allocation2 + $0x8] sm:$0xff] }
0x165b   : > { %v4686_v15 = vpop.xlane.xlu0 %4685 }
0x165c   : > { %9043 = vrcp.f32 %v4686_v15 }
0x165f   : > { %v4693_v39 = vpop.permute.xlu0 %4692 }
0x1660   : > { %8608 = vmatpush3.msra.mxu0 %v4693_v39  ;;  %v9053_v39 = vld [vmem:[#allocation2 + $0x18] sm:$0xff] }
0x1661   : > { %4849 = vmatprep.subr.bf16.mxu0 %v2394_v11 }
0x1662   : > { %v9042_v35 = vpop.eup %9041 }
0x1663   : > { %v4689_v43 = vmul.f32 %v9042_v35, %v9038_v24 }
0x1665   : > { %8610 = vmatmul.mubr.msk.f32.vlgmr.msra.gmra.mrb[34].mxu0 %vm2562_vm6, %v4689_v43 }
0x1666   : > { %v9044_v41 = vpop.eup %9043  ;;  %4850 = vmatpush1.bf16.msra.mxu0 %v2393_v52  ;;  %4881 = vmatprep.mubr.bf16.mxu0 %v9735_v23  ;;  %v9054_v52 = vld [vmem:[#allocation2 + $0x28] sm:$0xff] }
0x1667   : > { %v4690_v44 = vmul.f32 %v9044_v41, %v9040_v26  ;;  %4851 = vmatprep.subr.bf16.mxu0 %v2397_v19 }
0x1669   : > { %8615 = vmatmul.mubr.msk.f32.vlgmr.msra.gmra.mrb[42].mxu1 %vm2562_vm6, %v4690_v44 }
0x166a   : > { %8618 = vmatpush3.bf16.msra.mxu1 %v2395_v59  ;;  %4852 = vmatpush1.bf16.msra.mxu0 %v2396_v48 }
0x166b   : > { %8619 = vmatprep.subr.bf16.mxu1 %v9736_v31  ;;  %4853 = vmatprep.subr.bf16.mxu0 %v2400_v45 }
0x166c   : > { %8625 = vmatprep.mubr.msk.bf16.mxu1 %vm9737_vm4, %v9736_v31 }
0x166e   : > { %8620 = vmatpush3.bf16.msra.mxu1 %v2398_v50  ;;  %4854 = vmatpush1.bf16.msra.mxu0 %v2399_v10  ;;  %v5085_v10 = vld [vmem:[%s10443_s0 + $0x18] sm:$0xff] }
0x166f   : > { %8621 = vmatprep.subr.bf16.mxu1 %v9736_v31  ;;  %4855 = vmatprep.subr.bf16.mxu0 %v2403_v47  ;;  %v5227_v47 = vunpack.c.l.s8.bf16 %v5083_v62 }
0x1672   : > { %8622 = vmatpush3.bf16.msra.mxu1 %v2401_v0  ;;  %4856 = vmatpush1.bf16.msra.mxu0 %v2402_v2  ;;  %v5082_v0 = vld [vmem:[%s10443_s0] sm:$0xff]  ;;  %v5229_v2 = vunpack.c.l.s8.bf16 %v5085_v10 }
0x1673   : > { %8623 = vmatprep.subr.bf16.mxu1 %v9736_v31  ;;  %v4952_v31 = vrot.slane %v4939_v57, %v10622_v46  ;;  %v5097_v57 = vld [vmem:[%s10443_s0 + $0x78] sm:$0xff]  ;;  %5514 = vmatprep.subr.bf16.mxu0 %v5227_v47  ;;  %v5130_v47 = vld [vmem:[%s10443_s0 + $0x180] sm:$0xff] }
0x1676   : > { %8624 = vmatpush3.bf16.msra.mxu1 %v2404_v37  ;;  %v5226_v37 = vunpack.c.l.s8.bf16 %v5082_v0 }
0x1677   : > { %5600 = vmatprep.subr.bf16.mxu1 %v5229_v2  ;;  %v5132_v2 = vld [vmem:[%s10443_s0 + $0x190] sm:$0xff] }
0x1738   : > { %v4764_v49 = vpop.f32.mrb[34].mxu0 }
0x1739   : > { %v8611_v56 = vpop.f32.mrb[35].mxu0 }
0x173a   : > { %v5239_v56 = vunpack.c.h.s8.bf16 %v5083_v62 }
0x173c   : > { %v4841_v53 = vpop.f32.mrb[42].mxu1 }
0x173d   : > { %v4845_v17 = vpack.c.bf16 %v4841_v53, %v4764_v49  ;;  %v8616_v22 = vpop.f32.mrb[43].mxu1  ;;  %v5084_v49 = vld [vmem:[%s10443_s0 + $0x10] sm:$0xff] }
0x173e   : > { %v5228_v53 = vunpack.c.l.s8.bf16 %v5084_v49  ;;  %v5095_v22 = vld [vmem:[%s10443_s0 + $0x68] sm:$0xff] }
0x173f   : > { %8055 = vmatmul.mubr.msk.bf16.vlgmr.msra.gmra.mrb[16].mxu0 %vm2405_vm5, %v4845_v17  ;;  %8626 = vmatmul.mubr.msk.bf16.vlgmr.msra.gmra.mrb[24].mxu1 %vm2405_vm5, %v4845_v17  ;;  %v5241_v17 = vunpack.c.h.s8.bf16 %v5085_v10  ;;  %v5251_v42 = vunpack.c.l.s8.bf16 %v5095_v22 }
0x1740   : > { %5515 = vmatpush1.bf16.msra.mxu0 %v5226_v37  ;;  %5601 = vmatpush1.bf16.msra.mxu1 %v5228_v53  ;;  %v5322_v37 = vunpack.c.l.s8.bf16 %v5130_v47 }
0x1741   : > { %5516 = vmatprep.subr.bf16.mxu0 %v5239_v56  ;;  %5602 = vmatprep.subr.bf16.mxu1 %v5241_v17  ;;  %v5334_v17 = vunpack.c.h.s8.bf16 %v5130_v47 }
0x1812   : > { %v4883_v1 = vpop.f32.mrb[16].mxu0  ;;  %v4926_v9 = vpop.f32.mrb[24].mxu1 }
0x1813   : > { %v4956_v4 = vmul.f32 %v4944_v34, %v4883_v1  ;;  %v4958_v6 = vmul.f32 %v4952_v31, %v4926_v9  ;;  %v4885_v7 = vpop.f32.mrb[17].mxu0  ;;  %v8627_v8 = vpop.f32.mrb[25].mxu1  ;;  %v5094_v1 = vld [vmem:[%s10443_s0 + $0x60] sm:$0xff]  ;;  %v5096_v9 = vld [vmem:[%s10443_s0 + $0x70] sm:$0xff] }
0x1814   : > { %v4957_v36 = vmul.f32 %v4948_v63, %v4885_v7  ;;  %v4887_v12 = vpop.f32.mrb[18].mxu0  ;;  %v4929_v14 = vpop.f32.mrb[26].mxu1  ;;  %v5265_v7 = vunpack.c.h.s8.bf16 %v5097_v57  ;;  %v5107_v8 = vld [vmem:[%s10443_s0 + $0xc8] sm:$0xff] }
0x1815   : > { %v4962_v13 = vadd.f32 %v9050_v61, %v4956_v4  ;;  %v4959_v18 = vmul.f32 %v4944_v34, %v4887_v12  ;;  %v4961_v20 = vmul.f32 %v4952_v31, %v4929_v14  ;;  %v4889_v3 = vpop.f32.mrb[19].mxu0  ;;  %v8628_v24 = vpop.f32.mrb[27].mxu1  ;;  %v4964_v26 = vadd.f32 %v9051_v25, %v4958_v6 }
0x1816   : > { %v4963_v29 = vadd.f32 %v9052_v27, %v4957_v36  ;;  %v4960_v15 = vmul.f32 %v4948_v63, %v4889_v3  ;;  %v5238_v34 = vunpack.c.h.s8.bf16 %v5082_v0  ;;  %v5240_v31 = vunpack.c.h.s8.bf16 %v5084_v49  ;;  %v5109_v36 = vld [vmem:[%s10443_s0 + $0xd8] sm:$0xff] }
0x1817   : > { %v11084_v11 = vadd.f32 %v4973_v5, %v4962_v13  ;;  %v4965_v38 = vadd.f32 %v9053_v39, %v4959_v18  ;;  %v4967_v43 = vadd.f32 %v9054_v52, %v4961_v20  ;;  %v11090_v41 = vadd.f32 %v4981_v33, %v4964_v26  ;;  %v5106_v13 = vld [vmem:[%s10443_s0 + $0xc0] sm:$0xff]  ;;  %v5108_v18 = vld [vmem:[%s10443_s0 + $0xd0] sm:$0xff]  ;;  %v5119_v26 = vld [vmem:[%s10443_s0 + $0x128] sm:$0xff] }
0x1818   : > { %v11086_v35 = vadd.f32 %v4977_v40, %v4963_v29  ;;  %v4966_v19 = vadd.f32 %v9055_v16, %v4960_v15  ;;  %v5253_v63 = vunpack.c.l.s8.bf16 %v5097_v57  ;;  %5517 = vmatpush1.bf16.msra.mxu0 %v5238_v34  ;;  %5603 = vmatpush1.bf16.msra.mxu1 %v5240_v31  ;;  %v5250_v4 = vunpack.c.l.s8.bf16 %v5094_v1  ;;  %v5120_v52 = vld [vmem:[%s10443_s0 + $0x130] sm:$0xff] }
0x1819   : > { %v11088_v21 = vadd.f32 %v4973_v5, %v4965_v38  ;;  %v11096_v44 = vadd.f32 %v4981_v33, %v4967_v43  ;;  %v5252_v5 = vunpack.c.l.s8.bf16 %v5096_v9  ;;  %5518 = vmatprep.subr.bf16.mxu0 %v5251_v42  ;;  %v5263_v6 = vunpack.c.h.s8.bf16 %v5095_v22  ;;  %v5121_v33 = vld [vmem:[%s10443_s0 + $0x138] sm:$0xff]  ;;  %v5118_v38 = vld [vmem:[%s10443_s0 + $0x120] sm:$0xff] }
0x181a   : > { %v11092_v59 = vadd.f32 %v4977_v40, %v4966_v19  ;;  %v4991_v48 = vadd.f32 %v11086_v35, %v11084_v11  ;;  %5604 = vmatprep.subr.bf16.mxu1 %v5253_v63  ;;  %v5262_v40 = vunpack.c.h.s8.bf16 %v5094_v1  ;;  %v5264_v12 = vunpack.c.h.s8.bf16 %v5096_v9 }
0x181b   : > { %v5275_v14 = vunpack.c.l.s8.bf16 %v5107_v8  ;;  %v5277_v61 = vunpack.c.l.s8.bf16 %v5109_v36  ;;  %v5274_v20 = vunpack.c.l.s8.bf16 %v5106_v13  ;;  %v5276_v3 = vunpack.c.l.s8.bf16 %v5108_v18 }
0x181c   : > { %v4992_v45 = vadd.f32 %v4991_v48, %v11090_v41  ;;  %v4995_v50 = vadd.f32 %v11092_v59, %v11088_v21  ;;  %5519 = vmatpush1.bf16.msra.mxu0 %v5250_v4  ;;  %5605 = vmatpush1.bf16.msra.mxu1 %v5252_v5  ;;  %v5287_v24 = vunpack.c.h.s8.bf16 %v5107_v8  ;;  %v5289_v25 = vunpack.c.h.s8.bf16 %v5109_v36 }
0x181d   : > { %5520 = vmatprep.subr.bf16.mxu0 %v5263_v6  ;;  %5606 = vmatprep.subr.bf16.mxu1 %v5265_v7  ;;  %v5286_v27 = vunpack.c.h.s8.bf16 %v5106_v13  ;;  %v5288_v29 = vunpack.c.h.s8.bf16 %v5108_v18  ;;  %v5299_v15 = vunpack.c.l.s8.bf16 %v5119_v26  ;;  %v5301_v39 = vunpack.c.l.s8.bf16 %v5121_v33 }
0x181e   : > { %4993 = vadd.xlane.f32.xlu1 %v4992_v45  ;;  %v4996_v58 = vadd.f32 %v4995_v50, %v11096_v44  ;;  %v5298_v43 = vunpack.c.l.s8.bf16 %v5118_v38  ;;  %v5300_v16 = vunpack.c.l.s8.bf16 %v5120_v52  ;;  %v5311_v19 = vunpack.c.h.s8.bf16 %v5119_v26  ;;  %v5131_v45 = vld [vmem:[%s10443_s0 + $0x188] sm:$0xff]  ;;  %v5133_v50 = vld [vmem:[%s10443_s0 + $0x198] sm:$0xff] }
0x181f   : > { %v5313_v48 = vunpack.c.h.s8.bf16 %v5121_v33  ;;  %v5312_v62 = vunpack.c.h.s8.bf16 %v5120_v52  ;;  %v5323_v10 = vunpack.c.l.s8.bf16 %v5131_v45  ;;  %v5325_v0 = vunpack.c.l.s8.bf16 %v5133_v50  ;;  %v5142_v33 = vld [vmem:[%s10443_s0 + $0x1e0] sm:$0xff] }
0x1820   : > { %4997 = vadd.xlane.f32.xlu0 %v4996_v58  ;;  %5521 = vmatpush1.bf16.msra.mxu0 %v5262_v40  ;;  %v5310_v58 = vunpack.c.h.s8.bf16 %v5118_v38  ;;  %v5324_v49 = vunpack.c.l.s8.bf16 %v5132_v2  ;;  %v5335_v56 = vunpack.c.h.s8.bf16 %v5131_v45  ;;  %v5337_v53 = vunpack.c.h.s8.bf16 %v5133_v50 }
0x1821   : > { %5607 = vmatpush1.bf16.msra.mxu1 %v5264_v12  ;;  %5522 = vmatprep.subr.bf16.mxu0 %v5275_v14  ;;  %v5336_v22 = vunpack.c.h.s8.bf16 %v5132_v2  ;;  %v5358_v52 = vunpack.c.h.s8.bf16 %v5142_v33  ;;  %v5167_v2 = vld [vmem:[%s10443_s0 + $0x2a8] sm:$0xff] }
0x1822   : > { %5608 = vmatprep.subr.bf16.mxu1 %v5277_v61 }
0x1824   : > { %5523 = vmatpush1.bf16.msra.mxu0 %v5274_v20 }
0x1825   : > { %5609 = vmatpush1.bf16.msra.mxu1 %v5276_v3  ;;  %5524 = vmatprep.subr.bf16.mxu0 %v5287_v24  ;;  %v5143_v3 = vld [vmem:[%s10443_s0 + $0x1e8] sm:$0xff]  ;;  %v5145_v24 = vld [vmem:[%s10443_s0 + $0x1f8] sm:$0xff] }
0x1826   : > { %5610 = vmatprep.subr.bf16.mxu1 %v5289_v25  ;;  %v5347_v25 = vunpack.c.l.s8.bf16 %v5143_v3  ;;  %v5349_v26 = vunpack.c.l.s8.bf16 %v5145_v24  ;;  %v5361_v38 = vunpack.c.h.s8.bf16 %v5145_v24 }
0x1828   : > { %5525 = vmatpush1.bf16.msra.mxu0 %v5286_v27  ;;  %v5144_v27 = vld [vmem:[%s10443_s0 + $0x1f0] sm:$0xff] }
0x1829   : > { %5611 = vmatpush1.bf16.msra.mxu1 %v5288_v29  ;;  %5526 = vmatprep.subr.bf16.mxu0 %v5299_v15  ;;  %v5346_v29 = vunpack.c.l.s8.bf16 %v5142_v33  ;;  %v5348_v15 = vunpack.c.l.s8.bf16 %v5144_v27 }
0x182a   : > { %5612 = vmatprep.subr.bf16.mxu1 %v5301_v39  ;;  %v5359_v39 = vunpack.c.h.s8.bf16 %v5143_v3 }
0x182c   : > { %5527 = vmatpush1.bf16.msra.mxu0 %v5298_v43  ;;  %v5360_v43 = vunpack.c.h.s8.bf16 %v5144_v27  ;;  %v11174_v27 = vld [vmem:[%s912_s27] sm:$0x7] }
0x182d   : > { %5613 = vmatpush1.bf16.msra.mxu1 %v5300_v16  ;;  %5528 = vmatprep.subr.bf16.mxu0 %v5311_v19  ;;  %v5155_v16 = vld [vmem:[%s10443_s0 + $0x248] sm:$0xff]  ;;  %v5157_v19 = vld [vmem:[%s10443_s0 + $0x258] sm:$0xff] }
0x182e   : > { %5614 = vmatprep.subr.bf16.mxu1 %v5313_v48  ;;  %v5154_v48 = vld [vmem:[%s10443_s0 + $0x240] sm:$0xff]  ;;  %v5371_v45 = vunpack.c.l.s8.bf16 %v5155_v16  ;;  %v5373_v50 = vunpack.c.l.s8.bf16 %v5157_v19  ;;  %v5385_v47 = vunpack.c.h.s8.bf16 %v5157_v19 }
0x1830   : > { %5529 = vmatpush1.bf16.msra.mxu0 %v5310_v58  ;;  %v5370_v58 = vunpack.c.l.s8.bf16 %v5154_v48 }
0x1831   : > { %5615 = vmatpush1.bf16.msra.mxu1 %v5312_v62  ;;  %5530 = vmatprep.subr.bf16.mxu0 %v5323_v10  ;;  %v5156_v62 = vld [vmem:[%s10443_s0 + $0x250] sm:$0xff] }
0x1832   : > { %5616 = vmatprep.subr.bf16.mxu1 %v5325_v0  ;;  %v5372_v10 = vunpack.c.l.s8.bf16 %v5156_v62  ;;  %v5383_v0 = vunpack.c.h.s8.bf16 %v5155_v16  ;;  %v5065_v16 = vrot.slane %v11174_v27, %v10566_v54 }
0x1834   : > { %5531 = vmatpush1.bf16.msra.mxu0 %v5322_v37  ;;  %v5169_v37 = vld [vmem:[%s10443_s0 + $0x2b8] sm:$0xff] }
0x1835   : > { %5617 = vmatpush1.bf16.msra.mxu1 %v5324_v49  ;;  %5532 = vmatprep.subr.bf16.mxu0 %v5335_v56  ;;  %v5382_v49 = vunpack.c.h.s8.bf16 %v5154_v48  ;;  %v5384_v56 = vunpack.c.h.s8.bf16 %v5156_v62  ;;  %v5061_v48 = vrot.slane %v11174_v27, %v10569_v55  ;;  %v5178_v62 = vld [vmem:[%s10443_s0 + $0x300] sm:$0xff] }
0x1836   : > { %5618 = vmatprep.subr.bf16.mxu1 %v5337_v53  ;;  %v5395_v53 = vunpack.c.l.s8.bf16 %v5167_v2 }
0x1838   : > { %5533 = vmatpush1.bf16.msra.mxu0 %v5334_v17  ;;  %v5397_v17 = vunpack.c.l.s8.bf16 %v5169_v37 }
0x1839   : > { %5619 = vmatpush1.bf16.msra.mxu1 %v5336_v22  ;;  %5534 = vmatprep.subr.bf16.mxu0 %v5347_v25  ;;  %v5166_v22 = vld [vmem:[%s10443_s0 + $0x2a0] sm:$0xff] }
0x183a   : > { %5620 = vmatprep.subr.bf16.mxu1 %v5349_v26  ;;  %v11168_v26 = vld [vmem:[%s11819_s20] sm:$0x7] }
0x183b   : > { %v5042_v33 = vrot.slane %v11168_v26, %v10566_v54 }
0x183c   : > { %5535 = vmatpush1.bf16.msra.mxu0 %v5346_v29  ;;  %v5038_v29 = vrot.slane %v11168_v26, %v10569_v55 }
0x183d   : > { %5621 = vmatpush1.bf16.msra.mxu1 %v5348_v15  ;;  %5536 = vmatprep.subr.bf16.mxu0 %v5359_v39 }
0x183e   : > { %5622 = vmatprep.subr.bf16.mxu1 %v5361_v38 }
0x1840   : > { %5537 = vmatpush1.bf16.msra.mxu0 %v5358_v52 }
0x1841   : > { %5623 = vmatpush1.bf16.msra.mxu1 %v5360_v43  ;;  %5538 = vmatprep.subr.bf16.mxu0 %v5371_v45 }
0x1842   : > { %5624 = vmatprep.subr.bf16.mxu1 %v5373_v50 }
0x1844   : > { %5539 = vmatpush1.bf16.msra.mxu0 %v5370_v58 }
0x1845   : > { %5625 = vmatpush1.bf16.msra.mxu1 %v5372_v10  ;;  %5540 = vmatprep.subr.bf16.mxu0 %v5383_v0 }
0x1846   : > { %5626 = vmatprep.subr.bf16.mxu1 %v5385_v47 }
0x1848   : > { %5541 = vmatpush1.bf16.msra.mxu0 %v5382_v49 }
0x1849   : > { %5627 = vmatpush1.bf16.msra.mxu1 %v5384_v56  ;;  %5542 = vmatprep.subr.bf16.mxu0 %v5395_v53 }
0x184a   : > { %5628 = vmatprep.subr.bf16.mxu1 %v5397_v17  ;;  %v5191_v17 = vld [vmem:[%s10443_s0 + $0x368] sm:$0xff] }
0x18ab   : > { %v4994_v57 = vpop.xlane.xlu1 %4993 }
0x18ac   : > { %v4999_v34 = vmul.f32 0.0026041667, %v4994_v57  ;;  %v5168_v57 = vld [vmem:[%s10443_s0 + $0x2b0] sm:$0xff] }
0x18ad   : > { %v4998_v31 = vpop.xlane.xlu0 %4997 }
0x18ae   : > { %v11123_v42 = vsub.f32 %v11084_v11, %v4999_v34  ;;  %v11126_v63 = vsub.f32 %v11086_v35, %v4999_v34  ;;  %v5000_v1 = vmul.f32 0.0026041667, %v4998_v31  ;;  %v11129_v9 = vsub.f32 %v11090_v41, %v4999_v34 }
0x18af   : > { %v5394_v34 = vunpack.c.l.s8.bf16 %v5166_v22  ;;  %v5396_v31 = vunpack.c.l.s8.bf16 %v5168_v57 }
0x18b0   : > { %v11132_v4 = vsub.f32 %v11088_v21, %v5000_v1  ;;  %v11135_v5 = vsub.f32 %v11092_v59, %v5000_v1  ;;  %v11138_v6 = vsub.f32 %v11096_v44, %v5000_v1  ;;  %v5007_v7 = vmul.f32 %v11123_v42, %v11123_v42 }
0x18b1   : > { %v5008_v8 = vmul.f32 %v11126_v63, %v11126_v63  ;;  %v5009_v12 = vmul.f32 %v11129_v9, %v11129_v9  ;;  %v5407_v1 = vunpack.c.h.s8.bf16 %v5167_v2  ;;  %5543 = vmatpush1.bf16.msra.mxu0 %v5394_v34  ;;  %5629 = vmatpush1.bf16.msra.mxu1 %v5396_v31  ;;  %v5443_v31 = vunpack.c.l.s8.bf16 %v5191_v17 }
0x18b2   : > { %v5010_v36 = vmul.f32 %v11132_v4, %v11132_v4  ;;  %v5011_v40 = vmul.f32 %v11135_v5, %v11135_v5  ;;  %v5012_v61 = vmul.f32 %v11138_v6, %v11138_v6 }
0x18b3   : > { %v5013_v14 = vadd.f32 %v5008_v8, %v5007_v7  ;;  %v5409_v7 = vunpack.c.h.s8.bf16 %v5169_v37  ;;  %v5406_v8 = vunpack.c.h.s8.bf16 %v5166_v22  ;;  %5544 = vmatprep.subr.bf16.mxu0 %v5407_v1  ;;  %v5193_v22 = vld [vmem:[%s10443_s0 + $0x378] sm:$0xff] }
0x18b4   : > { %v5017_v13 = vadd.f32 %v5011_v40, %v5010_v36  ;;  %v5408_v36 = vunpack.c.h.s8.bf16 %v5168_v57  ;;  %v5179_v40 = vld [vmem:[%s10443_s0 + $0x308] sm:$0xff]  ;;  %v5430_v57 = vunpack.c.h.s8.bf16 %v5178_v62  ;;  %v5445_v1 = vunpack.c.l.s8.bf16 %v5193_v22 }
0x18b5   : > { %v5014_v18 = vadd.f32 %v5013_v14, %v5009_v12  ;;  %5630 = vmatprep.subr.bf16.mxu1 %v5409_v7  ;;  %5545 = vmatpush1.bf16.msra.mxu0 %v5406_v8  ;;  %v5181_v12 = vld [vmem:[%s10443_s0 + $0x318] sm:$0xff]  ;;  %v5419_v14 = vunpack.c.l.s8.bf16 %v5179_v40  ;;  %v5431_v56 = vunpack.c.h.s8.bf16 %v5179_v40  ;;  %v5190_v7 = vld [vmem:[%s10443_s0 + $0x360] sm:$0xff]  ;;  %v5192_v8 = vld [vmem:[%s10443_s0 + $0x370] sm:$0xff] }
0x18b6   : > { %v5018_v20 = vadd.f32 %v5017_v13, %v5012_v61  ;;  %5631 = vmatpush1.bf16.msra.mxu1 %v5408_v36  ;;  %v5421_v61 = vunpack.c.l.s8.bf16 %v5181_v12  ;;  %v5433_v53 = vunpack.c.h.s8.bf16 %v5181_v12  ;;  %v5442_v36 = vunpack.c.l.s8.bf16 %v5190_v7 }
0x18b7   : > { %5015 = vadd.xlane.f32.xlu0 %v5014_v18  ;;  %5557 = vmatprep.subr.bf16.mxu0 %v5419_v14  ;;  %v5444_v40 = vunpack.c.l.s8.bf16 %v5192_v8  ;;  %v5455_v12 = vunpack.c.h.s8.bf16 %v5191_v17  ;;  %v5457_v14 = vunpack.c.h.s8.bf16 %v5193_v22  ;;  %v5089_v17 = vld [vmem:[%s10443_s0 + $0x38] sm:$0xff] }
0x18b8   : > { %5019 = vadd.xlane.f32.xlu1 %v5018_v20  ;;  %5643 = vmatprep.subr.bf16.mxu1 %v5421_v61  ;;  %v5203_v61 = vld [vmem:[%s10443_s0 + $0x3c8] sm:$0xff] }
0x1944   : > { %v5016_v13 = vpop.xlane.xlu0 %5015 }
0x1945   : > { %v5021_v18 = vmul.f32 0.0026041667, %v5016_v13  ;;  %v5020_v20 = vpop.xlane.xlu1 %5019  ;;  %v5205_v13 = vld [vmem:[%s10443_s0 + $0x3d8] sm:$0xff] }
0x1946   : > { %v5022_v3 = vmul.f32 0.0026041667, %v5020_v20  ;;  %v5456_v20 = vunpack.c.h.s8.bf16 %v5192_v8 }
0x1947   : > { %v5023_v24 = vadd.f32 1e-05, %v5021_v18  ;;  %v5454_v18 = vunpack.c.h.s8.bf16 %v5190_v7 }
0x1948   : > { %v5024_v25 = vadd.f32 1e-05, %v5022_v3  ;;  %v5467_v3 = vunpack.c.l.s8.bf16 %v5203_v61 }
0x1949   : > { %9045 = vrsqrt.f32 %v5023_v24  ;;  %v5469_v24 = vunpack.c.l.s8.bf16 %v5205_v13 }
0x194a   : > { %9047 = vrsqrt.f32 %v5024_v25  ;;  %v5202_v25 = vld [vmem:[%s10443_s0 + $0x3c0] sm:$0xff] }
0x1953   : > { %v11178_v15 = vpop.eup %9045 }
0x1954   : > { %v11180_v39 = vpop.eup %9047  ;;  %v5028_v38 = vmul.f32 %v11178_v15, %v11126_v63  ;;  %v5027_v52 = vmul.f32 %v11178_v15, %v11123_v42  ;;  %v5180_v42 = vld [vmem:[%s10443_s0 + $0x310] sm:$0xff] }
0x1955   : > { %v5031_v43 = vmul.f32 %v11180_v39, %v11135_v5  ;;  %v5030_v19 = vmul.f32 %v11180_v39, %v11132_v4  ;;  %v5418_v4 = vunpack.c.l.s8.bf16 %v5178_v62  ;;  %v5420_v49 = vunpack.c.l.s8.bf16 %v5180_v42  ;;  %v5216_v62 = vld [vmem:[%s10443_s0 + $0x430] sm:$0xff] }
0x1956   : > { %v5051_v45 = vmul.f32 %v5042_v33, %v5028_v38  ;;  %v5050_v50 = vmul.f32 %v5038_v29, %v5027_v52  ;;  %v5432_v34 = vunpack.c.h.s8.bf16 %v5180_v42  ;;  %v5479_v52 = vunpack.c.h.s8.bf16 %v5203_v61 }
0x1957   : > { %v5054_v58 = vmul.f32 %v5042_v33, %v5031_v43  ;;  %v5053_v63 = vmul.f32 %v5038_v29, %v5030_v19  ;;  %v5204_v33 = vld [vmem:[%s10443_s0 + $0x3d0] sm:$0xff]  ;;  %v5466_v29 = vunpack.c.l.s8.bf16 %v5202_v25  ;;  %v5481_v43 = vunpack.c.h.s8.bf16 %v5205_v13  ;;  %v5217_v19 = vld [vmem:[%s10443_s0 + $0x438] sm:$0xff] }
0x1958   : > { %v5074_v10 = vadd.f32 %v5065_v16, %v5051_v45  ;;  %v5073_v5 = vadd.f32 %v5061_v48, %v5050_v50  ;;  %v5468_v38 = vunpack.c.l.s8.bf16 %v5204_v33  ;;  %v5480_v45 = vunpack.c.h.s8.bf16 %v5204_v33 }
0x1959   : > { %v5077_v0 = vadd.f32 %v5065_v16, %v5054_v58  ;;  %v5076_v47 = vadd.f32 %v5061_v48, %v5053_v63  ;;  %v5215_v16 = vld [vmem:[%s10443_s0 + $0x428] sm:$0xff]  ;;  %v5478_v48 = vunpack.c.h.s8.bf16 %v5202_v25  ;;  %v5493_v58 = vunpack.c.l.s8.bf16 %v5217_v19  ;;  %v5214_v63 = vld [vmem:[%s10443_s0 + $0x420] sm:$0xff] }
0x195a   : > { %v5491_v50 = vunpack.c.l.s8.bf16 %v5215_v16  ;;  %v5032_v42 = vmul.f32 %v11180_v39, %v11138_v6 }
0x195b   : > { %v11196_v2 = vpack.c.bf16 %v5077_v0, %v5074_v10  ;;  %v11198_v37 = vpack.c.bf16 %v5076_v47, %v5073_v5  ;;  %v5029_v10 = vmul.f32 %v11178_v15, %v11129_v9  ;;  %v5046_v0 = vrot.slane %v11168_v26, %v10622_v46 }
0x195c   : > { %v5490_v5 = vunpack.c.l.s8.bf16 %v5214_v63  ;;  %v5492_v47 = vunpack.c.l.s8.bf16 %v5216_v62  ;;  %v5069_v9 = vrot.slane %v11174_v27, %v10622_v46  ;;  %v5502_v26 = vunpack.c.h.s8.bf16 %v5214_v63 }
0x195d   : > { %5546 = vmatprep.mubr.bf16.mxu0 %v11196_v2  ;;  %5632 = vmatprep.mubr.bf16.mxu1 %v11196_v2  ;;  %v5052_v6 = vmul.f32 %v5046_v0, %v5029_v10  ;;  %v5504_v15 = vunpack.c.h.s8.bf16 %v5216_v62 }
0x195e   : > { %5547 = vmatmul.mubr.bf16.vlgmr.msra.gmra.mrb[36].mxu0 %v11198_v37  ;;  %5633 = vmatmul.mubr.bf16.vlgmr.msra.gmra.mrb[44].mxu1 %v11198_v37 }
0x195f   : > { %5558 = vmatpush1.bf16.msra.mxu0 %v5418_v4  ;;  %5644 = vmatpush1.bf16.msra.mxu1 %v5420_v49  ;;  %v5503_v4 = vunpack.c.h.s8.bf16 %v5215_v16  ;;  %v5505_v49 = vunpack.c.h.s8.bf16 %v5217_v19 }
0x1960   : > { %5559 = vmatprep.subr.bf16.mxu0 %v5431_v56  ;;  %5645 = vmatprep.subr.bf16.mxu1 %v5433_v53  ;;  %v5055_v56 = vmul.f32 %v5046_v0, %v5032_v42  ;;  %v5087_v53 = vld [vmem:[%s10443_s0 + $0x28] sm:$0xff] }
0x1961   : > { %5589 = vmatprep.mubr.bf16.mxu0 %v9735_v23  ;;  %5675 = vmatprep.mubr.bf16.mxu1 %v9735_v23  ;;  %v5231_v22 = vunpack.c.l.s8.bf16 %v5087_v53  ;;  %v5123_v0 = vld [vmem:[%s10443_s0 + $0x148] sm:$0xff] }
0x1962   : > { %v5078_v39 = vadd.f32 %v5069_v9, %v5055_v56  ;;  %v5122_v56 = vld [vmem:[%s10443_s0 + $0x140] sm:$0xff] }
0x1963   : > { %5560 = vmatpush1.bf16.msra.mxu0 %v5430_v57  ;;  %5646 = vmatpush1.bf16.msra.mxu1 %v5432_v34  ;;  %v5233_v57 = vunpack.c.l.s8.bf16 %v5089_v17  ;;  %v5086_v34 = vld [vmem:[%s10443_s0 + $0x20] sm:$0xff] }
0x1964   : > { %5561 = vmatprep.subr.bf16.mxu0 %v5443_v31  ;;  %5647 = vmatprep.subr.bf16.mxu1 %v5445_v1  ;;  %v5088_v31 = vld [vmem:[%s10443_s0 + $0x30] sm:$0xff]  ;;  %v5075_v1 = vadd.f32 %v5069_v9, %v5052_v6  ;;  %v5230_v7 = vunpack.c.l.s8.bf16 %v5086_v34  ;;  %v5242_v61 = vunpack.c.h.s8.bf16 %v5086_v34  ;;  %v5302_v6 = vunpack.c.l.s8.bf16 %v5122_v56 }
0x1965   : > { %v5232_v27 = vunpack.c.l.s8.bf16 %v5088_v31  ;;  %v5244_v13 = vunpack.c.h.s8.bf16 %v5088_v31 }
0x1966   : > { %v11230_v8 = vpack.c.bf16 %v5078_v39, %v5075_v1  ;;  %v5135_v39 = vld [vmem:[%s10443_s0 + $0x1a8] sm:$0xff]  ;;  %v5134_v1 = vld [vmem:[%s10443_s0 + $0x1a0] sm:$0xff] }
0x1967   : > { %5562 = vmatpush1.bf16.msra.mxu0 %v5442_v36  ;;  %5648 = vmatpush1.bf16.msra.mxu1 %v5444_v40  ;;  %v5243_v36 = vunpack.c.h.s8.bf16 %v5087_v53  ;;  %v5245_v40 = vunpack.c.h.s8.bf16 %v5089_v17  ;;  %v5124_v17 = vld [vmem:[%s10443_s0 + $0x150] sm:$0xff]  ;;  %v5327_v31 = vunpack.c.l.s8.bf16 %v5135_v39 }
0x1968   : > { %5563 = vmatprep.subr.bf16.mxu0 %v5455_v12  ;;  %5649 = vmatprep.subr.bf16.mxu1 %v5457_v14  ;;  %v5099_v12 = vld [vmem:[%s10443_s0 + $0x88] sm:$0xff]  ;;  %v5101_v14 = vld [vmem:[%s10443_s0 + $0x98] sm:$0xff]  ;;  %v5304_v9 = vunpack.c.l.s8.bf16 %v5124_v17  ;;  %v5316_v34 = vunpack.c.h.s8.bf16 %v5124_v17  ;;  %v5170_v17 = vld [vmem:[%s10443_s0 + $0x2c0] sm:$0xff] }
0x196b   : > { %5564 = vmatpush1.bf16.msra.mxu0 %v5454_v18  ;;  %5650 = vmatpush1.bf16.msra.mxu1 %v5456_v20  ;;  %v5255_v18 = vunpack.c.l.s8.bf16 %v5099_v12  ;;  %v5098_v20 = vld [vmem:[%s10443_s0 + $0x80] sm:$0xff] }
0x196c   : > { %5565 = vmatprep.subr.bf16.mxu0 %v5467_v3  ;;  %5651 = vmatprep.subr.bf16.mxu1 %v5469_v24  ;;  %v5257_v3 = vunpack.c.l.s8.bf16 %v5101_v14  ;;  %v5100_v24 = vld [vmem:[%s10443_s0 + $0x90] sm:$0xff]  ;;  %v5254_v25 = vunpack.c.l.s8.bf16 %v5098_v20  ;;  %v5266_v16 = vunpack.c.h.s8.bf16 %v5098_v20 }
0x196d   : > { %v5256_v33 = vunpack.c.l.s8.bf16 %v5100_v24  ;;  %v5268_v19 = vunpack.c.h.s8.bf16 %v5100_v24  ;;  %v5146_v24 = vld [vmem:[%s10443_s0 + $0x200] sm:$0xff] }
0x196f   : > { %5566 = vmatpush1.bf16.msra.mxu0 %v5466_v29  ;;  %5652 = vmatpush1.bf16.msra.mxu1 %v5468_v38  ;;  %v5267_v29 = vunpack.c.h.s8.bf16 %v5099_v12  ;;  %v5269_v38 = vunpack.c.h.s8.bf16 %v5101_v14  ;;  %v5339_v12 = vunpack.c.h.s8.bf16 %v5135_v39 }
0x1970   : > { %5567 = vmatprep.subr.bf16.mxu0 %v5479_v52  ;;  %5653 = vmatprep.subr.bf16.mxu1 %v5481_v43  ;;  %v5111_v52 = vld [vmem:[%s10443_s0 + $0xe8] sm:$0xff]  ;;  %v5113_v43 = vld [vmem:[%s10443_s0 + $0xf8] sm:$0xff] }
0x1971   : > { %v5291_v42 = vunpack.c.h.s8.bf16 %v5111_v52  ;;  %v5293_v10 = vunpack.c.h.s8.bf16 %v5113_v43 }
0x1973   : > { %5568 = vmatpush1.bf16.msra.mxu0 %v5478_v48  ;;  %5654 = vmatpush1.bf16.msra.mxu1 %v5480_v45  ;;  %v5279_v48 = vunpack.c.l.s8.bf16 %v5111_v52  ;;  %v5110_v45 = vld [vmem:[%s10443_s0 + $0xe0] sm:$0xff] }
0x1974   : > { %5569 = vmatprep.subr.bf16.mxu0 %v5491_v50  ;;  %5655 = vmatprep.subr.bf16.mxu1 %v5493_v58  ;;  %v5281_v50 = vunpack.c.l.s8.bf16 %v5113_v43  ;;  %v5112_v58 = vld [vmem:[%s10443_s0 + $0xf0] sm:$0xff]  ;;  %v5278_v63 = vunpack.c.l.s8.bf16 %v5110_v45 }
0x1975   : > { %v5280_v62 = vunpack.c.l.s8.bf16 %v5112_v58 }
0x1977   : > { %5570 = vmatpush1.bf16.msra.mxu0 %v5490_v5  ;;  %5656 = vmatpush1.bf16.msra.mxu1 %v5492_v47  ;;  %v5125_v5 = vld [vmem:[%s10443_s0 + $0x158] sm:$0xff]  ;;  %v5290_v47 = vunpack.c.h.s8.bf16 %v5110_v45 }
0x1978   : > { %5571 = vmatprep.subr.bf16.mxu0 %v5503_v4  ;;  %5657 = vmatprep.subr.bf16.mxu1 %v5505_v49  ;;  %v5292_v4 = vunpack.c.h.s8.bf16 %v5112_v58  ;;  %v5303_v49 = vunpack.c.l.s8.bf16 %v5123_v0  ;;  %v5305_v53 = vunpack.c.l.s8.bf16 %v5125_v5  ;;  %v5158_v58 = vld [vmem:[%s10443_s0 + $0x260] sm:$0xff] }
0x197b   : > { %5572 = vmatpush1.bf16.msra.mxu0 %v5502_v26  ;;  %5658 = vmatpush1.bf16.msra.mxu1 %v5504_v15  ;;  %v5315_v26 = vunpack.c.h.s8.bf16 %v5123_v0  ;;  %v5317_v15 = vunpack.c.h.s8.bf16 %v5125_v5 }
0x197c   : > { %5686 = vmatprep.subr.bf16.mxu0 %v5231_v22  ;;  %5772 = vmatprep.subr.bf16.mxu1 %v5233_v57  ;;  %v5137_v22 = vld [vmem:[%s10443_s0 + $0x1b8] sm:$0xff]  ;;  %v5314_v57 = vunpack.c.h.s8.bf16 %v5122_v56 }
0x197d   : > { %v5341_v14 = vunpack.c.h.s8.bf16 %v5137_v22 }
0x197e   : > { %5590 = vmatmul.mubr.bf16.vlgmr.msra.gmra.mrb[36].mxu0 %v11230_v8  ;;  %5676 = vmatmul.mubr.bf16.vlgmr.msra.gmra.mrb[44].mxu1 %v11230_v8 }
0x197f   : > { %5687 = vmatpush1.bf16.msra.mxu0 %v5230_v7  ;;  %5718 = vmatprep.mubr.bf16.mxu0 %v11196_v2  ;;  %v5329_v7 = vunpack.c.l.s8.bf16 %v5137_v22 }
0x1980   : > { %5773 = vmatpush1.bf16.msra.mxu1 %v5232_v27  ;;  %5804 = vmatprep.mubr.bf16.mxu1 %v11196_v2  ;;  %v5136_v27 = vld [vmem:[%s10443_s0 + $0x1b0] sm:$0xff] }
0x1981   : > { %5688 = vmatprep.subr.bf16.mxu0 %v5243_v36  ;;  %5774 = vmatprep.subr.bf16.mxu1 %v5245_v40  ;;  %v5326_v36 = vunpack.c.l.s8.bf16 %v5134_v1  ;;  %v5328_v40 = vunpack.c.l.s8.bf16 %v5136_v27  ;;  %v5340_v20 = vunpack.c.h.s8.bf16 %v5136_v27  ;;  %v5182_v27 = vld [vmem:[%s10443_s0 + $0x320] sm:$0xff] }
0x1983   : > { %5689 = vmatpush1.bf16.msra.mxu0 %v5242_v61  ;;  %v5147_v61 = vld [vmem:[%s10443_s0 + $0x208] sm:$0xff] }
0x1984   : > { %5775 = vmatpush1.bf16.msra.mxu1 %v5244_v13  ;;  %5690 = vmatprep.subr.bf16.mxu0 %v5255_v18  ;;  %v5149_v13 = vld [vmem:[%s10443_s0 + $0x218] sm:$0xff]  ;;  %v5338_v18 = vunpack.c.h.s8.bf16 %v5134_v1  ;;  %v5363_v52 = vunpack.c.h.s8.bf16 %v5147_v61 }
0x1985   : > { %5776 = vmatprep.subr.bf16.mxu1 %v5257_v3  ;;  %v5351_v3 = vunpack.c.l.s8.bf16 %v5147_v61  ;;  %v5365_v43 = vunpack.c.h.s8.bf16 %v5149_v13 }
0x1987   : > { %5691 = vmatpush1.bf16.msra.mxu0 %v5254_v25  ;;  %v5353_v25 = vunpack.c.l.s8.bf16 %v5149_v13 }
0x1988   : > { %5777 = vmatpush1.bf16.msra.mxu1 %v5256_v33  ;;  %5692 = vmatprep.subr.bf16.mxu0 %v5267_v29  ;;  %v5148_v33 = vld [vmem:[%s10443_s0 + $0x210] sm:$0xff]  ;;  %v5350_v29 = vunpack.c.l.s8.bf16 %v5146_v24 }
0x1989   : > { %5778 = vmatprep.subr.bf16.mxu1 %v5269_v38  ;;  %v5352_v38 = vunpack.c.l.s8.bf16 %v5148_v33  ;;  %v5364_v45 = vunpack.c.h.s8.bf16 %v5148_v33  ;;  %v5194_v33 = vld [vmem:[%s10443_s0 + $0x380] sm:$0xff] }
0x198b   : > { %5693 = vmatpush1.bf16.msra.mxu0 %v5266_v16  ;;  %v5159_v16 = vld [vmem:[%s10443_s0 + $0x268] sm:$0xff] }
0x198c   : > { %5779 = vmatpush1.bf16.msra.mxu1 %v5268_v19  ;;  %5694 = vmatprep.subr.bf16.mxu0 %v5279_v48  ;;  %v5161_v19 = vld [vmem:[%s10443_s0 + $0x278] sm:$0xff]  ;;  %v5362_v48 = vunpack.c.h.s8.bf16 %v5146_v24  ;;  %v5387_v0 = vunpack.c.h.s8.bf16 %v5159_v16 }
0x198d   : > { %5780 = vmatprep.subr.bf16.mxu1 %v5281_v50  ;;  %v5375_v50 = vunpack.c.l.s8.bf16 %v5159_v16  ;;  %v5389_v5 = vunpack.c.h.s8.bf16 %v5161_v19 }
0x198f   : > { %5695 = vmatpush1.bf16.msra.mxu0 %v5278_v63  ;;  %v5377_v63 = vunpack.c.l.s8.bf16 %v5161_v19 }
0x1990   : > { %5781 = vmatpush1.bf16.msra.mxu1 %v5280_v62  ;;  %5696 = vmatprep.subr.bf16.mxu0 %v5291_v42  ;;  %v5160_v62 = vld [vmem:[%s10443_s0 + $0x270] sm:$0xff]  ;;  %v5374_v42 = vunpack.c.l.s8.bf16 %v5158_v58 }
0x1991   : > { %5782 = vmatprep.subr.bf16.mxu1 %v5293_v10  ;;  %v5376_v10 = vunpack.c.l.s8.bf16 %v5160_v62  ;;  %v5388_v56 = vunpack.c.h.s8.bf16 %v5160_v62  ;;  %v5206_v62 = vld [vmem:[%s10443_s0 + $0x3e0] sm:$0xff] }
0x1993   : > { %5697 = vmatpush1.bf16.msra.mxu0 %v5290_v47  ;;  %v5171_v47 = vld [vmem:[%s10443_s0 + $0x2c8] sm:$0xff] }
0x1994   : > { %5783 = vmatpush1.bf16.msra.mxu1 %v5292_v4  ;;  %5698 = vmatprep.subr.bf16.mxu0 %v5303_v49  ;;  %v5173_v4 = vld [vmem:[%s10443_s0 + $0x2d8] sm:$0xff]  ;;  %v5386_v49 = vunpack.c.h.s8.bf16 %v5158_v58  ;;  %v5411_v39 = vunpack.c.h.s8.bf16 %v5171_v47 }
0x1995   : > { %5784 = vmatprep.subr.bf16.mxu1 %v5305_v53  ;;  %v5399_v53 = vunpack.c.l.s8.bf16 %v5171_v47  ;;  %v5413_v22 = vunpack.c.h.s8.bf16 %v5173_v4 }
0x1997   : > { %5699 = vmatpush1.bf16.msra.mxu0 %v5302_v6  ;;  %v5401_v6 = vunpack.c.l.s8.bf16 %v5173_v4 }
0x1998   : > { %5785 = vmatpush1.bf16.msra.mxu1 %v5304_v9  ;;  %5700 = vmatprep.subr.bf16.mxu0 %v5315_v26  ;;  %v5172_v9 = vld [vmem:[%s10443_s0 + $0x2d0] sm:$0xff]  ;;  %v5398_v26 = vunpack.c.l.s8.bf16 %v5170_v17 }
0x1999   : > { %5786 = vmatprep.subr.bf16.mxu1 %v5317_v15  ;;  %v5400_v15 = vunpack.c.l.s8.bf16 %v5172_v9  ;;  %v5412_v1 = vunpack.c.h.s8.bf16 %v5172_v9  ;;  %v5218_v9 = vld [vmem:[%s10443_s0 + $0x440] sm:$0xff] }
0x199b   : > { %5701 = vmatpush1.bf16.msra.mxu0 %v5314_v57  ;;  %v5183_v57 = vld [vmem:[%s10443_s0 + $0x328] sm:$0xff] }
0x199c   : > { %5787 = vmatpush1.bf16.msra.mxu1 %v5316_v34  ;;  %5702 = vmatprep.subr.bf16.mxu0 %v5327_v31  ;;  %v5185_v34 = vld [vmem:[%s10443_s0 + $0x338] sm:$0xff]  ;;  %v5410_v31 = vunpack.c.h.s8.bf16 %v5170_v17  ;;  %v5435_v61 = vunpack.c.h.s8.bf16 %v5183_v57 }
0x199d   : > { %5788 = vmatprep.subr.bf16.mxu1 %v5329_v7  ;;  %v5423_v7 = vunpack.c.l.s8.bf16 %v5183_v57  ;;  %v5437_v13 = vunpack.c.h.s8.bf16 %v5185_v34 }
0x199f   : > { %5703 = vmatpush1.bf16.msra.mxu0 %v5326_v36  ;;  %v5425_v36 = vunpack.c.l.s8.bf16 %v5185_v34 }
0x19a0   : > { %5789 = vmatpush1.bf16.msra.mxu1 %v5328_v40  ;;  %5704 = vmatprep.subr.bf16.mxu0 %v5339_v12  ;;  %v5184_v40 = vld [vmem:[%s10443_s0 + $0x330] sm:$0xff]  ;;  %v5422_v12 = vunpack.c.l.s8.bf16 %v5182_v27 }
0x19a1   : > { %5790 = vmatprep.subr.bf16.mxu1 %v5341_v14  ;;  %v5424_v14 = vunpack.c.l.s8.bf16 %v5184_v40  ;;  %v5436_v24 = vunpack.c.h.s8.bf16 %v5184_v40  ;;  %v5090_v40 = vld [vmem:[%s10443_s0 + $0x40] sm:$0xff] }
0x19a3   : > { %5705 = vmatpush1.bf16.msra.mxu0 %v5338_v18  ;;  %v5195_v18 = vld [vmem:[%s10443_s0 + $0x388] sm:$0xff] }
0x19a4   : > { %5791 = vmatpush1.bf16.msra.mxu1 %v5340_v20  ;;  %5706 = vmatprep.subr.bf16.mxu0 %v5351_v3  ;;  %v5197_v20 = vld [vmem:[%s10443_s0 + $0x398] sm:$0xff]  ;;  %v5434_v3 = vunpack.c.h.s8.bf16 %v5182_v27  ;;  %v5459_v16 = vunpack.c.h.s8.bf16 %v5195_v18 }
0x19a5   : > { %5792 = vmatprep.subr.bf16.mxu1 %v5353_v25  ;;  %v5447_v25 = vunpack.c.l.s8.bf16 %v5195_v18  ;;  %v5461_v19 = vunpack.c.h.s8.bf16 %v5197_v20 }
0x19a7   : > { %5707 = vmatpush1.bf16.msra.mxu0 %v5350_v29  ;;  %v5449_v29 = vunpack.c.l.s8.bf16 %v5197_v20  ;;  %v5103_v20 = vld [vmem:[%s10443_s0 + $0xa8] sm:$0xff] }
0x19a8   : > { %5793 = vmatpush1.bf16.msra.mxu1 %v5352_v38  ;;  %5708 = vmatprep.subr.bf16.mxu0 %v5363_v52  ;;  %v5196_v38 = vld [vmem:[%s10443_s0 + $0x390] sm:$0xff]  ;;  %v5446_v52 = vunpack.c.l.s8.bf16 %v5194_v33 }
0x19a9   : > { %5794 = vmatprep.subr.bf16.mxu1 %v5365_v43  ;;  %v5448_v43 = vunpack.c.l.s8.bf16 %v5196_v38  ;;  %v5460_v58 = vunpack.c.h.s8.bf16 %v5196_v38  ;;  %v5102_v38 = vld [vmem:[%s10443_s0 + $0xa0] sm:$0xff] }
0x19ab   : > { %5709 = vmatpush1.bf16.msra.mxu0 %v5362_v48  ;;  %v5207_v48 = vld [vmem:[%s10443_s0 + $0x3e8] sm:$0xff] }
0x19ac   : > { %5795 = vmatpush1.bf16.msra.mxu1 %v5364_v45  ;;  %5710 = vmatprep.subr.bf16.mxu0 %v5375_v50  ;;  %v5209_v45 = vld [vmem:[%s10443_s0 + $0x3f8] sm:$0xff]  ;;  %v5458_v50 = vunpack.c.h.s8.bf16 %v5194_v33  ;;  %v5483_v47 = vunpack.c.h.s8.bf16 %v5207_v48 }
0x19ad   : > { %5796 = vmatprep.subr.bf16.mxu1 %v5377_v63  ;;  %v5471_v63 = vunpack.c.l.s8.bf16 %v5207_v48  ;;  %v5485_v4 = vunpack.c.h.s8.bf16 %v5209_v45  ;;  %v5271_v48 = vunpack.c.h.s8.bf16 %v5103_v20 }
0x19af   : > { %5711 = vmatpush1.bf16.msra.mxu0 %v5374_v42  ;;  %v5473_v42 = vunpack.c.l.s8.bf16 %v5209_v45 }
0x19b0   : > { %5797 = vmatpush1.bf16.msra.mxu1 %v5376_v10  ;;  %5712 = vmatprep.subr.bf16.mxu0 %v5387_v0  ;;  %v5208_v10 = vld [vmem:[%s10443_s0 + $0x3f0] sm:$0xff]  ;;  %v5470_v0 = vunpack.c.l.s8.bf16 %v5206_v62 }
0x19b1   : > { %5798 = vmatprep.subr.bf16.mxu1 %v5389_v5  ;;  %v5472_v5 = vunpack.c.l.s8.bf16 %v5208_v10  ;;  %v5484_v17 = vunpack.c.h.s8.bf16 %v5208_v10 }
0x19b3   : > { %5713 = vmatpush1.bf16.msra.mxu0 %v5386_v49  ;;  %v5219_v49 = vld [vmem:[%s10443_s0 + $0x448] sm:$0xff] }
0x19b4   : > { %5799 = vmatpush1.bf16.msra.mxu1 %v5388_v56  ;;  %5714 = vmatprep.subr.bf16.mxu0 %v5399_v53  ;;  %v5221_v56 = vld [vmem:[%s10443_s0 + $0x458] sm:$0xff]  ;;  %v5482_v53 = vunpack.c.h.s8.bf16 %v5206_v62  ;;  %v5507_v57 = vunpack.c.h.s8.bf16 %v5219_v49 }
0x19b5   : > { %5800 = vmatprep.subr.bf16.mxu1 %v5401_v6  ;;  %v5495_v6 = vunpack.c.l.s8.bf16 %v5219_v49  ;;  %v5509_v34 = vunpack.c.h.s8.bf16 %v5221_v56 }
0x19b7   : > { %5715 = vmatpush1.bf16.msra.mxu0 %v5398_v26  ;;  %v5497_v26 = vunpack.c.l.s8.bf16 %v5221_v56  ;;  %v5127_v56 = vld [vmem:[%s10443_s0 + $0x168] sm:$0xff] }
0x19b8   : > { %5801 = vmatpush1.bf16.msra.mxu1 %v5400_v15  ;;  %5716 = vmatprep.subr.bf16.mxu0 %v5411_v39  ;;  %v5220_v15 = vld [vmem:[%s10443_s0 + $0x450] sm:$0xff]  ;;  %v5494_v39 = vunpack.c.l.s8.bf16 %v5218_v9 }
0x19b9   : > { %5802 = vmatprep.subr.bf16.mxu1 %v5413_v22  ;;  %v5496_v22 = vunpack.c.l.s8.bf16 %v5220_v15  ;;  %v5508_v27 = vunpack.c.h.s8.bf16 %v5220_v15 }
0x19bb   : > { %5717 = vmatpush1.bf16.msra.mxu0 %v5410_v31  ;;  %v5091_v31 = vld [vmem:[%s10443_s0 + $0x48] sm:$0xff] }
0x19bc   : > { %5803 = vmatpush1.bf16.msra.mxu1 %v5412_v1  ;;  %5729 = vmatprep.subr.bf16.mxu0 %v5423_v7  ;;  %v5093_v1 = vld [vmem:[%s10443_s0 + $0x58] sm:$0xff]  ;;  %v5506_v7 = vunpack.c.h.s8.bf16 %v5218_v9  ;;  %v5247_v18 = vunpack.c.h.s8.bf16 %v5091_v31  ;;  %v5307_v9 = vunpack.c.l.s8.bf16 %v5127_v56 }
0x19bd   : > { %5815 = vmatprep.subr.bf16.mxu1 %v5425_v36  ;;  %v5235_v36 = vunpack.c.l.s8.bf16 %v5091_v31 }
0x19be   : > { %5719 = vmatmul.mubr.bf16.vlgmr.msra.gmra.mrb[40].mxu0 %v11198_v37 }
0x19bf   : > { %5805 = vmatmul.mubr.bf16.vlgmr.msra.gmra.mrb[48].mxu1 %v11198_v37  ;;  %5730 = vmatpush1.bf16.msra.mxu0 %v5422_v12  ;;  %v5237_v12 = vunpack.c.l.s8.bf16 %v5093_v1 }
0x19c0   : > { %5816 = vmatpush1.bf16.msra.mxu1 %v5424_v14  ;;  %5731 = vmatprep.subr.bf16.mxu0 %v5435_v61  ;;  %v5092_v14 = vld [vmem:[%s10443_s0 + $0x50] sm:$0xff]  ;;  %v5234_v61 = vunpack.c.l.s8.bf16 %v5090_v40 }
0x19c1   : > { %5817 = vmatprep.subr.bf16.mxu1 %v5437_v13  ;;  %5761 = vmatprep.mubr.bf16.mxu0 %v9735_v23  ;;  %v5236_v13 = vunpack.c.l.s8.bf16 %v5092_v14  ;;  %v5248_v33 = vunpack.c.h.s8.bf16 %v5092_v14 }
0x19c2   : > { %5847 = vmatprep.mubr.bf16.mxu1 %v9735_v23 }
0x19c3   : > { %5732 = vmatpush1.bf16.msra.mxu0 %v5434_v3  ;;  %v5249_v3 = vunpack.c.h.s8.bf16 %v5093_v1  ;;  %v5139_v1 = vld [vmem:[%s10443_s0 + $0x1c8] sm:$0xff] }
0x19c4   : > { %5818 = vmatpush1.bf16.msra.mxu1 %v5436_v24  ;;  %5733 = vmatprep.subr.bf16.mxu0 %v5447_v25  ;;  %v5105_v24 = vld [vmem:[%s10443_s0 + $0xb8] sm:$0xff]  ;;  %v5246_v25 = vunpack.c.h.s8.bf16 %v5090_v40  ;;  %v5331_v40 = vunpack.c.l.s8.bf16 %v5139_v1 }
0x19c5   : > { %5819 = vmatprep.subr.bf16.mxu1 %v5449_v29  ;;  %v5259_v29 = vunpack.c.l.s8.bf16 %v5103_v20  ;;  %v5273_v45 = vunpack.c.h.s8.bf16 %v5105_v24  ;;  %v5343_v20 = vunpack.c.h.s8.bf16 %v5139_v1 }
0x19c7   : > { %5734 = vmatpush1.bf16.msra.mxu0 %v5446_v52  ;;  %v5261_v52 = vunpack.c.l.s8.bf16 %v5105_v24  ;;  %v5151_v24 = vld [vmem:[%s10443_s0 + $0x228] sm:$0xff] }
0x19c8   : > { %5820 = vmatpush1.bf16.msra.mxu1 %v5448_v43  ;;  %5735 = vmatprep.subr.bf16.mxu0 %v5459_v16  ;;  %v5104_v43 = vld [vmem:[%s10443_s0 + $0xb0] sm:$0xff]  ;;  %v5258_v16 = vunpack.c.l.s8.bf16 %v5102_v38 }
0x19c9   : > { %5821 = vmatprep.subr.bf16.mxu1 %v5461_v19  ;;  %v5260_v19 = vunpack.c.l.s8.bf16 %v5104_v43 }
0x19cb   : > { %5736 = vmatpush1.bf16.msra.mxu0 %v5458_v50  ;;  %v5115_v50 = vld [vmem:[%s10443_s0 + $0x108] sm:$0xff] }
0x19cc   : > { %5822 = vmatpush1.bf16.msra.mxu1 %v5460_v58  ;;  %5737 = vmatprep.subr.bf16.mxu0 %v5471_v63  ;;  %v5117_v58 = vld [vmem:[%s10443_s0 + $0x118] sm:$0xff]  ;;  %v5270_v63 = vunpack.c.h.s8.bf16 %v5102_v38  ;;  %v5283_v62 = vunpack.c.l.s8.bf16 %v5115_v50  ;;  %v5355_v38 = vunpack.c.l.s8.bf16 %v5151_v24 }
0x19cd   : > { %5823 = vmatprep.subr.bf16.mxu1 %v5473_v42  ;;  %v5114_v42 = vld [vmem:[%s10443_s0 + $0x100] sm:$0xff]  ;;  %v5285_v10 = vunpack.c.l.s8.bf16 %v5117_v58  ;;  %v5297_v49 = vunpack.c.h.s8.bf16 %v5117_v58  ;;  %v5163_v58 = vld [vmem:[%s10443_s0 + $0x288] sm:$0xff] }
0x19cf   : > { %5738 = vmatpush1.bf16.msra.mxu0 %v5470_v0  ;;  %v5116_v0 = vld [vmem:[%s10443_s0 + $0x110] sm:$0xff] }
0x19d0   : > { %5824 = vmatpush1.bf16.msra.mxu1 %v5472_v5  ;;  %5739 = vmatprep.subr.bf16.mxu0 %v5483_v47  ;;  %v5282_v5 = vunpack.c.l.s8.bf16 %v5114_v42  ;;  %v5284_v47 = vunpack.c.l.s8.bf16 %v5116_v0 }
0x19d1   : > { %5825 = vmatprep.subr.bf16.mxu1 %v5485_v4  ;;  %v5295_v4 = vunpack.c.h.s8.bf16 %v5115_v50 }
0x19d3   : > { %5740 = vmatpush1.bf16.msra.mxu0 %v5482_v53  ;;  %v5129_v53 = vld [vmem:[%s10443_s0 + $0x178] sm:$0xff] }
0x19d4   : > { %5826 = vmatpush1.bf16.msra.mxu1 %v5484_v17  ;;  %5741 = vmatprep.subr.bf16.mxu0 %v5495_v6  ;;  %v5294_v17 = vunpack.c.h.s8.bf16 %v5114_v42  ;;  %v5296_v6 = vunpack.c.h.s8.bf16 %v5116_v0  ;;  %v5309_v15 = vunpack.c.l.s8.bf16 %v5129_v53  ;;  %v5321_v31 = vunpack.c.h.s8.bf16 %v5129_v53  ;;  %v5175_v53 = vld [vmem:[%s10443_s0 + $0x2e8] sm:$0xff] }
0x19d5   : > { %5827 = vmatprep.subr.bf16.mxu1 %v5497_v26  ;;  %v5126_v26 = vld [vmem:[%s10443_s0 + $0x160] sm:$0xff]  ;;  %v5379_v42 = vunpack.c.l.s8.bf16 %v5163_v58 }
0x19d7   : > { %5742 = vmatpush1.bf16.msra.mxu0 %v5494_v39  ;;  %v5128_v39 = vld [vmem:[%s10443_s0 + $0x170] sm:$0xff] }
0x19d8   : > { %5828 = vmatpush1.bf16.msra.mxu1 %v5496_v22  ;;  %5743 = vmatprep.subr.bf16.mxu0 %v5507_v57  ;;  %v5306_v22 = vunpack.c.l.s8.bf16 %v5126_v26  ;;  %v5308_v57 = vunpack.c.l.s8.bf16 %v5128_v39 }
0x19d9   : > { %5829 = vmatprep.subr.bf16.mxu1 %v5509_v34  ;;  %v5319_v34 = vunpack.c.h.s8.bf16 %v5127_v56 }
0x19db   : > { %5744 = vmatpush1.bf16.msra.mxu0 %v5506_v7  ;;  %v5141_v7 = vld [vmem:[%s10443_s0 + $0x1d8] sm:$0xff] }
0x19dc   : > { %5830 = vmatpush1.bf16.msra.mxu1 %v5508_v27  ;;  %5858 = vmatprep.subr.bf16.mxu0 %v5235_v36  ;;  %v5318_v27 = vunpack.c.h.s8.bf16 %v5126_v26  ;;  %v5320_v36 = vunpack.c.h.s8.bf16 %v5128_v39  ;;  %v5333_v14 = vunpack.c.l.s8.bf16 %v5141_v7  ;;  %v5403_v26 = vunpack.c.l.s8.bf16 %v5175_v53 }
0x19dd   : > { %5944 = vmatprep.subr.bf16.mxu1 %v5237_v12  ;;  %v5138_v12 = vld [vmem:[%s10443_s0 + $0x1c0] sm:$0xff] }
0x19de   : > { %5762 = vmatmul.mubr.bf16.vlgmr.msra.gmra.mrb[40].mxu0 %v11230_v8 }
0x19df   : > { %5848 = vmatmul.mubr.bf16.vlgmr.msra.gmra.mrb[48].mxu1 %v11230_v8  ;;  %5859 = vmatpush1.bf16.msra.mxu0 %v5234_v61  ;;  %v5140_v61 = vld [vmem:[%s10443_s0 + $0x1d0] sm:$0xff] }
0x19e0   : > { %5890 = vmatprep.mubr.bf16.mxu0 %v11196_v2  ;;  %5945 = vmatpush1.bf16.msra.mxu1 %v5236_v13  ;;  %v5330_v13 = vunpack.c.l.s8.bf16 %v5138_v12 }
0x19e1   : > { %5976 = vmatprep.mubr.bf16.mxu1 %v11196_v2  ;;  %5860 = vmatprep.subr.bf16.mxu0 %v5247_v18  ;;  %v5272_v2 = vunpack.c.h.s8.bf16 %v5104_v43  ;;  %v5332_v18 = vunpack.c.l.s8.bf16 %v5140_v61 }
0x19e2   : > { %5946 = vmatprep.subr.bf16.mxu1 %v5249_v3  ;;  %v5345_v3 = vunpack.c.h.s8.bf16 %v5141_v7  ;;  %v5187_v7 = vld [vmem:[%s10443_s0 + $0x348] sm:$0xff] }
0x19e3   : > { %5861 = vmatpush1.bf16.msra.mxu0 %v5246_v25  ;;  %v5153_v25 = vld [vmem:[%s10443_s0 + $0x238] sm:$0xff] }
0x19e4   : > { %5947 = vmatpush1.bf16.msra.mxu1 %v5248_v33  ;;  %5862 = vmatprep.subr.bf16.mxu0 %v5259_v29  ;;  %v5342_v33 = vunpack.c.h.s8.bf16 %v5138_v12  ;;  %v5344_v29 = vunpack.c.h.s8.bf16 %v5140_v61  ;;  %v5357_v43 = vunpack.c.l.s8.bf16 %v5153_v25  ;;  %v5369_v50 = vunpack.c.h.s8.bf16 %v5153_v25  ;;  %v5199_v25 = vld [vmem:[%s10443_s0 + $0x3a8] sm:$0xff] }
0x19e5   : > { %5948 = vmatprep.subr.bf16.mxu1 %v5261_v52  ;;  %v5150_v52 = vld [vmem:[%s10443_s0 + $0x220] sm:$0xff]  ;;  %v5427_v12 = vunpack.c.l.s8.bf16 %v5187_v7 }
0x19e7   : > { %5863 = vmatpush1.bf16.msra.mxu0 %v5258_v16  ;;  %v5152_v16 = vld [vmem:[%s10443_s0 + $0x230] sm:$0xff] }
0x19e8   : > { %5949 = vmatpush1.bf16.msra.mxu1 %v5260_v19  ;;  %5864 = vmatprep.subr.bf16.mxu0 %v5271_v48  ;;  %v5354_v19 = vunpack.c.l.s8.bf16 %v5150_v52  ;;  %v5356_v48 = vunpack.c.l.s8.bf16 %v5152_v16 }
0x19e9   : > { %5950 = vmatprep.subr.bf16.mxu1 %v5273_v45  ;;  %v5367_v45 = vunpack.c.h.s8.bf16 %v5151_v24 }
0x19eb   : > { %5865 = vmatpush1.bf16.msra.mxu0 %v5270_v63  ;;  %v5165_v63 = vld [vmem:[%s10443_s0 + $0x298] sm:$0xff] }
0x19ec   : > { %5951 = vmatpush1.bf16.msra.mxu1 %v5272_v2  ;;  %5866 = vmatprep.subr.bf16.mxu0 %v5283_v62  ;;  %v5366_v2 = vunpack.c.h.s8.bf16 %v5150_v52  ;;  %v5368_v62 = vunpack.c.h.s8.bf16 %v5152_v16  ;;  %v5381_v0 = vunpack.c.l.s8.bf16 %v5165_v63  ;;  %v5393_v56 = vunpack.c.h.s8.bf16 %v5165_v63  ;;  %v5213_v63 = vld [vmem:[%s10443_s0 + $0x418] sm:$0xff] }
0x19ed   : > { %5952 = vmatprep.subr.bf16.mxu1 %v5285_v10  ;;  %v5162_v10 = vld [vmem:[%s10443_s0 + $0x280] sm:$0xff]  ;;  %v5451_v52 = vunpack.c.l.s8.bf16 %v5199_v25 }
0x19ef   : > { %5867 = vmatpush1.bf16.msra.mxu0 %v5282_v5  ;;  %v5164_v5 = vld [vmem:[%s10443_s0 + $0x290] sm:$0xff] }
0x19f0   : > { %5953 = vmatpush1.bf16.msra.mxu1 %v5284_v47  ;;  %5868 = vmatprep.subr.bf16.mxu0 %v5295_v4  ;;  %v5378_v47 = vunpack.c.l.s8.bf16 %v5162_v10  ;;  %v5380_v4 = vunpack.c.l.s8.bf16 %v5164_v5 }
0x19f1   : > { %5954 = vmatprep.subr.bf16.mxu1 %v5297_v49  ;;  %v5391_v49 = vunpack.c.h.s8.bf16 %v5163_v58  ;;  %v5211_v58 = vld [vmem:[%s10443_s0 + $0x408] sm:$0xff] }
0x19f3   : > { %5869 = vmatpush1.bf16.msra.mxu0 %v5294_v17  ;;  %v5177_v17 = vld [vmem:[%s10443_s0 + $0x2f8] sm:$0xff] }
0x19f4   : > { %5955 = vmatpush1.bf16.msra.mxu1 %v5296_v6  ;;  %5870 = vmatprep.subr.bf16.mxu0 %v5307_v9  ;;  %v5390_v6 = vunpack.c.h.s8.bf16 %v5162_v10  ;;  %v5392_v9 = vunpack.c.h.s8.bf16 %v5164_v5  ;;  %v5405_v39 = vunpack.c.l.s8.bf16 %v5177_v17  ;;  %v5417_v1 = vunpack.c.h.s8.bf16 %v5177_v17 }
0x19f5   : > { %5956 = vmatprep.subr.bf16.mxu1 %v5309_v15  ;;  %v5174_v15 = vld [vmem:[%s10443_s0 + $0x2e0] sm:$0xff]  ;;  %v5477_v10 = vunpack.c.l.s8.bf16 %v5213_v63 }
0x19f7   : > { %5871 = vmatpush1.bf16.msra.mxu0 %v5306_v22  ;;  %v5176_v22 = vld [vmem:[%s10443_s0 + $0x2f0] sm:$0xff] }
0x19f8   : > { %5957 = vmatpush1.bf16.msra.mxu1 %v5308_v57  ;;  %5872 = vmatprep.subr.bf16.mxu0 %v5319_v34  ;;  %v5402_v57 = vunpack.c.l.s8.bf16 %v5174_v15  ;;  %v5404_v34 = vunpack.c.l.s8.bf16 %v5176_v22 }
0x19f9   : > { %5958 = vmatprep.subr.bf16.mxu1 %v5321_v31  ;;  %v5415_v31 = vunpack.c.h.s8.bf16 %v5175_v53  ;;  %v5225_v53 = vld [vmem:[%s10443_s0 + $0x478] sm:$0xff] }
0x19fb   : > { %5873 = vmatpush1.bf16.msra.mxu0 %v5318_v27  ;;  %v5189_v27 = vld [vmem:[%s10443_s0 + $0x358] sm:$0xff] }
0x19fc   : > { %5959 = vmatpush1.bf16.msra.mxu1 %v5320_v36  ;;  %5874 = vmatprep.subr.bf16.mxu0 %v5331_v40  ;;  %v5414_v36 = vunpack.c.h.s8.bf16 %v5174_v15  ;;  %v5416_v40 = vunpack.c.h.s8.bf16 %v5176_v22  ;;  %v5429_v61 = vunpack.c.l.s8.bf16 %v5189_v27  ;;  %v5441_v24 = vunpack.c.h.s8.bf16 %v5189_v27 }
0x19fd   : > { %5960 = vmatprep.subr.bf16.mxu1 %v5333_v14  ;;  %v5186_v14 = vld [vmem:[%s10443_s0 + $0x340] sm:$0xff]  ;;  %v5501_v15 = vunpack.c.l.s8.bf16 %v5225_v53 }
0x19ff   : > { %5875 = vmatpush1.bf16.msra.mxu0 %v5330_v13  ;;  %v5188_v13 = vld [vmem:[%s10443_s0 + $0x350] sm:$0xff] }
0x1a00   : > { %5961 = vmatpush1.bf16.msra.mxu1 %v5332_v18  ;;  %5876 = vmatprep.subr.bf16.mxu0 %v5343_v20  ;;  %v5426_v18 = vunpack.c.l.s8.bf16 %v5186_v14  ;;  %v5428_v20 = vunpack.c.l.s8.bf16 %v5188_v13 }
0x1a01   : > { %5962 = vmatprep.subr.bf16.mxu1 %v5345_v3  ;;  %v5439_v3 = vunpack.c.h.s8.bf16 %v5187_v7  ;;  %v6256_v7 = vld [vmem:[%s10449_s4 + $0x70] sm:$0xff] }
0x1a03   : > { %5877 = vmatpush1.bf16.msra.mxu0 %v5342_v33  ;;  %v5201_v33 = vld [vmem:[%s10443_s0 + $0x3b8] sm:$0xff] }
0x1a04   : > { %5963 = vmatpush1.bf16.msra.mxu1 %v5344_v29  ;;  %5878 = vmatprep.subr.bf16.mxu0 %v5355_v38  ;;  %v5438_v29 = vunpack.c.h.s8.bf16 %v5186_v14  ;;  %v5440_v38 = vunpack.c.h.s8.bf16 %v5188_v13  ;;  %v5453_v16 = vunpack.c.l.s8.bf16 %v5201_v33  ;;  %v6412_v14 = vunpack.c.l.s8.bf16 %v6256_v7 }
0x1a05   : > { %5964 = vmatprep.subr.bf16.mxu1 %v5357_v43  ;;  %v5198_v43 = vld [vmem:[%s10443_s0 + $0x3a0] sm:$0xff] }
0x1a07   : > { %5879 = vmatpush1.bf16.msra.mxu0 %v5354_v19  ;;  %v5200_v19 = vld [vmem:[%s10443_s0 + $0x3b0] sm:$0xff] }
0x1a08   : > { %5965 = vmatpush1.bf16.msra.mxu1 %v5356_v48  ;;  %5880 = vmatprep.subr.bf16.mxu0 %v5367_v45  ;;  %v5450_v48 = vunpack.c.l.s8.bf16 %v5198_v43  ;;  %v5463_v45 = vunpack.c.h.s8.bf16 %v5199_v25  ;;  %v6259_v25 = vld [vmem:[%s10449_s4 + $0x88] sm:$0xff] }
0x1a09   : > { %5966 = vmatprep.subr.bf16.mxu1 %v5369_v50  ;;  %v5465_v50 = vunpack.c.h.s8.bf16 %v5201_v33 }
0x1a0b   : > { %5881 = vmatpush1.bf16.msra.mxu0 %v5366_v2  ;;  %v5462_v2 = vunpack.c.h.s8.bf16 %v5198_v43  ;;  %v6418_v43 = vunpack.c.l.s8.bf16 %v6259_v25 }
0x1a0c   : > { %5967 = vmatpush1.bf16.msra.mxu1 %v5368_v62  ;;  %5882 = vmatprep.subr.bf16.mxu0 %v5379_v42  ;;  %v5464_v62 = vunpack.c.h.s8.bf16 %v5200_v19  ;;  %v5210_v42 = vld [vmem:[%s10443_s0 + $0x400] sm:$0xff] }
0x1a0d   : > { %5968 = vmatprep.subr.bf16.mxu1 %v5381_v0  ;;  %v5212_v0 = vld [vmem:[%s10443_s0 + $0x410] sm:$0xff]  ;;  %v5474_v5 = vunpack.c.l.s8.bf16 %v5210_v42  ;;  %v5486_v17 = vunpack.c.h.s8.bf16 %v5210_v42 }
0x1a0e   : > { %v6250_v42 = vld [vmem:[%s10449_s4 + $0x40] sm:$0xff] }
0x1a0f   : > { %5883 = vmatpush1.bf16.msra.mxu0 %v5378_v47  ;;  %v5476_v47 = vunpack.c.l.s8.bf16 %v5212_v0 }
0x1a10   : > { %5969 = vmatpush1.bf16.msra.mxu1 %v5380_v4  ;;  %5884 = vmatprep.subr.bf16.mxu0 %v5391_v49  ;;  %v5487_v4 = vunpack.c.h.s8.bf16 %v5211_v58  ;;  %v5489_v49 = vunpack.c.h.s8.bf16 %v5213_v63 }
0x1a11   : > { %5970 = vmatprep.subr.bf16.mxu1 %v5393_v56  ;;  %v5223_v56 = vld [vmem:[%s10443_s0 + $0x468] sm:$0xff] }
0x1a13   : > { %5885 = vmatpush1.bf16.msra.mxu0 %v5390_v6  ;;  %v5488_v6 = vunpack.c.h.s8.bf16 %v5212_v0  ;;  %v11355_v0 = vld [vmem:[%s10445_s14] sm:$0xff] }
0x1a14   : > { %5971 = vmatpush1.bf16.msra.mxu1 %v5392_v9  ;;  %5886 = vmatprep.subr.bf16.mxu0 %v5403_v26  ;;  %v5499_v9 = vunpack.c.l.s8.bf16 %v5223_v56  ;;  %v5222_v26 = vld [vmem:[%s10443_s0 + $0x460] sm:$0xff] }
0x1a15   : > { %5972 = vmatprep.subr.bf16.mxu1 %v5405_v39  ;;  %v5224_v39 = vld [vmem:[%s10443_s0 + $0x470] sm:$0xff]  ;;  %v5498_v22 = vunpack.c.l.s8.bf16 %v5222_v26  ;;  %v5510_v27 = vunpack.c.h.s8.bf16 %v5222_v26  ;;  %v6049_v26 = vrot.slane %v11355_v0, %v10738_v32 }
0x1a17   : > { %5887 = vmatpush1.bf16.msra.mxu0 %v5402_v57  ;;  %v5500_v57 = vunpack.c.l.s8.bf16 %v5224_v39 }
0x1a18   : > { %5973 = vmatpush1.bf16.msra.mxu1 %v5404_v34  ;;  %5888 = vmatprep.subr.bf16.mxu0 %v5415_v31  ;;  %v5511_v34 = vunpack.c.h.s8.bf16 %v5223_v56  ;;  %v5513_v31 = vunpack.c.h.s8.bf16 %v5225_v53  ;;  %v6037_v56 = vrot.slane %v11355_v0, %v10569_v55  ;;  %v6045_v53 = vrot.slane %v11355_v0, %v10622_v46 }
0x1a19   : > { %5974 = vmatprep.subr.bf16.mxu1 %v5417_v1  ;;  %v6243_v1 = vld [vmem:[%s10449_s4 + $0x8] sm:$0xff] }
0x1a1b   : > { %5889 = vmatpush1.bf16.msra.mxu0 %v5414_v36  ;;  %v5512_v36 = vunpack.c.h.s8.bf16 %v5224_v39  ;;  %v11373_v39 = vld [vmem:[%s10449_s4 + $0x48] sm:$0xff] }
0x1a1c   : > { %5975 = vmatpush1.bf16.msra.mxu1 %v5416_v40  ;;  %5901 = vmatprep.subr.bf16.mxu0 %v5427_v12  ;;  %v6387_v40 = vunpack.c.l.s8.bf16 %v6243_v1  ;;  %v6242_v12 = vld [vmem:[%s10449_s4] sm:$0xff] }
0x1a1d   : > { %5987 = vmatprep.subr.bf16.mxu1 %v5429_v61  ;;  %v6244_v61 = vld [vmem:[%s10449_s4 + $0x10] sm:$0xff]  ;;  %v6386_v13 = vunpack.c.l.s8.bf16 %v6242_v12  ;;  %v6389_v33 = vunpack.c.h.s8.bf16 %v6242_v12 }
0x1a1e   : > { %5891 = vmatmul.mubr.bf16.vlgmr.msra.gmra.mrb[44].mxu0 %v11198_v37 }
0x1a1f   : > { %5977 = vmatmul.mubr.bf16.vlgmr.msra.gmra.mrb[52].mxu1 %v11198_v37  ;;  %5902 = vmatpush1.bf16.msra.mxu0 %v5426_v18  ;;  %v5452_v37 = vunpack.c.l.s8.bf16 %v5200_v19  ;;  %v6388_v18 = vunpack.c.l.s8.bf16 %v6244_v61 }
0x1a20   : > { %5988 = vmatpush1.bf16.msra.mxu1 %v5428_v20  ;;  %5903 = vmatprep.subr.bf16.mxu0 %v5439_v3  ;;  %v6390_v20 = vunpack.c.h.s8.bf16 %v6243_v1  ;;  %v6415_v3 = vunpack.c.h.s8.bf16 %v6256_v7 }
0x1a21   : > { %5989 = vmatprep.subr.bf16.mxu1 %v5441_v24  ;;  %5933 = vmatprep.mubr.bf16.mxu0 %v9735_v23  ;;  %v6246_v24 = vld [vmem:[%s10449_s4 + $0x20] sm:$0xff] }
0x1a22   : > { %6019 = vmatprep.mubr.bf16.mxu1 %v9735_v23  ;;  %v5475_v23 = vunpack.c.l.s8.bf16 %v5211_v58 }
0x1a23   : > { %5904 = vmatpush1.bf16.msra.mxu0 %v5438_v29  ;;  %v6391_v29 = vunpack.c.h.s8.bf16 %v6244_v61 }
0x1a24   : > { %5990 = vmatpush1.bf16.msra.mxu1 %v5440_v38  ;;  %5905 = vmatprep.subr.bf16.mxu0 %v5451_v52  ;;  %v6393_v38 = vunpack.c.l.s8.bf16 %v6246_v24  ;;  %v6245_v52 = vld [vmem:[%s10449_s4 + $0x18] sm:$0xff] }
0x1a25   : > { %5991 = vmatprep.subr.bf16.mxu1 %v5453_v16  ;;  %v6247_v16 = vld [vmem:[%s10449_s4 + $0x28] sm:$0xff]  ;;  %v6392_v19 = vunpack.c.l.s8.bf16 %v6245_v52  ;;  %v6395_v58 = vunpack.c.h.s8.bf16 %v6245_v52 }
0x1a26   : > { %v6397_v63 = vunpack.c.h.s8.bf16 %v6247_v16 }
0x1a27   : > { %5906 = vmatpush1.bf16.msra.mxu0 %v5450_v48  ;;  %v6394_v48 = vunpack.c.l.s8.bf16 %v6247_v16 }
0x1a28   : > { %5992 = vmatpush1.bf16.msra.mxu1 %v5452_v37  ;;  %5907 = vmatprep.subr.bf16.mxu0 %v5463_v45  ;;  %v6421_v37 = vunpack.c.h.s8.bf16 %v6259_v25  ;;  %v6249_v45 = vld [vmem:[%s10449_s4 + $0x38] sm:$0xff] }
0x1a29   : > { %5993 = vmatprep.subr.bf16.mxu1 %v5465_v50  ;;  %v6262_v50 = vld [vmem:[%s10449_s4 + $0xa0] sm:$0xff] }
0x1a2b   : > { %5908 = vmatpush1.bf16.msra.mxu0 %v5462_v2  ;;  %v6399_v2 = vunpack.c.l.s8.bf16 %v6249_v45 }
0x1a2c   : > { %5994 = vmatpush1.bf16.msra.mxu1 %v5464_v62  ;;  %5909 = vmatprep.subr.bf16.mxu0 %v5475_v23  ;;  %v6248_v62 = vld [vmem:[%s10449_s4 + $0x30] sm:$0xff]  ;;  %v6424_v23 = vunpack.c.l.s8.bf16 %v6262_v50 }
0x1a2d   : > { %5995 = vmatprep.subr.bf16.mxu1 %v5477_v10  ;;  %v6398_v10 = vunpack.c.l.s8.bf16 %v6248_v62 }
0x1a2f   : > { %5910 = vmatpush1.bf16.msra.mxu0 %v5474_v5  ;;  %v6400_v5 = vunpack.c.l.s8.bf16 %v6250_v42 }
0x1a30   : > { %5996 = vmatpush1.bf16.msra.mxu1 %v5476_v47  ;;  %5911 = vmatprep.subr.bf16.mxu0 %v5487_v4  ;;  %v6402_v47 = vunpack.c.h.s8.bf16 %v6249_v45  ;;  %v11358_v4 = vld [vmem:[%s10447_s22] sm:$0xff] }
0x1a31   : > { %5997 = vmatprep.subr.bf16.mxu1 %v5489_v49  ;;  %v6427_v49 = vunpack.c.h.s8.bf16 %v6262_v50  ;;  %v6255_v45 = vld [vmem:[%s10449_s4 + $0x68] sm:$0xff] }
0x1a33   : > { %5912 = vmatpush1.bf16.msra.mxu0 %v5486_v17  ;;  %v6252_v17 = vld [vmem:[%s10449_s4 + $0x50] sm:$0xff] }
0x1a34   : > { %5998 = vmatpush1.bf16.msra.mxu1 %v5488_v6  ;;  %5913 = vmatprep.subr.bf16.mxu0 %v5499_v9  ;;  %v11366_v6 = vld [vmem:[%s10449_s4 + $0xb8] sm:$0xff]  ;;  %v6041_v9 = vrot.slane %v11355_v0, %v10566_v54 }
0x1a35   : > { %5999 = vmatprep.subr.bf16.mxu1 %v5501_v15  ;;  %v6401_v15 = vunpack.c.h.s8.bf16 %v6248_v62  ;;  %v6430_v12 = vunpack.c.l.s8.bf16 %v11366_v6  ;;  %v6433_v52 = vunpack.c.h.s8.bf16 %v11366_v6 }
0x1a37   : > { %5914 = vmatpush1.bf16.msra.mxu0 %v5498_v22  ;;  %v11376_v22 = vld [vmem:[%s10449_s4 + $0x58] sm:$0xff] }
0x1a38   : > { %6000 = vmatpush1.bf16.msra.mxu1 %v5500_v57  ;;  %5915 = vmatprep.subr.bf16.mxu0 %v5511_v34  ;;  %v6125_v57 = vrot.slane %v11358_v4, %v10569_v55  ;;  %v6133_v34 = vrot.slane %v11358_v4, %v10622_v46 }
0x1a39   : > { %6001 = vmatprep.subr.bf16.mxu1 %v5513_v31  ;;  %v6403_v31 = vunpack.c.h.s8.bf16 %v6250_v42  ;;  %v6407_v42 = vunpack.c.h.s8.bf16 %v11373_v39 }
0x1a3b   : > { %5916 = vmatpush1.bf16.msra.mxu0 %v5510_v27  ;;  %v6129_v27 = vrot.slane %v11358_v4, %v10566_v54 }
0x1a3c   : > { %6002 = vmatpush1.bf16.msra.mxu1 %v5512_v36  ;;  %6674 = vmatprep.subr.bf16.mxu0 %v6387_v40  ;;  %v6137_v36 = vrot.slane %v11358_v4, %v10738_v32  ;;  %v6405_v40 = vunpack.c.l.s8.bf16 %v6252_v17 }
0x1a3d   : > { %8219 = vmatprep.subr.bf16.mxu1 %v6412_v14 }
0x1a3e   : > { %5934 = vmatmul.mubr.bf16.vlgmr.msra.gmra.mrb[44].mxu0 %v11230_v8 }
0x1a3f   : > { %6020 = vmatmul.mubr.bf16.vlgmr.msra.gmra.mrb[52].mxu1 %v11230_v8  ;;  %6675 = vmatpush1.bf16.msra.mxu0 %v6386_v13  ;;  %v6396_v8 = vunpack.c.h.s8.bf16 %v6246_v24 }
0x1a40   : > { %8220 = vmatpush3.bf16.msra.mxu1 %v6388_v18  ;;  %6676 = vmatprep.subr.bf16.mxu0 %v6390_v20  ;;  %v6404_v20 = vunpack.c.l.s8.bf16 %v11373_v39  ;;  %v6268_v39 = vld [vmem:[%s10449_s4 + $0xd0] sm:$0xff] }
0x1a41   : > { %8221 = vmatprep.subr.bf16.mxu1 %v6415_v3  ;;  %v6406_v3 = vunpack.c.l.s8.bf16 %v11376_v22 }
0x1a43   : > { %6677 = vmatpush1.bf16.msra.mxu0 %v6389_v33 }
0x1a44   : > { %8222 = vmatpush3.bf16.msra.mxu1 %v6391_v29  ;;  %6678 = vmatprep.subr.bf16.mxu0 %v6393_v38  ;;  %v6408_v38 = vunpack.c.h.s8.bf16 %v6252_v17 }
0x1a45   : > { %8223 = vmatprep.subr.bf16.mxu1 %v6418_v43 }
0x1a47   : > { %6679 = vmatpush1.bf16.msra.mxu0 %v6392_v19 }
0x1a48   : > { %8224 = vmatpush3.bf16.msra.mxu1 %v6394_v48  ;;  %6680 = vmatprep.subr.bf16.mxu0 %v6396_v8 }
0x1a49   : > { %8225 = vmatprep.subr.bf16.mxu1 %v6421_v37 }
0x1a4b   : > { %6681 = vmatpush1.bf16.msra.mxu0 %v6395_v58 }
0x1a4c   : > { %8226 = vmatpush3.bf16.msra.mxu1 %v6397_v63  ;;  %6682 = vmatprep.subr.bf16.mxu0 %v6399_v2 }
0x1a4d   : > { %8227 = vmatprep.subr.bf16.mxu1 %v6424_v23 }
0x1a4f   : > { %6683 = vmatpush1.bf16.msra.mxu0 %v6398_v10 }
0x1a50   : > { %8228 = vmatpush3.bf16.msra.mxu1 %v6400_v5  ;;  %6684 = vmatprep.subr.bf16.mxu0 %v6402_v47  ;;  %v6409_v47 = vunpack.c.h.s8.bf16 %v11376_v22 }
0x1a51   : > { %v5591_v1 = vpop.f32.mrb[36].mxu0  ;;  %v5677_v7 = vpop.f32.mrb[44].mxu1  ;;  %8229 = vmatprep.subr.bf16.mxu1 %v6427_v49  ;;  %v6411_v49 = vunpack.c.l.s8.bf16 %v6255_v45 }
0x1a52   : > { %v6094_v14 = vmul.f32 %v6037_v56, %v5591_v1  ;;  %v6096_v61 = vmul.f32 %v6045_v53, %v5677_v7  ;;  %v5593_v13 = vpop.f32.mrb[37].mxu0  ;;  %v5679_v18 = vpop.f32.mrb[45].mxu1 }
0x1a53   : > { %v6095_v24 = vmul.f32 %v6041_v9, %v5593_v13  ;;  %v6097_v25 = vmul.f32 %v6049_v26, %v5679_v18  ;;  %v5595_v33 = vpop.f32.mrb[38].mxu0  ;;  %v5681_v29 = vpop.f32.mrb[46].mxu1  ;;  %6685 = vmatpush1.bf16.msra.mxu0 %v6401_v15  ;;  %v6258_v13 = vld [vmem:[%s10449_s4 + $0x80] sm:$0xff]  ;;  %v6283_v18 = vld [vmem:[%s10449_s4 + $0x148] sm:$0xff] }
0x1a54   : > { %v6182_v43 = vadd.f32 %v6125_v57, %v6094_v14  ;;  %v6184_v16 = vadd.f32 %v6133_v34, %v6096_v61  ;;  %v6106_v19 = vmul.f32 %v6037_v56, %v5595_v33  ;;  %v6108_v48 = vmul.f32 %v6045_v53, %v5681_v29  ;;  %8230 = vmatpush3.bf16.msra.mxu1 %v6403_v31  ;;  %v5597_v8 = vpop.f32.mrb[39].mxu0  ;;  %v5683_v37 = vpop.f32.mrb[47].mxu1  ;;  %v6280_v56 = vld [vmem:[%s10449_s4 + $0x130] sm:$0xff]  ;;  %v6271_v29 = vld [vmem:[%s10449_s4 + $0xe8] sm:$0xff] }
0x1a55   : > { %v6183_v50 = vadd.f32 %v6129_v27, %v6095_v24  ;;  %v6185_v58 = vadd.f32 %v6137_v36, %v6097_v25  ;;  %v6107_v63 = vmul.f32 %v6041_v9, %v5597_v8  ;;  %v6109_v2 = vmul.f32 %v6049_v26, %v5683_v37  ;;  %6686 = vmatprep.subr.bf16.mxu0 %v6405_v40  ;;  %v6254_v26 = vld [vmem:[%s10449_s4 + $0x60] sm:$0xff]  ;;  %v6257_v25 = vld [vmem:[%s10449_s4 + $0x78] sm:$0xff] }
0x1a56   : > { %v6194_v62 = vadd.f32 %v6125_v57, %v6106_v19  ;;  %v6196_v23 = vadd.f32 %v6133_v34, %v6108_v48  ;;  %8231 = vmatprep.subr.bf16.mxu1 %v6430_v12  ;;  %v6206_v53 = vmax.f32 %v6182_v43, 0.0  ;;  %v6208_v17 = vmax.f32 %v6184_v16, 0.0  ;;  %v6261_v19 = vld [vmem:[%s10449_s4 + $0x98] sm:$0xff]  ;;  %v6286_v48 = vld [vmem:[%s10449_s4 + $0x160] sm:$0xff] }
0x1a57   : > { %v6195_v10 = vadd.f32 %v6129_v27, %v6107_v63  ;;  %v6197_v5 = vadd.f32 %v6137_v36, %v6109_v2  ;;  %6687 = vmatpush1.bf16.msra.mxu0 %v6404_v20  ;;  %v6207_v15 = vmax.f32 %v6183_v50, 0.0  ;;  %v6209_v57 = vmax.f32 %v6185_v58, 0.0  ;;  %v6260_v50 = vld [vmem:[%s10449_s4 + $0x90] sm:$0xff]  ;;  %v6274_v63 = vld [vmem:[%s10449_s4 + $0x100] sm:$0xff] }
0x1a58   : > { %v6218_v6 = vmax.f32 %v6194_v62, 0.0  ;;  %v6220_v9 = vmax.f32 %v6196_v23, 0.0  ;;  %8232 = vmatpush3.bf16.msra.mxu1 %v6406_v3  ;;  %6688 = vmatprep.subr.bf16.mxu0 %v6408_v38  ;;  %v6460_v7 = vunpack.c.l.s8.bf16 %v6280_v56  ;;  %v6410_v36 = vunpack.c.l.s8.bf16 %v6254_v26 }
0x1a59   : > { %v6219_v34 = vmax.f32 %v6195_v10, 0.0  ;;  %v6221_v31 = vmax.f32 %v6197_v5, 0.0  ;;  %8233 = vmatprep.subr.bf16.mxu1 %v6433_v52  ;;  %v6436_v12 = vunpack.c.l.s8.bf16 %v6268_v39  ;;  %v6414_v14 = vunpack.c.h.s8.bf16 %v6255_v45  ;;  %v6264_v10 = vld [vmem:[%s10449_s4 + $0xb0] sm:$0xff]  ;;  %v6289_v5 = vld [vmem:[%s10449_s4 + $0x178] sm:$0xff] }
0x1a5a   : > { %v11396_v1 = vpack.c.bf16 %v6218_v6, %v6206_v53  ;;  %v11398_v22 = vpack.c.bf16 %v6220_v9, %v6208_v17  ;;  %v6463_v61 = vunpack.c.h.s8.bf16 %v6280_v56  ;;  %v6413_v20 = vunpack.c.h.s8.bf16 %v6254_v26  ;;  %v6263_v53 = vld [vmem:[%s10449_s4 + $0xa8] sm:$0xff]  ;;  %v6277_v6 = vld [vmem:[%s10449_s4 + $0x118] sm:$0xff] }
0x1a5b   : > { %6689 = vmatpush1.bf16.msra.mxu0 %v6407_v42  ;;  %v6231_v27 = vpack.c.bf16 %v6219_v34, %v6207_v15  ;;  %v11400_v40 = vpack.c.bf16 %v6221_v31, %v6209_v57  ;;  %v6439_v3 = vunpack.c.h.s8.bf16 %v6268_v39  ;;  %v6417_v24 = vunpack.c.l.s8.bf16 %v6258_v13  ;;  %v6267_v34 = vld [vmem:[%s10449_s4 + $0xc8] sm:$0xff]  ;;  %v6304_v31 = vld [vmem:[%s10449_s4 + $0x1f0] sm:$0xff] }
0x1a5c   : > { %8234 = vmatpush3.bf16.msra.mxu1 %v6409_v47  ;;  %6690 = vmatprep.subr.bf16.mxu0 %v6411_v49  ;;  %v6466_v33 = vunpack.c.l.s8.bf16 %v6283_v18  ;;  %v6416_v38 = vunpack.c.l.s8.bf16 %v6257_v25  ;;  %v6442_v52 = vunpack.c.l.s8.bf16 %v6271_v29  ;;  %v6420_v43 = vunpack.c.h.s8.bf16 %v6258_v13 }
0x1a5d   : > { %6706 = vmatprep.mubr.bf16.mxu0 %v6231_v27  ;;  %6964 = vmatprep.mubr.bf16.mxu1 %v6231_v27  ;;  %v6469_v16 = vunpack.c.h.s8.bf16 %v6283_v18  ;;  %v6419_v8 = vunpack.c.h.s8.bf16 %v6257_v25  ;;  %v6445_v37 = vunpack.c.h.s8.bf16 %v6271_v29  ;;  %v6423_v45 = vunpack.c.l.s8.bf16 %v6261_v19  ;;  %v6270_v18 = vld [vmem:[%s10449_s4 + $0xe0] sm:$0xff]  ;;  %v6307_v25 = vld [vmem:[%s10449_s4 + $0x208] sm:$0xff]  ;;  %v6269_v29 = vld [vmem:[%s10449_s4 + $0xd8] sm:$0xff] }
0x1a5e   : > { %8241 = vmatprep.subr.bf16.mxu1 %v6460_v7  ;;  %v6472_v58 = vunpack.c.l.s8.bf16 %v6286_v48  ;;  %v6422_v2 = vunpack.c.l.s8.bf16 %v6260_v50  ;;  %v6448_v62 = vunpack.c.l.s8.bf16 %v6274_v63  ;;  %v6426_v23 = vunpack.c.h.s8.bf16 %v6261_v19  ;;  %v6273_v19 = vld [vmem:[%s10449_s4 + $0xf8] sm:$0xff] }
0x1a5f   : > { %6965 = vmatmul.mubr.bf16.vlgmr.msra.gmra.mrb[56].mxu1 %v11396_v1  ;;  %6691 = vmatpush1.bf16.msra.mxu0 %v6410_v36  ;;  %v6475_v42 = vunpack.c.h.s8.bf16 %v6286_v48  ;;  %v6425_v47 = vunpack.c.h.s8.bf16 %v6260_v50  ;;  %v6451_v49 = vunpack.c.h.s8.bf16 %v6274_v63  ;;  %v6429_v56 = vunpack.c.l.s8.bf16 %v6264_v10  ;;  %v6266_v36 = vld [vmem:[%s10449_s4 + $0xc0] sm:$0xff]  ;;  %v6272_v50 = vld [vmem:[%s10449_s4 + $0xf0] sm:$0xff] }
0x1a60   : > { %8242 = vmatpush3.bf16.msra.mxu1 %v6436_v12  ;;  %7005 = vmatprep.mubr.bf16.mxu1 %v11400_v40  ;;  %v6478_v17 = vunpack.c.l.s8.bf16 %v6289_v5  ;;  %v6428_v9 = vunpack.c.l.s8.bf16 %v6263_v53  ;;  %v6454_v26 = vunpack.c.l.s8.bf16 %v6277_v6  ;;  %v6432_v15 = vunpack.c.h.s8.bf16 %v6264_v10 }
0x1a61   : > { %6692 = vmatprep.subr.bf16.mxu0 %v6414_v14  ;;  %8243 = vmatprep.subr.bf16.mxu1 %v6463_v61  ;;  %v6481_v57 = vunpack.c.h.s8.bf16 %v6289_v5  ;;  %v6431_v39 = vunpack.c.h.s8.bf16 %v6263_v53  ;;  %v6457_v7 = vunpack.c.h.s8.bf16 %v6277_v6  ;;  %v6435_v27 = vunpack.c.l.s8.bf16 %v6267_v34  ;;  %v6292_v14 = vld [vmem:[%s10449_s4 + $0x190] sm:$0xff]  ;;  %v6275_v53 = vld [vmem:[%s10449_s4 + $0x108] sm:$0xff] }
0x1a62   : > { %v6508_v12 = vunpack.c.l.s8.bf16 %v6304_v31  ;;  %v6434_v61 = vunpack.c.l.s8.bf16 %v6266_v36  ;;  %v6438_v13 = vunpack.c.h.s8.bf16 %v6267_v34 }
0x1a63   : > { %6693 = vmatpush1.bf16.msra.mxu0 %v6413_v20  ;;  %v6484_v20 = vunpack.c.l.s8.bf16 %v6292_v14 }
0x1a64   : > { %8244 = vmatpush3.bf16.msra.mxu1 %v6439_v3  ;;  %6694 = vmatprep.subr.bf16.mxu0 %v6417_v24  ;;  %v6511_v3 = vunpack.c.h.s8.bf16 %v6304_v31  ;;  %v6437_v24 = vunpack.c.h.s8.bf16 %v6266_v36  ;;  %v6278_v36 = vld [vmem:[%s10449_s4 + $0x120] sm:$0xff] }
0x1a65   : > { %8245 = vmatprep.subr.bf16.mxu1 %v6466_v33  ;;  %v6441_v33 = vunpack.c.l.s8.bf16 %v6270_v18 }
0x1a67   : > { %6695 = vmatpush1.bf16.msra.mxu0 %v6416_v38  ;;  %v6487_v38 = vunpack.c.h.s8.bf16 %v6292_v14 }
0x1a68   : > { %8246 = vmatpush3.bf16.msra.mxu1 %v6442_v52  ;;  %6696 = vmatprep.subr.bf16.mxu0 %v6420_v43  ;;  %v6514_v52 = vunpack.c.l.s8.bf16 %v6307_v25  ;;  %v6295_v43 = vld [vmem:[%s10449_s4 + $0x1a8] sm:$0xff] }
0x1a69   : > { %8247 = vmatprep.subr.bf16.mxu1 %v6469_v16  ;;  %v6444_v16 = vunpack.c.h.s8.bf16 %v6270_v18  ;;  %v6490_v48 = vunpack.c.l.s8.bf16 %v6295_v43  ;;  %v6282_v18 = vld [vmem:[%s10449_s4 + $0x140] sm:$0xff] }
0x1a6b   : > { %6697 = vmatpush1.bf16.msra.mxu0 %v6419_v8  ;;  %v6443_v8 = vunpack.c.h.s8.bf16 %v6269_v29 }
0x1a6c   : > { %8248 = vmatpush3.bf16.msra.mxu1 %v6445_v37  ;;  %6698 = vmatprep.subr.bf16.mxu0 %v6423_v45  ;;  %v6310_v37 = vld [vmem:[%s10449_s4 + $0x220] sm:$0xff]  ;;  %v6447_v45 = vunpack.c.l.s8.bf16 %v6273_v19 }
0x1a6d   : > { %8249 = vmatprep.subr.bf16.mxu1 %v6472_v58  ;;  %v6493_v58 = vunpack.c.h.s8.bf16 %v6295_v43  ;;  %v6520_v63 = vunpack.c.l.s8.bf16 %v6310_v37  ;;  %v6523_v5 = vunpack.c.h.s8.bf16 %v6310_v37  ;;  %v6284_v43 = vld [vmem:[%s10449_s4 + $0x150] sm:$0xff] }
0x1a6e   : > { %v6473_v37 = vunpack.c.h.s8.bf16 %v6284_v43 }
0x1a6f   : > { %6699 = vmatpush1.bf16.msra.mxu0 %v6422_v2  ;;  %v6298_v2 = vld [vmem:[%s10449_s4 + $0x1c0] sm:$0xff] }
0x1a70   : > { %8250 = vmatpush3.bf16.msra.mxu1 %v6448_v62  ;;  %6700 = vmatprep.subr.bf16.mxu0 %v6426_v23  ;;  %v6446_v62 = vunpack.c.l.s8.bf16 %v6272_v50  ;;  %v6450_v23 = vunpack.c.h.s8.bf16 %v6273_v19  ;;  %v6496_v10 = vunpack.c.l.s8.bf16 %v6298_v2  ;;  %v6288_v19 = vld [vmem:[%s10449_s4 + $0x170] sm:$0xff] }
0x1a71   : > { %8251 = vmatprep.subr.bf16.mxu1 %v6475_v42  ;;  %v6276_v42 = vld [vmem:[%s10449_s4 + $0x110] sm:$0xff] }
0x1a73   : > { %6701 = vmatpush1.bf16.msra.mxu0 %v6425_v47  ;;  %v6449_v47 = vunpack.c.h.s8.bf16 %v6272_v50  ;;  %v6065_v50 = vrot.slane %v11355_v0, %v10864_v30 }
0x1a74   : > { %8252 = vmatpush3.bf16.msra.mxu1 %v6451_v49  ;;  %6702 = vmatprep.subr.bf16.mxu0 %v6429_v56  ;;  %v6313_v49 = vld [vmem:[%s10449_s4 + $0x238] sm:$0xff]  ;;  %v6453_v56 = vunpack.c.l.s8.bf16 %v6276_v42 }
0x1a75   : > { %8253 = vmatprep.subr.bf16.mxu1 %v6478_v17  ;;  %v6499_v17 = vunpack.c.h.s8.bf16 %v6298_v2  ;;  %v6526_v6 = vunpack.c.l.s8.bf16 %v6313_v49  ;;  %v6529_v31 = vunpack.c.h.s8.bf16 %v6313_v49 }
0x1a77   : > { %6703 = vmatpush1.bf16.msra.mxu0 %v6428_v9  ;;  %v6301_v9 = vld [vmem:[%s10449_s4 + $0x1d8] sm:$0xff] }
0x1a78   : > { %8254 = vmatpush3.bf16.msra.mxu1 %v6454_v26  ;;  %6704 = vmatprep.subr.bf16.mxu0 %v6432_v15  ;;  %v6452_v26 = vunpack.c.l.s8.bf16 %v6275_v53  ;;  %v6456_v15 = vunpack.c.h.s8.bf16 %v6276_v42  ;;  %v6502_v34 = vunpack.c.l.s8.bf16 %v6301_v9 }
0x1a79   : > { %8255 = vmatprep.subr.bf16.mxu1 %v6481_v57  ;;  %v6279_v57 = vld [vmem:[%s10449_s4 + $0x128] sm:$0xff] }
0x1a7b   : > { %6705 = vmatpush1.bf16.msra.mxu0 %v6431_v39  ;;  %v6455_v39 = vunpack.c.h.s8.bf16 %v6275_v53 }
0x1a7c   : > { %8256 = vmatpush3.bf16.msra.mxu1 %v6457_v7  ;;  %6717 = vmatprep.subr.bf16.mxu0 %v6435_v27  ;;  %v11437_v7 = vld [vmem:[%s10449_s4 + $0x2b0] sm:$0xff]  ;;  %v6459_v27 = vunpack.c.l.s8.bf16 %v6279_v57 }
0x1a7d   : > { %8263 = vmatprep.subr.bf16.mxu1 %v6508_v12  ;;  %v6505_v12 = vunpack.c.h.s8.bf16 %v6301_v9  ;;  %v6556_v14 = vunpack.c.l.s8.bf16 %v11437_v7 }
0x1a7e   : > { %6707 = vmatmul.mubr.bf16.vlgmr.msra.gmra.mrb[48].mxu0 %v11396_v1  ;;  %v6440_v1 = vunpack.c.l.s8.bf16 %v6269_v29  ;;  %v6285_v29 = vld [vmem:[%s10449_s4 + $0x158] sm:$0xff] }
0x1a7f   : > { %7006 = vmatmul.mubr.bf16.vlgmr.msra.gmra.mrb[60].mxu1 %v11398_v22  ;;  %6718 = vmatpush1.bf16.msra.mxu0 %v6434_v61  ;;  %v6458_v61 = vunpack.c.l.s8.bf16 %v6278_v36 }
0x1a80   : > { %6749 = vmatprep.mubr.bf16.mxu0 %v11400_v40  ;;  %6719 = vmatprep.subr.bf16.mxu0 %v6438_v13  ;;  %v6517_v40 = vunpack.c.h.s8.bf16 %v6307_v25  ;;  %v6462_v13 = vunpack.c.h.s8.bf16 %v6279_v57 }
0x1a81   : > { %8264 = vmatpush3.bf16.msra.mxu1 %v6484_v20  ;;  %v6461_v20 = vunpack.c.h.s8.bf16 %v6278_v36 }
0x1a82   : > { %8265 = vmatprep.subr.bf16.mxu1 %v6511_v3  ;;  %v6465_v3 = vunpack.c.l.s8.bf16 %v6282_v18 }
0x1a83   : > { %6720 = vmatpush1.bf16.msra.mxu0 %v6437_v24  ;;  %v6281_v24 = vld [vmem:[%s10449_s4 + $0x138] sm:$0xff] }
0x1a84   : > { %6721 = vmatprep.subr.bf16.mxu0 %v6441_v33  ;;  %v6464_v25 = vunpack.c.l.s8.bf16 %v6281_v24  ;;  %v6468_v33 = vunpack.c.h.s8.bf16 %v6282_v18 }
0x1a85   : > { %8266 = vmatpush3.bf16.msra.mxu1 %v6487_v38  ;;  %v6467_v38 = vunpack.c.h.s8.bf16 %v6281_v24  ;;  %v6316_v24 = vld [vmem:[%s10449_s4 + $0x250] sm:$0xff] }
0x1a86   : > { %8267 = vmatprep.subr.bf16.mxu1 %v6514_v52  ;;  %v6471_v52 = vunpack.c.l.s8.bf16 %v6285_v29 }
0x1a87   : > { %6722 = vmatpush1.bf16.msra.mxu0 %v6440_v1  ;;  %v6470_v1 = vunpack.c.l.s8.bf16 %v6284_v43 }
0x1a88   : > { %6723 = vmatprep.subr.bf16.mxu0 %v6444_v16  ;;  %v6474_v16 = vunpack.c.h.s8.bf16 %v6285_v29 }
0x1a89   : > { %8268 = vmatpush3.bf16.msra.mxu1 %v6490_v48  ;;  %v6053_v48 = vrot.slane %v11355_v0, %v10857_v28 }
0x1a8a   : > { %8269 = vmatprep.subr.bf16.mxu1 %v6517_v40  ;;  %v6061_v40 = vrot.slane %v11355_v0, %v10765_v51 }
0x1a8b   : > { %6724 = vmatpush1.bf16.msra.mxu0 %v6443_v8  ;;  %v6057_v8 = vrot.slane %v11355_v0, %v10971_v60 }
0x1a8c   : > { %6725 = vmatprep.subr.bf16.mxu0 %v6447_v45  ;;  %v6141_v45 = vrot.slane %v11358_v4, %v10857_v28 }
0x1a8d   : > { %8270 = vmatpush3.bf16.msra.mxu1 %v6493_v58  ;;  %v6477_v58 = vunpack.c.l.s8.bf16 %v6288_v19 }
0x1a8e   : > { %8271 = vmatprep.subr.bf16.mxu1 %v6520_v63  ;;  %v6287_v63 = vld [vmem:[%s10449_s4 + $0x168] sm:$0xff] }
0x1a8f   : > { %6726 = vmatpush1.bf16.msra.mxu0 %v6446_v62  ;;  %v6149_v62 = vrot.slane %v11358_v4, %v10765_v51  ;;  %v6476_v53 = vunpack.c.l.s8.bf16 %v6287_v63 }
0x1a90   : > { %6727 = vmatprep.subr.bf16.mxu0 %v6450_v23  ;;  %v6145_v23 = vrot.slane %v11358_v4, %v10971_v60  ;;  %v6480_v60 = vunpack.c.h.s8.bf16 %v6288_v19 }
0x1a91   : > { %8272 = vmatpush3.bf16.msra.mxu1 %v6496_v10 }
0x1a92   : > { %8273 = vmatprep.subr.bf16.mxu1 %v6523_v5 }
0x1a93   : > { %6728 = vmatpush1.bf16.msra.mxu0 %v6449_v47  ;;  %v6153_v47 = vrot.slane %v11358_v4, %v10864_v30  ;;  %v6291_v4 = vld [vmem:[%s10449_s4 + $0x188] sm:$0xff] }
0x1a94   : > { %6729 = vmatprep.subr.bf16.mxu0 %v6453_v56 }
0x1a95   : > { %8274 = vmatpush3.bf16.msra.mxu1 %v6499_v17 }
0x1a96   : > { %8275 = vmatprep.subr.bf16.mxu1 %v6526_v6 }
0x1a97   : > { %6730 = vmatpush1.bf16.msra.mxu0 %v6452_v26 }
0x1a98   : > { %6731 = vmatprep.subr.bf16.mxu0 %v6456_v15 }
0x1a99   : > { %8276 = vmatpush3.bf16.msra.mxu1 %v6502_v34 }
0x1a9a   : > { %8277 = vmatprep.subr.bf16.mxu1 %v6529_v31 }
0x1a9b   : > { %6732 = vmatpush1.bf16.msra.mxu0 %v6455_v39 }
0x1a9c   : > { %6733 = vmatprep.subr.bf16.mxu0 %v6459_v27 }
0x1a9d   : > { %8278 = vmatpush3.bf16.msra.mxu1 %v6505_v12 }
0x1a9e   : > { %8285 = vmatprep.subr.bf16.mxu1 %v6556_v14 }
0x1a9f   : > { %6734 = vmatpush1.bf16.msra.mxu0 %v6458_v61  ;;  %v6479_v61 = vunpack.c.h.s8.bf16 %v6287_v63  ;;  %v6294_v63 = vld [vmem:[%s10449_s4 + $0x1a0] sm:$0xff] }
0x1aa0   : > { %6735 = vmatprep.subr.bf16.mxu0 %v6462_v13 }
0x1aa3   : > { %6736 = vmatpush1.bf16.msra.mxu0 %v6461_v20 }
0x1aa4   : > { %6737 = vmatprep.subr.bf16.mxu0 %v6465_v3  ;;  %v6483_v3 = vunpack.c.l.s8.bf16 %v6291_v4 }
0x1aa7   : > { %6738 = vmatpush1.bf16.msra.mxu0 %v6464_v25  ;;  %v6290_v25 = vld [vmem:[%s10449_s4 + $0x180] sm:$0xff] }
0x1aa8   : > { %6739 = vmatprep.subr.bf16.mxu0 %v6468_v33 }
0x1aab   : > { %6740 = vmatpush1.bf16.msra.mxu0 %v6467_v38 }
0x1aac   : > { %6741 = vmatprep.subr.bf16.mxu0 %v6471_v52 }
0x1aaf   : > { %6742 = vmatpush1.bf16.msra.mxu0 %v6470_v1 }
0x1ab0   : > { %6743 = vmatprep.subr.bf16.mxu0 %v6474_v16 }
0x1ab1   : > { %v5763_v2 = vpop.f32.mrb[40].mxu0 }
0x1ab2   : > { %v6098_v42 = vmul.f32 %v6053_v48, %v5763_v2  ;;  %v5849_v10 = vpop.f32.mrb[48].mxu1  ;;  %v5765_v5 = vpop.f32.mrb[41].mxu0  ;;  %v6535_v2 = vunpack.c.h.s8.bf16 %v6316_v24 }
0x1ab3   : > { %v6100_v28 = vmul.f32 %v6061_v40, %v5849_v10  ;;  %v6099_v49 = vmul.f32 %v6057_v8, %v5765_v5  ;;  %v5851_v56 = vpop.f32.mrb[49].mxu1  ;;  %v5767_v0 = vpop.f32.mrb[42].mxu0  ;;  %6744 = vmatpush1.bf16.msra.mxu0 %v6473_v37  ;;  %v6319_v10 = vld [vmem:[%s10449_s4 + $0x268] sm:$0xff] }
0x1ab4   : > { %v6186_v17 = vadd.f32 %v6141_v45, %v6098_v42  ;;  %v6101_v6 = vmul.f32 %v6065_v50, %v5851_v56  ;;  %v6110_v9 = vmul.f32 %v6053_v48, %v5767_v0  ;;  %v5853_v51 = vpop.f32.mrb[50].mxu1  ;;  %v5769_v26 = vpop.f32.mrb[43].mxu0  ;;  %6745 = vmatprep.subr.bf16.mxu0 %v6477_v58  ;;  %v6331_v58 = vld [vmem:[%s10449_s4 + $0x2c8] sm:$0xff]  ;;  %v6489_v42 = vunpack.c.l.s8.bf16 %v6294_v63  ;;  %v6297_v56 = vld [vmem:[%s10449_s4 + $0x1b8] sm:$0xff] }
0x1ab5   : > { %v6188_v15 = vadd.f32 %v6149_v62, %v6100_v28  ;;  %v6187_v57 = vadd.f32 %v6145_v23, %v6099_v49  ;;  %v6112_v34 = vmul.f32 %v6061_v40, %v5853_v51  ;;  %v6111_v31 = vmul.f32 %v6057_v8, %v5769_v26  ;;  %v5855_v30 = vpop.f32.mrb[51].mxu1  ;;  %v6334_v49 = vld [vmem:[%s10449_s4 + $0x2e0] sm:$0xff]  ;;  %v6296_v51 = vld [vmem:[%s10449_s4 + $0x1b0] sm:$0xff] }
0x1ab6   : > { %v6189_v39 = vadd.f32 %v6153_v47, %v6101_v6  ;;  %v6198_v27 = vadd.f32 %v6141_v45, %v6110_v9  ;;  %v6113_v36 = vmul.f32 %v6065_v50, %v5855_v30  ;;  %v6210_v13 = vmax.f32 %v6186_v17, 0.0  ;;  %v6322_v9 = vld [vmem:[%s10449_s4 + $0x280] sm:$0xff] }
0x1ab7   : > { %v6200_v12 = vadd.f32 %v6149_v62, %v6112_v34  ;;  %v6199_v14 = vadd.f32 %v6145_v23, %v6111_v31  ;;  %6746 = vmatpush1.bf16.msra.mxu0 %v6476_v53  ;;  %v6212_v33 = vmax.f32 %v6188_v15, 0.0  ;;  %v6211_v29 = vmax.f32 %v6187_v57, 0.0  ;;  %v6337_v34 = vld [vmem:[%s10449_s4 + $0x2f8] sm:$0xff]  ;;  %v6300_v31 = vld [vmem:[%s10449_s4 + $0x1d0] sm:$0xff] }
0x1ab8   : > { %v6222_v18 = vmax.f32 %v6198_v27, 0.0  ;;  %v6201_v20 = vadd.f32 %v6153_v47, %v6113_v36  ;;  %6747 = vmatprep.subr.bf16.mxu0 %v6480_v60  ;;  %v6213_v43 = vmax.f32 %v6189_v39, 0.0  ;;  %v6532_v40 = vunpack.c.l.s8.bf16 %v6316_v24  ;;  %v6325_v36 = vld [vmem:[%s10449_s4 + $0x298] sm:$0xff] }
0x1ab9   : > { %v6224_v38 = vmax.f32 %v6200_v12, 0.0  ;;  %v6223_v52 = vmax.f32 %v6199_v14, 0.0  ;;  %v6482_v8 = vunpack.c.l.s8.bf16 %v6290_v25  ;;  %v6559_v45 = vunpack.c.h.s8.bf16 %v11437_v7  ;;  %v6293_v7 = vld [vmem:[%s10449_s4 + $0x198] sm:$0xff]  ;;  %v6299_v12 = vld [vmem:[%s10449_s4 + $0x1c8] sm:$0xff] }
0x1aba   : > { %v11466_v1 = vpack.c.bf16 %v6222_v18, %v6210_v13  ;;  %v6225_v16 = vmax.f32 %v6201_v20, 0.0  ;;  %v6486_v50 = vunpack.c.h.s8.bf16 %v6291_v4  ;;  %v6485_v62 = vunpack.c.h.s8.bf16 %v6290_v25  ;;  %v6303_v20 = vld [vmem:[%s10449_s4 + $0x1e8] sm:$0xff] }
0x1abb   : > { %v11468_v19 = vpack.c.bf16 %v6224_v38, %v6212_v33  ;;  %6748 = vmatpush1.bf16.msra.mxu0 %v6479_v61  ;;  %v6235_v48 = vpack.c.bf16 %v6223_v52, %v6211_v29  ;;  %v6562_v23 = vunpack.c.l.s8.bf16 %v6331_v58  ;;  %v6488_v5 = vunpack.c.l.s8.bf16 %v6293_v7  ;;  %v6302_v29 = vld [vmem:[%s10449_s4 + $0x1e0] sm:$0xff]  ;;  %v6340_v52 = vld [vmem:[%s10449_s4 + $0x310] sm:$0xff] }
0x1abc   : > { %6760 = vmatprep.subr.bf16.mxu0 %v6483_v3  ;;  %v11470_v37 = vpack.c.bf16 %v6225_v16, %v6213_v43  ;;  %v6565_v47 = vunpack.c.h.s8.bf16 %v6331_v58  ;;  %v6492_v28 = vunpack.c.h.s8.bf16 %v6294_v63  ;;  %v6541_v0 = vunpack.c.h.s8.bf16 %v6319_v10  ;;  %v6352_v3 = vld [vmem:[%s10449_s4 + $0x370] sm:$0xff] }
0x1abd   : > { %7046 = vmatprep.mubr.bf16.mxu1 %v6235_v48  ;;  %v6491_v53 = vunpack.c.h.s8.bf16 %v6293_v7  ;;  %v6568_v17 = vunpack.c.l.s8.bf16 %v6334_v49  ;;  %v6495_v6 = vunpack.c.l.s8.bf16 %v6297_v56  ;;  %v6544_v26 = vunpack.c.l.s8.bf16 %v6322_v9 }
0x1abe   : > { %6750 = vmatmul.mubr.bf16.vlgmr.msra.gmra.mrb[48].mxu0 %v11398_v22  ;;  %7047 = vmatmul.mubr.bf16.vlgmr.msra.gmra.mrb[64].mxu1 %v11466_v1  ;;  %v6538_v22 = vunpack.c.l.s8.bf16 %v6319_v10  ;;  %v6494_v60 = vunpack.c.l.s8.bf16 %v6296_v51  ;;  %v6571_v15 = vunpack.c.h.s8.bf16 %v6334_v49  ;;  %v6498_v57 = vunpack.c.h.s8.bf16 %v6297_v56 }
0x1abf   : > { %8286 = vmatpush3.bf16.msra.mxu1 %v6532_v40  ;;  %6761 = vmatpush1.bf16.msra.mxu0 %v6482_v8  ;;  %v6547_v30 = vunpack.c.h.s8.bf16 %v6322_v9  ;;  %v6497_v4 = vunpack.c.h.s8.bf16 %v6296_v51  ;;  %v6574_v39 = vunpack.c.l.s8.bf16 %v6337_v34  ;;  %v6501_v27 = vunpack.c.l.s8.bf16 %v6300_v31  ;;  %v6306_v8 = vld [vmem:[%s10449_s4 + $0x200] sm:$0xff] }
0x1ac0   : > { %6792 = vmatprep.mubr.bf16.mxu0 %v6235_v48  ;;  %7087 = vmatprep.mubr.bf16.mxu1 %v11470_v37  ;;  %v6550_v14 = vunpack.c.l.s8.bf16 %v6325_v36  ;;  %v6500_v61 = vunpack.c.l.s8.bf16 %v6299_v12  ;;  %v6577_v13 = vunpack.c.h.s8.bf16 %v6337_v34  ;;  %v6504_v18 = vunpack.c.h.s8.bf16 %v6300_v31 }
0x1ac1   : > { %8287 = vmatprep.subr.bf16.mxu1 %v6559_v45  ;;  %6762 = vmatprep.subr.bf16.mxu0 %v6486_v50  ;;  %v6553_v24 = vunpack.c.h.s8.bf16 %v6325_v36  ;;  %v6503_v25 = vunpack.c.h.s8.bf16 %v6299_v12  ;;  %v6507_v33 = vunpack.c.l.s8.bf16 %v6303_v20  ;;  %v6604_v38 = vunpack.c.l.s8.bf16 %v6352_v3  ;;  %v6355_v45 = vld [vmem:[%s10449_s4 + $0x388] sm:$0xff] }
0x1ac2   : > { %v6506_v43 = vunpack.c.l.s8.bf16 %v6302_v29  ;;  %v6580_v16 = vunpack.c.l.s8.bf16 %v6340_v52  ;;  %v6510_v48 = vunpack.c.h.s8.bf16 %v6303_v20  ;;  %v6607_v40 = vunpack.c.h.s8.bf16 %v6352_v3 }
0x1ac3   : > { %8288 = vmatpush3.bf16.msra.mxu1 %v6535_v2  ;;  %6763 = vmatpush1.bf16.msra.mxu0 %v6485_v62  ;;  %v6509_v50 = vunpack.c.h.s8.bf16 %v6302_v29  ;;  %v6583_v58 = vunpack.c.h.s8.bf16 %v6340_v52  ;;  %v6513_v63 = vunpack.c.l.s8.bf16 %v6306_v8  ;;  %v6305_v2 = vld [vmem:[%s10449_s4 + $0x1f8] sm:$0xff]  ;;  %v6610_v62 = vunpack.c.l.s8.bf16 %v6355_v45 }
0x1ac4   : > { %8289 = vmatprep.subr.bf16.mxu1 %v6562_v23  ;;  %6764 = vmatprep.subr.bf16.mxu0 %v6489_v42  ;;  %v6343_v23 = vld [vmem:[%s10449_s4 + $0x328] sm:$0xff]  ;;  %v6512_v42 = vunpack.c.l.s8.bf16 %v6305_v2  ;;  %v6516_v7 = vunpack.c.h.s8.bf16 %v6306_v8  ;;  %v6321_v8 = vld [vmem:[%s10449_s4 + $0x278] sm:$0xff] }
0x1ac5   : > { %v6586_v10 = vunpack.c.l.s8.bf16 %v6343_v23  ;;  %v6589_v49 = vunpack.c.h.s8.bf16 %v6343_v23 }
0x1ac7   : > { %8290 = vmatpush3.bf16.msra.mxu1 %v6538_v22  ;;  %6765 = vmatpush1.bf16.msra.mxu0 %v6488_v5  ;;  %v6613_v22 = vunpack.c.h.s8.bf16 %v6355_v45  ;;  %v6309_v5 = vld [vmem:[%s10449_s4 + $0x218] sm:$0xff] }
0x1ac8   : > { %8291 = vmatprep.subr.bf16.mxu1 %v6565_v47  ;;  %6766 = vmatprep.subr.bf16.mxu0 %v6492_v28  ;;  %v6358_v47 = vld [vmem:[%s10449_s4 + $0x3a0] sm:$0xff]  ;;  %v6515_v28 = vunpack.c.h.s8.bf16 %v6305_v2  ;;  %v6519_v56 = vunpack.c.l.s8.bf16 %v6309_v5  ;;  %v6522_v51 = vunpack.c.h.s8.bf16 %v6309_v5  ;;  %v6119_v2 = vld [vmem:[%s10447_s22 + $0x8] sm:$0xf] }
0x1acb   : > { %8292 = vmatpush3.bf16.msra.mxu1 %v6541_v0  ;;  %6767 = vmatpush1.bf16.msra.mxu0 %v6491_v53  ;;  %v6308_v0 = vld [vmem:[%s10449_s4 + $0x210] sm:$0xff]  ;;  %v6616_v53 = vunpack.c.l.s8.bf16 %v6358_v47 }
0x1acc   : > { %8293 = vmatprep.subr.bf16.mxu1 %v6568_v17  ;;  %6768 = vmatprep.subr.bf16.mxu0 %v6495_v6  ;;  %v6346_v17 = vld [vmem:[%s10449_s4 + $0x340] sm:$0xff]  ;;  %v6518_v6 = vunpack.c.l.s8.bf16 %v6308_v0 }
0x1acd   : > { %v6592_v9 = vunpack.c.l.s8.bf16 %v6346_v17  ;;  %v6595_v34 = vunpack.c.h.s8.bf16 %v6346_v17 }
0x1acf   : > { %8294 = vmatpush3.bf16.msra.mxu1 %v6544_v26  ;;  %6769 = vmatpush1.bf16.msra.mxu0 %v6494_v60  ;;  %v6619_v26 = vunpack.c.h.s8.bf16 %v6358_v47  ;;  %v6312_v60 = vld [vmem:[%s10449_s4 + $0x230] sm:$0xff] }
0x1ad0   : > { %8295 = vmatprep.subr.bf16.mxu1 %v6571_v15  ;;  %6770 = vmatprep.subr.bf16.mxu0 %v6498_v57  ;;  %v6361_v15 = vld [vmem:[%s10449_s4 + $0x3b8] sm:$0xff]  ;;  %v6521_v57 = vunpack.c.h.s8.bf16 %v6308_v0  ;;  %v6525_v31 = vunpack.c.l.s8.bf16 %v6312_v60  ;;  %v6528_v12 = vunpack.c.h.s8.bf16 %v6312_v60  ;;  %v6161_v0 = vrot.slane %v6119_v2, %v10566_v54 }
0x1ad3   : > { %8296 = vmatpush3.bf16.msra.mxu1 %v6547_v30  ;;  %6771 = vmatpush1.bf16.msra.mxu0 %v6497_v4  ;;  %v6311_v30 = vld [vmem:[%s10449_s4 + $0x228] sm:$0xff]  ;;  %v6622_v4 = vunpack.c.l.s8.bf16 %v6361_v15 }
0x1ad4   : > { %8297 = vmatprep.subr.bf16.mxu1 %v6574_v39  ;;  %6772 = vmatprep.subr.bf16.mxu0 %v6501_v27  ;;  %v6349_v39 = vld [vmem:[%s10449_s4 + $0x358] sm:$0xff]  ;;  %v6524_v27 = vunpack.c.l.s8.bf16 %v6311_v30 }
0x1ad5   : > { %v6598_v36 = vunpack.c.l.s8.bf16 %v6349_v39  ;;  %v6601_v20 = vunpack.c.h.s8.bf16 %v6349_v39 }
0x1ad7   : > { %8298 = vmatpush3.bf16.msra.mxu1 %v6550_v14  ;;  %6773 = vmatpush1.bf16.msra.mxu0 %v6500_v61  ;;  %v6625_v14 = vunpack.c.h.s8.bf16 %v6361_v15  ;;  %v6315_v61 = vld [vmem:[%s10449_s4 + $0x248] sm:$0xff] }
0x1ad8   : > { %8299 = vmatprep.subr.bf16.mxu1 %v6577_v13  ;;  %6774 = vmatprep.subr.bf16.mxu0 %v6504_v18  ;;  %v11507_v13 = vld [vmem:[%s10449_s4 + $0x430] sm:$0xff]  ;;  %v6527_v18 = vunpack.c.h.s8.bf16 %v6311_v30  ;;  %v6531_v3 = vunpack.c.l.s8.bf16 %v6315_v61  ;;  %v6534_v29 = vunpack.c.h.s8.bf16 %v6315_v61 }
0x1adb   : > { %8300 = vmatpush3.bf16.msra.mxu1 %v6553_v24  ;;  %6775 = vmatpush1.bf16.msra.mxu0 %v6503_v25  ;;  %v6314_v24 = vld [vmem:[%s10449_s4 + $0x240] sm:$0xff]  ;;  %v6652_v25 = vunpack.c.l.s8.bf16 %v11507_v13 }
0x1adc   : > { %6776 = vmatprep.subr.bf16.mxu0 %v6507_v33  ;;  %8307 = vmatprep.subr.bf16.mxu1 %v6604_v38  ;;  %v6530_v33 = vunpack.c.l.s8.bf16 %v6314_v24  ;;  %v6318_v38 = vld [vmem:[%s10449_s4 + $0x260] sm:$0xff]  ;;  %v6533_v52 = vunpack.c.h.s8.bf16 %v6314_v24 }
0x1ade   : > { %7088 = vmatmul.mubr.bf16.vlgmr.msra.gmra.mrb[68].mxu1 %v11468_v19 }
0x1adf   : > { %6777 = vmatpush1.bf16.msra.mxu0 %v6506_v43  ;;  %8308 = vmatpush3.bf16.msra.mxu1 %v6580_v16  ;;  %v6537_v43 = vunpack.c.l.s8.bf16 %v6318_v38  ;;  %v6317_v16 = vld [vmem:[%s10449_s4 + $0x258] sm:$0xff] }
0x1ae0   : > { %6778 = vmatprep.subr.bf16.mxu0 %v6510_v48  ;;  %8309 = vmatprep.subr.bf16.mxu1 %v6607_v40  ;;  %v6536_v48 = vunpack.c.l.s8.bf16 %v6317_v16  ;;  %v6540_v40 = vunpack.c.h.s8.bf16 %v6318_v38  ;;  %v6539_v45 = vunpack.c.h.s8.bf16 %v6317_v16 }
0x1ae3   : > { %6779 = vmatpush1.bf16.msra.mxu0 %v6509_v50  ;;  %8310 = vmatpush3.bf16.msra.mxu1 %v6583_v58  ;;  %v6320_v50 = vld [vmem:[%s10449_s4 + $0x270] sm:$0xff]  ;;  %v6031_v58 = vld [vmem:[%s10445_s14 + $0x8] sm:$0xf] }
0x1ae4   : > { %6780 = vmatprep.subr.bf16.mxu0 %v6513_v63  ;;  %8311 = vmatprep.subr.bf16.mxu1 %v6610_v62  ;;  %v6546_v63 = vunpack.c.h.s8.bf16 %v6321_v8  ;;  %v6324_v62 = vld [vmem:[%s10449_s4 + $0x290] sm:$0xff]  ;;  %v6069_v23 = vrot.slane %v6031_v58, %v10569_v55  ;;  %v6081_v5 = vrot.slane %v6031_v58, %v10738_v32 }
0x1ae5   : > { %v6549_v47 = vunpack.c.l.s8.bf16 %v6324_v62 }
0x1ae7   : > { %6781 = vmatpush1.bf16.msra.mxu0 %v6512_v42  ;;  %8312 = vmatpush3.bf16.msra.mxu1 %v6586_v10  ;;  %v6077_v42 = vrot.slane %v6031_v58, %v10622_v46  ;;  %v6073_v10 = vrot.slane %v6031_v58, %v10566_v54 }
0x1ae8   : > { %6782 = vmatprep.subr.bf16.mxu0 %v6516_v7  ;;  %8313 = vmatprep.subr.bf16.mxu1 %v6613_v22  ;;  %v6545_v7 = vunpack.c.h.s8.bf16 %v6320_v50  ;;  %v6157_v22 = vrot.slane %v6119_v2, %v10569_v55 }
0x1aeb   : > { %6783 = vmatpush1.bf16.msra.mxu0 %v6515_v28  ;;  %8314 = vmatpush3.bf16.msra.mxu1 %v6589_v49  ;;  %v6323_v28 = vld [vmem:[%s10449_s4 + $0x288] sm:$0xff] }
0x1aec   : > { %6784 = vmatprep.subr.bf16.mxu0 %v6519_v56  ;;  %8315 = vmatprep.subr.bf16.mxu1 %v6616_v53  ;;  %v6165_v56 = vrot.slane %v6119_v2, %v10622_v46 }
0x1aef   : > { %6785 = vmatpush1.bf16.msra.mxu0 %v6518_v6  ;;  %8316 = vmatpush3.bf16.msra.mxu1 %v6592_v9  ;;  %v6169_v9 = vrot.slane %v6119_v2, %v10738_v32 }
0x1af0   : > { %6786 = vmatprep.subr.bf16.mxu0 %v6522_v51  ;;  %8317 = vmatprep.subr.bf16.mxu1 %v6619_v26 }
0x1af3   : > { %6787 = vmatpush1.bf16.msra.mxu0 %v6521_v57  ;;  %8318 = vmatpush3.bf16.msra.mxu1 %v6595_v34  ;;  %v6548_v57 = vunpack.c.l.s8.bf16 %v6323_v28 }
0x1af4   : > { %6788 = vmatprep.subr.bf16.mxu0 %v6525_v31  ;;  %8319 = vmatprep.subr.bf16.mxu1 %v6622_v4 }
0x1af7   : > { %6789 = vmatpush1.bf16.msra.mxu0 %v6524_v27  ;;  %8320 = vmatpush3.bf16.msra.mxu1 %v6598_v36  ;;  %v6552_v27 = vunpack.c.h.s8.bf16 %v6324_v62 }
0x1af8   : > { %6790 = vmatprep.subr.bf16.mxu0 %v6528_v12  ;;  %8321 = vmatprep.subr.bf16.mxu1 %v6625_v14 }
0x1afb   : > { %6791 = vmatpush1.bf16.msra.mxu0 %v6527_v18  ;;  %8322 = vmatpush3.bf16.msra.mxu1 %v6601_v20  ;;  %v6327_v18 = vld [vmem:[%s10449_s4 + $0x2a8] sm:$0xff] }
0x1afc   : > { %6803 = vmatprep.subr.bf16.mxu0 %v6531_v3  ;;  %8329 = vmatprep.subr.bf16.mxu1 %v6652_v25  ;;  %v6555_v16 = vunpack.c.l.s8.bf16 %v6327_v18 }
0x1afe   : > { %6793 = vmatmul.mubr.bf16.vlgmr.msra.gmra.mrb[48].mxu0 %v11466_v1  ;;  %v6543_v1 = vunpack.c.l.s8.bf16 %v6321_v8 }
0x1aff   : > { %6804 = vmatpush1.bf16.msra.mxu0 %v6530_v33  ;;  %6835 = vmatprep.mubr.bf16.mxu0 %v11470_v37  ;;  %v6542_v37 = vunpack.c.l.s8.bf16 %v6320_v50 }
0x1b00   : > { %6805 = vmatprep.subr.bf16.mxu0 %v6534_v29  ;;  %v6551_v29 = vunpack.c.h.s8.bf16 %v6323_v28 }
0x1b03   : > { %6806 = vmatpush1.bf16.msra.mxu0 %v6533_v52 }
0x1b04   : > { %6807 = vmatprep.subr.bf16.mxu0 %v6537_v43 }
0x1b07   : > { %6808 = vmatpush1.bf16.msra.mxu0 %v6536_v48  ;;  %v6364_v48 = vld [vmem:[%s10449_s4 + $0x3d0] sm:$0xff] }
0x1b08   : > { %6809 = vmatprep.subr.bf16.mxu0 %v6540_v40  ;;  %v6326_v40 = vld [vmem:[%s10449_s4 + $0x2a0] sm:$0xff]  ;;  %v6631_v28 = vunpack.c.h.s8.bf16 %v6364_v48 }
0x1b0b   : > { %6810 = vmatpush1.bf16.msra.mxu0 %v6539_v45 }
0x1b0c   : > { %6811 = vmatprep.subr.bf16.mxu0 %v6543_v1 }
0x1b0f   : > { %6812 = vmatpush1.bf16.msra.mxu0 %v6542_v37 }
0x1b10   : > { %6813 = vmatprep.subr.bf16.mxu0 %v6546_v63 }
0x1b11   : > { %v5935_v49 = vpop.f32.mrb[44].mxu0 }
0x1b12   : > { %v6102_v53 = vmul.f32 %v6069_v23, %v5935_v49  ;;  %v6021_v17 = vpop.f32.mrb[52].mxu1  ;;  %v5937_v6 = vpop.f32.mrb[45].mxu0  ;;  %v6557_v49 = vunpack.c.h.s8.bf16 %v6326_v40 }
0x1b13   : > { %v6104_v51 = vmul.f32 %v6077_v42, %v6021_v17  ;;  %v6103_v26 = vmul.f32 %v6073_v10, %v5937_v6  ;;  %v6023_v60 = vpop.f32.mrb[53].mxu1  ;;  %v5939_v15 = vpop.f32.mrb[46].mxu0  ;;  %6814 = vmatpush1.bf16.msra.mxu0 %v6545_v7  ;;  %v6655_v7 = vunpack.c.h.s8.bf16 %v11507_v13  ;;  %v6329_v13 = vld [vmem:[%s10449_s4 + $0x2b8] sm:$0xff] }
0x1b14   : > { %v6190_v34 = vadd.f32 %v6157_v22, %v6102_v53  ;;  %v6105_v31 = vmul.f32 %v6081_v5, %v6023_v60  ;;  %v6114_v30 = vmul.f32 %v6069_v23, %v5939_v15  ;;  %v6025_v4 = vpop.f32.mrb[54].mxu1  ;;  %v5941_v39 = vpop.f32.mrb[47].mxu0  ;;  %6815 = vmatprep.subr.bf16.mxu0 %v6549_v47  ;;  %v6628_v23 = vunpack.c.l.s8.bf16 %v6364_v48  ;;  %v6330_v47 = vld [vmem:[%s10449_s4 + $0x2c0] sm:$0xff]  ;;  %v6367_v53 = vld [vmem:[%s10449_s4 + $0x3e8] sm:$0xff]  ;;  %v6333_v60 = vld [vmem:[%s10449_s4 + $0x2d8] sm:$0xff] }
0x1b15   : > { %v6192_v36 = vadd.f32 %v6165_v56, %v6104_v51  ;;  %v6191_v12 = vadd.f32 %v6161_v0, %v6103_v26  ;;  %v6116_v14 = vmul.f32 %v6077_v42, %v6025_v4  ;;  %v6115_v61 = vmul.f32 %v6073_v10, %v5941_v39  ;;  %v6027_v32 = vpop.f32.mrb[55].mxu1  ;;  %v6382_v26 = vld [vmem:[%s10449_s4 + $0x460] sm:$0xff]  ;;  %v6332_v4 = vld [vmem:[%s10449_s4 + $0x2d0] sm:$0xff] }
0x1b16   : > { %v6193_v20 = vadd.f32 %v6169_v9, %v6105_v31  ;;  %v6202_v3 = vadd.f32 %v6157_v22, %v6114_v30  ;;  %v6117_v24 = vmul.f32 %v6081_v5, %v6027_v32  ;;  %v6214_v38 = vmax.f32 %v6190_v34, 0.0  ;;  %v6379_v5 = vld [vmem:[%s10449_s4 + $0x448] sm:$0xff]  ;;  %v6370_v30 = vld [vmem:[%s10449_s4 + $0x400] sm:$0xff] }
0x1b17   : > { %v6204_v25 = vadd.f32 %v6165_v56, %v6116_v14  ;;  %v6203_v33 = vadd.f32 %v6161_v0, %v6115_v61  ;;  %6816 = vmatpush1.bf16.msra.mxu0 %v6548_v57  ;;  %v6216_v8 = vmax.f32 %v6192_v36, 0.0  ;;  %v6215_v45 = vmax.f32 %v6191_v12, 0.0  ;;  %v6385_v14 = vld [vmem:[%s10449_s4 + $0x478] sm:$0xff]  ;;  %v6336_v61 = vld [vmem:[%s10449_s4 + $0x2f0] sm:$0xff] }
0x1b18   : > { %v6226_v52 = vmax.f32 %v6202_v3, 0.0  ;;  %v6205_v43 = vadd.f32 %v6169_v9, %v6117_v24  ;;  %6817 = vmatprep.subr.bf16.mxu0 %v6552_v27  ;;  %v6217_v37 = vmax.f32 %v6193_v20, 0.0  ;;  %v6554_v42 = vunpack.c.l.s8.bf16 %v6326_v40  ;;  %v6373_v24 = vld [vmem:[%s10449_s4 + $0x418] sm:$0xff] }
0x1b19   : > { %v6228_v1 = vmax.f32 %v6204_v25, 0.0  ;;  %v6227_v50 = vmax.f32 %v6203_v33, 0.0  ;;  %v6558_v22 = vunpack.c.h.s8.bf16 %v6327_v18  ;;  %v6658_v56 = vunpack.c.l.s8.bf16 %v6379_v5  ;;  %v6335_v25 = vld [vmem:[%s10449_s4 + $0x2e8] sm:$0xff] }
0x1b1a   : > { %v11532_v58 = vpack.c.bf16 %v6226_v52, %v6214_v38  ;;  %v6229_v63 = vmax.f32 %v6205_v43, 0.0  ;;  %v6561_v0 = vunpack.c.l.s8.bf16 %v6330_v47  ;;  %v6634_v17 = vunpack.c.l.s8.bf16 %v6367_v53 }
0x1b1b   : > { %v11534_v2 = vpack.c.bf16 %v6228_v1, %v6216_v8  ;;  %6818 = vmatpush1.bf16.msra.mxu0 %v6551_v29  ;;  %v11536_v62 = vpack.c.bf16 %v6227_v50, %v6215_v45  ;;  %v6560_v6 = vunpack.c.l.s8.bf16 %v6329_v13  ;;  %v6661_v9 = vunpack.c.h.s8.bf16 %v6379_v5  ;;  %v6339_v45 = vld [vmem:[%s10449_s4 + $0x308] sm:$0xff] }
0x1b1c   : > { %6819 = vmatprep.subr.bf16.mxu0 %v6555_v16  ;;  %v11538_v10 = vpack.c.bf16 %v6229_v63, %v6217_v37  ;;  %v6564_v51 = vunpack.c.h.s8.bf16 %v6330_v47  ;;  %v6637_v15 = vunpack.c.h.s8.bf16 %v6367_v53  ;;  %v6563_v57 = vunpack.c.h.s8.bf16 %v6329_v13 }
0x1b1d   : > { %7128 = vmatprep.mubr.bf16.mxu1 %v11536_v62  ;;  %v6664_v34 = vunpack.c.l.s8.bf16 %v6382_v26  ;;  %v6567_v31 = vunpack.c.l.s8.bf16 %v6333_v60  ;;  %v6640_v39 = vunpack.c.l.s8.bf16 %v6370_v30  ;;  %v6566_v27 = vunpack.c.l.s8.bf16 %v6332_v4 }
0x1b1e   : > { %7129 = vmatmul.mubr.bf16.vlgmr.msra.gmra.mrb[72].mxu1 %v11532_v58  ;;  %v6667_v36 = vunpack.c.h.s8.bf16 %v6382_v26  ;;  %v6570_v12 = vunpack.c.h.s8.bf16 %v6333_v60  ;;  %v6643_v32 = vunpack.c.h.s8.bf16 %v6370_v30  ;;  %v6569_v18 = vunpack.c.h.s8.bf16 %v6332_v4  ;;  %v6347_v26 = vld [vmem:[%s10449_s4 + $0x348] sm:$0xff] }
0x1b1f   : > { %8330 = vmatpush3.bf16.msra.mxu1 %v6628_v23  ;;  %6820 = vmatpush1.bf16.msra.mxu0 %v6554_v42  ;;  %v6670_v20 = vunpack.c.l.s8.bf16 %v6385_v14  ;;  %v6573_v3 = vunpack.c.l.s8.bf16 %v6336_v61  ;;  %v6646_v38 = vunpack.c.l.s8.bf16 %v6373_v24  ;;  %v6572_v52 = vunpack.c.l.s8.bf16 %v6335_v25  ;;  %v6338_v23 = vld [vmem:[%s10449_s4 + $0x300] sm:$0xff] }
0x1b20   : > { %7169 = vmatprep.mubr.bf16.mxu1 %v11538_v10  ;;  %8331 = vmatprep.subr.bf16.mxu1 %v6655_v7  ;;  %v6673_v48 = vunpack.c.h.s8.bf16 %v6385_v14  ;;  %v6576_v40 = vunpack.c.h.s8.bf16 %v6336_v61  ;;  %v6649_v50 = vunpack.c.h.s8.bf16 %v6373_v24  ;;  %v6575_v37 = vunpack.c.h.s8.bf16 %v6335_v25 }
0x1b21   : > { %6821 = vmatprep.subr.bf16.mxu0 %v6558_v22  ;;  %v6579_v63 = vunpack.c.l.s8.bf16 %v6339_v45  ;;  %v6578_v42 = vunpack.c.l.s8.bf16 %v6338_v23  ;;  %v6582_v7 = vunpack.c.h.s8.bf16 %v6339_v45  ;;  %v6342_v22 = vld [vmem:[%s10449_s4 + $0x320] sm:$0xff]  ;;  %v6581_v5 = vunpack.c.h.s8.bf16 %v6338_v23  ;;  %v6360_v45 = vld [vmem:[%s10449_s4 + $0x3b0] sm:$0xff] }
0x1b22   : > { %v6585_v47 = vunpack.c.l.s8.bf16 %v6342_v22  ;;  %v6624_v23 = vunpack.c.h.s8.bf16 %v6360_v45 }
0x1b23   : > { %8332 = vmatpush3.bf16.msra.mxu1 %v6631_v28  ;;  %6822 = vmatpush1.bf16.msra.mxu0 %v6557_v49  ;;  %v6341_v28 = vld [vmem:[%s10449_s4 + $0x318] sm:$0xff] }
0x1b24   : > { %8333 = vmatprep.subr.bf16.mxu1 %v6658_v56  ;;  %6823 = vmatprep.subr.bf16.mxu0 %v6561_v0  ;;  %v6584_v49 = vunpack.c.l.s8.bf16 %v6341_v28  ;;  %v6588_v56 = vunpack.c.h.s8.bf16 %v6342_v22  ;;  %v6345_v0 = vld [vmem:[%s10449_s4 + $0x338] sm:$0xff]  ;;  %v6587_v53 = vunpack.c.h.s8.bf16 %v6341_v28 }
0x1b25   : > { %v6591_v13 = vunpack.c.l.s8.bf16 %v6345_v0 }
0x1b27   : > { %8334 = vmatpush3.bf16.msra.mxu1 %v6634_v17  ;;  %6824 = vmatpush1.bf16.msra.mxu0 %v6560_v6  ;;  %v6348_v6 = vld [vmem:[%s10449_s4 + $0x350] sm:$0xff] }
0x1b28   : > { %8335 = vmatprep.subr.bf16.mxu1 %v6661_v9  ;;  %6825 = vmatprep.subr.bf16.mxu0 %v6564_v51  ;;  %v6597_v51 = vunpack.c.l.s8.bf16 %v6348_v6  ;;  %v6600_v30 = vunpack.c.h.s8.bf16 %v6348_v6 }
0x1b2b   : > { %8336 = vmatpush3.bf16.msra.mxu1 %v6637_v15  ;;  %6826 = vmatpush1.bf16.msra.mxu0 %v6563_v57  ;;  %v6596_v57 = vunpack.c.l.s8.bf16 %v6347_v26 }
0x1b2c   : > { %8337 = vmatprep.subr.bf16.mxu1 %v6664_v34  ;;  %6827 = vmatprep.subr.bf16.mxu0 %v6567_v31 }
0x1b2f   : > { %8338 = vmatpush3.bf16.msra.mxu1 %v6640_v39  ;;  %6828 = vmatpush1.bf16.msra.mxu0 %v6566_v27  ;;  %v6351_v39 = vld [vmem:[%s10449_s4 + $0x368] sm:$0xff] }
0x1b30   : > { %8339 = vmatprep.subr.bf16.mxu1 %v6667_v36  ;;  %6829 = vmatprep.subr.bf16.mxu0 %v6570_v12  ;;  %v6599_v12 = vunpack.c.h.s8.bf16 %v6347_v26  ;;  %v6603_v61 = vunpack.c.l.s8.bf16 %v6351_v39 }
0x1b32   : > { %v8235_v33 = vpop.f32.mrb[56].mxu1 }
0x1b33   : > { %v8236_v29 = vpop.f32.mrb[57].mxu1  ;;  %8340 = vmatpush3.bf16.msra.mxu1 %v6643_v32  ;;  %6830 = vmatpush1.bf16.msra.mxu0 %v6569_v18  ;;  %v6350_v32 = vld [vmem:[%s10449_s4 + $0x360] sm:$0xff] }
0x1b34   : > { %v8237_v43 = vadd.f32 %v8236_v29, %v8235_v33  ;;  %v8238_v16 = vpop.f32.mrb[58].mxu1  ;;  %8341 = vmatprep.subr.bf16.mxu1 %v6670_v20  ;;  %6831 = vmatprep.subr.bf16.mxu0 %v6573_v3  ;;  %v6602_v18 = vunpack.c.l.s8.bf16 %v6350_v32  ;;  %v6606_v20 = vunpack.c.h.s8.bf16 %v6351_v39  ;;  %v6354_v3 = vld [vmem:[%s10449_s4 + $0x380] sm:$0xff]  ;;  %v6605_v24 = vunpack.c.h.s8.bf16 %v6350_v32  ;;  %v6353_v33 = vld [vmem:[%s10449_s4 + $0x378] sm:$0xff]  ;;  %v6375_v32 = vld [vmem:[%s10449_s4 + $0x428] sm:$0xff] }
0x1b35   : > { %v8239_v8 = vpop.f32.mrb[59].mxu1  ;;  %v6609_v25 = vunpack.c.l.s8.bf16 %v6354_v3  ;;  %v6608_v29 = vunpack.c.l.s8.bf16 %v6353_v33 }
0x1b36   : > { %v8240_v1 = vadd.f32 %v8239_v8, %v8238_v16 }
0x1b37   : > { %8342 = vmatpush3.bf16.msra.mxu1 %v6646_v38  ;;  %6832 = vmatpush1.bf16.msra.mxu0 %v6572_v52  ;;  %v6612_v38 = vunpack.c.h.s8.bf16 %v6354_v3  ;;  %v6357_v52 = vld [vmem:[%s10449_s4 + $0x398] sm:$0xff]  ;;  %v6651_v3 = vunpack.c.l.s8.bf16 %v6375_v32 }
0x1b38   : > { %8343 = vmatprep.subr.bf16.mxu1 %v6673_v48  ;;  %6833 = vmatprep.subr.bf16.mxu0 %v6576_v40  ;;  %v6615_v16 = vunpack.c.l.s8.bf16 %v6357_v52  ;;  %v6356_v48 = vld [vmem:[%s10449_s4 + $0x390] sm:$0xff]  ;;  %v6618_v8 = vunpack.c.h.s8.bf16 %v6357_v52  ;;  %v6377_v52 = vld [vmem:[%s10449_s4 + $0x438] sm:$0xff] }
0x1b39   : > { %v6614_v40 = vunpack.c.l.s8.bf16 %v6356_v48 }
0x1b3b   : > { %8344 = vmatpush3.bf16.msra.mxu1 %v6649_v50  ;;  %6834 = vmatpush1.bf16.msra.mxu0 %v6575_v37  ;;  %v6621_v50 = vunpack.c.l.s8.bf16 %v6360_v45  ;;  %v6359_v37 = vld [vmem:[%s10449_s4 + $0x3a8] sm:$0xff] }
0x1b3c   : > { %6846 = vmatprep.subr.bf16.mxu0 %v6579_v63  ;;  %v6620_v63 = vunpack.c.l.s8.bf16 %v6359_v37 }
0x1b3e   : > { %7170 = vmatmul.mubr.bf16.vlgmr.msra.gmra.mrb[76].mxu1 %v11534_v2  ;;  %6836 = vmatmul.mubr.bf16.vlgmr.msra.gmra.mrb[48].mxu0 %v11468_v19  ;;  %v6344_v19 = vld [vmem:[%s10449_s4 + $0x330] sm:$0xff] }
0x1b3f   : > { %6847 = vmatpush1.bf16.msra.mxu0 %v6578_v42  ;;  %6878 = vmatprep.mubr.bf16.mxu0 %v11536_v62  ;;  %v6590_v17 = vunpack.c.l.s8.bf16 %v6344_v19  ;;  %v6594_v62 = vunpack.c.h.s8.bf16 %v6345_v0  ;;  %v6593_v9 = vunpack.c.h.s8.bf16 %v6344_v19  ;;  %v6363_v42 = vld [vmem:[%s10449_s4 + $0x3c8] sm:$0xff] }
0x1b40   : > { %6848 = vmatprep.subr.bf16.mxu0 %v6582_v7  ;;  %v6623_v7 = vunpack.c.h.s8.bf16 %v6359_v37  ;;  %v6627_v22 = vunpack.c.l.s8.bf16 %v6363_v42  ;;  %v6630_v28 = vunpack.c.h.s8.bf16 %v6363_v42 }
0x1b43   : > { %6849 = vmatpush1.bf16.msra.mxu0 %v6581_v5  ;;  %v6362_v5 = vld [vmem:[%s10449_s4 + $0x3c0] sm:$0xff] }
0x1b44   : > { %6850 = vmatprep.subr.bf16.mxu0 %v6585_v47  ;;  %v6626_v47 = vunpack.c.l.s8.bf16 %v6362_v5 }
0x1b47   : > { %6851 = vmatpush1.bf16.msra.mxu0 %v6584_v49  ;;  %v6366_v49 = vld [vmem:[%s10449_s4 + $0x3e0] sm:$0xff] }
0x1b48   : > { %6852 = vmatprep.subr.bf16.mxu0 %v6588_v56  ;;  %v6629_v56 = vunpack.c.h.s8.bf16 %v6362_v5  ;;  %v6633_v0 = vunpack.c.l.s8.bf16 %v6366_v49  ;;  %v6636_v19 = vunpack.c.h.s8.bf16 %v6366_v49 }
0x1b4b   : > { %6853 = vmatpush1.bf16.msra.mxu0 %v6587_v53  ;;  %v6365_v53 = vld [vmem:[%s10449_s4 + $0x3d8] sm:$0xff] }
0x1b4c   : > { %6854 = vmatprep.subr.bf16.mxu0 %v6591_v13  ;;  %v6632_v13 = vunpack.c.l.s8.bf16 %v6365_v53 }
0x1b4f   : > { %6855 = vmatpush1.bf16.msra.mxu0 %v6590_v17  ;;  %v6369_v17 = vld [vmem:[%s10449_s4 + $0x3f8] sm:$0xff] }
0x1b50   : > { %6856 = vmatprep.subr.bf16.mxu0 %v6594_v62  ;;  %v6635_v62 = vunpack.c.h.s8.bf16 %v6365_v53  ;;  %v6639_v6 = vunpack.c.l.s8.bf16 %v6369_v17 }
0x1b52   : > { %v8257_v60 = vpop.f32.mrb[60].mxu1 }
0x1b53   : > { %v8258_v15 = vpop.f32.mrb[61].mxu1  ;;  %6857 = vmatpush1.bf16.msra.mxu0 %v6593_v9 }
0x1b54   : > { %v8259_v34 = vadd.f32 %v8258_v15, %v8257_v60  ;;  %v8260_v31 = vpop.f32.mrb[62].mxu1  ;;  %6858 = vmatprep.subr.bf16.mxu0 %v6597_v51  ;;  %v6372_v51 = vld [vmem:[%s10449_s4 + $0x410] sm:$0xff]  ;;  %v6371_v15 = vld [vmem:[%s10449_s4 + $0x408] sm:$0xff] }
0x1b55   : > { %v8261_v4 = vpop.f32.mrb[63].mxu1  ;;  %v6645_v60 = vunpack.c.l.s8.bf16 %v6372_v51 }
0x1b56   : > { %v11568_v27 = vadd.f32 %v8259_v34, %v8237_v43  ;;  %v8262_v36 = vadd.f32 %v8261_v4, %v8260_v31  ;;  %v6611_v43 = vunpack.c.h.s8.bf16 %v6353_v33  ;;  %v6644_v4 = vunpack.c.l.s8.bf16 %v6371_v15 }
0x1b57   : > { %6859 = vmatpush1.bf16.msra.mxu0 %v6596_v57  ;;  %v6654_v33 = vunpack.c.h.s8.bf16 %v6375_v32 }
0x1b58   : > { %v11570_v14 = vadd.f32 %v8262_v36, %v8240_v1  ;;  %6860 = vmatprep.subr.bf16.mxu0 %v6600_v30  ;;  %v6617_v1 = vunpack.c.h.s8.bf16 %v6356_v48  ;;  %v6648_v36 = vunpack.c.h.s8.bf16 %v6372_v51  ;;  %v6659_v48 = vunpack.c.h.s8.bf16 %v6377_v52 }
0x1b5b   : > { %6861 = vmatpush1.bf16.msra.mxu0 %v6599_v12 }
0x1b5c   : > { %6862 = vmatprep.subr.bf16.mxu0 %v6603_v61 }
0x1b5f   : > { %6863 = vmatpush1.bf16.msra.mxu0 %v6602_v18 }
0x1b60   : > { %6864 = vmatprep.subr.bf16.mxu0 %v6606_v20  ;;  %v6647_v20 = vunpack.c.h.s8.bf16 %v6371_v15 }
0x1b63   : > { %6865 = vmatpush1.bf16.msra.mxu0 %v6605_v24  ;;  %v6374_v24 = vld [vmem:[%s10449_s4 + $0x420] sm:$0xff] }
0x1b64   : > { %6866 = vmatprep.subr.bf16.mxu0 %v6609_v25  ;;  %v6650_v25 = vunpack.c.l.s8.bf16 %v6374_v24 }
0x1b67   : > { %6867 = vmatpush1.bf16.msra.mxu0 %v6608_v29  ;;  %v6378_v29 = vld [vmem:[%s10449_s4 + $0x440] sm:$0xff] }
0x1b68   : > { %6868 = vmatprep.subr.bf16.mxu0 %v6612_v38  ;;  %v6653_v38 = vunpack.c.h.s8.bf16 %v6374_v24 }
0x1b6b   : > { %6869 = vmatpush1.bf16.msra.mxu0 %v6611_v43  ;;  %v6660_v43 = vunpack.c.h.s8.bf16 %v6378_v29 }
0x1b6c   : > { %6870 = vmatprep.subr.bf16.mxu0 %v6615_v16  ;;  %v6381_v16 = vld [vmem:[%s10449_s4 + $0x458] sm:$0xff] }
0x1b6f   : > { %6871 = vmatpush1.bf16.msra.mxu0 %v6614_v40  ;;  %v6663_v40 = vunpack.c.l.s8.bf16 %v6381_v16 }
0x1b70   : > { %6872 = vmatprep.subr.bf16.mxu0 %v6618_v8  ;;  %v6380_v8 = vld [vmem:[%s10449_s4 + $0x450] sm:$0xff] }
0x1b71   : > { %v6662_v45 = vunpack.c.l.s8.bf16 %v6380_v8  ;;  %v6665_v37 = vunpack.c.h.s8.bf16 %v6380_v8 }
0x1b73   : > { %6873 = vmatpush1.bf16.msra.mxu0 %v6617_v1  ;;  %v6666_v1 = vunpack.c.h.s8.bf16 %v6381_v16 }
0x1b74   : > { %6874 = vmatprep.subr.bf16.mxu0 %v6621_v50  ;;  %v6384_v50 = vld [vmem:[%s10449_s4 + $0x470] sm:$0xff] }
0x1b75   : > { %v6672_v49 = vunpack.c.h.s8.bf16 %v6384_v50 }
0x1b77   : > { %6875 = vmatpush1.bf16.msra.mxu0 %v6620_v63  ;;  %v6669_v63 = vunpack.c.l.s8.bf16 %v6384_v50 }
0x1b78   : > { %6876 = vmatprep.subr.bf16.mxu0 %v6624_v23  ;;  %v6383_v23 = vld [vmem:[%s10449_s4 + $0x468] sm:$0xff] }
0x1b7b   : > { %6877 = vmatpush1.bf16.msra.mxu0 %v6623_v7 }
0x1b7c   : > { %6889 = vmatprep.subr.bf16.mxu0 %v6627_v22 }
0x1b7e   : > { %6879 = vmatmul.mubr.bf16.vlgmr.msra.gmra.mrb[48].mxu0 %v11532_v58  ;;  %v6368_v58 = vld [vmem:[%s10449_s4 + $0x3f0] sm:$0xff] }
0x1b7f   : > { %6890 = vmatpush1.bf16.msra.mxu0 %v6626_v47  ;;  %6921 = vmatprep.mubr.bf16.mxu0 %v11538_v10  ;;  %v6638_v9 = vunpack.c.l.s8.bf16 %v6368_v58  ;;  %v6642_v10 = vunpack.c.h.s8.bf16 %v6369_v17  ;;  %v6641_v26 = vunpack.c.h.s8.bf16 %v6368_v58  ;;  %v6668_v47 = vunpack.c.l.s8.bf16 %v6383_v23 }
0x1b80   : > { %6891 = vmatprep.subr.bf16.mxu0 %v6630_v28 }
0x1b83   : > { %6892 = vmatpush1.bf16.msra.mxu0 %v6629_v56 }
0x1b84   : > { %6893 = vmatprep.subr.bf16.mxu0 %v6633_v0 }
0x1b87   : > { %6894 = vmatpush1.bf16.msra.mxu0 %v6632_v13  ;;  %v6671_v13 = vunpack.c.h.s8.bf16 %v6383_v23 }
0x1b88   : > { %6895 = vmatprep.subr.bf16.mxu0 %v6636_v19 }
0x1b8b   : > { %6896 = vmatpush1.bf16.msra.mxu0 %v6635_v62 }
0x1b8c   : > { %6897 = vmatprep.subr.bf16.mxu0 %v6639_v6 }
0x1b8f   : > { %6898 = vmatpush1.bf16.msra.mxu0 %v6638_v9 }
0x1b90   : > { %6899 = vmatprep.subr.bf16.mxu0 %v6642_v10 }
0x1b91   : > { %v8279_v57 = vpop.f32.mrb[64].mxu1 }
0x1b92   : > { %v8280_v34 = vpop.f32.mrb[65].mxu1 }
0x1b93   : > { %v8281_v31 = vadd.f32 %v8280_v34, %v8279_v57  ;;  %6900 = vmatpush1.bf16.msra.mxu0 %v6641_v26  ;;  %v8282_v30 = vpop.f32.mrb[66].mxu1  ;;  %v7178_v26 = vld [vmem:[%s1002_s6] sm:$0x7]  ;;  %v7201_v57 = vld [vmem:[%s1011_s7] sm:$0x7]  ;;  %s11820_s6 = sld [smem:[#allocation37_spill]] }
0x1b94   : > { %v8283_v39 = vpop.f32.mrb[67].mxu1  ;;  %6901 = vmatprep.subr.bf16.mxu0 %v6645_v60 }
0x1b95   : > { %v7049_v12 = vadd.f32 %v8281_v31, %v11568_v27  ;;  %v8284_v61 = vadd.f32 %v8283_v39, %v8282_v30  ;;  %v6657_v27 = vunpack.c.l.s8.bf16 %v6378_v29  ;;  %v7191_v31 = vrot.slane %v7178_v26, %v10622_v46 }
0x1b96   : > { %v7214_v39 = vrot.slane %v7201_v57, %v10622_v46  ;;  %v7206_v29 = vrot.slane %v7201_v57, %v10569_v55 }
0x1b97   : > { %v7052_v18 = vadd.f32 %v8284_v61, %v11570_v14  ;;  %6902 = vmatpush1.bf16.msra.mxu0 %v6644_v4  ;;  %v6656_v14 = vunpack.c.l.s8.bf16 %v6377_v52 }
0x1b98   : > { %6903 = vmatprep.subr.bf16.mxu0 %v6648_v36 }
0x1b99   : > { %p8057_p1 = scmp.ne.s32.totalorder %s11820_s6, 5 }
0x1b9a   : > { %vm9740_vm7 = vmmov (!%p8057_p1), 0  }
0x1b9b   : > { %6904 = vmatpush1.bf16.msra.mxu0 %v6647_v20 }
0x1b9c   : > { %6905 = vmatprep.subr.bf16.mxu0 %v6651_v3 }
0x1b9f   : > { %6906 = vmatpush1.bf16.msra.mxu0 %v6650_v25  ;;  %v7183_v25 = vrot.slane %v7178_v26, %v10569_v55 }
0x1ba0   : > { %6907 = vmatprep.subr.bf16.mxu0 %v6654_v33  ;;  %v7187_v33 = vrot.slane %v7178_v26, %v10566_v54 }
0x1ba3   : > { %6908 = vmatpush1.bf16.msra.mxu0 %v6653_v38 }
0x1ba4   : > { %6909 = vmatprep.subr.bf16.mxu0 %v6657_v27  ;;  %v7210_v27 = vrot.slane %v7201_v57, %v10566_v54 }
0x1ba7   : > { %6910 = vmatpush1.bf16.msra.mxu0 %v6656_v14 }
0x1ba8   : > { %6911 = vmatprep.subr.bf16.mxu0 %v6660_v43 }
0x1bab   : > { %6912 = vmatpush1.bf16.msra.mxu0 %v6659_v48 }
0x1bac   : > { %6913 = vmatprep.subr.bf16.mxu0 %v6663_v40 }
0x1baf   : > { %6914 = vmatpush1.bf16.msra.mxu0 %v6662_v45 }
0x1bb0   : > { %6915 = vmatprep.subr.bf16.mxu0 %v6666_v1 }
0x1bb1   : > { %v8301_v42 = vpop.f32.mrb[68].mxu1 }
0x1bb2   : > { %v8302_v7 = vpop.f32.mrb[69].mxu1 }
0x1bb3   : > { %v8303_v22 = vadd.f32 %v8302_v7, %v8301_v42  ;;  %v8304_v5 = vpop.f32.mrb[70].mxu1  ;;  %6916 = vmatpush1.bf16.msra.mxu0 %v6665_v37 }
0x1bb4   : > { %v8305_v28 = vpop.f32.mrb[71].mxu1  ;;  %6917 = vmatprep.subr.bf16.mxu0 %v6669_v63 }
0x1bb5   : > { %v7090_v56 = vadd.f32 %v8303_v22, %v7049_v12  ;;  %v8306_v0 = vadd.f32 %v8305_v28, %v8304_v5  ;;  %v9056_v5 = vld [vmem:[#allocation25 + $0x40] sm:$0xff] (!%p8057_p1)   ;;  %v9739_v28 = vmov (!%p8057_p1), 0.0  }
0x1bb6   : > { %8629 = vmatprep.subr.bf16.mxu1 (!%p8057_p1), %v9739_v28  ;;  %8645 = vmatprep.mubr.msk.bf16.mxu1 (!%p8057_p1), %vm9740_vm7, %v9739_v28 }
0x1bb7   : > { %v7093_v53 = vadd.f32 %v8306_v0, %v7052_v18  ;;  %6918 = vmatpush1.bf16.msra.mxu0 %v6668_v47  ;;  %v9058_v47 = vld [vmem:[#allocation25] sm:$0xff] (!%p8057_p1)  }
0x1bb8   : > { %6919 = vmatprep.subr.bf16.mxu0 %v6672_v49 }
0x1bbb   : > { %6920 = vmatpush1.bf16.msra.mxu0 %v6671_v13 }
0x1bbc   : > { %8351 = vmatprep.subr.bf16.mxu0 (!%p8057_p1), %v9056_v5 }
0x1bbe   : > { %6922 = vmatmul.mubr.bf16.vlgmr.msra.gmra.mrb[48].mxu0 %v11534_v2 }
0x1bbf   : > { %8352 = vmatpush3.bf16.msra.mxu0 (!%p8057_p1), %v9058_v47 }
0x1bf1   : > { %v8323_v19 = vpop.f32.mrb[72].mxu1 }
0x1bf2   : > { %v8324_v17 = vpop.f32.mrb[73].mxu1 }
0x1bf3   : > { %v8325_v62 = vadd.f32 %v8324_v17, %v8323_v19  ;;  %v8326_v6 = vpop.f32.mrb[74].mxu1 }
0x1bf4   : > { %v8327_v58 = vpop.f32.mrb[75].mxu1 }
0x1bf5   : > { %v7131_v9 = vadd.f32 %v8325_v62, %v7090_v56  ;;  %v8328_v10 = vadd.f32 %v8327_v58, %v8326_v6 }
0x1bf7   : > { %v7134_v51 = vadd.f32 %v8328_v10, %v7093_v53 }
0x1c11   : > { %v8345_v60 = vpop.f32.mrb[76].mxu1 }
0x1c12   : > { %v8346_v15 = vpop.f32.mrb[77].mxu1 }
0x1c13   : > { %v8347_v34 = vadd.f32 %v8346_v15, %v8345_v60  ;;  %v8348_v30 = vpop.f32.mrb[78].mxu1 }
0x1c14   : > { %v8349_v4 = vpop.f32.mrb[79].mxu1 }
0x1c15   : > { %v7172_v2 = vadd.f32 %v8347_v34, %v7131_v9  ;;  %v8350_v36 = vadd.f32 %v8349_v4, %v8348_v30  ;;  %v9060_v30 = vld [vmem:[#allocation25 + $0x88] sm:$0xff] (!%p8057_p1)  }
0x1c16   : > { %v9061_v4 = vld [vmem:[#allocation25 + $0x8] sm:$0xff] (!%p8057_p1)  }
0x1c17   : > { %v7197_v12 = vmul.f32 %v7191_v31, %v7172_v2  ;;  %v7175_v61 = vadd.f32 %v8350_v36, %v7134_v51  ;;  %v9062_v2 = vld [vmem:[#allocation25 + $0x50] sm:$0xff] (!%p8057_p1)  }
0x1c18   : > { %v9064_v36 = vld [vmem:[#allocation25 + $0x10] sm:$0xff] (!%p8057_p1)  }
0x1c19   : > { %v7220_v32 = vadd.f32 %v7214_v39, %v7197_v12  ;;  %v7200_v18 = vmul.f32 %v7191_v31, %v7175_v61  ;;  %v9059_v31 = vld [vmem:[#allocation25 + $0x48] sm:$0xff] (!%p8057_p1)   ;;  %v9065_v12 = vld [vmem:[#allocation25 + $0x58] sm:$0xff] (!%p8057_p1)  }
0x1c1a   : > { %8353 = vmatprep.subr.bf16.mxu0 (!%p8057_p1), %v9059_v31  ;;  %v9066_v61 = vld [vmem:[#allocation25 + $0x98] sm:$0xff] (!%p8057_p1)  }
0x1c1b   : > { %v7226_v20 = vadd.f32 %v7220_v32, %v11090_v41  ;;  %v7223_v3 = vadd.f32 %v7214_v39, %v7200_v18  ;;  %8354 = vmatpush3.bf16.msra.mxu0 (!%p8057_p1), %v9061_v4  ;;  %v9063_v39 = vld [vmem:[#allocation25 + $0x90] sm:$0xff] (!%p8057_p1)   ;;  %v9067_v32 = vld [vmem:[#allocation25 + $0x18] sm:$0xff] (!%p8057_p1)   ;;  %v9068_v18 = vld [vmem:[#allocation25 + $0x60] sm:$0xff] (!%p8057_p1)  }
0x1c1c   : > { %8355 = vmatprep.subr.bf16.mxu0 (!%p8057_p1), %v9062_v2 }
0x1c1d   : > { %7232 = vst [vmem:[#allocation2 + $0x10] sm:$0xff] %v7226_v20  ;;  %v7229_v24 = vadd.f32 %v7223_v3, %v11096_v44  ;;  %v9070_v3 = vld [vmem:[#allocation25 + $0x20] sm:$0xff] (!%p8057_p1)  }
0x1c1f   : > { %7235 = vst [vmem:[#allocation2 + $0x28] sm:$0xff] %v7229_v24  ;;  %8356 = vmatpush3.bf16.msra.mxu0 (!%p8057_p1), %v9064_v36 }
0x1c20   : > { %8357 = vmatprep.subr.bf16.mxu0 (!%p8057_p1), %v9065_v12 }
0x1c23   : > { %8358 = vmatpush3.bf16.msra.mxu0 (!%p8057_p1), %v9067_v32 }
0x1c24   : > { %8359 = vmatprep.subr.bf16.mxu0 (!%p8057_p1), %v9068_v18 }
0x1c27   : > { %8360 = vmatpush3.bf16.msra.mxu0 (!%p8057_p1), %v9070_v3 }
0x1c91   : > { %v6923_v38 = vpop.f32.mrb[48].mxu0 }
0x1c92   : > { %v7195_v52 = vmul.f32 %v7183_v25, %v6923_v38  ;;  %v6925_v14 = vpop.f32.mrb[49].mxu0  ;;  %v9075_v38 = vld [vmem:[#allocation25 + $0xb0] sm:$0xff] (!%p8057_p1)  }
0x1c93   : > { %v7196_v43 = vmul.f32 %v7187_v33, %v6925_v14  ;;  %v6927_v16 = vpop.f32.mrb[50].mxu0  ;;  %v9078_v14 = vld [vmem:[#allocation25 + $0xb8] sm:$0xff] (!%p8057_p1)  }
0x1c94   : > { %v7218_v48 = vadd.f32 %v7206_v29, %v7195_v52  ;;  %v7198_v41 = vmul.f32 %v7183_v25, %v6927_v16  ;;  %v6929_v40 = vpop.f32.mrb[51].mxu0  ;;  %v9072_v25 = vld [vmem:[#allocation25 + $0xa8] sm:$0xff] (!%p8057_p1)   ;;  %v9077_v52 = vld [vmem:[#allocation25 + $0x78] sm:$0xff] (!%p8057_p1)  }
0x1c95   : > { %v7219_v8 = vadd.f32 %v7210_v27, %v7196_v43  ;;  %v7199_v45 = vmul.f32 %v7187_v33, %v6929_v40  ;;  %7239 = sbr.rel (%p8057_p1) target bundleno = 7871 (0x1ebf), region = 184  ;;  %v9073_v33 = vld [vmem:[#allocation25 + $0x28] sm:$0xff] (!%p8057_p1)   ;;  %v9079_v43 = vld [vmem:[#allocation25 + $0x38] sm:$0xff] (!%p8057_p1)  }
0x1c96   : > { %v7224_v44 = vadd.f32 %v7218_v48, %v11084_v11  ;;  %v7221_v1 = vadd.f32 %v7206_v29, %v7198_v41  ;;  %v9074_v29 = vld [vmem:[#allocation25 + $0x70] sm:$0xff] (!%p8057_p1)  }
0x1c97   : > { %v7225_v50 = vadd.f32 %v7219_v8, %v11086_v35  ;;  %v7222_v37 = vadd.f32 %v7210_v27, %v7199_v45  ;;  %v9057_v35 = vld [vmem:[#allocation25 + $0x80] sm:$0xff] (!%p8057_p1)   ;;  %v9076_v27 = vld [vmem:[#allocation25 + $0x30] sm:$0xff] (!%p8057_p1)  }
0x1c98   : > { %7230 = vst [vmem:[#allocation2] sm:$0xff] %v7224_v44  ;;  %v7227_v63 = vadd.f32 %v7221_v1, %v11088_v21  ;;  %8630 = vmatpush3.bf16.msra.mxu1 (!%p8057_p1), %v9057_v35 }
0x1c99   : > { %7231 = vst [vmem:[#allocation2 + $0x8] sm:$0xff] %v7225_v50  ;;  %v7228_v23 = vadd.f32 %v7222_v37, %v11092_v59  ;;  %v7240_v42 = vadd.f32 (!%p8057_p1), %v7225_v50, %v7224_v44  ;;  %8631 = vmatprep.subr.bf16.mxu1 (!%p8057_p1), %v9739_v28 }
0x1c9a   : > { %7233 = vst [vmem:[#allocation2 + $0x18] sm:$0xff] %v7227_v63 }
0x1c9b   : > { %7234 = vst [vmem:[#allocation2 + $0x20] sm:$0xff] %v7228_v23  ;;  %v7244_v7 = vadd.f32 (!%p8057_p1), %v7228_v23, %v7227_v63  ;;  %v7241_v22 = vadd.f32 (!%p8057_p1), %v7240_v42, %v7226_v20 }
0x1c9c   : > { %8632 = vmatpush3.bf16.msra.mxu1 %v9060_v30 }
0x1c9d   : > { %7242 = vadd.xlane.f32.xlu0 %v7241_v22  ;;  %v7245_v11 = vadd.f32 %v7244_v7, %v7229_v24  ;;  %8633 = vmatprep.subr.bf16.mxu1 %v9739_v28 }
0x1ca0   : > { %8634 = vmatpush3.bf16.msra.mxu1 %v9063_v39 }
0x1ca1   : > { %7246 = vadd.xlane.f32.xlu0 %v7245_v11  ;;  %8635 = vmatprep.subr.bf16.mxu1 %v9739_v28 }
0x1ca4   : > { %8636 = vmatpush3.bf16.msra.mxu1 %v9066_v61 }
0x1ca5   : > { %8637 = vmatprep.subr.bf16.mxu1 %v9739_v28 }
0x1d2a   : > { %v7243_v21 = vpop.xlane.xlu0 %7242 }
0x1d2b   : > { %v7248_v59 = vmul.f32 0.0026041667, %v7243_v21 }
0x1d2d   : > { %v11619_v49 = vsub.f32 %v7224_v44, %v7248_v59  ;;  %v11621_v56 = vsub.f32 %v7225_v50, %v7248_v59  ;;  %v11623_v0 = vsub.f32 %v7226_v20, %v7248_v59  ;;  %v9069_v20 = vld [vmem:[#allocation25 + $0xa0] sm:$0xff]   ;;  %v7282_v44 = vld [vmem:[#allocation22] sm:$0x7] }
0x1d2e   : > { %v7247_v53 = vpop.xlane.xlu0 %7246  ;;  %8638 = vmatpush3.bf16.msra.mxu1 %v9069_v20  ;;  %v7291_v37 = vrot.slane %v7282_v44, %v10566_v54  ;;  %v7295_v42 = vrot.slane %v7282_v44, %v10622_v46  ;;  %v7287_v22 = vrot.slane %v7282_v44, %v10569_v55 }
0x1d2f   : > { %v7249_v13 = vmul.f32 0.0026041667, %v7247_v53  ;;  %v7256_v19 = vmul.f32 %v11619_v49, %v11619_v49  ;;  %v7257_v17 = vmul.f32 %v11621_v56, %v11621_v56  ;;  %v7258_v62 = vmul.f32 %v11623_v0, %v11623_v0  ;;  %8639 = vmatprep.subr.bf16.mxu1 %v9739_v28 }
0x1d31   : > { %v11631_v6 = vsub.f32 %v7227_v63, %v7249_v13  ;;  %v11633_v58 = vsub.f32 %v7228_v23, %v7249_v13  ;;  %v11635_v9 = vsub.f32 %v7229_v24, %v7249_v13  ;;  %v7262_v10 = vadd.f32 %v7257_v17, %v7256_v19  ;;  %v9071_v24 = vld [vmem:[#allocation25 + $0x68] sm:$0xff]   ;;  %v7305_v63 = vld [vmem:[#allocation23] sm:$0x7] }
0x1d32   : > { %8361 = vmatprep.subr.bf16.mxu0 %v9071_v24  ;;  %8640 = vmatpush3.bf16.msra.mxu1 %v9072_v25  ;;  %v7314_v5 = vrot.slane %v7305_v63, %v10566_v54  ;;  %v7318_v35 = vrot.slane %v7305_v63, %v10622_v46  ;;  %v7310_v53 = vrot.slane %v7305_v63, %v10569_v55 }
0x1d33   : > { %v7263_v51 = vadd.f32 %v7262_v10, %v7258_v62  ;;  %v7259_v26 = vmul.f32 %v11631_v6, %v11631_v6  ;;  %v7260_v60 = vmul.f32 %v11633_v58, %v11633_v58  ;;  %v7261_v15 = vmul.f32 %v11635_v9, %v11635_v9  ;;  %8362 = vmatpush3.bf16.msra.mxu0 %v9073_v33 }
0x1d34   : > { %8641 = vmatprep.subr.bf16.mxu1 %v9739_v28  ;;  %8363 = vmatprep.subr.bf16.mxu0 %v9074_v29 }
0x1d35   : > { %7264 = vadd.xlane.f32.xlu1 %v7263_v51  ;;  %v7266_v57 = vadd.f32 %v7260_v60, %v7259_v26 }
0x1d36   : > { %8642 = vmatpush3.bf16.msra.mxu1 %v9075_v38 }
0x1d37   : > { %v7267_v34 = vadd.f32 %v7266_v57, %v7261_v15  ;;  %8364 = vmatpush3.bf16.msra.mxu0 %v9076_v27  ;;  %8643 = vmatprep.subr.bf16.mxu1 %v9739_v28  ;;  %v8058_v57 = vld [vmem:[#allocation26] ss:$0 sm:$0xff] }
0x1d38   : > { %8365 = vmatprep.subr.bf16.mxu0 %v9077_v52 }
0x1d39   : > { %7268 = vadd.xlane.f32.xlu1 %v7267_v34 }
0x1d3a   : > { %8644 = vmatpush3.bf16.msra.mxu1 %v9078_v14 }
0x1d3b   : > { %8366 = vmatpush3.bf16.msra.mxu0 %v9079_v43 }
0x1dc2   : > { %v7265_v16 = vpop.xlane.xlu1 %7264 }
0x1dc3   : > { %v7270_v48 = vmul.f32 0.0026041667, %v7265_v16 }
0x1dc5   : > { %v7272_v41 = vadd.f32 1e-05, %v7270_v48 }
0x1dc6   : > { %v7269_v40 = vpop.xlane.xlu1 %7268 }
0x1dc7   : > { %9080 = vrsqrt.f32 %v7272_v41  ;;  %v7271_v8 = vmul.f32 0.0026041667, %v7269_v40 }
0x1dc9   : > { %v7273_v45 = vadd.f32 1e-05, %v7271_v8 }
0x1dcb   : > { %9082 = vrsqrt.f32 %v7273_v45 }
0x1dd1   : > { %v9081_v1 = vpop.eup %9080 }
0x1dd2   : > { %v7277_v50 = vmul.f32 %v9081_v1, %v11621_v56  ;;  %v7278_v23 = vmul.f32 %v9081_v1, %v11623_v0  ;;  %v7276_v7 = vmul.f32 %v9081_v1, %v11619_v49 }
0x1dd4   : > { %v7300_v28 = vmul.f32 %v7291_v37, %v7277_v50  ;;  %v7301_v59 = vmul.f32 %v7295_v42, %v7278_v23  ;;  %v7299_v0 = vmul.f32 %v7287_v22, %v7276_v7 }
0x1dd5   : > { %v9083_v11 = vpop.eup %9082 }
0x1dd6   : > { %v7280_v47 = vmul.f32 %v9083_v11, %v11633_v58  ;;  %v7281_v21 = vmul.f32 %v9083_v11, %v11635_v9  ;;  %v7279_v56 = vmul.f32 %v9083_v11, %v11631_v6  ;;  %v7323_v17 = vadd.f32 %v7314_v5, %v7300_v28 }
0x1dd7   : > { %v7324_v10 = vadd.f32 %v7318_v35, %v7301_v59  ;;  %v7322_v51 = vadd.f32 %v7310_v53, %v7299_v0 }
0x1dd8   : > { %v7303_v13 = vmul.f32 %v7291_v37, %v7280_v47  ;;  %v7304_v49 = vmul.f32 %v7295_v42, %v7281_v21  ;;  %v7302_v19 = vmul.f32 %v7287_v22, %v7279_v56 }
0x1dda   : > { %v7326_v62 = vadd.f32 %v7314_v5, %v7303_v13  ;;  %v7327_v54 = vadd.f32 %v7318_v35, %v7304_v49  ;;  %v7325_v46 = vadd.f32 %v7310_v53, %v7302_v19 }
0x1ddc   : > { %v7329_v26 = vpack.c.bf16 %v7326_v62, %v7323_v17  ;;  %v7330_v58 = vpack.c.bf16 %v7327_v54, %v7324_v10  ;;  %v7328_v60 = vpack.c.bf16 %v7325_v46, %v7322_v51 }
0x1dde   : > { %7562 = vmatprep.mubr.bf16.mxu0 %v7329_v26  ;;  %8646 = vmatmul.mubr.bf16.vlgmr.msra.gmra.mrb[0].mxu1 %v7330_v58 }
0x1ddf   : > { %7563 = vmatmul.mubr.bf16.vlgmr.msra.gmra.mrb[0].mxu0 %v7328_v60 }
0x1eb1   : > { %v7605_v9 = vpop.f32.mrb[0].mxu1 }
0x1eb2   : > { %v8367_v6 = vpop.f32.mrb[0].mxu0  ;;  %v8647_v15 = vpop.f32.mrb[1].mxu1 }
0x1eb3   : > { %v8368_v55 = vpop.f32.mrb[1].mxu0  ;;  %v7608_v34 = vpop.f32.mrb[2].mxu1 }
0x1eb4   : > { %v8369_v31 = vadd.f32 %v8368_v55, %v8367_v6  ;;  %v8370_v30 = vpop.f32.mrb[2].mxu0  ;;  %v8648_v4 = vpop.f32.mrb[3].mxu1 }
0x1eb5   : > { %v8371_v2 = vpop.f32.mrb[3].mxu0 }
0x1eb6   : > { %v7565_v39 = vadd.f32 %v8369_v31, %v8058_v57  ;;  %v8372_v36 = vadd.f32 %v8371_v2, %v8370_v30 }
0x1eb8   : > { %v7606_v12 = vadd.f32 %v7605_v9, %v7565_v39  ;;  %v7568_v61 = vadd.f32 %v8372_v36, %v8058_v57 }
0x1eba   : > { %v7609_v32 = vadd.f32 %v7608_v34, %v7568_v61 }
0x1ebc   : > { %v8090_v18 = vpack.c.bf16 %v7609_v32, %v7606_v12 }
0x1ebe   : > { %8091 = vst [vmem:[#allocation28] sm:$0xff] %v8090_v18  }
0x1ebf PF: > { %s11821_s7 = sld [smem:[#allocation37_spill]]  ;;  %s9741_s4 = smov [#allocation28]  }
0x1ec0   : > { %s7622_s21 = sshll.u32 %s9741_s4, 4  ;;  %s7623_s21 = int_to_ptr.vmem [resolvable:$true] %s7622_s21 }
0x1ec1   : > { %s9616_s22 = scalar_lea.vmem %s7623_s21, 128  ;;  %p9623_p5 = scmp.lt.s32.totalorder %s7623_s21, %s7623_s21 }
0x1ec2   : > { %p9617_p13 = scmp.ne.s32.totalorder %s7623_s21, %s9616_s22  ;;  %p9624_p0 = scmp.lt.s32.totalorder %s9616_s22, %s9616_s22 }
0x1ec4   : > { %p9625_p8 = por %p9624_p0, %p9623_p5 }
0x1ec5   : > { %p8930_p11 = scmp.eq.s32.totalorder %s11821_s7, 5 }
0x1ec7   : > { %p9618_p4 = pnand %p9617_p13, %p8930_p11 }
0x1ec9   : > { %p9619_p2 = pneg %p9618_p4 }
0x1ecb   : > { %p9626_p3 = pnand %p9625_p8, %p9619_p2 }
0x1ecd   : > { %9629 = shalt.err (!%p9626_p3)
}
0x1ece   : > { %s11822_s24 = sld [smem:[#allocation57_spill]] }
0x1ed4   : > { %s11823_s28 = smov %s11822_s24  ;;  %s9630_s26 = scalar_lea.hbm %s11822_s24, 128 }
0x1ed5   : > { %p9631_p9 = scmp.ne.s32.totalorder %s11823_s28, %s9630_s26  ;;  %p9636_p6 = scmp.lt.u32.totalorder %s9630_s26, %s11823_s28 }
0x1ed7   : > { %p9632_p10 = pnand %p9631_p9, %p8930_p11 }
0x1ed9   : > { %p9633_p7 = pneg %p9632_p10 }
0x1edb   : > { %p9638_p12 = pnand %p9636_p6, %p9633_p7 }
0x1edd   : > { %9641 = shalt.err (!%p9638_p12)
}
0x1ede   : > { %s9742_s13 = smov 4  }
0x1edf   : > { %8896 = dma.vmem_to_hbm [thread:$0]  (%p8930_p11), %s7623_s21, 128, %s11823_s28, [#allocation6], %s9738_s1, %s9738_s1, %s9742_s13  }
0x1ee0   : > { %9683 = dma.done.wait (%p8930_p11), [#allocation6], 128  }
0x1ee1   : > { %9685 = vsyncadd (%p8930_p11), [#allocation6], 4294967168 }
0x1ee2 PF: > { %s11824_s24 = sld [smem:[#allocation38_spill]]  ;;  %s11825_s1 = sld [smem:[#allocation36_spill]] }
0x1ee3   : > { %s11826_s20 = sld [smem:[#allocation39_spill]]  ;;  %s11827_s22 = smov %s9696_s23 }
0x1ee8   : > { %p32_p1 = scmp.ge.s32.totalorder %s11824_s24, 8  }
0x1ee9   : > { %s11828_s23 = smov %s11826_s20 }
0x1eea   :  { %34 = sbr.rel (!%p32_p1) target bundleno = 23 (0x17), region = 300 }
0x1ef1   :  { %7638 = vsyncpa [#allocation5], 1 }
0x1ef2   :  { %7640 = vsyncpa [#allocation5 + $0x1], 1 }
0x1ef3   :  { %7641 = vsyncpa [#allocation8], 1 }
0x1ef4   :  { %7642 = vsyncpa [#allocation24], 1 }
0x1ef5   :  { %7643 = vsyncpa [#allocation27], 1 }
0x1ef6   :  { %7644 = vsyncpa [#allocation6], 1 }
0x1ef7   :  { %7646 = vsyncpa [#allocation6 + $0x1], 1 }

</bundles_post_ra>
